<compile_context>
chip_gen: v7x
topology: tpu7x:2x2x1
jax: 0.10.0
libtpu: 0.0.40
codegen_flags: <defaults>
</compile_context>

<pallas_src>
import functools

import jax
import jax.numpy as jnp
from jax import lax
from jax.experimental import pallas as pl
from jax.experimental.pallas import tpu as pltpu


def _bigru_kernel(xf_ref, xb_ref, wih_ref, whh_ref, bx_ref, bhn_ref,
                  outf_ref, outb_ref,
                  hf_scr, hb_scr, gxf_scr, gxb_scr, *, Tc, B, H):
  f32 = jnp.float32
  mxu_dtype = wih_ref.dtype

  # Zero the persistent recurrent state on the first grid step only.
  @pl.when(pl.program_id(0) == 0)
  def _():
    hf_scr[...] = jnp.zeros_like(hf_scr)
    hb_scr[...] = jnp.zeros_like(hb_scr)

  # (1) Per-chunk input projection: one MXU matmul per direction, written
  #     straight into small per-chunk scratch (no duplicate materialization).
  #     bx already folds b_ih + b_hh for the r/z gates and b_ih only for n.
  gxf_scr[...] = (jnp.dot(xf_ref[...], wih_ref[0],
                          preferred_element_type=f32) + bx_ref[0])
  gxb_scr[...] = (jnp.dot(xb_ref[...], wih_ref[1],
                          preferred_element_type=f32) + bx_ref[1])

  # Loop-invariant operands hoisted out of the recurrence.
  whh_f = whh_ref[0]                                 # (H, 3H), packed [r|z|n]
  whh_b = whh_ref[1]
  bn_f = jnp.broadcast_to(bhn_ref[0], (B, H))        # hoisted (no CSE in loop)
  bn_b = jnp.broadcast_to(bhn_ref[1], (B, H))

  def cell(h, gx, whh_d, bn_d):
    # Single fused (B,H)x(H,3H) recurrent matmul per direction per step.
    gh = jnp.dot(h.astype(mxu_dtype), whh_d, preferred_element_type=f32)
    r = jax.nn.sigmoid(gx[:, 0:H] + gh[:, 0:H])
    z = jax.nn.sigmoid(gx[:, H:2 * H] + gh[:, H:2 * H])
    n = jnp.tanh(gx[:, 2 * H:3 * H] + r * (gh[:, 2 * H:3 * H] + bn_d))
    return (1.0 - z) * n + z * h

  def step(tl, h_f, h_b):
    # Fused fwd (local time tl) + bwd (local time Tc-1-tl) step: one
    # direction's MXU push overlaps the other's VPU/EUP gate math.
    tb = Tc - 1 - tl
    sf, sb = tl * B, tb * B
    if not isinstance(tl, int) and B % 8 == 0:       # hint only on dynamic path
      sf = pl.multiple_of(sf, 8)
      sb = pl.multiple_of(sb, 8)
    h_f = cell(h_f, gxf_scr[pl.ds(sf, B), :], whh_f, bn_f)
    h_b = cell(h_b, gxb_scr[pl.ds(sb, B), :], whh_b, bn_b)
    outf_ref[pl.ds(sf, B), :] = h_f                  # lane-offset-0 store
    outb_ref[pl.ds(sb, B), :] = h_b                  # lane-offset-0 store
    return h_f, h_b

  h_f = hf_scr[...]
  h_b = hb_scr[...]
  if Tc <= 16:
    # Small static chunk: full unroll; live ranges bounded by the grid step.
    for tl in range(Tc):
      h_f, h_b = step(tl, h_f, h_b)
  else:
    # Long-chunk fallback: bounded unroll keeps register pressure sane.
    h_f, h_b = lax.fori_loop(0, Tc, lambda tl, c: step(tl, *c), (h_f, h_b),
                             unroll=4)

  hf_scr[...] = h_f
  hb_scr[...] = h_b


def _prep_operands(params, H, mxu_dtype):
  """Repack PyTorch-layout GRU weights into kernel operands."""
  def bx_dir(bih, bhh):          # fold b_hh into b_ih for the r/z gates only
    return jnp.concatenate([bih[:, 0:2 * H] + bhh[:, 0:2 * H],
                            bih[:, 2 * H:3 * H]], axis=1)

  wih = jnp.stack([params["wih_f"], params["wih_b"]], axis=0).astype(mxu_dtype)
  whh = jnp.stack([params["whh_f"], params["whh_b"]], axis=0).astype(mxu_dtype)
  bx = jnp.stack([bx_dir(params["bih_f"], params["bhh_f"]),
                  bx_dir(params["bih_b"], params["bhh_b"])],
                 axis=0).astype(jnp.float32)                    # (2, 1, 3H)
  bhn = jnp.stack([params["bhh_f"][:, 2 * H:3 * H],
                   params["bhh_b"][:, 2 * H:3 * H]],
                  axis=0).astype(jnp.float32)                   # (2, 1, H)
  return wih, whh, bx, bhn


def _pick_chunk(T, B, *, max_chunk, sublane):
  """Largest divisor of T (<= max_chunk) giving a sublane-aligned row block."""
  for tc in range(min(T, max_chunk), 0, -1):
    if T % tc == 0 and (tc * B) % sublane == 0:
      return tc
  return T        # single resident chunk (small / odd shapes); still correct


def _vmem_limit_bytes(B, D, H, Tc, mxu_itemsize):
  rows = Tc * B
  est = 0
  est += 2 * (2 * D * 3 * H) * mxu_itemsize      # W_ih (double buffered)
  est += 2 * (2 * H * 3 * H) * mxu_itemsize      # W_hh (double buffered)
  est += 2 * (2 * 3 * H + 2 * H) * 4             # biases
  est += 2 * 2 * rows * D * mxu_itemsize         # x chunks (2 dirs x 2 buffers)
  est += 2 * 2 * rows * H * 4                    # output chunks
  est += 2 * B * H * 4 + 2 * rows * 3 * H * 4    # h carry + per-chunk gx scratch
  est = 2 * est + (2 << 20)                      # 2x margin + slack
  return int(max(16 << 20, min(64 << 20, est)))


def _resident(arr):
  """Full-array block with a constant index_map (stays resident in VMEM)."""
  nd = arr.ndim
  return pl.BlockSpec(arr.shape, lambda i: (0,) * nd)


def bigru_encoder(x, params, *, mxu_dtype=jnp.bfloat16, max_chunk=8):
  """x: (B, T, D) float32 -> (B, T, 2*H), = torch.nn.GRU(bidirectional=True) h."""
  B, T, D = x.shape
  H = params["whh_f"].shape[0]
  wih, whh, bx, bhn = _prep_operands(params, H, mxu_dtype)

  # Time-major layout for contiguous (B, D) per-timestep rows inside a chunk.
  # TODO(synk): read x per chunk in native (B, Tc, D) layout / write output in
  #             the consumer layout to drop these wrapper-side HBM transposes.
  x_tm = jnp.transpose(x, (1, 0, 2)).reshape(T * B, D).astype(mxu_dtype)

  itemsize = jnp.dtype(mxu_dtype).itemsize
  sublane = 8 if itemsize >= 4 else 16
  Tc = _pick_chunk(T, B, max_chunk=max_chunk, sublane=sublane)
  nc = T // Tc
  rows = Tc * B

  kernel = functools.partial(_bigru_kernel, Tc=Tc, B=B, H=H)

  grid_spec = pltpu.PrefetchScalarGridSpec(
      num_scalar_prefetch=0,
      grid=(nc,),
      in_specs=[
          pl.BlockSpec((rows, D), lambda i: (i, 0)),            # x, fwd chunk i
          pl.BlockSpec((rows, D), lambda i: (nc - 1 - i, 0)),   # x, bwd chunk
          _resident(wih), _resident(whh), _resident(bx), _resident(bhn),
      ],
      out_specs=[
          pl.BlockSpec((rows, H), lambda i: (i, 0)),            # forward half
          pl.BlockSpec((rows, H), lambda i: (nc - 1 - i, 0)),   # backward half
      ],
      scratch_shapes=[
          pltpu.VMEM((B, H), jnp.float32),            # h_f carry (persistent)
          pltpu.VMEM((B, H), jnp.float32),            # h_b carry (persistent)
          pltpu.VMEM((rows, 3 * H), jnp.float32),     # per-chunk gx, forward
          pltpu.VMEM((rows, 3 * H), jnp.float32),     # per-chunk gx, backward
      ],
  )

  out_f_tm, out_b_tm = pl.pallas_call(
      kernel,
      out_shape=(jax.ShapeDtypeStruct((T * B, H), jnp.float32),
                 jax.ShapeDtypeStruct((T * B, H), jnp.float32)),
      grid_spec=grid_spec,
      compiler_params=pltpu.CompilerParams(
          dimension_semantics=("arbitrary",),    # sequential recurrence
          vmem_limit_bytes=_vmem_limit_bytes(B, D, H, Tc, itemsize),
      ),
  )(x_tm, x_tm, wih, whh, bx, bhn)

  out_f = out_f_tm.reshape(T, B, H).transpose(1, 0, 2)
  out_b = out_b_tm.reshape(T, B, H).transpose(1, 0, 2)
  return jnp.concatenate([out_f, out_b], axis=-1)       # (B, T, 2H)


def _reference_bigru(x, params):
  """Pure-JAX f32 reference of torch.nn.GRU(bidirectional=True, batch_first)."""
  B, T, D = x.shape
  H = params["whh_f"].shape[0]

  def run(time_order, wih, whh, bih, bhh):
    h = jnp.zeros((B, H), jnp.float32)
    outs = [None] * T
    for t in time_order:
      gx = x[:, t, :] @ wih + bih
      gh = h @ whh + bhh
      r = jax.nn.sigmoid(gx[:, 0:H] + gh[:, 0:H])
      z = jax.nn.sigmoid(gx[:, H:2 * H] + gh[:, H:2 * H])
      n = jnp.tanh(gx[:, 2 * H:3 * H] + r * gh[:, 2 * H:3 * H])
      h = (1.0 - z) * n + z * h
      outs[t] = h
    return jnp.stack(outs, axis=1)   # (B, T, H)

  out_f = run(range(T), params["wih_f"], params["whh_f"],
              params["bih_f"], params["bhh_f"])
  out_b = run(range(T - 1, -1, -1), params["wih_b"], params["whh_b"],
              params["bih_b"], params["bhh_b"])
  return jnp.concatenate([out_f, out_b], axis=-1)


def init_params(key, input_dim, hidden_dim):
  """nn.GRU-style U(-1/sqrt(H), 1/sqrt(H)) init; weights stored transposed
  ((D,3H)/(H,3H)) for right-multiplication, gate order [r | z | n]."""
  k = 1.0 / float(hidden_dim) ** 0.5
  keys = jax.random.split(key, 8)
  def u(kk, shape):
    return jax.random.uniform(kk, shape, jnp.float32, minval=-k, maxval=k)
  return {
      "wih_f": u(keys[0], (input_dim, 3 * hidden_dim)),
      "whh_f": u(keys[1], (hidden_dim, 3 * hidden_dim)),
      "bih_f": u(keys[2], (1, 3 * hidden_dim)),
      "bhh_f": u(keys[3], (1, 3 * hidden_dim)),
      "wih_b": u(keys[4], (input_dim, 3 * hidden_dim)),
      "whh_b": u(keys[5], (hidden_dim, 3 * hidden_dim)),
      "bih_b": u(keys[6], (1, 3 * hidden_dim)),
      "bhh_b": u(keys[7], (1, 3 * hidden_dim)),
  }


if __name__ == "__main__":
  # Module dims (input_dim=128, hidden_dim=256) at a small batch/sequence.
  B, T, D, H = 2, 32, 128, 256

  root = jax.random.PRNGKey(0)
  key_p, key_x = jax.random.split(root)
  params = init_params(key_p, D, H)
  x = jax.random.normal(key_x, (B, T, D), jnp.float32)

  h = jax.jit(bigru_encoder)(x, params)
  h = jax.block_until_ready(h)
  assert h.shape == (B, T, 2 * H), h.shape

  h_ref = _reference_bigru(x, params)
  err = float(jnp.max(jnp.abs(h - h_ref)))
  # bf16 MXU inputs (f32 accumulation / f32 gates & state) => loosened tolerance.
  assert err < 5e-2, "mismatch vs reference: max abs err = %g" % err

  print("KERNEL_OK")
</pallas_src>

<mosaic_0001>
module attributes {stable_mosaic.version = 11 : i64} {
  func.func @_bigru_kernel(%arg0: i32, %arg1: memref<16x128xbf16, #tpu.memory_space<vmem>>, %arg2: memref<16x128xbf16, #tpu.memory_space<vmem>>, %arg3: memref<2x128x768xbf16, #tpu.memory_space<vmem>>, %arg4: memref<2x256x768xbf16, #tpu.memory_space<vmem>>, %arg5: memref<2x1x768xf32, #tpu.memory_space<vmem>>, %arg6: memref<2x1x256xf32, #tpu.memory_space<vmem>>, %arg7: memref<16x256xf32, #tpu.memory_space<vmem>>, %arg8: memref<16x256xf32, #tpu.memory_space<vmem>>, %arg9: memref<2x256xf32, #tpu.memory_space<vmem>>, %arg10: memref<2x256xf32, #tpu.memory_space<vmem>>, %arg11: memref<16x768xf32, #tpu.memory_space<vmem>>, %arg12: memref<16x768xf32, #tpu.memory_space<vmem>>) attributes {dimension_semantics = [#tpu.dimension_semantics<arbitrary>], iteration_bounds = array<i64: 4>, scalar_prefetch = 0 : i64, scratch_operands = 4 : i64, tpu.core_type = #tpu.core_type<tc>, window_params = [{transform_indices = @transform_0, window_bounds = array<i64: 16, 128>}, {transform_indices = @transform_1, window_bounds = array<i64: 16, 128>}, {pipeline_mode = #tpu.pipeline_mode<synchronous>, transform_indices = @transform_2, window_bounds = array<i64: 2, 128, 768>}, {pipeline_mode = #tpu.pipeline_mode<synchronous>, transform_indices = @transform_3, window_bounds = array<i64: 2, 256, 768>}, {pipeline_mode = #tpu.pipeline_mode<synchronous>, transform_indices = @transform_4, window_bounds = array<i64: 2, 1, 768>}, {pipeline_mode = #tpu.pipeline_mode<synchronous>, transform_indices = @transform_5, window_bounds = array<i64: 2, 1, 256>}, {transform_indices = @transform_6, window_bounds = array<i64: 16, 256>}, {transform_indices = @transform_7, window_bounds = array<i64: 16, 256>}]} {
    %c0_i32 = arith.constant 0 : i32
    %0 = arith.cmpi eq, %arg0, %c0_i32 : i32
    %1 = arith.extui %0 : i1 to i32
    %c0_i32_0 = arith.constant 0 : i32
    %2 = arith.cmpi ne, %1, %c0_i32_0 : i32
    scf.if %2 {
      %cst_161 = arith.constant 0.000000e+00 : f32
      %533 = vector.broadcast %cst_161 : f32 to vector<2x256xf32>
      %c0_162 = arith.constant 0 : index
      %c0_163 = arith.constant 0 : index
      %534 = vector.load %arg9[%c0_162, %c0_163] : memref<2x256xf32, #tpu.memory_space<vmem>>, vector<2x256xf32>
      tpu.vector_store %arg9[%c0_162, %c0_163], %533 {strides = array<i32>} : memref<2x256xf32, #tpu.memory_space<vmem>>, vector<2x256xf32>,
      %cst_164 = arith.constant 0.000000e+00 : f32
      %535 = vector.broadcast %cst_164 : f32 to vector<2x256xf32>
      %c0_165 = arith.constant 0 : index
      %c0_166 = arith.constant 0 : index
      %536 = vector.load %arg10[%c0_165, %c0_166] : memref<2x256xf32, #tpu.memory_space<vmem>>, vector<2x256xf32>
      tpu.vector_store %arg10[%c0_165, %c0_166], %535 {strides = array<i32>} : memref<2x256xf32, #tpu.memory_space<vmem>>, vector<2x256xf32>,
    } else {
    }
    %c0 = arith.constant 0 : index
    %c0_1 = arith.constant 0 : index
    %3 = vector.load %arg1[%c0, %c0_1] : memref<16x128xbf16, #tpu.memory_space<vmem>>, vector<16x128xbf16>
    %c0_2 = arith.constant 0 : index
    %c0_3 = arith.constant 0 : index
    %c0_4 = arith.constant 0 : index
    %4 = vector.load %arg3[%c0_2, %c0_3, %c0_4] : memref<2x128x768xbf16, #tpu.memory_space<vmem>>, vector<1x128x768xbf16>
    %5 = vector.shape_cast %4 : vector<1x128x768xbf16> to vector<128x768xbf16>
    %cst = arith.constant dense<0.000000e+00> : vector<16x768xf32>
    %6 = tpu.matmul %3, %5, %cst {dimension_numbers = #tpu.dot_dimension_numbers<[1], [0], [0], [1], [0, 0, 1, 1], [], []>} : vector<16x128xbf16>, vector<128x768xbf16>, vector<16x768xf32> -> vector<16x768xf32>
    %c0_5 = arith.constant 0 : index
    %c0_6 = arith.constant 0 : index
    %c0_7 = arith.constant 0 : index
    %7 = vector.load %arg5[%c0_5, %c0_6, %c0_7] : memref<2x1x768xf32, #tpu.memory_space<vmem>>, vector<1x1x768xf32>
    %8 = vector.shape_cast %7 : vector<1x1x768xf32> to vector<1x768xf32>
    %9 = vector.broadcast %8 : vector<1x768xf32> to vector<16x768xf32>
    %10 = arith.addf %6, %9 : vector<16x768xf32>
    %c0_8 = arith.constant 0 : index
    %c0_9 = arith.constant 0 : index
    %11 = vector.load %arg11[%c0_8, %c0_9] : memref<16x768xf32, #tpu.memory_space<vmem>>, vector<16x768xf32>
    tpu.vector_store %arg11[%c0_8, %c0_9], %10 {strides = array<i32>} : memref<16x768xf32, #tpu.memory_space<vmem>>, vector<16x768xf32>,
    %c0_10 = arith.constant 0 : index
    %c0_11 = arith.constant 0 : index
    %12 = vector.load %arg2[%c0_10, %c0_11] : memref<16x128xbf16, #tpu.memory_space<vmem>>, vector<16x128xbf16>
    %c1 = arith.constant 1 : index
    %c0_12 = arith.constant 0 : index
    %c0_13 = arith.constant 0 : index
    %13 = vector.load %arg3[%c1, %c0_12, %c0_13] : memref<2x128x768xbf16, #tpu.memory_space<vmem>>, vector<1x128x768xbf16>
    %14 = vector.shape_cast %13 : vector<1x128x768xbf16> to vector<128x768xbf16>
    %cst_14 = arith.constant dense<0.000000e+00> : vector<16x768xf32>
    %15 = tpu.matmul %12, %14, %cst_14 {dimension_numbers = #tpu.dot_dimension_numbers<[1], [0], [0], [1], [0, 0, 1, 1], [], []>} : vector<16x128xbf16>, vector<128x768xbf16>, vector<16x768xf32> -> vector<16x768xf32>
    %c1_15 = arith.constant 1 : index
    %c0_16 = arith.constant 0 : index
    %c0_17 = arith.constant 0 : index
    %16 = vector.load %arg5[%c1_15, %c0_16, %c0_17] : memref<2x1x768xf32, #tpu.memory_space<vmem>>, vector<1x1x768xf32>
    %17 = vector.shape_cast %16 : vector<1x1x768xf32> to vector<1x768xf32>
    %18 = vector.broadcast %17 : vector<1x768xf32> to vector<16x768xf32>
    %19 = arith.addf %15, %18 : vector<16x768xf32>
    %c0_18 = arith.constant 0 : index
    %c0_19 = arith.constant 0 : index
    %20 = vector.load %arg12[%c0_18, %c0_19] : memref<16x768xf32, #tpu.memory_space<vmem>>, vector<16x768xf32>
    tpu.vector_store %arg12[%c0_18, %c0_19], %19 {strides = array<i32>} : memref<16x768xf32, #tpu.memory_space<vmem>>, vector<16x768xf32>,
    %c0_20 = arith.constant 0 : index
    %c0_21 = arith.constant 0 : index
    %c0_22 = arith.constant 0 : index
    %21 = vector.load %arg4[%c0_20, %c0_21, %c0_22] : memref<2x256x768xbf16, #tpu.memory_space<vmem>>, vector<1x256x768xbf16>
    %22 = vector.shape_cast %21 : vector<1x256x768xbf16> to vector<256x768xbf16>
    %c1_23 = arith.constant 1 : index
    %c0_24 = arith.constant 0 : index
    %c0_25 = arith.constant 0 : index
    %23 = vector.load %arg4[%c1_23, %c0_24, %c0_25] : memref<2x256x768xbf16, #tpu.memory_space<vmem>>, vector<1x256x768xbf16>
    %24 = vector.shape_cast %23 : vector<1x256x768xbf16> to vector<256x768xbf16>
    %c0_26 = arith.constant 0 : index
    %c0_27 = arith.constant 0 : index
    %c0_28 = arith.constant 0 : index
    %25 = vector.load %arg6[%c0_26, %c0_27, %c0_28] : memref<2x1x256xf32, #tpu.memory_space<vmem>>, vector<1x1x256xf32>
    %26 = vector.shape_cast %25 : vector<1x1x256xf32> to vector<1x256xf32>
    %27 = vector.shape_cast %26 : vector<1x256xf32> to vector<1x256xf32>
    %28 = vector.broadcast %27 : vector<1x256xf32> to vector<2x256xf32>
    %c1_29 = arith.constant 1 : index
    %c0_30 = arith.constant 0 : index
    %c0_31 = arith.constant 0 : index
    %29 = vector.load %arg6[%c1_29, %c0_30, %c0_31] : memref<2x1x256xf32, #tpu.memory_space<vmem>>, vector<1x1x256xf32>
    %30 = vector.shape_cast %29 : vector<1x1x256xf32> to vector<1x256xf32>
    %31 = vector.shape_cast %30 : vector<1x256xf32> to vector<1x256xf32>
    %32 = vector.broadcast %31 : vector<1x256xf32> to vector<2x256xf32>
    %c0_32 = arith.constant 0 : index
    %c0_33 = arith.constant 0 : index
    %33 = vector.load %arg9[%c0_32, %c0_33] : memref<2x256xf32, #tpu.memory_space<vmem>>, vector<2x256xf32>
    %c0_34 = arith.constant 0 : index
    %c0_35 = arith.constant 0 : index
    %34 = vector.load %arg10[%c0_34, %c0_35] : memref<2x256xf32, #tpu.memory_space<vmem>>, vector<2x256xf32>
    %c0_36 = arith.constant 0 : index
    %c0_37 = arith.constant 0 : index
    %35 = vector.load %arg11[%c0_36, %c0_37] : memref<16x768xf32, #tpu.memory_space<vmem>>, vector<2x768xf32>
    %36 = arith.truncf %33 : vector<2x256xf32> to vector<2x256xbf16>
    %cst_38 = arith.constant dense<0.000000e+00> : vector<2x768xf32>
    %37 = tpu.matmul %36, %22, %cst_38 {dimension_numbers = #tpu.dot_dimension_numbers<[1], [0], [0], [1], [0, 0, 1, 1], [], []>} : vector<2x256xbf16>, vector<256x768xbf16>, vector<2x768xf32> -> vector<2x768xf32>
    %38 = vector.extract_strided_slice %35 {offsets = [0, 0], sizes = [2, 256], strides = [1, 1]} : vector<2x768xf32> to vector<2x256xf32>
    %39 = vector.extract_strided_slice %37 {offsets = [0, 0], sizes = [2, 256], strides = [1, 1]} : vector<2x768xf32> to vector<2x256xf32>
    %40 = arith.addf %38, %39 : vector<2x256xf32>
    %41 = arith.negf %40 : vector<2x256xf32>
    %42 = math.exp %41 : vector<2x256xf32>
    %cst_39 = arith.constant 1.000000e+00 : f32
    %43 = vector.broadcast %cst_39 : f32 to vector<2x256xf32>
    %44 = arith.addf %43, %42 : vector<2x256xf32>
    %45 = arith.divf %43, %44 : vector<2x256xf32>
    %46 = vector.extract_strided_slice %35 {offsets = [0, 256], sizes = [2, 256], strides = [1, 1]} : vector<2x768xf32> to vector<2x256xf32>
    %47 = vector.extract_strided_slice %37 {offsets = [0, 256], sizes = [2, 256], strides = [1, 1]} : vector<2x768xf32> to vector<2x256xf32>
    %48 = arith.addf %46, %47 : vector<2x256xf32>
    %49 = arith.negf %48 : vector<2x256xf32>
    %50 = math.exp %49 : vector<2x256xf32>
    %cst_40 = arith.constant 1.000000e+00 : f32
    %51 = vector.broadcast %cst_40 : f32 to vector<2x256xf32>
    %52 = arith.addf %51, %50 : vector<2x256xf32>
    %53 = arith.divf %51, %52 : vector<2x256xf32>
    %54 = vector.extract_strided_slice %35 {offsets = [0, 512], sizes = [2, 256], strides = [1, 1]} : vector<2x768xf32> to vector<2x256xf32>
    %55 = vector.extract_strided_slice %37 {offsets = [0, 512], sizes = [2, 256], strides = [1, 1]} : vector<2x768xf32> to vector<2x256xf32>
    %56 = arith.addf %55, %28 : vector<2x256xf32>
    %57 = arith.mulf %45, %56 : vector<2x256xf32>
    %58 = arith.addf %54, %57 : vector<2x256xf32>
    %59 = math.tanh %58 : vector<2x256xf32>
    %cst_41 = arith.constant 1.000000e+00 : f32
    %60 = vector.broadcast %cst_41 : f32 to vector<2x256xf32>
    %61 = arith.subf %60, %53 : vector<2x256xf32>
    %62 = arith.mulf %61, %59 : vector<2x256xf32>
    %63 = arith.mulf %53, %33 : vector<2x256xf32>
    %64 = arith.addf %62, %63 : vector<2x256xf32>
    %c14 = arith.constant 14 : index
    %c0_42 = arith.constant 0 : index
    %65 = vector.load %arg12[%c14, %c0_42] : memref<16x768xf32, #tpu.memory_space<vmem>>, vector<2x768xf32>
    %66 = arith.truncf %34 : vector<2x256xf32> to vector<2x256xbf16>
    %cst_43 = arith.constant dense<0.000000e+00> : vector<2x768xf32>
    %67 = tpu.matmul %66, %24, %cst_43 {dimension_numbers = #tpu.dot_dimension_numbers<[1], [0], [0], [1], [0, 0, 1, 1], [], []>} : vector<2x256xbf16>, vector<256x768xbf16>, vector<2x768xf32> -> vector<2x768xf32>
    %68 = vector.extract_strided_slice %65 {offsets = [0, 0], sizes = [2, 256], strides = [1, 1]} : vector<2x768xf32> to vector<2x256xf32>
    %69 = vector.extract_strided_slice %67 {offsets = [0, 0], sizes = [2, 256], strides = [1, 1]} : vector<2x768xf32> to vector<2x256xf32>
    %70 = arith.addf %68, %69 : vector<2x256xf32>
    %71 = arith.negf %70 : vector<2x256xf32>
    %72 = math.exp %71 : vector<2x256xf32>
    %cst_44 = arith.constant 1.000000e+00 : f32
    %73 = vector.broadcast %cst_44 : f32 to vector<2x256xf32>
    %74 = arith.addf %73, %72 : vector<2x256xf32>
    %75 = arith.divf %73, %74 : vector<2x256xf32>
    %76 = vector.extract_strided_slice %65 {offsets = [0, 256], sizes = [2, 256], strides = [1, 1]} : vector<2x768xf32> to vector<2x256xf32>
    %77 = vector.extract_strided_slice %67 {offsets = [0, 256], sizes = [2, 256], strides = [1, 1]} : vector<2x768xf32> to vector<2x256xf32>
    %78 = arith.addf %76, %77 : vector<2x256xf32>
    %79 = arith.negf %78 : vector<2x256xf32>
    %80 = math.exp %79 : vector<2x256xf32>
    %cst_45 = arith.constant 1.000000e+00 : f32
    %81 = vector.broadcast %cst_45 : f32 to vector<2x256xf32>
    %82 = arith.addf %81, %80 : vector<2x256xf32>
    %83 = arith.divf %81, %82 : vector<2x256xf32>
    %84 = vector.extract_strided_slice %65 {offsets = [0, 512], sizes = [2, 256], strides = [1, 1]} : vector<2x768xf32> to vector<2x256xf32>
    %85 = vector.extract_strided_slice %67 {offsets = [0, 512], sizes = [2, 256], strides = [1, 1]} : vector<2x768xf32> to vector<2x256xf32>
    %86 = arith.addf %85, %32 : vector<2x256xf32>
    %87 = arith.mulf %75, %86 : vector<2x256xf32>
    %88 = arith.addf %84, %87 : vector<2x256xf32>
    %89 = math.tanh %88 : vector<2x256xf32>
    %cst_46 = arith.constant 1.000000e+00 : f32
    %90 = vector.broadcast %cst_46 : f32 to vector<2x256xf32>
    %91 = arith.subf %90, %83 : vector<2x256xf32>
    %92 = arith.mulf %91, %89 : vector<2x256xf32>
    %93 = arith.mulf %83, %34 : vector<2x256xf32>
    %94 = arith.addf %92, %93 : vector<2x256xf32>
    %c0_47 = arith.constant 0 : index
    %c0_48 = arith.constant 0 : index
    %95 = vector.load %arg7[%c0_47, %c0_48] : memref<16x256xf32, #tpu.memory_space<vmem>>, vector<2x256xf32>
    tpu.vector_store %arg7[%c0_47, %c0_48], %64 {strides = array<i32>} : memref<16x256xf32, #tpu.memory_space<vmem>>, vector<2x256xf32>,
    %c14_49 = arith.constant 14 : index
    %c0_50 = arith.constant 0 : index
    %96 = vector.load %arg8[%c14_49, %c0_50] : memref<16x256xf32, #tpu.memory_space<vmem>>, vector<2x256xf32>
    tpu.vector_store %arg8[%c14_49, %c0_50], %94 {strides = array<i32>} : memref<16x256xf32, #tpu.memory_space<vmem>>, vector<2x256xf32>,
    %c2 = arith.constant 2 : index
    %c0_51 = arith.constant 0 : index
    %97 = vector.load %arg11[%c2, %c0_51] : memref<16x768xf32, #tpu.memory_space<vmem>>, vector<2x768xf32>
    %98 = arith.truncf %64 : vector<2x256xf32> to vector<2x256xbf16>
    %cst_52 = arith.constant dense<0.000000e+00> : vector<2x768xf32>
    %99 = tpu.matmul %98, %22, %cst_52 {dimension_numbers = #tpu.dot_dimension_numbers<[1], [0], [0], [1], [0, 0, 1, 1], [], []>} : vector<2x256xbf16>, vector<256x768xbf16>, vector<2x768xf32> -> vector<2x768xf32>
    %100 = vector.extract_strided_slice %97 {offsets = [0, 0], sizes = [2, 256], strides = [1, 1]} : vector<2x768xf32> to vector<2x256xf32>
    %101 = vector.extract_strided_slice %99 {offsets = [0, 0], sizes = [2, 256], strides = [1, 1]} : vector<2x768xf32> to vector<2x256xf32>
    %102 = arith.addf %100, %101 : vector<2x256xf32>
    %103 = arith.negf %102 : vector<2x256xf32>
    %104 = math.exp %103 : vector<2x256xf32>
    %cst_53 = arith.constant 1.000000e+00 : f32
    %105 = vector.broadcast %cst_53 : f32 to vector<2x256xf32>
    %106 = arith.addf %105, %104 : vector<2x256xf32>
    %107 = arith.divf %105, %106 : vector<2x256xf32>
    %108 = vector.extract_strided_slice %97 {offsets = [0, 256], sizes = [2, 256], strides = [1, 1]} : vector<2x768xf32> to vector<2x256xf32>
    %109 = vector.extract_strided_slice %99 {offsets = [0, 256], sizes = [2, 256], strides = [1, 1]} : vector<2x768xf32> to vector<2x256xf32>
    %110 = arith.addf %108, %109 : vector<2x256xf32>
    %111 = arith.negf %110 : vector<2x256xf32>
    %112 = math.exp %111 : vector<2x256xf32>
    %cst_54 = arith.constant 1.000000e+00 : f32
    %113 = vector.broadcast %cst_54 : f32 to vector<2x256xf32>
    %114 = arith.addf %113, %112 : vector<2x256xf32>
    %115 = arith.divf %113, %114 : vector<2x256xf32>
    %116 = vector.extract_strided_slice %97 {offsets = [0, 512], sizes = [2, 256], strides = [1, 1]} : vector<2x768xf32> to vector<2x256xf32>
    %117 = vector.extract_strided_slice %99 {offsets = [0, 512], sizes = [2, 256], strides = [1, 1]} : vector<2x768xf32> to vector<2x256xf32>
    %118 = arith.addf %117, %28 : vector<2x256xf32>
    %119 = arith.mulf %107, %118 : vector<2x256xf32>
    %120 = arith.addf %116, %119 : vector<2x256xf32>
    %121 = math.tanh %120 : vector<2x256xf32>
    %cst_55 = arith.constant 1.000000e+00 : f32
    %122 = vector.broadcast %cst_55 : f32 to vector<2x256xf32>
    %123 = arith.subf %122, %115 : vector<2x256xf32>
    %124 = arith.mulf %123, %121 : vector<2x256xf32>
    %125 = arith.mulf %115, %64 : vector<2x256xf32>
    %126 = arith.addf %124, %125 : vector<2x256xf32>
    %c12 = arith.constant 12 : index
    %c0_56 = arith.constant 0 : index
    %127 = vector.load %arg12[%c12, %c0_56] : memref<16x768xf32, #tpu.memory_space<vmem>>, vector<2x768xf32>
    %128 = arith.truncf %94 : vector<2x256xf32> to vector<2x256xbf16>
    %cst_57 = arith.constant dense<0.000000e+00> : vector<2x768xf32>
    %129 = tpu.matmul %128, %24, %cst_57 {dimension_numbers = #tpu.dot_dimension_numbers<[1], [0], [0], [1], [0, 0, 1, 1], [], []>} : vector<2x256xbf16>, vector<256x768xbf16>, vector<2x768xf32> -> vector<2x768xf32>
    %130 = vector.extract_strided_slice %127 {offsets = [0, 0], sizes = [2, 256], strides = [1, 1]} : vector<2x768xf32> to vector<2x256xf32>
    %131 = vector.extract_strided_slice %129 {offsets = [0, 0], sizes = [2, 256], strides = [1, 1]} : vector<2x768xf32> to vector<2x256xf32>
    %132 = arith.addf %130, %131 : vector<2x256xf32>
    %133 = arith.negf %132 : vector<2x256xf32>
    %134 = math.exp %133 : vector<2x256xf32>
    %cst_58 = arith.constant 1.000000e+00 : f32
    %135 = vector.broadcast %cst_58 : f32 to vector<2x256xf32>
    %136 = arith.addf %135, %134 : vector<2x256xf32>
    %137 = arith.divf %135, %136 : vector<2x256xf32>
    %138 = vector.extract_strided_slice %127 {offsets = [0, 256], sizes = [2, 256], strides = [1, 1]} : vector<2x768xf32> to vector<2x256xf32>
    %139 = vector.extract_strided_slice %129 {offsets = [0, 256], sizes = [2, 256], strides = [1, 1]} : vector<2x768xf32> to vector<2x256xf32>
    %140 = arith.addf %138, %139 : vector<2x256xf32>
    %141 = arith.negf %140 : vector<2x256xf32>
    %142 = math.exp %141 : vector<2x256xf32>
    %cst_59 = arith.constant 1.000000e+00 : f32
    %143 = vector.broadcast %cst_59 : f32 to vector<2x256xf32>
    %144 = arith.addf %143, %142 : vector<2x256xf32>
    %145 = arith.divf %143, %144 : vector<2x256xf32>
    %146 = vector.extract_strided_slice %127 {offsets = [0, 512], sizes = [2, 256], strides = [1, 1]} : vector<2x768xf32> to vector<2x256xf32>
    %147 = vector.extract_strided_slice %129 {offsets = [0, 512], sizes = [2, 256], strides = [1, 1]} : vector<2x768xf32> to vector<2x256xf32>
    %148 = arith.addf %147, %32 : vector<2x256xf32>
    %149 = arith.mulf %137, %148 : vector<2x256xf32>
    %150 = arith.addf %146, %149 : vector<2x256xf32>
    %151 = math.tanh %150 : vector<2x256xf32>
    %cst_60 = arith.constant 1.000000e+00 : f32
    %152 = vector.broadcast %cst_60 : f32 to vector<2x256xf32>
    %153 = arith.subf %152, %145 : vector<2x256xf32>
    %154 = arith.mulf %153, %151 : vector<2x256xf32>
    %155 = arith.mulf %145, %94 : vector<2x256xf32>
    %156 = arith.addf %154, %155 : vector<2x256xf32>
    %c2_61 = arith.constant 2 : index
    %c0_62 = arith.constant 0 : index
    %157 = vector.load %arg7[%c2_61, %c0_62] : memref<16x256xf32, #tpu.memory_space<vmem>>, vector<2x256xf32>
    tpu.vector_store %arg7[%c2_61, %c0_62], %126 {strides = array<i32>} : memref<16x256xf32, #tpu.memory_space<vmem>>, vector<2x256xf32>,
    %c12_63 = arith.constant 12 : index
    %c0_64 = arith.constant 0 : index
    %158 = vector.load %arg8[%c12_63, %c0_64] : memref<16x256xf32, #tpu.memory_space<vmem>>, vector<2x256xf32>
    tpu.vector_store %arg8[%c12_63, %c0_64], %156 {strides = array<i32>} : memref<16x256xf32, #tpu.memory_space<vmem>>, vector<2x256xf32>,
    %c4 = arith.constant 4 : index
    %c0_65 = arith.constant 0 : index
    %159 = vector.load %arg11[%c4, %c0_65] : memref<16x768xf32, #tpu.memory_space<vmem>>, vector<2x768xf32>
    %160 = arith.truncf %126 : vector<2x256xf32> to vector<2x256xbf16>
    %cst_66 = arith.constant dense<0.000000e+00> : vector<2x768xf32>
    %161 = tpu.matmul %160, %22, %cst_66 {dimension_numbers = #tpu.dot_dimension_numbers<[1], [0], [0], [1], [0, 0, 1, 1], [], []>} : vector<2x256xbf16>, vector<256x768xbf16>, vector<2x768xf32> -> vector<2x768xf32>
    %162 = vector.extract_strided_slice %159 {offsets = [0, 0], sizes = [2, 256], strides = [1, 1]} : vector<2x768xf32> to vector<2x256xf32>
    %163 = vector.extract_strided_slice %161 {offsets = [0, 0], sizes = [2, 256], strides = [1, 1]} : vector<2x768xf32> to vector<2x256xf32>
    %164 = arith.addf %162, %163 : vector<2x256xf32>
    %165 = arith.negf %164 : vector<2x256xf32>
    %166 = math.exp %165 : vector<2x256xf32>
    %cst_67 = arith.constant 1.000000e+00 : f32
    %167 = vector.broadcast %cst_67 : f32 to vector<2x256xf32>
    %168 = arith.addf %167, %166 : vector<2x256xf32>
    %169 = arith.divf %167, %168 : vector<2x256xf32>
    %170 = vector.extract_strided_slice %159 {offsets = [0, 256], sizes = [2, 256], strides = [1, 1]} : vector<2x768xf32> to vector<2x256xf32>
    %171 = vector.extract_strided_slice %161 {offsets = [0, 256], sizes = [2, 256], strides = [1, 1]} : vector<2x768xf32> to vector<2x256xf32>
    %172 = arith.addf %170, %171 : vector<2x256xf32>
    %173 = arith.negf %172 : vector<2x256xf32>
    %174 = math.exp %173 : vector<2x256xf32>
    %cst_68 = arith.constant 1.000000e+00 : f32
    %175 = vector.broadcast %cst_68 : f32 to vector<2x256xf32>
    %176 = arith.addf %175, %174 : vector<2x256xf32>
    %177 = arith.divf %175, %176 : vector<2x256xf32>
    %178 = vector.extract_strided_slice %159 {offsets = [0, 512], sizes = [2, 256], strides = [1, 1]} : vector<2x768xf32> to vector<2x256xf32>
    %179 = vector.extract_strided_slice %161 {offsets = [0, 512], sizes = [2, 256], strides = [1, 1]} : vector<2x768xf32> to vector<2x256xf32>
    %180 = arith.addf %179, %28 : vector<2x256xf32>
    %181 = arith.mulf %169, %180 : vector<2x256xf32>
    %182 = arith.addf %178, %181 : vector<2x256xf32>
    %183 = math.tanh %182 : vector<2x256xf32>
    %cst_69 = arith.constant 1.000000e+00 : f32
    %184 = vector.broadcast %cst_69 : f32 to vector<2x256xf32>
    %185 = arith.subf %184, %177 : vector<2x256xf32>
    %186 = arith.mulf %185, %183 : vector<2x256xf32>
    %187 = arith.mulf %177, %126 : vector<2x256xf32>
    %188 = arith.addf %186, %187 : vector<2x256xf32>
    %c10 = arith.constant 10 : index
    %c0_70 = arith.constant 0 : index
    %189 = vector.load %arg12[%c10, %c0_70] : memref<16x768xf32, #tpu.memory_space<vmem>>, vector<2x768xf32>
    %190 = arith.truncf %156 : vector<2x256xf32> to vector<2x256xbf16>
    %cst_71 = arith.constant dense<0.000000e+00> : vector<2x768xf32>
    %191 = tpu.matmul %190, %24, %cst_71 {dimension_numbers = #tpu.dot_dimension_numbers<[1], [0], [0], [1], [0, 0, 1, 1], [], []>} : vector<2x256xbf16>, vector<256x768xbf16>, vector<2x768xf32> -> vector<2x768xf32>
    %192 = vector.extract_strided_slice %189 {offsets = [0, 0], sizes = [2, 256], strides = [1, 1]} : vector<2x768xf32> to vector<2x256xf32>
    %193 = vector.extract_strided_slice %191 {offsets = [0, 0], sizes = [2, 256], strides = [1, 1]} : vector<2x768xf32> to vector<2x256xf32>
    %194 = arith.addf %192, %193 : vector<2x256xf32>
    %195 = arith.negf %194 : vector<2x256xf32>
    %196 = math.exp %195 : vector<2x256xf32>
    %cst_72 = arith.constant 1.000000e+00 : f32
    %197 = vector.broadcast %cst_72 : f32 to vector<2x256xf32>
    %198 = arith.addf %197, %196 : vector<2x256xf32>
    %199 = arith.divf %197, %198 : vector<2x256xf32>
    %200 = vector.extract_strided_slice %189 {offsets = [0, 256], sizes = [2, 256], strides = [1, 1]} : vector<2x768xf32> to vector<2x256xf32>
    %201 = vector.extract_strided_slice %191 {offsets = [0, 256], sizes = [2, 256], strides = [1, 1]} : vector<2x768xf32> to vector<2x256xf32>
    %202 = arith.addf %200, %201 : vector<2x256xf32>
    %203 = arith.negf %202 : vector<2x256xf32>
    %204 = math.exp %203 : vector<2x256xf32>
    %cst_73 = arith.constant 1.000000e+00 : f32
    %205 = vector.broadcast %cst_73 : f32 to vector<2x256xf32>
    %206 = arith.addf %205, %204 : vector<2x256xf32>
    %207 = arith.divf %205, %206 : vector<2x256xf32>
    %208 = vector.extract_strided_slice %189 {offsets = [0, 512], sizes = [2, 256], strides = [1, 1]} : vector<2x768xf32> to vector<2x256xf32>
    %209 = vector.extract_strided_slice %191 {offsets = [0, 512], sizes = [2, 256], strides = [1, 1]} : vector<2x768xf32> to vector<2x256xf32>
    %210 = arith.addf %209, %32 : vector<2x256xf32>
    %211 = arith.mulf %199, %210 : vector<2x256xf32>
    %212 = arith.addf %208, %211 : vector<2x256xf32>
    %213 = math.tanh %212 : vector<2x256xf32>
    %cst_74 = arith.constant 1.000000e+00 : f32
    %214 = vector.broadcast %cst_74 : f32 to vector<2x256xf32>
    %215 = arith.subf %214, %207 : vector<2x256xf32>
    %216 = arith.mulf %215, %213 : vector<2x256xf32>
    %217 = arith.mulf %207, %156 : vector<2x256xf32>
    %218 = arith.addf %216, %217 : vector<2x256xf32>
    %c4_75 = arith.constant 4 : index
    %c0_76 = arith.constant 0 : index
    %219 = vector.load %arg7[%c4_75, %c0_76] : memref<16x256xf32, #tpu.memory_space<vmem>>, vector<2x256xf32>
    tpu.vector_store %arg7[%c4_75, %c0_76], %188 {strides = array<i32>} : memref<16x256xf32, #tpu.memory_space<vmem>>, vector<2x256xf32>,
    %c10_77 = arith.constant 10 : index
    %c0_78 = arith.constant 0 : index
    %220 = vector.load %arg8[%c10_77, %c0_78] : memref<16x256xf32, #tpu.memory_space<vmem>>, vector<2x256xf32>
    tpu.vector_store %arg8[%c10_77, %c0_78], %218 {strides = array<i32>} : memref<16x256xf32, #tpu.memory_space<vmem>>, vector<2x256xf32>,
    %c6 = arith.constant 6 : index
    %c0_79 = arith.constant 0 : index
    %221 = vector.load %arg11[%c6, %c0_79] : memref<16x768xf32, #tpu.memory_space<vmem>>, vector<2x768xf32>
    %222 = arith.truncf %188 : vector<2x256xf32> to vector<2x256xbf16>
    %cst_80 = arith.constant dense<0.000000e+00> : vector<2x768xf32>
    %223 = tpu.matmul %222, %22, %cst_80 {dimension_numbers = #tpu.dot_dimension_numbers<[1], [0], [0], [1], [0, 0, 1, 1], [], []>} : vector<2x256xbf16>, vector<256x768xbf16>, vector<2x768xf32> -> vector<2x768xf32>
    %224 = vector.extract_strided_slice %221 {offsets = [0, 0], sizes = [2, 256], strides = [1, 1]} : vector<2x768xf32> to vector<2x256xf32>
    %225 = vector.extract_strided_slice %223 {offsets = [0, 0], sizes = [2, 256], strides = [1, 1]} : vector<2x768xf32> to vector<2x256xf32>
    %226 = arith.addf %224, %225 : vector<2x256xf32>
    %227 = arith.negf %226 : vector<2x256xf32>
    %228 = math.exp %227 : vector<2x256xf32>
    %cst_81 = arith.constant 1.000000e+00 : f32
    %229 = vector.broadcast %cst_81 : f32 to vector<2x256xf32>
    %230 = arith.addf %229, %228 : vector<2x256xf32>
    %231 = arith.divf %229, %230 : vector<2x256xf32>
    %232 = vector.extract_strided_slice %221 {offsets = [0, 256], sizes = [2, 256], strides = [1, 1]} : vector<2x768xf32> to vector<2x256xf32>
    %233 = vector.extract_strided_slice %223 {offsets = [0, 256], sizes = [2, 256], strides = [1, 1]} : vector<2x768xf32> to vector<2x256xf32>
    %234 = arith.addf %232, %233 : vector<2x256xf32>
    %235 = arith.negf %234 : vector<2x256xf32>
    %236 = math.exp %235 : vector<2x256xf32>
    %cst_82 = arith.constant 1.000000e+00 : f32
    %237 = vector.broadcast %cst_82 : f32 to vector<2x256xf32>
    %238 = arith.addf %237, %236 : vector<2x256xf32>
    %239 = arith.divf %237, %238 : vector<2x256xf32>
    %240 = vector.extract_strided_slice %221 {offsets = [0, 512], sizes = [2, 256], strides = [1, 1]} : vector<2x768xf32> to vector<2x256xf32>
    %241 = vector.extract_strided_slice %223 {offsets = [0, 512], sizes = [2, 256], strides = [1, 1]} : vector<2x768xf32> to vector<2x256xf32>
    %242 = arith.addf %241, %28 : vector<2x256xf32>
    %243 = arith.mulf %231, %242 : vector<2x256xf32>
    %244 = arith.addf %240, %243 : vector<2x256xf32>
    %245 = math.tanh %244 : vector<2x256xf32>
    %cst_83 = arith.constant 1.000000e+00 : f32
    %246 = vector.broadcast %cst_83 : f32 to vector<2x256xf32>
    %247 = arith.subf %246, %239 : vector<2x256xf32>
    %248 = arith.mulf %247, %245 : vector<2x256xf32>
    %249 = arith.mulf %239, %188 : vector<2x256xf32>
    %250 = arith.addf %248, %249 : vector<2x256xf32>
    %c8 = arith.constant 8 : index
    %c0_84 = arith.constant 0 : index
    %251 = vector.load %arg12[%c8, %c0_84] : memref<16x768xf32, #tpu.memory_space<vmem>>, vector<2x768xf32>
    %252 = arith.truncf %218 : vector<2x256xf32> to vector<2x256xbf16>
    %cst_85 = arith.constant dense<0.000000e+00> : vector<2x768xf32>
    %253 = tpu.matmul %252, %24, %cst_85 {dimension_numbers = #tpu.dot_dimension_numbers<[1], [0], [0], [1], [0, 0, 1, 1], [], []>} : vector<2x256xbf16>, vector<256x768xbf16>, vector<2x768xf32> -> vector<2x768xf32>
    %254 = vector.extract_strided_slice %251 {offsets = [0, 0], sizes = [2, 256], strides = [1, 1]} : vector<2x768xf32> to vector<2x256xf32>
    %255 = vector.extract_strided_slice %253 {offsets = [0, 0], sizes = [2, 256], strides = [1, 1]} : vector<2x768xf32> to vector<2x256xf32>
    %256 = arith.addf %254, %255 : vector<2x256xf32>
    %257 = arith.negf %256 : vector<2x256xf32>
    %258 = math.exp %257 : vector<2x256xf32>
    %cst_86 = arith.constant 1.000000e+00 : f32
    %259 = vector.broadcast %cst_86 : f32 to vector<2x256xf32>
    %260 = arith.addf %259, %258 : vector<2x256xf32>
    %261 = arith.divf %259, %260 : vector<2x256xf32>
    %262 = vector.extract_strided_slice %251 {offsets = [0, 256], sizes = [2, 256], strides = [1, 1]} : vector<2x768xf32> to vector<2x256xf32>
    %263 = vector.extract_strided_slice %253 {offsets = [0, 256], sizes = [2, 256], strides = [1, 1]} : vector<2x768xf32> to vector<2x256xf32>
    %264 = arith.addf %262, %263 : vector<2x256xf32>
    %265 = arith.negf %264 : vector<2x256xf32>
    %266 = math.exp %265 : vector<2x256xf32>
    %cst_87 = arith.constant 1.000000e+00 : f32
    %267 = vector.broadcast %cst_87 : f32 to vector<2x256xf32>
    %268 = arith.addf %267, %266 : vector<2x256xf32>
    %269 = arith.divf %267, %268 : vector<2x256xf32>
    %270 = vector.extract_strided_slice %251 {offsets = [0, 512], sizes = [2, 256], strides = [1, 1]} : vector<2x768xf32> to vector<2x256xf32>
    %271 = vector.extract_strided_slice %253 {offsets = [0, 512], sizes = [2, 256], strides = [1, 1]} : vector<2x768xf32> to vector<2x256xf32>
    %272 = arith.addf %271, %32 : vector<2x256xf32>
    %273 = arith.mulf %261, %272 : vector<2x256xf32>
    %274 = arith.addf %270, %273 : vector<2x256xf32>
    %275 = math.tanh %274 : vector<2x256xf32>
    %cst_88 = arith.constant 1.000000e+00 : f32
    %276 = vector.broadcast %cst_88 : f32 to vector<2x256xf32>
    %277 = arith.subf %276, %269 : vector<2x256xf32>
    %278 = arith.mulf %277, %275 : vector<2x256xf32>
    %279 = arith.mulf %269, %218 : vector<2x256xf32>
    %280 = arith.addf %278, %279 : vector<2x256xf32>
    %c6_89 = arith.constant 6 : index
    %c0_90 = arith.constant 0 : index
    %281 = vector.load %arg7[%c6_89, %c0_90] : memref<16x256xf32, #tpu.memory_space<vmem>>, vector<2x256xf32>
    tpu.vector_store %arg7[%c6_89, %c0_90], %250 {strides = array<i32>} : memref<16x256xf32, #tpu.memory_space<vmem>>, vector<2x256xf32>,
    %c8_91 = arith.constant 8 : index
    %c0_92 = arith.constant 0 : index
    %282 = vector.load %arg8[%c8_91, %c0_92] : memref<16x256xf32, #tpu.memory_space<vmem>>, vector<2x256xf32>
    tpu.vector_store %arg8[%c8_91, %c0_92], %280 {strides = array<i32>} : memref<16x256xf32, #tpu.memory_space<vmem>>, vector<2x256xf32>,
    %c8_93 = arith.constant 8 : index
    %c0_94 = arith.constant 0 : index
    %283 = vector.load %arg11[%c8_93, %c0_94] : memref<16x768xf32, #tpu.memory_space<vmem>>, vector<2x768xf32>
    %284 = arith.truncf %250 : vector<2x256xf32> to vector<2x256xbf16>
    %cst_95 = arith.constant dense<0.000000e+00> : vector<2x768xf32>
    %285 = tpu.matmul %284, %22, %cst_95 {dimension_numbers = #tpu.dot_dimension_numbers<[1], [0], [0], [1], [0, 0, 1, 1], [], []>} : vector<2x256xbf16>, vector<256x768xbf16>, vector<2x768xf32> -> vector<2x768xf32>
    %286 = vector.extract_strided_slice %283 {offsets = [0, 0], sizes = [2, 256], strides = [1, 1]} : vector<2x768xf32> to vector<2x256xf32>
    %287 = vector.extract_strided_slice %285 {offsets = [0, 0], sizes = [2, 256], strides = [1, 1]} : vector<2x768xf32> to vector<2x256xf32>
    %288 = arith.addf %286, %287 : vector<2x256xf32>
    %289 = arith.negf %288 : vector<2x256xf32>
    %290 = math.exp %289 : vector<2x256xf32>
    %cst_96 = arith.constant 1.000000e+00 : f32
    %291 = vector.broadcast %cst_96 : f32 to vector<2x256xf32>
    %292 = arith.addf %291, %290 : vector<2x256xf32>
    %293 = arith.divf %291, %292 : vector<2x256xf32>
    %294 = vector.extract_strided_slice %283 {offsets = [0, 256], sizes = [2, 256], strides = [1, 1]} : vector<2x768xf32> to vector<2x256xf32>
    %295 = vector.extract_strided_slice %285 {offsets = [0, 256], sizes = [2, 256], strides = [1, 1]} : vector<2x768xf32> to vector<2x256xf32>
    %296 = arith.addf %294, %295 : vector<2x256xf32>
    %297 = arith.negf %296 : vector<2x256xf32>
    %298 = math.exp %297 : vector<2x256xf32>
    %cst_97 = arith.constant 1.000000e+00 : f32
    %299 = vector.broadcast %cst_97 : f32 to vector<2x256xf32>
    %300 = arith.addf %299, %298 : vector<2x256xf32>
    %301 = arith.divf %299, %300 : vector<2x256xf32>
    %302 = vector.extract_strided_slice %283 {offsets = [0, 512], sizes = [2, 256], strides = [1, 1]} : vector<2x768xf32> to vector<2x256xf32>
    %303 = vector.extract_strided_slice %285 {offsets = [0, 512], sizes = [2, 256], strides = [1, 1]} : vector<2x768xf32> to vector<2x256xf32>
    %304 = arith.addf %303, %28 : vector<2x256xf32>
    %305 = arith.mulf %293, %304 : vector<2x256xf32>
    %306 = arith.addf %302, %305 : vector<2x256xf32>
    %307 = math.tanh %306 : vector<2x256xf32>
    %cst_98 = arith.constant 1.000000e+00 : f32
    %308 = vector.broadcast %cst_98 : f32 to vector<2x256xf32>
    %309 = arith.subf %308, %301 : vector<2x256xf32>
    %310 = arith.mulf %309, %307 : vector<2x256xf32>
    %311 = arith.mulf %301, %250 : vector<2x256xf32>
    %312 = arith.addf %310, %311 : vector<2x256xf32>
    %c6_99 = arith.constant 6 : index
    %c0_100 = arith.constant 0 : index
    %313 = vector.load %arg12[%c6_99, %c0_100] : memref<16x768xf32, #tpu.memory_space<vmem>>, vector<2x768xf32>
    %314 = arith.truncf %280 : vector<2x256xf32> to vector<2x256xbf16>
    %cst_101 = arith.constant dense<0.000000e+00> : vector<2x768xf32>
    %315 = tpu.matmul %314, %24, %cst_101 {dimension_numbers = #tpu.dot_dimension_numbers<[1], [0], [0], [1], [0, 0, 1, 1], [], []>} : vector<2x256xbf16>, vector<256x768xbf16>, vector<2x768xf32> -> vector<2x768xf32>
    %316 = vector.extract_strided_slice %313 {offsets = [0, 0], sizes = [2, 256], strides = [1, 1]} : vector<2x768xf32> to vector<2x256xf32>
    %317 = vector.extract_strided_slice %315 {offsets = [0, 0], sizes = [2, 256], strides = [1, 1]} : vector<2x768xf32> to vector<2x256xf32>
    %318 = arith.addf %316, %317 : vector<2x256xf32>
    %319 = arith.negf %318 : vector<2x256xf32>
    %320 = math.exp %319 : vector<2x256xf32>
    %cst_102 = arith.constant 1.000000e+00 : f32
    %321 = vector.broadcast %cst_102 : f32 to vector<2x256xf32>
    %322 = arith.addf %321, %320 : vector<2x256xf32>
    %323 = arith.divf %321, %322 : vector<2x256xf32>
    %324 = vector.extract_strided_slice %313 {offsets = [0, 256], sizes = [2, 256], strides = [1, 1]} : vector<2x768xf32> to vector<2x256xf32>
    %325 = vector.extract_strided_slice %315 {offsets = [0, 256], sizes = [2, 256], strides = [1, 1]} : vector<2x768xf32> to vector<2x256xf32>
    %326 = arith.addf %324, %325 : vector<2x256xf32>
    %327 = arith.negf %326 : vector<2x256xf32>
    %328 = math.exp %327 : vector<2x256xf32>
    %cst_103 = arith.constant 1.000000e+00 : f32
    %329 = vector.broadcast %cst_103 : f32 to vector<2x256xf32>
    %330 = arith.addf %329, %328 : vector<2x256xf32>
    %331 = arith.divf %329, %330 : vector<2x256xf32>
    %332 = vector.extract_strided_slice %313 {offsets = [0, 512], sizes = [2, 256], strides = [1, 1]} : vector<2x768xf32> to vector<2x256xf32>
    %333 = vector.extract_strided_slice %315 {offsets = [0, 512], sizes = [2, 256], strides = [1, 1]} : vector<2x768xf32> to vector<2x256xf32>
    %334 = arith.addf %333, %32 : vector<2x256xf32>
    %335 = arith.mulf %323, %334 : vector<2x256xf32>
    %336 = arith.addf %332, %335 : vector<2x256xf32>
    %337 = math.tanh %336 : vector<2x256xf32>
    %cst_104 = arith.constant 1.000000e+00 : f32
    %338 = vector.broadcast %cst_104 : f32 to vector<2x256xf32>
    %339 = arith.subf %338, %331 : vector<2x256xf32>
    %340 = arith.mulf %339, %337 : vector<2x256xf32>
    %341 = arith.mulf %331, %280 : vector<2x256xf32>
    %342 = arith.addf %340, %341 : vector<2x256xf32>
    %c8_105 = arith.constant 8 : index
    %c0_106 = arith.constant 0 : index
    %343 = vector.load %arg7[%c8_105, %c0_106] : memref<16x256xf32, #tpu.memory_space<vmem>>, vector<2x256xf32>
    tpu.vector_store %arg7[%c8_105, %c0_106], %312 {strides = array<i32>} : memref<16x256xf32, #tpu.memory_space<vmem>>, vector<2x256xf32>,
    %c6_107 = arith.constant 6 : index
    %c0_108 = arith.constant 0 : index
    %344 = vector.load %arg8[%c6_107, %c0_108] : memref<16x256xf32, #tpu.memory_space<vmem>>, vector<2x256xf32>
    tpu.vector_store %arg8[%c6_107, %c0_108], %342 {strides = array<i32>} : memref<16x256xf32, #tpu.memory_space<vmem>>, vector<2x256xf32>,
    %c10_109 = arith.constant 10 : index
    %c0_110 = arith.constant 0 : index
    %345 = vector.load %arg11[%c10_109, %c0_110] : memref<16x768xf32, #tpu.memory_space<vmem>>, vector<2x768xf32>
    %346 = arith.truncf %312 : vector<2x256xf32> to vector<2x256xbf16>
    %cst_111 = arith.constant dense<0.000000e+00> : vector<2x768xf32>
    %347 = tpu.matmul %346, %22, %cst_111 {dimension_numbers = #tpu.dot_dimension_numbers<[1], [0], [0], [1], [0, 0, 1, 1], [], []>} : vector<2x256xbf16>, vector<256x768xbf16>, vector<2x768xf32> -> vector<2x768xf32>
    %348 = vector.extract_strided_slice %345 {offsets = [0, 0], sizes = [2, 256], strides = [1, 1]} : vector<2x768xf32> to vector<2x256xf32>
    %349 = vector.extract_strided_slice %347 {offsets = [0, 0], sizes = [2, 256], strides = [1, 1]} : vector<2x768xf32> to vector<2x256xf32>
    %350 = arith.addf %348, %349 : vector<2x256xf32>
    %351 = arith.negf %350 : vector<2x256xf32>
    %352 = math.exp %351 : vector<2x256xf32>
    %cst_112 = arith.constant 1.000000e+00 : f32
    %353 = vector.broadcast %cst_112 : f32 to vector<2x256xf32>
    %354 = arith.addf %353, %352 : vector<2x256xf32>
    %355 = arith.divf %353, %354 : vector<2x256xf32>
    %356 = vector.extract_strided_slice %345 {offsets = [0, 256], sizes = [2, 256], strides = [1, 1]} : vector<2x768xf32> to vector<2x256xf32>
    %357 = vector.extract_strided_slice %347 {offsets = [0, 256], sizes = [2, 256], strides = [1, 1]} : vector<2x768xf32> to vector<2x256xf32>
    %358 = arith.addf %356, %357 : vector<2x256xf32>
    %359 = arith.negf %358 : vector<2x256xf32>
    %360 = math.exp %359 : vector<2x256xf32>
    %cst_113 = arith.constant 1.000000e+00 : f32
    %361 = vector.broadcast %cst_113 : f32 to vector<2x256xf32>
    %362 = arith.addf %361, %360 : vector<2x256xf32>
    %363 = arith.divf %361, %362 : vector<2x256xf32>
    %364 = vector.extract_strided_slice %345 {offsets = [0, 512], sizes = [2, 256], strides = [1, 1]} : vector<2x768xf32> to vector<2x256xf32>
    %365 = vector.extract_strided_slice %347 {offsets = [0, 512], sizes = [2, 256], strides = [1, 1]} : vector<2x768xf32> to vector<2x256xf32>
    %366 = arith.addf %365, %28 : vector<2x256xf32>
    %367 = arith.mulf %355, %366 : vector<2x256xf32>
    %368 = arith.addf %364, %367 : vector<2x256xf32>
    %369 = math.tanh %368 : vector<2x256xf32>
    %cst_114 = arith.constant 1.000000e+00 : f32
    %370 = vector.broadcast %cst_114 : f32 to vector<2x256xf32>
    %371 = arith.subf %370, %363 : vector<2x256xf32>
    %372 = arith.mulf %371, %369 : vector<2x256xf32>
    %373 = arith.mulf %363, %312 : vector<2x256xf32>
    %374 = arith.addf %372, %373 : vector<2x256xf32>
    %c4_115 = arith.constant 4 : index
    %c0_116 = arith.constant 0 : index
    %375 = vector.load %arg12[%c4_115, %c0_116] : memref<16x768xf32, #tpu.memory_space<vmem>>, vector<2x768xf32>
    %376 = arith.truncf %342 : vector<2x256xf32> to vector<2x256xbf16>
    %cst_117 = arith.constant dense<0.000000e+00> : vector<2x768xf32>
    %377 = tpu.matmul %376, %24, %cst_117 {dimension_numbers = #tpu.dot_dimension_numbers<[1], [0], [0], [1], [0, 0, 1, 1], [], []>} : vector<2x256xbf16>, vector<256x768xbf16>, vector<2x768xf32> -> vector<2x768xf32>
    %378 = vector.extract_strided_slice %375 {offsets = [0, 0], sizes = [2, 256], strides = [1, 1]} : vector<2x768xf32> to vector<2x256xf32>
    %379 = vector.extract_strided_slice %377 {offsets = [0, 0], sizes = [2, 256], strides = [1, 1]} : vector<2x768xf32> to vector<2x256xf32>
    %380 = arith.addf %378, %379 : vector<2x256xf32>
    %381 = arith.negf %380 : vector<2x256xf32>
    %382 = math.exp %381 : vector<2x256xf32>
    %cst_118 = arith.constant 1.000000e+00 : f32
    %383 = vector.broadcast %cst_118 : f32 to vector<2x256xf32>
    %384 = arith.addf %383, %382 : vector<2x256xf32>
    %385 = arith.divf %383, %384 : vector<2x256xf32>
    %386 = vector.extract_strided_slice %375 {offsets = [0, 256], sizes = [2, 256], strides = [1, 1]} : vector<2x768xf32> to vector<2x256xf32>
    %387 = vector.extract_strided_slice %377 {offsets = [0, 256], sizes = [2, 256], strides = [1, 1]} : vector<2x768xf32> to vector<2x256xf32>
    %388 = arith.addf %386, %387 : vector<2x256xf32>
    %389 = arith.negf %388 : vector<2x256xf32>
    %390 = math.exp %389 : vector<2x256xf32>
    %cst_119 = arith.constant 1.000000e+00 : f32
    %391 = vector.broadcast %cst_119 : f32 to vector<2x256xf32>
    %392 = arith.addf %391, %390 : vector<2x256xf32>
    %393 = arith.divf %391, %392 : vector<2x256xf32>
    %394 = vector.extract_strided_slice %375 {offsets = [0, 512], sizes = [2, 256], strides = [1, 1]} : vector<2x768xf32> to vector<2x256xf32>
    %395 = vector.extract_strided_slice %377 {offsets = [0, 512], sizes = [2, 256], strides = [1, 1]} : vector<2x768xf32> to vector<2x256xf32>
    %396 = arith.addf %395, %32 : vector<2x256xf32>
    %397 = arith.mulf %385, %396 : vector<2x256xf32>
    %398 = arith.addf %394, %397 : vector<2x256xf32>
    %399 = math.tanh %398 : vector<2x256xf32>
    %cst_120 = arith.constant 1.000000e+00 : f32
    %400 = vector.broadcast %cst_120 : f32 to vector<2x256xf32>
    %401 = arith.subf %400, %393 : vector<2x256xf32>
    %402 = arith.mulf %401, %399 : vector<2x256xf32>
    %403 = arith.mulf %393, %342 : vector<2x256xf32>
    %404 = arith.addf %402, %403 : vector<2x256xf32>
    %c10_121 = arith.constant 10 : index
    %c0_122 = arith.constant 0 : index
    %405 = vector.load %arg7[%c10_121, %c0_122] : memref<16x256xf32, #tpu.memory_space<vmem>>, vector<2x256xf32>
    tpu.vector_store %arg7[%c10_121, %c0_122], %374 {strides = array<i32>} : memref<16x256xf32, #tpu.memory_space<vmem>>, vector<2x256xf32>,
    %c4_123 = arith.constant 4 : index
    %c0_124 = arith.constant 0 : index
    %406 = vector.load %arg8[%c4_123, %c0_124] : memref<16x256xf32, #tpu.memory_space<vmem>>, vector<2x256xf32>
    tpu.vector_store %arg8[%c4_123, %c0_124], %404 {strides = array<i32>} : memref<16x256xf32, #tpu.memory_space<vmem>>, vector<2x256xf32>,
    %c12_125 = arith.constant 12 : index
    %c0_126 = arith.constant 0 : index
    %407 = vector.load %arg11[%c12_125, %c0_126] : memref<16x768xf32, #tpu.memory_space<vmem>>, vector<2x768xf32>
    %408 = arith.truncf %374 : vector<2x256xf32> to vector<2x256xbf16>
    %cst_127 = arith.constant dense<0.000000e+00> : vector<2x768xf32>
    %409 = tpu.matmul %408, %22, %cst_127 {dimension_numbers = #tpu.dot_dimension_numbers<[1], [0], [0], [1], [0, 0, 1, 1], [], []>} : vector<2x256xbf16>, vector<256x768xbf16>, vector<2x768xf32> -> vector<2x768xf32>
    %410 = vector.extract_strided_slice %407 {offsets = [0, 0], sizes = [2, 256], strides = [1, 1]} : vector<2x768xf32> to vector<2x256xf32>
    %411 = vector.extract_strided_slice %409 {offsets = [0, 0], sizes = [2, 256], strides = [1, 1]} : vector<2x768xf32> to vector<2x256xf32>
    %412 = arith.addf %410, %411 : vector<2x256xf32>
    %413 = arith.negf %412 : vector<2x256xf32>
    %414 = math.exp %413 : vector<2x256xf32>
    %cst_128 = arith.constant 1.000000e+00 : f32
    %415 = vector.broadcast %cst_128 : f32 to vector<2x256xf32>
    %416 = arith.addf %415, %414 : vector<2x256xf32>
    %417 = arith.divf %415, %416 : vector<2x256xf32>
    %418 = vector.extract_strided_slice %407 {offsets = [0, 256], sizes = [2, 256], strides = [1, 1]} : vector<2x768xf32> to vector<2x256xf32>
    %419 = vector.extract_strided_slice %409 {offsets = [0, 256], sizes = [2, 256], strides = [1, 1]} : vector<2x768xf32> to vector<2x256xf32>
    %420 = arith.addf %418, %419 : vector<2x256xf32>
    %421 = arith.negf %420 : vector<2x256xf32>
    %422 = math.exp %421 : vector<2x256xf32>
    %cst_129 = arith.constant 1.000000e+00 : f32
    %423 = vector.broadcast %cst_129 : f32 to vector<2x256xf32>
    %424 = arith.addf %423, %422 : vector<2x256xf32>
    %425 = arith.divf %423, %424 : vector<2x256xf32>
    %426 = vector.extract_strided_slice %407 {offsets = [0, 512], sizes = [2, 256], strides = [1, 1]} : vector<2x768xf32> to vector<2x256xf32>
    %427 = vector.extract_strided_slice %409 {offsets = [0, 512], sizes = [2, 256], strides = [1, 1]} : vector<2x768xf32> to vector<2x256xf32>
    %428 = arith.addf %427, %28 : vector<2x256xf32>
    %429 = arith.mulf %417, %428 : vector<2x256xf32>
    %430 = arith.addf %426, %429 : vector<2x256xf32>
    %431 = math.tanh %430 : vector<2x256xf32>
    %cst_130 = arith.constant 1.000000e+00 : f32
    %432 = vector.broadcast %cst_130 : f32 to vector<2x256xf32>
    %433 = arith.subf %432, %425 : vector<2x256xf32>
    %434 = arith.mulf %433, %431 : vector<2x256xf32>
    %435 = arith.mulf %425, %374 : vector<2x256xf32>
    %436 = arith.addf %434, %435 : vector<2x256xf32>
    %c2_131 = arith.constant 2 : index
    %c0_132 = arith.constant 0 : index
    %437 = vector.load %arg12[%c2_131, %c0_132] : memref<16x768xf32, #tpu.memory_space<vmem>>, vector<2x768xf32>
    %438 = arith.truncf %404 : vector<2x256xf32> to vector<2x256xbf16>
    %cst_133 = arith.constant dense<0.000000e+00> : vector<2x768xf32>
    %439 = tpu.matmul %438, %24, %cst_133 {dimension_numbers = #tpu.dot_dimension_numbers<[1], [0], [0], [1], [0, 0, 1, 1], [], []>} : vector<2x256xbf16>, vector<256x768xbf16>, vector<2x768xf32> -> vector<2x768xf32>
    %440 = vector.extract_strided_slice %437 {offsets = [0, 0], sizes = [2, 256], strides = [1, 1]} : vector<2x768xf32> to vector<2x256xf32>
    %441 = vector.extract_strided_slice %439 {offsets = [0, 0], sizes = [2, 256], strides = [1, 1]} : vector<2x768xf32> to vector<2x256xf32>
    %442 = arith.addf %440, %441 : vector<2x256xf32>
    %443 = arith.negf %442 : vector<2x256xf32>
    %444 = math.exp %443 : vector<2x256xf32>
    %cst_134 = arith.constant 1.000000e+00 : f32
    %445 = vector.broadcast %cst_134 : f32 to vector<2x256xf32>
    %446 = arith.addf %445, %444 : vector<2x256xf32>
    %447 = arith.divf %445, %446 : vector<2x256xf32>
    %448 = vector.extract_strided_slice %437 {offsets = [0, 256], sizes = [2, 256], strides = [1, 1]} : vector<2x768xf32> to vector<2x256xf32>
    %449 = vector.extract_strided_slice %439 {offsets = [0, 256], sizes = [2, 256], strides = [1, 1]} : vector<2x768xf32> to vector<2x256xf32>
    %450 = arith.addf %448, %449 : vector<2x256xf32>
    %451 = arith.negf %450 : vector<2x256xf32>
    %452 = math.exp %451 : vector<2x256xf32>
    %cst_135 = arith.constant 1.000000e+00 : f32
    %453 = vector.broadcast %cst_135 : f32 to vector<2x256xf32>
    %454 = arith.addf %453, %452 : vector<2x256xf32>
    %455 = arith.divf %453, %454 : vector<2x256xf32>
    %456 = vector.extract_strided_slice %437 {offsets = [0, 512], sizes = [2, 256], strides = [1, 1]} : vector<2x768xf32> to vector<2x256xf32>
    %457 = vector.extract_strided_slice %439 {offsets = [0, 512], sizes = [2, 256], strides = [1, 1]} : vector<2x768xf32> to vector<2x256xf32>
    %458 = arith.addf %457, %32 : vector<2x256xf32>
    %459 = arith.mulf %447, %458 : vector<2x256xf32>
    %460 = arith.addf %456, %459 : vector<2x256xf32>
    %461 = math.tanh %460 : vector<2x256xf32>
    %cst_136 = arith.constant 1.000000e+00 : f32
    %462 = vector.broadcast %cst_136 : f32 to vector<2x256xf32>
    %463 = arith.subf %462, %455 : vector<2x256xf32>
    %464 = arith.mulf %463, %461 : vector<2x256xf32>
    %465 = arith.mulf %455, %404 : vector<2x256xf32>
    %466 = arith.addf %464, %465 : vector<2x256xf32>
    %c12_137 = arith.constant 12 : index
    %c0_138 = arith.constant 0 : index
    %467 = vector.load %arg7[%c12_137, %c0_138] : memref<16x256xf32, #tpu.memory_space<vmem>>, vector<2x256xf32>
    tpu.vector_store %arg7[%c12_137, %c0_138], %436 {strides = array<i32>} : memref<16x256xf32, #tpu.memory_space<vmem>>, vector<2x256xf32>,
    %c2_139 = arith.constant 2 : index
    %c0_140 = arith.constant 0 : index
    %468 = vector.load %arg8[%c2_139, %c0_140] : memref<16x256xf32, #tpu.memory_space<vmem>>, vector<2x256xf32>
    tpu.vector_store %arg8[%c2_139, %c0_140], %466 {strides = array<i32>} : memref<16x256xf32, #tpu.memory_space<vmem>>, vector<2x256xf32>,
    %c14_141 = arith.constant 14 : index
    %c0_142 = arith.constant 0 : index
    %469 = vector.load %arg11[%c14_141, %c0_142] : memref<16x768xf32, #tpu.memory_space<vmem>>, vector<2x768xf32>
    %470 = arith.truncf %436 : vector<2x256xf32> to vector<2x256xbf16>
    %cst_143 = arith.constant dense<0.000000e+00> : vector<2x768xf32>
    %471 = tpu.matmul %470, %22, %cst_143 {dimension_numbers = #tpu.dot_dimension_numbers<[1], [0], [0], [1], [0, 0, 1, 1], [], []>} : vector<2x256xbf16>, vector<256x768xbf16>, vector<2x768xf32> -> vector<2x768xf32>
    %472 = vector.extract_strided_slice %469 {offsets = [0, 0], sizes = [2, 256], strides = [1, 1]} : vector<2x768xf32> to vector<2x256xf32>
    %473 = vector.extract_strided_slice %471 {offsets = [0, 0], sizes = [2, 256], strides = [1, 1]} : vector<2x768xf32> to vector<2x256xf32>
    %474 = arith.addf %472, %473 : vector<2x256xf32>
    %475 = arith.negf %474 : vector<2x256xf32>
    %476 = math.exp %475 : vector<2x256xf32>
    %cst_144 = arith.constant 1.000000e+00 : f32
    %477 = vector.broadcast %cst_144 : f32 to vector<2x256xf32>
    %478 = arith.addf %477, %476 : vector<2x256xf32>
    %479 = arith.divf %477, %478 : vector<2x256xf32>
    %480 = vector.extract_strided_slice %469 {offsets = [0, 256], sizes = [2, 256], strides = [1, 1]} : vector<2x768xf32> to vector<2x256xf32>
    %481 = vector.extract_strided_slice %471 {offsets = [0, 256], sizes = [2, 256], strides = [1, 1]} : vector<2x768xf32> to vector<2x256xf32>
    %482 = arith.addf %480, %481 : vector<2x256xf32>
    %483 = arith.negf %482 : vector<2x256xf32>
    %484 = math.exp %483 : vector<2x256xf32>
    %cst_145 = arith.constant 1.000000e+00 : f32
    %485 = vector.broadcast %cst_145 : f32 to vector<2x256xf32>
    %486 = arith.addf %485, %484 : vector<2x256xf32>
    %487 = arith.divf %485, %486 : vector<2x256xf32>
    %488 = vector.extract_strided_slice %469 {offsets = [0, 512], sizes = [2, 256], strides = [1, 1]} : vector<2x768xf32> to vector<2x256xf32>
    %489 = vector.extract_strided_slice %471 {offsets = [0, 512], sizes = [2, 256], strides = [1, 1]} : vector<2x768xf32> to vector<2x256xf32>
    %490 = arith.addf %489, %28 : vector<2x256xf32>
    %491 = arith.mulf %479, %490 : vector<2x256xf32>
    %492 = arith.addf %488, %491 : vector<2x256xf32>
    %493 = math.tanh %492 : vector<2x256xf32>
    %cst_146 = arith.constant 1.000000e+00 : f32
    %494 = vector.broadcast %cst_146 : f32 to vector<2x256xf32>
    %495 = arith.subf %494, %487 : vector<2x256xf32>
    %496 = arith.mulf %495, %493 : vector<2x256xf32>
    %497 = arith.mulf %487, %436 : vector<2x256xf32>
    %498 = arith.addf %496, %497 : vector<2x256xf32>
    %c0_147 = arith.constant 0 : index
    %c0_148 = arith.constant 0 : index
    %499 = vector.load %arg12[%c0_147, %c0_148] : memref<16x768xf32, #tpu.memory_space<vmem>>, vector<2x768xf32>
    %500 = arith.truncf %466 : vector<2x256xf32> to vector<2x256xbf16>
    %cst_149 = arith.constant dense<0.000000e+00> : vector<2x768xf32>
    %501 = tpu.matmul %500, %24, %cst_149 {dimension_numbers = #tpu.dot_dimension_numbers<[1], [0], [0], [1], [0, 0, 1, 1], [], []>} : vector<2x256xbf16>, vector<256x768xbf16>, vector<2x768xf32> -> vector<2x768xf32>
    %502 = vector.extract_strided_slice %499 {offsets = [0, 0], sizes = [2, 256], strides = [1, 1]} : vector<2x768xf32> to vector<2x256xf32>
    %503 = vector.extract_strided_slice %501 {offsets = [0, 0], sizes = [2, 256], strides = [1, 1]} : vector<2x768xf32> to vector<2x256xf32>
    %504 = arith.addf %502, %503 : vector<2x256xf32>
    %505 = arith.negf %504 : vector<2x256xf32>
    %506 = math.exp %505 : vector<2x256xf32>
    %cst_150 = arith.constant 1.000000e+00 : f32
    %507 = vector.broadcast %cst_150 : f32 to vector<2x256xf32>
    %508 = arith.addf %507, %506 : vector<2x256xf32>
    %509 = arith.divf %507, %508 : vector<2x256xf32>
    %510 = vector.extract_strided_slice %499 {offsets = [0, 256], sizes = [2, 256], strides = [1, 1]} : vector<2x768xf32> to vector<2x256xf32>
    %511 = vector.extract_strided_slice %501 {offsets = [0, 256], sizes = [2, 256], strides = [1, 1]} : vector<2x768xf32> to vector<2x256xf32>
    %512 = arith.addf %510, %511 : vector<2x256xf32>
    %513 = arith.negf %512 : vector<2x256xf32>
    %514 = math.exp %513 : vector<2x256xf32>
    %cst_151 = arith.constant 1.000000e+00 : f32
    %515 = vector.broadcast %cst_151 : f32 to vector<2x256xf32>
    %516 = arith.addf %515, %514 : vector<2x256xf32>
    %517 = arith.divf %515, %516 : vector<2x256xf32>
    %518 = vector.extract_strided_slice %499 {offsets = [0, 512], sizes = [2, 256], strides = [1, 1]} : vector<2x768xf32> to vector<2x256xf32>
    %519 = vector.extract_strided_slice %501 {offsets = [0, 512], sizes = [2, 256], strides = [1, 1]} : vector<2x768xf32> to vector<2x256xf32>
    %520 = arith.addf %519, %32 : vector<2x256xf32>
    %521 = arith.mulf %509, %520 : vector<2x256xf32>
    %522 = arith.addf %518, %521 : vector<2x256xf32>
    %523 = math.tanh %522 : vector<2x256xf32>
    %cst_152 = arith.constant 1.000000e+00 : f32
    %524 = vector.broadcast %cst_152 : f32 to vector<2x256xf32>
    %525 = arith.subf %524, %517 : vector<2x256xf32>
    %526 = arith.mulf %525, %523 : vector<2x256xf32>
    %527 = arith.mulf %517, %466 : vector<2x256xf32>
    %528 = arith.addf %526, %527 : vector<2x256xf32>
    %c14_153 = arith.constant 14 : index
    %c0_154 = arith.constant 0 : index
    %529 = vector.load %arg7[%c14_153, %c0_154] : memref<16x256xf32, #tpu.memory_space<vmem>>, vector<2x256xf32>
    tpu.vector_store %arg7[%c14_153, %c0_154], %498 {strides = array<i32>} : memref<16x256xf32, #tpu.memory_space<vmem>>, vector<2x256xf32>,
    %c0_155 = arith.constant 0 : index
    %c0_156 = arith.constant 0 : index
    %530 = vector.load %arg8[%c0_155, %c0_156] : memref<16x256xf32, #tpu.memory_space<vmem>>, vector<2x256xf32>
    tpu.vector_store %arg8[%c0_155, %c0_156], %528 {strides = array<i32>} : memref<16x256xf32, #tpu.memory_space<vmem>>, vector<2x256xf32>,
    %c0_157 = arith.constant 0 : index
    %c0_158 = arith.constant 0 : index
    %531 = vector.load %arg9[%c0_157, %c0_158] : memref<2x256xf32, #tpu.memory_space<vmem>>, vector<2x256xf32>
    tpu.vector_store %arg9[%c0_157, %c0_158], %498 {strides = array<i32>} : memref<2x256xf32, #tpu.memory_space<vmem>>, vector<2x256xf32>,
    %c0_159 = arith.constant 0 : index
    %c0_160 = arith.constant 0 : index
    %532 = vector.load %arg10[%c0_159, %c0_160] : memref<2x256xf32, #tpu.memory_space<vmem>>, vector<2x256xf32>
    tpu.vector_store %arg10[%c0_159, %c0_160], %528 {strides = array<i32>} : memref<2x256xf32, #tpu.memory_space<vmem>>, vector<2x256xf32>,
    return
  }
  func.func @transform_0(%arg0: i32) -> (i32, i32) {
    %c0_i32 = arith.constant 0 : i32
    %c0_i32_0 = arith.constant 0 : i32
    return %arg0, %c0_i32 : i32, i32
  }
  func.func @transform_1(%arg0: i32) -> (i32, i32) {
    %c3_i32 = arith.constant 3 : i32
    %0 = arith.subi %c3_i32, %arg0 : i32
    %c0_i32 = arith.constant 0 : i32
    %c0_i32_0 = arith.constant 0 : i32
    return %0, %c0_i32 : i32, i32
  }
  func.func @transform_2(%arg0: i32) -> (i32, i32, i32) {
    %c0_i32 = arith.constant 0 : i32
    %c0_i32_0 = arith.constant 0 : i32
    %c0_i32_1 = arith.constant 0 : i32
    %c0_i32_2 = arith.constant 0 : i32
    return %c0_i32, %c0_i32_0, %c0_i32_1 : i32, i32, i32
  }
  func.func @transform_3(%arg0: i32) -> (i32, i32, i32) {
    %c0_i32 = arith.constant 0 : i32
    %c0_i32_0 = arith.constant 0 : i32
    %c0_i32_1 = arith.constant 0 : i32
    %c0_i32_2 = arith.constant 0 : i32
    return %c0_i32, %c0_i32_0, %c0_i32_1 : i32, i32, i32
  }
  func.func @transform_4(%arg0: i32) -> (i32, i32, i32) {
    %c0_i32 = arith.constant 0 : i32
    %c0_i32_0 = arith.constant 0 : i32
    %c0_i32_1 = arith.constant 0 : i32
    %c0_i32_2 = arith.constant 0 : i32
    return %c0_i32, %c0_i32_0, %c0_i32_1 : i32, i32, i32
  }
  func.func @transform_5(%arg0: i32) -> (i32, i32, i32) {
    %c0_i32 = arith.constant 0 : i32
    %c0_i32_0 = arith.constant 0 : i32
    %c0_i32_1 = arith.constant 0 : i32
    %c0_i32_2 = arith.constant 0 : i32
    return %c0_i32, %c0_i32_0, %c0_i32_1 : i32, i32, i32
  }
  func.func @transform_6(%arg0: i32) -> (i32, i32) {
    %c0_i32 = arith.constant 0 : i32
    %c0_i32_0 = arith.constant 0 : i32
    return %arg0, %c0_i32 : i32, i32
  }
  func.func @transform_7(%arg0: i32) -> (i32, i32) {
    %c3_i32 = arith.constant 3 : i32
    %0 = arith.subi %c3_i32, %arg0 : i32
    %c0_i32 = arith.constant 0 : i32
    %c0_i32_0 = arith.constant 0 : i32
    return %0, %c0_i32 : i32, i32
  }
}

</mosaic_0001>

<bundles_post_ra>
// kernel: bigru_encoder.1
= control target key start
LH: loop header
LB: loop body
LE: loop exit
PB: predicated region body
PF: predicated region fallthrough
CT: control target
= control target key end

     0   :  { %s7825_s24 = smov 0   ;;  %s13888_s0 = inlined_call_operand.vmem [shape: bf16[64,128], index: 0, kind: input, shape index: {}, may-alias: {0,1}]   ;;  %s13889_s1 = inlined_call_operand.vmem [shape: bf16[64,128], index: 1, kind: input, shape index: {}, may-alias: {0,1}]   ;;  %s13890_s2 = inlined_call_operand.vmem [shape: bf16[2,128,768], index: 2, kind: input, shape index: {}]   ;;  %s13891_s3 = inlined_call_operand.vmem [shape: bf16[2,256,768], index: 3, kind: input, shape index: {}]   ;;  %s13892_s4 = inlined_call_operand.vmem [shape: f32[2,1,768], index: 4, kind: input, shape index: {}]   ;;  %s13893_s5 = inlined_call_operand.vmem [shape: f32[2,1,256], index: 5, kind: input, shape index: {}]   ;;  %s13894_s6 = inlined_call_operand.vmem [shape: f32[64,256], index: 6, kind: output, shape index: {0}]   ;;  %s13895_s7 = inlined_call_operand.vmem [shape: f32[64,256], index: 7, kind: output, shape index: {1}]  }
   0x1 LB: > { %s5826_s25 = sadd.s32 4294967295, %s7780_s24   ;;  %p5830_p0 = scmp.ge.s32.totalorder %s7780_s24, 1  ;;  %s7780_s24 = sphi %s7825_s24, %s18_s24  }
   0x2   : > { %p258_p1 = scmp.lt.s32.totalorder %s7780_s24, 5 }
   0x4   : > { %p259_p2 = pnand %p5830_p0, %p258_p1 }
   0x6   : > { %262 = sbr.rel (%p259_p2) target bundleno = 2699 (0xa8b), region = 44 }
   0xd   : > { %s5831_s26 = sshll.u32 %s5826_s25, 1  ;;  %s310_s27 = ssub.s32 3, %s5826_s25 }
   0xe   : > { %p305_p3 = scmp.lt.s32.totalorder %s5831_s26, 7  ;;  %s5833_s28 = sshll.u32 %s310_s27, 1 }
   0xf   : > { %p312_p4 = scmp.lt.s32.totalorder %s5833_s28, 7  ;;  %p5841_p5 = scmp.ne.s32.totalorder %s5826_s25, 0 }
  0x10   : > { %s15211_s26 = smov (!%p305_p3, %s5831_s26), 7  ;;  %v7782_v0 = vmov (!%p5841_p5), 0.0  }
  0x11   : > { %s15213_s28 = smov (!%p312_p4, %s5833_s28), 7  ;;  %s5832_s29 = sshll.u32 %s15211_s26, 2  ;;  %339 = vst [vmem:[#allocation2] sm:$0xf] (!%p5841_p5), %v7782_v0  ;;  %340 = vst [vmem:[#allocation3] sm:$0xf] (!%p5841_p5), %v7782_v0 }
  0x12   : > { %s6346_s30 = sshll.u32 %s15211_s26, 4  ;;  %s7836_s10 = scalar_lea.vmem %s13888_s0, %s5832_s29 }
  0x13   : > { %s5834_s11 = sshll.u32 %s15213_s28, 2  ;;  %s7846_s17 = scalar_lea.vmem %s13894_s6, %s6346_s30 }
  0x14   : > { %s7841_s14 = scalar_lea.vmem %s13889_s1, %s5834_s11  ;;  %s6347_s18 = sshll.u32 %s15213_s28, 4 }
  0x15   : > { %s7851_s21 = scalar_lea.vmem %s13895_s7, %s6347_s18  ;;  %338 = sbr.rel (%p5841_p5) target bundleno = 28 (0x1c), region = 48 }
  0x1c PF: > { %v6359_v1 = vld [vmem:[%s13890_s2 + $0x4] ss:$24 sps:$4 sm:$0xff]   ;;  %v7783_v3 = vmov 0   ;;  %v6363_v4 = vld [vmem:[%s13890_s2] ss:$24 sps:$4 sm:$0xff]  }
  0x1d   : > { %v6361_v2 = vld [vmem:[%s13890_s2 + $0xc] ss:$24 sps:$4 sm:$0xff]   ;;  %701 = vmatprep.mubr.bf16.mxu0 %v7783_v3  ;;  %744 = vmatprep.mubr.bf16.mxu1 %v7783_v3  ;;  %v6364_v5 = vld [vmem:[%s13890_s2 + $0x8] ss:$24 sps:$4 sm:$0xff]   ;;  %v6367_v7 = vld [vmem:[%s13890_s2 + $0x3c] ss:$24 sps:$4 sm:$0xff]  }
  0x1e   : > { %669 = vmatprep.subr.bf16.mxu0 %v6359_v1  ;;  %712 = vmatprep.subr.bf16.mxu1 %v6361_v2  ;;  %v6365_v6 = vld [vmem:[%s13890_s2 + $0x34] ss:$24 sps:$4 sm:$0xff]   ;;  %v6369_v8 = vld [vmem:[%s13890_s2 + $0x30] ss:$24 sps:$4 sm:$0xff]   ;;  %v6371_v10 = vld [vmem:[%s13890_s2 + $0x64] ss:$24 sps:$4 sm:$0xff]  }
  0x1f   : > { %670 = vmatpush1.bf16.msra.mxu0 %v6363_v4  ;;  %713 = vmatpush1.bf16.msra.mxu1 %v6364_v5  ;;  %v6370_v9 = vld [vmem:[%s13890_s2 + $0x38] ss:$24 sps:$4 sm:$0xff]   ;;  %v6373_v11 = vld [vmem:[%s13890_s2 + $0x6c] ss:$24 sps:$4 sm:$0xff]   ;;  %v6376_v13 = vld [vmem:[%s13890_s2 + $0x68] ss:$24 sps:$4 sm:$0xff]  }
  0x20   : > { %671 = vmatprep.subr.bf16.mxu0 %v6365_v6  ;;  %714 = vmatprep.subr.bf16.mxu1 %v6367_v7  ;;  %v6375_v12 = vld [vmem:[%s13890_s2 + $0x60] ss:$24 sps:$4 sm:$0xff]   ;;  %v6377_v14 = vld [vmem:[%s13890_s2 + $0x94] ss:$24 sps:$4 sm:$0xff]   ;;  %v6381_v16 = vld [vmem:[%s13890_s2 + $0x90] ss:$24 sps:$4 sm:$0xff]  }
  0x21   : > { %v6379_v15 = vld [vmem:[%s13890_s2 + $0x9c] ss:$24 sps:$4 sm:$0xff]   ;;  %v6382_v17 = vld [vmem:[%s13890_s2 + $0x98] ss:$24 sps:$4 sm:$0xff]   ;;  %v6385_v19 = vld [vmem:[%s13890_s2 + $0xcc] ss:$24 sps:$4 sm:$0xff]  }
  0x22   : > { %v6383_v18 = vld [vmem:[%s13890_s2 + $0xc4] ss:$24 sps:$4 sm:$0xff]   ;;  %v6387_v20 = vld [vmem:[%s13890_s2 + $0xc0] ss:$24 sps:$4 sm:$0xff]   ;;  %v6389_v22 = vld [vmem:[%s13890_s2 + $0xf4] ss:$24 sps:$4 sm:$0xff]  }
  0x23   : > { %672 = vmatpush1.bf16.msra.mxu0 %v6369_v8  ;;  %715 = vmatpush1.bf16.msra.mxu1 %v6370_v9  ;;  %v6388_v21 = vld [vmem:[%s13890_s2 + $0xc8] ss:$24 sps:$4 sm:$0xff]   ;;  %v6391_v23 = vld [vmem:[%s13890_s2 + $0xfc] ss:$24 sps:$4 sm:$0xff]   ;;  %v6394_v25 = vld [vmem:[%s13890_s2 + $0xf8] ss:$24 sps:$4 sm:$0xff]  }
  0x24   : > { %673 = vmatprep.subr.bf16.mxu0 %v6371_v10  ;;  %716 = vmatprep.subr.bf16.mxu1 %v6373_v11  ;;  %v6393_v24 = vld [vmem:[%s13890_s2 + $0xf0] ss:$24 sps:$4 sm:$0xff]   ;;  %v6395_v26 = vld [vmem:[%s13890_s2 + $0x124] ss:$24 sps:$4 sm:$0xff]   ;;  %v6399_v28 = vld [vmem:[%s13890_s2 + $0x120] ss:$24 sps:$4 sm:$0xff]  }
  0x25   : > { %v6397_v27 = vld [vmem:[%s13890_s2 + $0x12c] ss:$24 sps:$4 sm:$0xff]   ;;  %v6400_v29 = vld [vmem:[%s13890_s2 + $0x128] ss:$24 sps:$4 sm:$0xff]   ;;  %v6403_v31 = vld [vmem:[%s13890_s2 + $0x15c] ss:$24 sps:$4 sm:$0xff]  }
  0x26   : > { %v6401_v30 = vld [vmem:[%s13890_s2 + $0x154] ss:$24 sps:$4 sm:$0xff]   ;;  %v6405_v32 = vld [vmem:[%s13890_s2 + $0x150] ss:$24 sps:$4 sm:$0xff]   ;;  %v6413_v35 = vld [vmem:[%s13890_s2 + $0x184] ss:$24 sps:$4 sm:$0xff]  }
  0x27   : > { %674 = vmatpush1.bf16.msra.mxu0 %v6375_v12  ;;  %717 = vmatpush1.bf16.msra.mxu1 %v6376_v13  ;;  %v6406_v33 = vld [vmem:[%s13890_s2 + $0x158] ss:$24 sps:$4 sm:$0xff]   ;;  %v6410_v34 = vld [vmem:[%s13890_s2 + $0x14] ss:$24 sps:$4 sm:$0xff]   ;;  %v7958_v36 = vld [vmem:[%s7836_s10] sm:$0xff]  }
  0x28   : > { %675 = vmatprep.subr.bf16.mxu0 %v6377_v14  ;;  %718 = vmatprep.subr.bf16.mxu1 %v6379_v15  ;;  %v6408_v37 = vld [vmem:[%s13890_s2 + $0x10] ss:$24 sps:$4 sm:$0xff]   ;;  %v6411_v38 = vld [vmem:[%s13890_s2 + $0x180] ss:$24 sps:$4 sm:$0xff]   ;;  %v6416_v39 = vld [vmem:[%s13890_s2 + $0x44] ss:$24 sps:$4 sm:$0xff]  }
  0x29   : > { %v6419_v40 = vld [vmem:[%s13890_s2 + $0x1b4] ss:$24 sps:$4 sm:$0xff]   ;;  %v6414_v41 = vld [vmem:[%s13890_s2 + $0x40] ss:$24 sps:$4 sm:$0xff]   ;;  %v6417_v42 = vld [vmem:[%s13890_s2 + $0x1b0] ss:$24 sps:$4 sm:$0xff]  }
  0x2a   : > { %v6422_v43 = vld [vmem:[%s13890_s2 + $0x74] ss:$24 sps:$4 sm:$0xff]   ;;  %v6425_v44 = vld [vmem:[%s13890_s2 + $0x1e4] ss:$24 sps:$4 sm:$0xff]   ;;  %v6420_v45 = vld [vmem:[%s13890_s2 + $0x70] ss:$24 sps:$4 sm:$0xff]  }
  0x2b   : > { %676 = vmatpush1.bf16.msra.mxu0 %v6381_v16  ;;  %719 = vmatpush1.bf16.msra.mxu1 %v6382_v17  ;;  %v6423_v46 = vld [vmem:[%s13890_s2 + $0x1e0] ss:$24 sps:$4 sm:$0xff]   ;;  %v6428_v47 = vld [vmem:[%s13890_s2 + $0xa4] ss:$24 sps:$4 sm:$0xff]   ;;  %v6431_v48 = vld [vmem:[%s13890_s2 + $0x214] ss:$24 sps:$4 sm:$0xff]  }
  0x2c   : > { %677 = vmatprep.subr.bf16.mxu0 %v6383_v18  ;;  %720 = vmatprep.subr.bf16.mxu1 %v6385_v19  ;;  %v6426_v49 = vld [vmem:[%s13890_s2 + $0xa0] ss:$24 sps:$4 sm:$0xff]   ;;  %v6429_v50 = vld [vmem:[%s13890_s2 + $0x210] ss:$24 sps:$4 sm:$0xff]   ;;  %v6434_v51 = vld [vmem:[%s13890_s2 + $0xd4] ss:$24 sps:$4 sm:$0xff]  }
  0x2d   : > { %v6437_v52 = vld [vmem:[%s13890_s2 + $0x244] ss:$24 sps:$4 sm:$0xff]   ;;  %v6432_v53 = vld [vmem:[%s13890_s2 + $0xd0] ss:$24 sps:$4 sm:$0xff]   ;;  %v6435_v54 = vld [vmem:[%s13890_s2 + $0x240] ss:$24 sps:$4 sm:$0xff]  }
  0x2e   : > { %v6440_v55 = vld [vmem:[%s13890_s2 + $0x104] ss:$24 sps:$4 sm:$0xff]   ;;  %v6443_v56 = vld [vmem:[%s13890_s2 + $0x274] ss:$24 sps:$4 sm:$0xff]   ;;  %v6438_v57 = vld [vmem:[%s13890_s2 + $0x100] ss:$24 sps:$4 sm:$0xff]  }
  0x2f   : > { %678 = vmatpush1.bf16.msra.mxu0 %v6387_v20  ;;  %721 = vmatpush1.bf16.msra.mxu1 %v6388_v21  ;;  %v6441_v58 = vld [vmem:[%s13890_s2 + $0x270] ss:$24 sps:$4 sm:$0xff]   ;;  %v6446_v59 = vld [vmem:[%s13890_s2 + $0x134] ss:$24 sps:$4 sm:$0xff]   ;;  %v6449_v60 = vld [vmem:[%s13890_s2 + $0x2a4] ss:$24 sps:$4 sm:$0xff]  }
  0x30   : > { %679 = vmatprep.subr.bf16.mxu0 %v6389_v22  ;;  %722 = vmatprep.subr.bf16.mxu1 %v6391_v23  ;;  %v6444_v61 = vld [vmem:[%s13890_s2 + $0x130] ss:$24 sps:$4 sm:$0xff]   ;;  %v6447_v62 = vld [vmem:[%s13890_s2 + $0x2a0] ss:$24 sps:$4 sm:$0xff]   ;;  %v6452_v63 = vld [vmem:[%s13890_s2 + $0x164] ss:$24 sps:$4 sm:$0xff]  }
  0x31   : > { %v6455_v0 = vld [vmem:[%s13890_s2 + $0x2d4] ss:$24 sps:$4 sm:$0xff]   ;;  %v6450_v1 = vld [vmem:[%s13890_s2 + $0x160] ss:$24 sps:$4 sm:$0xff]   ;;  %v6453_v2 = vld [vmem:[%s13890_s2 + $0x2d0] ss:$24 sps:$4 sm:$0xff]  }
  0x32   : > { %v6458_v4 = vld [vmem:[%s13890_s2 + $0x18c] ss:$24 sps:$4 sm:$0xff]   ;;  %v6456_v7 = vld [vmem:[%s13890_s2 + $0x188] ss:$24 sps:$4 sm:$0xff]   ;;  %v6465_v9 = vld [vmem:[%s13890_s2 + $0x1bc] ss:$24 sps:$4 sm:$0xff]  }
  0x33   : > { %680 = vmatpush1.bf16.msra.mxu0 %v6393_v24  ;;  %723 = vmatpush1.bf16.msra.mxu1 %v6394_v25  ;;  %v6461_v5 = vld [vmem:[%s13890_s2 + $0x194] ss:$24 sps:$4 sm:$0xff]   ;;  %v8061_v6 = vld [vmem:[%s7841_s14] sm:$0xff]   ;;  %v6459_v8 = vld [vmem:[%s13890_s2 + $0x190] ss:$24 sps:$4 sm:$0xff]  }
  0x34   : > { %681 = vmatprep.subr.bf16.mxu0 %v6395_v26  ;;  %724 = vmatprep.subr.bf16.mxu1 %v6397_v27  ;;  %v6468_v10 = vld [vmem:[%s13890_s2 + $0x1c4] ss:$24 sps:$4 sm:$0xff]   ;;  %v6463_v11 = vld [vmem:[%s13890_s2 + $0x1b8] ss:$24 sps:$4 sm:$0xff]   ;;  %v6474_v14 = vld [vmem:[%s13890_s2 + $0x1f4] ss:$24 sps:$4 sm:$0xff]  }
  0x35   : > { %v6466_v12 = vld [vmem:[%s13890_s2 + $0x1c0] ss:$24 sps:$4 sm:$0xff]   ;;  %v6471_v13 = vld [vmem:[%s13890_s2 + $0x1ec] ss:$24 sps:$4 sm:$0xff]   ;;  %v6472_v16 = vld [vmem:[%s13890_s2 + $0x1f0] ss:$24 sps:$4 sm:$0xff]  }
  0x36   : > { %v6469_v15 = vld [vmem:[%s13890_s2 + $0x1e8] ss:$24 sps:$4 sm:$0xff]   ;;  %v6477_v17 = vld [vmem:[%s13890_s2 + $0x21c] ss:$24 sps:$4 sm:$0xff]   ;;  %v6475_v18 = vld [vmem:[%s13890_s2 + $0x218] ss:$24 sps:$4 sm:$0xff]  }
  0x37   : > { %682 = vmatpush1.bf16.msra.mxu0 %v6399_v28  ;;  %725 = vmatpush1.bf16.msra.mxu1 %v6400_v29  ;;  %v6478_v19 = vld [vmem:[%s13890_s2 + $0x220] ss:$24 sps:$4 sm:$0xff]   ;;  %v6483_v20 = vld [vmem:[%s13890_s2 + $0x24c] ss:$24 sps:$4 sm:$0xff]   ;;  %v6484_v23 = vld [vmem:[%s13890_s2 + $0x250] ss:$24 sps:$4 sm:$0xff]  }
  0x38   : > { %683 = vmatprep.subr.bf16.mxu0 %v6401_v30  ;;  %726 = vmatprep.subr.bf16.mxu1 %v6403_v31  ;;  %v6486_v21 = vld [vmem:[%s13890_s2 + $0x254] ss:$24 sps:$4 sm:$0xff]   ;;  %v6481_v22 = vld [vmem:[%s13890_s2 + $0x248] ss:$24 sps:$4 sm:$0xff]   ;;  %v6492_v25 = vld [vmem:[%s13890_s2 + $0x284] ss:$24 sps:$4 sm:$0xff]  }
  0x39   : > { %v6489_v24 = vld [vmem:[%s13890_s2 + $0x27c] ss:$24 sps:$4 sm:$0xff]   ;;  %v6487_v26 = vld [vmem:[%s13890_s2 + $0x278] ss:$24 sps:$4 sm:$0xff]   ;;  %v6495_v28 = vld [vmem:[%s13890_s2 + $0x2ac] ss:$24 sps:$4 sm:$0xff]  }
  0x3a   : > { %v6490_v27 = vld [vmem:[%s13890_s2 + $0x280] ss:$24 sps:$4 sm:$0xff]   ;;  %v6498_v29 = vld [vmem:[%s13890_s2 + $0x2b4] ss:$24 sps:$4 sm:$0xff]   ;;  %v6496_v31 = vld [vmem:[%s13890_s2 + $0x2b0] ss:$24 sps:$4 sm:$0xff]  }
  0x3b   : > { %684 = vmatpush1.bf16.msra.mxu0 %v6405_v32  ;;  %727 = vmatpush1.bf16.msra.mxu1 %v6406_v33  ;;  %v6493_v30 = vld [vmem:[%s13890_s2 + $0x2a8] ss:$24 sps:$4 sm:$0xff]   ;;  %v6501_v32 = vld [vmem:[%s13890_s2 + $0x2dc] ss:$24 sps:$4 sm:$0xff]  }
  0x3c   : > { %755 = vmatprep.subr.bf16.mxu0 %v6410_v34  ;;  %1140 = vmatprep.subr.bf16.mxu1 %v6413_v35  ;;  %v6504_v33 = vld [vmem:[%s13890_s2 + $0x2e4] ss:$24 sps:$4 sm:$0xff]   ;;  %v6499_v34 = vld [vmem:[%s13890_s2 + $0x2d8] ss:$24 sps:$4 sm:$0xff]  }
  0x3d   : > { %v6502_v35 = vld [vmem:[%s13890_s2 + $0x2e0] ss:$24 sps:$4 sm:$0xff]  }
  0x3e   : > { %702 = vmatmul.mubr.bf16.vlgmr.msra.gmra.mrb[0].mxu0 %v7958_v36  ;;  %745 = vmatmul.mubr.bf16.vlgmr.msra.gmra.mrb[0].mxu1 %v7958_v36 }
  0x3f   : > { %756 = vmatpush1.bf16.msra.mxu0 %v6408_v37  ;;  %1141 = vmatpush1.bf16.msra.mxu1 %v6411_v38  ;;  %v6507_v37 = vld [vmem:[%s13891_s3 + $0xc] ss:$24 sps:$4 sm:$0xff]   ;;  %v6509_v38 = vld [vmem:[%s13891_s3] ss:$24 sps:$4 sm:$0xff]  }
  0x40   : > { %757 = vmatprep.subr.bf16.mxu0 %v6416_v39  ;;  %1142 = vmatprep.subr.bf16.mxu1 %v6419_v40  ;;  %v6510_v39 = vld [vmem:[%s13891_s3 + $0x8] ss:$24 sps:$4 sm:$0xff]   ;;  %v6511_v40 = vld [vmem:[%s13891_s3 + $0x34] ss:$24 sps:$4 sm:$0xff]  }
  0x41   : > { %787 = vmatprep.mubr.bf16.mxu0 %v7783_v3  ;;  %1172 = vmatprep.mubr.bf16.mxu1 %v7783_v3 }
  0x43   : > { %758 = vmatpush1.bf16.msra.mxu0 %v6414_v41  ;;  %1143 = vmatpush1.bf16.msra.mxu1 %v6417_v42  ;;  %v6513_v41 = vld [vmem:[%s13891_s3 + $0x3c] ss:$24 sps:$4 sm:$0xff]   ;;  %v6515_v42 = vld [vmem:[%s13891_s3 + $0x30] ss:$24 sps:$4 sm:$0xff]  }
  0x44   : > { %759 = vmatprep.subr.bf16.mxu0 %v6422_v43  ;;  %1144 = vmatprep.subr.bf16.mxu1 %v6425_v44  ;;  %v6516_v43 = vld [vmem:[%s13891_s3 + $0x38] ss:$24 sps:$4 sm:$0xff]   ;;  %v6517_v44 = vld [vmem:[%s13891_s3 + $0x64] ss:$24 sps:$4 sm:$0xff]  }
  0x47   : > { %760 = vmatpush1.bf16.msra.mxu0 %v6420_v45  ;;  %1145 = vmatpush1.bf16.msra.mxu1 %v6423_v46  ;;  %v6519_v45 = vld [vmem:[%s13891_s3 + $0x6c] ss:$24 sps:$4 sm:$0xff]   ;;  %v6521_v46 = vld [vmem:[%s13891_s3 + $0x60] ss:$24 sps:$4 sm:$0xff]  }
  0x48   : > { %761 = vmatprep.subr.bf16.mxu0 %v6428_v47  ;;  %1146 = vmatprep.subr.bf16.mxu1 %v6431_v48  ;;  %v6522_v47 = vld [vmem:[%s13891_s3 + $0x68] ss:$24 sps:$4 sm:$0xff]   ;;  %v6523_v48 = vld [vmem:[%s13891_s3 + $0x94] ss:$24 sps:$4 sm:$0xff]  }
  0x4b   : > { %762 = vmatpush1.bf16.msra.mxu0 %v6426_v49  ;;  %1147 = vmatpush1.bf16.msra.mxu1 %v6429_v50  ;;  %v6525_v49 = vld [vmem:[%s13891_s3 + $0x9c] ss:$24 sps:$4 sm:$0xff]   ;;  %v6527_v50 = vld [vmem:[%s13891_s3 + $0x90] ss:$24 sps:$4 sm:$0xff]  }
  0x4c   : > { %763 = vmatprep.subr.bf16.mxu0 %v6434_v51  ;;  %1148 = vmatprep.subr.bf16.mxu1 %v6437_v52  ;;  %v6528_v51 = vld [vmem:[%s13891_s3 + $0x98] ss:$24 sps:$4 sm:$0xff]   ;;  %v6529_v52 = vld [vmem:[%s13891_s3 + $0xc4] ss:$24 sps:$4 sm:$0xff]  }
  0x4f   : > { %764 = vmatpush1.bf16.msra.mxu0 %v6432_v53  ;;  %1149 = vmatpush1.bf16.msra.mxu1 %v6435_v54  ;;  %v6531_v53 = vld [vmem:[%s13891_s3 + $0xcc] ss:$24 sps:$4 sm:$0xff]   ;;  %v8213_v54 = vld.sshfl [vmem:[#allocation2] sm:$0x33 pattern:$0x76325410] }
  0x50   : > { %765 = vmatprep.subr.bf16.mxu0 %v6440_v55  ;;  %1150 = vmatprep.subr.bf16.mxu1 %v6443_v56  ;;  %v8217_v55 = vcombine.high %v8213_v54, %v8213_v54  ;;  %v6533_v56 = vld [vmem:[%s13891_s3 + $0xc0] ss:$24 sps:$4 sm:$0xff]  }
  0x53   : > { %766 = vmatpush1.bf16.msra.mxu0 %v6438_v57  ;;  %1151 = vmatpush1.bf16.msra.mxu1 %v6441_v58  ;;  %v6534_v57 = vld [vmem:[%s13891_s3 + $0xc8] ss:$24 sps:$4 sm:$0xff]   ;;  %v8227_v58 = vpack.c.bf16 %v8217_v55, %v8217_v55 }
  0x54   : > { %767 = vmatprep.subr.bf16.mxu0 %v6446_v59  ;;  %1152 = vmatprep.subr.bf16.mxu1 %v6449_v60  ;;  %v6535_v59 = vld [vmem:[%s13891_s3 + $0xf4] ss:$24 sps:$4 sm:$0xff]  }
  0x55   : > { %v6537_v60 = vld [vmem:[%s13891_s3 + $0xfc] ss:$24 sps:$4 sm:$0xff]  }
  0x57   : > { %768 = vmatpush1.bf16.msra.mxu0 %v6444_v61  ;;  %1153 = vmatpush1.bf16.msra.mxu1 %v6447_v62  ;;  %v6539_v61 = vld [vmem:[%s13891_s3 + $0xf0] ss:$24 sps:$4 sm:$0xff]  }
  0x58   : > { %769 = vmatprep.subr.bf16.mxu0 %v6452_v63  ;;  %1154 = vmatprep.subr.bf16.mxu1 %v6455_v0  ;;  %v6540_v62 = vld [vmem:[%s13891_s3 + $0xf8] ss:$24 sps:$4 sm:$0xff]   ;;  %v6541_v63 = vld [vmem:[%s13891_s3 + $0x124] ss:$24 sps:$4 sm:$0xff]  }
  0x59   : > { %v6543_v0 = vld [vmem:[%s13891_s3 + $0x12c] ss:$24 sps:$4 sm:$0xff]  }
  0x5b   : > { %770 = vmatpush1.bf16.msra.mxu0 %v6450_v1  ;;  %1155 = vmatpush1.bf16.msra.mxu1 %v6453_v2  ;;  %v6545_v1 = vld [vmem:[%s13891_s3 + $0x120] ss:$24 sps:$4 sm:$0xff]  }
  0x5c   : > { %1183 = vmatprep.subr.bf16.mxu0 %v6458_v4  ;;  %1226 = vmatprep.subr.bf16.mxu1 %v6461_v5  ;;  %v6546_v2 = vld [vmem:[%s13891_s3 + $0x128] ss:$24 sps:$4 sm:$0xff]   ;;  %v6547_v4 = vld [vmem:[%s13891_s3 + $0x154] ss:$24 sps:$4 sm:$0xff]  }
  0x5d   : > { %v6549_v5 = vld [vmem:[%s13891_s3 + $0x15c] ss:$24 sps:$4 sm:$0xff]  }
  0x5e   : > { %788 = vmatmul.mubr.bf16.vlgmr.msra.gmra.mrb[4].mxu0 %v7958_v36  ;;  %1173 = vmatmul.mubr.bf16.vlgmr.msra.gmra.mrb[4].mxu1 %v8061_v6  ;;  %v6505_v36 = vld [vmem:[%s13891_s3 + $0x4] ss:$24 sps:$4 sm:$0xff]  }
  0x5f   : > { %1184 = vmatpush1.bf16.msra.mxu0 %v6456_v7  ;;  %1227 = vmatpush1.bf16.msra.mxu1 %v6459_v8  ;;  %v6552_v7 = vld [vmem:[%s13891_s3 + $0x158] ss:$24 sps:$4 sm:$0xff]   ;;  %v6553_v8 = vld [vmem:[%s13891_s3 + $0x184] ss:$24 sps:$4 sm:$0xff]  }
  0x60   : > { %1185 = vmatprep.subr.bf16.mxu0 %v6465_v9  ;;  %1228 = vmatprep.subr.bf16.mxu1 %v6468_v10  ;;  %v6555_v9 = vld [vmem:[%s13891_s3 + $0x18c] ss:$24 sps:$4 sm:$0xff]   ;;  %v6557_v10 = vld [vmem:[%s13891_s3 + $0x180] ss:$24 sps:$4 sm:$0xff]  }
  0x61   : > { %1215 = vmatprep.mubr.bf16.mxu0 %v7783_v3  ;;  %1258 = vmatprep.mubr.bf16.mxu1 %v7783_v3  ;;  %v6480_v3 = vld [vmem:[%s13890_s2 + $0x224] ss:$24 sps:$4 sm:$0xff]  }
  0x63   : > { %1186 = vmatpush1.bf16.msra.mxu0 %v6463_v11  ;;  %1229 = vmatpush1.bf16.msra.mxu1 %v6466_v12  ;;  %v6558_v11 = vld [vmem:[%s13891_s3 + $0x188] ss:$24 sps:$4 sm:$0xff]   ;;  %v6559_v12 = vld [vmem:[%s13891_s3 + $0x1b4] ss:$24 sps:$4 sm:$0xff]  }
  0x64   : > { %1187 = vmatprep.subr.bf16.mxu0 %v6471_v13  ;;  %1230 = vmatprep.subr.bf16.mxu1 %v6474_v14  ;;  %v6561_v13 = vld [vmem:[%s13891_s3 + $0x1bc] ss:$24 sps:$4 sm:$0xff]   ;;  %v6563_v14 = vld [vmem:[%s13891_s3 + $0x1b0] ss:$24 sps:$4 sm:$0xff]  }
  0x67   : > { %1188 = vmatpush1.bf16.msra.mxu0 %v6469_v15  ;;  %1231 = vmatpush1.bf16.msra.mxu1 %v6472_v16  ;;  %v6564_v15 = vld [vmem:[%s13891_s3 + $0x1b8] ss:$24 sps:$4 sm:$0xff]   ;;  %v6565_v16 = vld [vmem:[%s13891_s3 + $0x1e4] ss:$24 sps:$4 sm:$0xff]  }
  0x68   : > { %1189 = vmatprep.subr.bf16.mxu0 %v6477_v17  ;;  %1232 = vmatprep.subr.bf16.mxu1 %v6480_v3  ;;  %v6567_v17 = vld [vmem:[%s13891_s3 + $0x1ec] ss:$24 sps:$4 sm:$0xff]   ;;  %v6569_v3 = vld [vmem:[%s13891_s3 + $0x1e0] ss:$24 sps:$4 sm:$0xff]  }
  0x6b   : > { %1190 = vmatpush1.bf16.msra.mxu0 %v6475_v18  ;;  %1233 = vmatpush1.bf16.msra.mxu1 %v6478_v19  ;;  %v6570_v18 = vld [vmem:[%s13891_s3 + $0x1e8] ss:$24 sps:$4 sm:$0xff]   ;;  %v6571_v19 = vld [vmem:[%s13891_s3 + $0x214] ss:$24 sps:$4 sm:$0xff]  }
  0x6c   : > { %1191 = vmatprep.subr.bf16.mxu0 %v6483_v20  ;;  %1234 = vmatprep.subr.bf16.mxu1 %v6486_v21  ;;  %v6573_v20 = vld [vmem:[%s13891_s3 + $0x21c] ss:$24 sps:$4 sm:$0xff]   ;;  %v6575_v21 = vld [vmem:[%s13891_s3 + $0x210] ss:$24 sps:$4 sm:$0xff]  }
  0x6f   : > { %1192 = vmatpush1.bf16.msra.mxu0 %v6481_v22  ;;  %1235 = vmatpush1.bf16.msra.mxu1 %v6484_v23  ;;  %v6576_v22 = vld [vmem:[%s13891_s3 + $0x218] ss:$24 sps:$4 sm:$0xff]   ;;  %v6577_v23 = vld [vmem:[%s13891_s3 + $0x244] ss:$24 sps:$4 sm:$0xff]  }
  0x70   : > { %1193 = vmatprep.subr.bf16.mxu0 %v6489_v24  ;;  %1236 = vmatprep.subr.bf16.mxu1 %v6492_v25  ;;  %v6579_v24 = vld [vmem:[%s13891_s3 + $0x24c] ss:$24 sps:$4 sm:$0xff]   ;;  %v393_v25 = vlaneseq }
  0x73   : > { %1194 = vmatpush1.bf16.msra.mxu0 %v6487_v26  ;;  %1237 = vmatpush1.bf16.msra.mxu1 %v6490_v27  ;;  %v7784_v26 = vmov 1983009808  }
  0x74   : > { %1195 = vmatprep.subr.bf16.mxu0 %v6495_v28  ;;  %1238 = vmatprep.subr.bf16.mxu1 %v6498_v29  ;;  %v2175_v27 = vunpack.c.l.s4 %v7784_v26  ;;  %v6581_v28 = vld [vmem:[%s13891_s3 + $0x240] ss:$24 sps:$4 sm:$0xff]   ;;  %v8587_v26 = vld [vmem:[%s13891_s3 + $0x1f4] ss:$24 sps:$4 sm:$0xff]  }
  0x75   : > { %v6582_v29 = vld [vmem:[%s13891_s3 + $0x248] ss:$24 sps:$4 sm:$0xff]  }
  0x77   : > { %1196 = vmatpush1.bf16.msra.mxu0 %v6493_v30  ;;  %1239 = vmatpush1.bf16.msra.mxu1 %v6496_v31  ;;  %v6583_v30 = vld [vmem:[%s13891_s3 + $0x274] ss:$24 sps:$4 sm:$0xff]  }
  0x78   : > { %1197 = vmatprep.subr.bf16.mxu0 %v6501_v32  ;;  %1240 = vmatprep.subr.bf16.mxu1 %v6504_v33  ;;  %v6585_v31 = vld [vmem:[%s13891_s3 + $0x27c] ss:$24 sps:$4 sm:$0xff]   ;;  %v8333_v32 = vshrl.u32 %v393_v25, 7  ;;  %v2176_v33 = vunpack.c.0.s8 %v2175_v27  ;;  %v8580_v25 = vld [vmem:[%s13891_s3 + $0x4b0] ss:$24 sps:$4 sm:$0xff]  }
  0x79   : > { %v8592_v27 = vld [vmem:[%s13891_s3 + $0x4e4] ss:$24 sps:$4 sm:$0xff]  }
  0x7b   : > { %1198 = vmatpush1.bf16.msra.mxu0 %v6499_v34  ;;  %1241 = vmatpush1.bf16.msra.mxu1 %v6502_v35  ;;  %v8338_v34 = vld [vmem:[%s13891_s3 + $0x270] ss:$24 sps:$4 sm:$0xff]  }
  0x7c   : > { %2000 = vmatprep.subr.bf16.mxu0 %v6505_v36  ;;  %2041 = vmatprep.subr.bf16.mxu1 %v6507_v37  ;;  %v8343_v35 = vld [vmem:[%s13891_s3 + $0x278] ss:$24 sps:$4 sm:$0xff]   ;;  %v8348_v36 = vld [vmem:[%s13891_s3 + $0x2a4] ss:$24 sps:$4 sm:$0xff]  }
  0x7d   : > { %v8353_v37 = vld [vmem:[%s13891_s3 + $0x2ac] ss:$24 sps:$4 sm:$0xff]  }
  0x7e   : > { %1216 = vmatmul.mubr.bf16.vlgmr.msra.gmra.mrb[8].mxu0 %v8061_v6  ;;  %1259 = vmatmul.mubr.bf16.vlgmr.msra.gmra.mrb[8].mxu1 %v8061_v6  ;;  %v6551_v6 = vld [vmem:[%s13891_s3 + $0x150] ss:$24 sps:$4 sm:$0xff]  }
  0x7f   : > { %2001 = vmatpush1.bf16.msra.mxu0 %v6509_v38  ;;  %2042 = vmatpush1.bf16.msra.mxu1 %v6510_v39  ;;  %v8356_v38 = vsub.s32 %v2176_v33, %v8333_v32  ;;  %v8361_v39 = vld [vmem:[%s13891_s3 + $0x2a0] ss:$24 sps:$4 sm:$0xff]  }
  0x80   : > { %2002 = vmatprep.subr.bf16.mxu0 %v6511_v40  ;;  %2043 = vmatprep.subr.bf16.mxu1 %v6513_v41  ;;  %v8366_v40 = vld [vmem:[%s13891_s3 + $0x2a8] ss:$24 sps:$4 sm:$0xff]   ;;  %v8368_v41 = vld.sshfl [vmem:[#allocation3] sm:$0x33 pattern:$0x76325410] }
  0x81   : > { %2032 = vmatprep.mubr.bf16.mxu0 %v8227_v58  ;;  %2073 = vmatprep.mubr.bf16.mxu1 %v8227_v58  ;;  %14334 = vst [vmem:[#allocation6_spill] sm:$0xff] %v8356_v38  ;;  %v8623_v33 = vld [vmem:[%s13891_s3 + $0x220] ss:$24 sps:$4 sm:$0xff]  }
  0x82   : > { %v6709_v38 = vld [vmem:[%s13891_s3 + $0x340] ss:$24 sps:$4 sm:$0xff]  }
  0x83   : > { %2003 = vmatpush1.bf16.msra.mxu0 %v6515_v42  ;;  %2044 = vmatpush1.bf16.msra.mxu1 %v6516_v43  ;;  %v8375_v42 = vld [vmem:[%s13891_s3 + $0x2d4] ss:$24 sps:$4 sm:$0xff]  }
  0x84   : > { %2004 = vmatprep.subr.bf16.mxu0 %v6517_v44  ;;  %2045 = vmatprep.subr.bf16.mxu1 %v6519_v45  ;;  %v8382_v43 = vld [vmem:[%s13891_s3 + $0x2dc] ss:$24 sps:$4 sm:$0xff]   ;;  %v8387_v44 = vld [vmem:[%s13891_s3 + $0x2d0] ss:$24 sps:$4 sm:$0xff]  }
  0x85   : > { %v8394_v45 = vld [vmem:[%s13891_s3 + $0x2d8] ss:$24 sps:$4 sm:$0xff]  }
  0x87   : > { %2005 = vmatpush1.bf16.msra.mxu0 %v6521_v46  ;;  %2046 = vmatpush1.bf16.msra.mxu1 %v6522_v47  ;;  %v8399_v46 = vld [vmem:[%s13891_s3 + $0x14] ss:$24 sps:$4 sm:$0xff]   ;;  %v8406_v47 = vld [vmem:[%s13891_s3 + $0x304] ss:$24 sps:$4 sm:$0xff]  }
  0x88   : > { %2006 = vmatprep.subr.bf16.mxu0 %v6523_v48  ;;  %2047 = vmatprep.subr.bf16.mxu1 %v6525_v49  ;;  %v2181_v48 = vcombine.high %v8368_v41, %v8368_v41  ;;  %v8412_v49 = vpack.c.bf16 %v8213_v54, %v8213_v54 }
  0x8a   : > { %v8430_v54 = vpack.c.bf16 %v2181_v48, %v2181_v48  ;;  %v8628_v48 = vld [vmem:[%s13891_s3 + $0x510] ss:$24 sps:$4 sm:$0xff]  }
  0x8b   : > { %2007 = vmatpush1.bf16.msra.mxu0 %v6527_v50  ;;  %2048 = vmatpush1.bf16.msra.mxu1 %v6528_v51  ;;  %v6605_v50 = vld [vmem:[%s13891_s3 + $0x10] ss:$24 sps:$4 sm:$0xff]   ;;  %v6606_v51 = vld [vmem:[%s13891_s3 + $0x300] ss:$24 sps:$4 sm:$0xff]  }
  0x8c   : > { %2008 = vmatprep.subr.bf16.mxu0 %v6529_v52  ;;  %2049 = vmatprep.subr.bf16.mxu1 %v6531_v53  ;;  %v6607_v52 = vld [vmem:[%s13891_s3 + $0x44] ss:$24 sps:$4 sm:$0xff]   ;;  %v6609_v53 = vld [vmem:[%s13891_s3 + $0x334] ss:$24 sps:$4 sm:$0xff]  }
  0x8f   : > { %2009 = vmatpush1.bf16.msra.mxu0 %v6533_v56  ;;  %2050 = vmatpush1.bf16.msra.mxu1 %v6534_v57  ;;  %v6611_v56 = vld [vmem:[%s13891_s3 + $0x40] ss:$24 sps:$4 sm:$0xff]   ;;  %v6612_v57 = vld [vmem:[%s13891_s3 + $0x330] ss:$24 sps:$4 sm:$0xff]  }
  0x90   : > { %2010 = vmatprep.subr.bf16.mxu0 %v6535_v59  ;;  %2051 = vmatprep.subr.bf16.mxu1 %v6537_v60  ;;  %v6613_v59 = vld [vmem:[%s13891_s3 + $0x74] ss:$24 sps:$4 sm:$0xff]   ;;  %v6615_v60 = vld [vmem:[%s13891_s3 + $0x364] ss:$24 sps:$4 sm:$0xff]  }
  0x93   : > { %2011 = vmatpush1.bf16.msra.mxu0 %v6539_v61  ;;  %2052 = vmatpush1.bf16.msra.mxu1 %v6540_v62  ;;  %v6617_v61 = vld [vmem:[%s13891_s3 + $0x70] ss:$24 sps:$4 sm:$0xff]   ;;  %v6618_v62 = vld [vmem:[%s13891_s3 + $0x360] ss:$24 sps:$4 sm:$0xff]  }
  0x94   : > { %2012 = vmatprep.subr.bf16.mxu0 %v6541_v63  ;;  %2053 = vmatprep.subr.bf16.mxu1 %v6543_v0  ;;  %v6619_v63 = vld [vmem:[%s13891_s3 + $0xa4] ss:$24 sps:$4 sm:$0xff]   ;;  %v6623_v0 = vld [vmem:[%s13891_s3 + $0xa0] ss:$24 sps:$4 sm:$0xff]  }
  0x97   : > { %2013 = vmatpush1.bf16.msra.mxu0 %v6545_v1  ;;  %2054 = vmatpush1.bf16.msra.mxu1 %v6546_v2  ;;  %v6624_v1 = vld [vmem:[%s13891_s3 + $0x390] ss:$24 sps:$4 sm:$0xff]   ;;  %v6625_v2 = vld [vmem:[%s13891_s3 + $0xd4] ss:$24 sps:$4 sm:$0xff]  }
  0x98   : > { %2014 = vmatprep.subr.bf16.mxu0 %v6547_v4  ;;  %2055 = vmatprep.subr.bf16.mxu1 %v6549_v5  ;;  %v6627_v4 = vld [vmem:[%s13891_s3 + $0x3c4] ss:$24 sps:$4 sm:$0xff]   ;;  %v6629_v5 = vld [vmem:[%s13891_s3 + $0xd0] ss:$24 sps:$4 sm:$0xff]  }
  0x9b   : > { %2015 = vmatpush1.bf16.msra.mxu0 %v6551_v6  ;;  %2056 = vmatpush1.bf16.msra.mxu1 %v6552_v7  ;;  %v6630_v6 = vld [vmem:[%s13891_s3 + $0x3c0] ss:$24 sps:$4 sm:$0xff]   ;;  %v6631_v7 = vld [vmem:[%s13891_s3 + $0x104] ss:$24 sps:$4 sm:$0xff]  }
  0x9c   : > { %2016 = vmatprep.subr.bf16.mxu0 %v6553_v8  ;;  %2057 = vmatprep.subr.bf16.mxu1 %v6555_v9  ;;  %v6633_v8 = vld [vmem:[%s13891_s3 + $0x3f4] ss:$24 sps:$4 sm:$0xff]   ;;  %v6635_v9 = vld [vmem:[%s13891_s3 + $0x100] ss:$24 sps:$4 sm:$0xff]  }
  0x9f   : > { %2017 = vmatpush1.bf16.msra.mxu0 %v6557_v10  ;;  %2058 = vmatpush1.bf16.msra.mxu1 %v6558_v11  ;;  %v6636_v10 = vld [vmem:[%s13891_s3 + $0x3f0] ss:$24 sps:$4 sm:$0xff]   ;;  %v8493_v11 = vld [vmem:[%s13891_s3 + $0x134] ss:$24 sps:$4 sm:$0xff]  }
  0xa0   : > { %2018 = vmatprep.subr.bf16.mxu0 %v6559_v12  ;;  %2059 = vmatprep.subr.bf16.mxu1 %v6561_v13  ;;  %v8498_v12 = vld [vmem:[%s13891_s3 + $0x424] ss:$24 sps:$4 sm:$0xff]   ;;  %v8503_v13 = vld [vmem:[%s13891_s3 + $0x130] ss:$24 sps:$4 sm:$0xff]  }
  0xa3   : > { %2019 = vmatpush1.bf16.msra.mxu0 %v6563_v14  ;;  %2060 = vmatpush1.bf16.msra.mxu1 %v6564_v15  ;;  %v8508_v14 = vld [vmem:[%s13891_s3 + $0x420] ss:$24 sps:$4 sm:$0xff]   ;;  %v8513_v15 = vld [vmem:[%s13891_s3 + $0x164] ss:$24 sps:$4 sm:$0xff]  }
  0xa4   : > { %2020 = vmatprep.subr.bf16.mxu0 %v6565_v16  ;;  %2061 = vmatprep.subr.bf16.mxu1 %v6567_v17  ;;  %v8520_v16 = vld [vmem:[%s13891_s3 + $0x454] ss:$24 sps:$4 sm:$0xff]   ;;  %v8525_v17 = vld [vmem:[%s13891_s3 + $0x160] ss:$24 sps:$4 sm:$0xff]  }
  0xa7   : > { %2021 = vmatpush1.bf16.msra.mxu0 %v6569_v3  ;;  %2062 = vmatpush1.bf16.msra.mxu1 %v6570_v18  ;;  %v8532_v3 = vld [vmem:[%s13891_s3 + $0x450] ss:$24 sps:$4 sm:$0xff]   ;;  %v8539_v18 = vld [vmem:[%s13891_s3 + $0x194] ss:$24 sps:$4 sm:$0xff]  }
  0xa8   : > { %2022 = vmatprep.subr.bf16.mxu0 %v6571_v19  ;;  %2063 = vmatprep.subr.bf16.mxu1 %v6573_v20  ;;  %v8544_v19 = vld [vmem:[%s13891_s3 + $0x484] ss:$24 sps:$4 sm:$0xff]   ;;  %v8551_v20 = vld [vmem:[%s13891_s3 + $0x190] ss:$24 sps:$4 sm:$0xff]  }
  0xab   : > { %2023 = vmatpush1.bf16.msra.mxu0 %v6575_v21  ;;  %2064 = vmatpush1.bf16.msra.mxu1 %v6576_v22  ;;  %v8556_v21 = vld [vmem:[%s13891_s3 + $0x480] ss:$24 sps:$4 sm:$0xff]   ;;  %v8561_v22 = vld [vmem:[%s13891_s3 + $0x1c4] ss:$24 sps:$4 sm:$0xff]  }
  0xac   : > { %2024 = vmatprep.subr.bf16.mxu0 %v6577_v23  ;;  %2065 = vmatprep.subr.bf16.mxu1 %v6579_v24  ;;  %v8568_v23 = vld [vmem:[%s13891_s3 + $0x4b4] ss:$24 sps:$4 sm:$0xff]   ;;  %v8575_v24 = vld [vmem:[%s13891_s3 + $0x1c0] ss:$24 sps:$4 sm:$0xff]  }
  0xaf   : > { %2025 = vmatpush1.bf16.msra.mxu0 %v6581_v28  ;;  %2066 = vmatpush1.bf16.msra.mxu1 %v6582_v29  ;;  %v8599_v28 = vld [vmem:[%s13891_s3 + $0x1f0] ss:$24 sps:$4 sm:$0xff]   ;;  %v8604_v29 = vld [vmem:[%s13891_s3 + $0x4e0] ss:$24 sps:$4 sm:$0xff]  }
  0xb0   : > { %2026 = vmatprep.subr.bf16.mxu0 %v6583_v30  ;;  %2067 = vmatprep.subr.bf16.mxu1 %v6585_v31  ;;  %v8611_v30 = vld [vmem:[%s13891_s3 + $0x224] ss:$24 sps:$4 sm:$0xff]   ;;  %v8616_v31 = vld [vmem:[%s13891_s3 + $0x514] ss:$24 sps:$4 sm:$0xff]  }
  0xb3   : > { %2027 = vmatpush1.bf16.msra.mxu0 %v8338_v34  ;;  %2068 = vmatpush1.bf16.msra.mxu1 %v8343_v35 }
  0xb4   : > { %2028 = vmatprep.subr.bf16.mxu0 %v8348_v36  ;;  %2069 = vmatprep.subr.bf16.mxu1 %v8353_v37 }
  0xb7   : > { %2029 = vmatpush1.bf16.msra.mxu0 %v8361_v39  ;;  %2070 = vmatpush1.bf16.msra.mxu1 %v8366_v40 }
  0xb8   : > { %2030 = vmatprep.subr.bf16.mxu0 %v8375_v42  ;;  %2071 = vmatprep.subr.bf16.mxu1 %v8382_v43 }
  0xbb   : > { %2031 = vmatpush1.bf16.msra.mxu0 %v8387_v44  ;;  %2072 = vmatpush1.bf16.msra.mxu1 %v8394_v45 }
  0xbc   : > { %2082 = vmatprep.subr.bf16.mxu0 %v8399_v46  ;;  %2666 = vmatprep.subr.bf16.mxu1 %v8406_v47 }
  0xbe   : > { %2033 = vmatmul.mubr.bf16.vlgmr.msra.gmra.mrb[12].mxu0 %v8412_v49  ;;  %2074 = vmatmul.mubr.bf16.vlgmr.msra.gmra.mrb[12].mxu1 %v8412_v49 }
  0xbf   : > { %2083 = vmatpush1.bf16.msra.mxu0 %v6605_v50  ;;  %2667 = vmatpush1.bf16.msra.mxu1 %v6606_v51  ;;  %v8635_v50 = vld [vmem:[%s13891_s3 + $0x254] ss:$24 sps:$4 sm:$0xff]   ;;  %v8640_v51 = vld [vmem:[%s13891_s3 + $0x544] ss:$24 sps:$4 sm:$0xff]  }
  0xc0   : > { %2084 = vmatprep.subr.bf16.mxu0 %v6607_v52  ;;  %2668 = vmatprep.subr.bf16.mxu1 %v6609_v53  ;;  %v8647_v52 = vld [vmem:[%s13891_s3 + $0x250] ss:$24 sps:$4 sm:$0xff]   ;;  %v8652_v53 = vld [vmem:[%s13891_s3 + $0x540] ss:$24 sps:$4 sm:$0xff]  }
  0xc1   : > { %2114 = vmatprep.mubr.bf16.mxu0 %v8227_v58  ;;  %2698 = vmatprep.mubr.bf16.mxu1 %v8430_v54  ;;  %v6621_v58 = vld [vmem:[%s13891_s3 + $0x394] ss:$24 sps:$4 sm:$0xff]   ;;  %14335 = vst [vmem:[#allocation7_spill] sm:$0xff] %v8647_v52  ;;  %14336 = vst [vmem:[#allocation8_spill] sm:$0xff] %v8652_v53 }
  0xc3   : > { %2085 = vmatpush1.bf16.msra.mxu0 %v6611_v56  ;;  %2669 = vmatpush1.bf16.msra.mxu1 %v6612_v57  ;;  %v8659_v56 = vld [vmem:[%s13891_s3 + $0x284] ss:$24 sps:$4 sm:$0xff]   ;;  %v8664_v57 = vld [vmem:[%s13891_s3 + $0x574] ss:$24 sps:$4 sm:$0xff]  }
  0xc4   : > { %2086 = vmatprep.subr.bf16.mxu0 %v6613_v59  ;;  %2670 = vmatprep.subr.bf16.mxu1 %v6615_v60  ;;  %14337 = vst [vmem:[#allocation9_spill] sm:$0xff] %v8659_v56  ;;  %14338 = vst [vmem:[#allocation10_spill] sm:$0xff] %v8664_v57  ;;  %v8671_v59 = vld [vmem:[%s13891_s3 + $0x280] ss:$24 sps:$4 sm:$0xff]   ;;  %v8676_v60 = vld [vmem:[%s13891_s3 + $0x570] ss:$24 sps:$4 sm:$0xff]  }
  0xc5   : > { %14339 = vst [vmem:[#allocation11_spill] sm:$0xff] %v8671_v59  ;;  %14340 = vst [vmem:[#allocation12_spill] sm:$0xff] %v8676_v60 }
  0xc7   : > { %2087 = vmatpush1.bf16.msra.mxu0 %v6617_v61  ;;  %2671 = vmatpush1.bf16.msra.mxu1 %v6618_v62  ;;  %v8683_v61 = vld [vmem:[%s13891_s3 + $0x2b4] ss:$24 sps:$4 sm:$0xff]   ;;  %v8688_v62 = vld [vmem:[%s13891_s3 + $0x5a4] ss:$24 sps:$4 sm:$0xff]  }
  0xc8   : > { %2088 = vmatprep.subr.bf16.mxu0 %v6619_v63  ;;  %2672 = vmatprep.subr.bf16.mxu1 %v6621_v58  ;;  %14341 = vst [vmem:[#allocation13_spill] sm:$0xff] %v8683_v61  ;;  %14342 = vst [vmem:[#allocation14_spill] sm:$0xff] %v8688_v62  ;;  %v8695_v63 = vld [vmem:[%s13891_s3 + $0x2b0] ss:$24 sps:$4 sm:$0xff]   ;;  %v8700_v58 = vld [vmem:[%s13891_s3 + $0x5a0] ss:$24 sps:$4 sm:$0xff]  }
  0xc9   : > { %14343 = vst [vmem:[#allocation15_spill] sm:$0xff] %v8695_v63  ;;  %14344 = vst [vmem:[#allocation16_spill] sm:$0xff] %v8700_v58 }
  0xcb   : > { %2089 = vmatpush1.bf16.msra.mxu0 %v6623_v0  ;;  %2673 = vmatpush1.bf16.msra.mxu1 %v6624_v1  ;;  %v8707_v0 = vld [vmem:[%s13891_s3 + $0x2e4] ss:$24 sps:$4 sm:$0xff]   ;;  %v8712_v1 = vld [vmem:[%s13891_s3 + $0x5d4] ss:$24 sps:$4 sm:$0xff]  }
  0xcc   : > { %2090 = vmatprep.subr.bf16.mxu0 %v6625_v2  ;;  %2674 = vmatprep.subr.bf16.mxu1 %v6627_v4  ;;  %14345 = vst [vmem:[#allocation17_spill] sm:$0xff] %v8707_v0  ;;  %14346 = vst [vmem:[#allocation18_spill] sm:$0xff] %v8712_v1  ;;  %v8719_v2 = vld [vmem:[%s13891_s3 + $0x2e0] ss:$24 sps:$4 sm:$0xff]   ;;  %v8724_v4 = vld [vmem:[%s13891_s3 + $0x5d0] ss:$24 sps:$4 sm:$0xff]  }
  0xcd   : > { %14347 = vst [vmem:[#allocation19_spill] sm:$0xff] %v8719_v2  ;;  %14348 = vst [vmem:[#allocation20_spill] sm:$0xff] %v8724_v4 }
  0xcf   : > { %2091 = vmatpush1.bf16.msra.mxu0 %v6629_v5  ;;  %2675 = vmatpush1.bf16.msra.mxu1 %v6630_v6  ;;  %v8731_v5 = vld [vmem:[%s13891_s3 + $0x30c] ss:$24 sps:$4 sm:$0xff]  }
  0xd0   : > { %2092 = vmatprep.subr.bf16.mxu0 %v6631_v7  ;;  %2676 = vmatprep.subr.bf16.mxu1 %v6633_v8  ;;  %14349 = vst [vmem:[#allocation21_spill] sm:$0xff] %v8731_v5  ;;  %v8736_v6 = vld [vmem:[%s13891_s3 + $0x314] ss:$24 sps:$4 sm:$0xff]   ;;  %v8740_v7 = vpack.c.bf16 %v8368_v41, %v8368_v41  ;;  %v8747_v8 = vld [vmem:[%s13891_s3 + $0x308] ss:$24 sps:$4 sm:$0xff]  }
  0xd1   : > { %14350 = vst [vmem:[#allocation22_spill] sm:$0xff] %v8736_v6  ;;  %14351 = vst [vmem:[#allocation23_spill] sm:$0xff] %v8747_v8  ;;  %v8757_v41 = vld [vmem:[%s13891_s3 + $0x33c] ss:$24 sps:$4 sm:$0xff]  }
  0xd2   : > { %14352 = vst [vmem:[#allocation24_spill] sm:$0xff] %v8757_v41 }
  0xd3   : > { %2093 = vmatpush1.bf16.msra.mxu0 %v6635_v9  ;;  %2677 = vmatpush1.bf16.msra.mxu1 %v6636_v10  ;;  %v6703_v9 = vld [vmem:[%s13891_s3 + $0x310] ss:$24 sps:$4 sm:$0xff]   ;;  %v6706_v10 = vld [vmem:[%s13891_s3 + $0x344] ss:$24 sps:$4 sm:$0xff]  }
  0xd4   : > { %2094 = vmatprep.subr.bf16.mxu0 %v8493_v11  ;;  %2678 = vmatprep.subr.bf16.mxu1 %v8498_v12 }
  0xd7   : > { %2095 = vmatpush1.bf16.msra.mxu0 %v8503_v13  ;;  %2679 = vmatpush1.bf16.msra.mxu1 %v8508_v14 }
  0xd8   : > { %2096 = vmatprep.subr.bf16.mxu0 %v8513_v15  ;;  %2680 = vmatprep.subr.bf16.mxu1 %v8520_v16 }
  0xdb   : > { %2097 = vmatpush1.bf16.msra.mxu0 %v8525_v17  ;;  %2681 = vmatpush1.bf16.msra.mxu1 %v8532_v3 }
  0xdc   : > { %2098 = vmatprep.subr.bf16.mxu0 %v8539_v18  ;;  %2682 = vmatprep.subr.bf16.mxu1 %v8544_v19 }
  0xdf   : > { %2099 = vmatpush1.bf16.msra.mxu0 %v8551_v20  ;;  %2683 = vmatpush1.bf16.msra.mxu1 %v8556_v21 }
  0xe0   : > { %2100 = vmatprep.subr.bf16.mxu0 %v8561_v22  ;;  %2684 = vmatprep.subr.bf16.mxu1 %v8568_v23 }
  0xe3   : > { %2101 = vmatpush1.bf16.msra.mxu0 %v8575_v24  ;;  %2685 = vmatpush1.bf16.msra.mxu1 %v8580_v25 }
  0xe4   : > { %2102 = vmatprep.subr.bf16.mxu0 %v8587_v26  ;;  %2686 = vmatprep.subr.bf16.mxu1 %v8592_v27 }
  0xe7   : > { %2103 = vmatpush1.bf16.msra.mxu0 %v8599_v28  ;;  %2687 = vmatpush1.bf16.msra.mxu1 %v8604_v29 }
  0xe8   : > { %2104 = vmatprep.subr.bf16.mxu0 %v8611_v30  ;;  %2688 = vmatprep.subr.bf16.mxu1 %v8616_v31 }
  0xeb   : > { %2105 = vmatpush1.bf16.msra.mxu0 %v8623_v33  ;;  %2689 = vmatpush1.bf16.msra.mxu1 %v8628_v48 }
  0xec   : > { %2106 = vmatprep.subr.bf16.mxu0 %v8635_v50  ;;  %2690 = vmatprep.subr.bf16.mxu1 %v8640_v51 }
  0xef   : > { %2107 = vmatpush1.bf16.msra.mxu0 %v8647_v52  ;;  %2691 = vmatpush1.bf16.msra.mxu1 %v8652_v53  ;;  %v8908_v53 = vld [vmem:[%s13891_s3 + $0x430] ss:$24 sps:$4 sm:$0xff]  }
  0xf0   : > { %2108 = vmatprep.subr.bf16.mxu0 %v8659_v56  ;;  %2692 = vmatprep.subr.bf16.mxu1 %v8664_v57  ;;  %14373 = vst [vmem:[#allocation43_spill] sm:$0xff] %v8908_v53 }
  0xf3   : > { %2109 = vmatpush1.bf16.msra.mxu0 %v8671_v59  ;;  %2693 = vmatpush1.bf16.msra.mxu1 %v8676_v60 }
  0xf4   : > { %2110 = vmatprep.subr.bf16.mxu0 %v8683_v61  ;;  %2694 = vmatprep.subr.bf16.mxu1 %v8688_v62 }
  0xf7   : > { %2111 = vmatpush1.bf16.msra.mxu0 %v8695_v63  ;;  %2695 = vmatpush1.bf16.msra.mxu1 %v8700_v58  ;;  %v8881_v58 = vld [vmem:[%s13891_s3 + $0x400] ss:$24 sps:$4 sm:$0xff]  }
  0xf8   : > { %2112 = vmatprep.subr.bf16.mxu0 %v8707_v0  ;;  %2696 = vmatprep.subr.bf16.mxu1 %v8712_v1  ;;  %14368 = vst [vmem:[#allocation39_spill] sm:$0xff] %v8881_v58  ;;  %v14369_v0 = vsub.s32 3, %v8333_v32 }
  0xfb   : > { %2113 = vmatpush1.bf16.msra.mxu0 %v8719_v2  ;;  %2697 = vmatpush1.bf16.msra.mxu1 %v8724_v4  ;;  %v8840_v4 = vld [vmem:[%s13891_s3 + $0x3c8] ss:$24 sps:$4 sm:$0xff]   ;;  %v14366_v2 = vsub.s32 2, %v8333_v32 }
  0xfc   : > { %2707 = vmatprep.subr.bf16.mxu0 %v8731_v5  ;;  %2748 = vmatprep.subr.bf16.mxu1 %v8736_v6  ;;  %v8768_v6 = vld [vmem:[%s13891_s3 + $0x338] ss:$24 sps:$4 sm:$0xff]   ;;  %14362 = vst [vmem:[#allocation34_spill] sm:$0xff] %v8840_v4 }
  0xfd   : > { %14353 = vst [vmem:[#allocation25_spill] sm:$0xff] %v8768_v6  ;;  %v8845_v5 = vld [vmem:[%s13891_s3 + $0x3d0] ss:$24 sps:$4 sm:$0xff]  }
  0xfe   : > { %2115 = vmatmul.mubr.bf16.vlgmr.msra.gmra.mrb[16].mxu0 %v8412_v49  ;;  %2699 = vmatmul.mubr.bf16.vlgmr.msra.gmra.mrb[16].mxu1 %v8740_v7  ;;  %v8777_v49 = vld [vmem:[%s13891_s3 + $0x36c] ss:$24 sps:$4 sm:$0xff]   ;;  %14363 = vst [vmem:[#allocation35_spill] sm:$0xff] %v8845_v5 }
  0xff   : > { %2708 = vmatpush1.bf16.msra.mxu0 %v8747_v8  ;;  %2749 = vmatpush1.bf16.msra.mxu1 %v6703_v9  ;;  %14354 = vst [vmem:[#allocation26_spill] sm:$0xff] %v8777_v49  ;;  %v6712_v9 = vld [vmem:[%s13891_s3 + $0x374] ss:$24 sps:$4 sm:$0xff]  }
 0x100   : > { %2709 = vmatprep.subr.bf16.mxu0 %v8757_v41  ;;  %2750 = vmatprep.subr.bf16.mxu1 %v6706_v10  ;;  %v8788_v10 = vld [vmem:[%s13891_s3 + $0x368] ss:$24 sps:$4 sm:$0xff]   ;;  %v8797_v8 = vld [vmem:[%s13891_s3 + $0x39c] ss:$24 sps:$4 sm:$0xff]  }
 0x101   : > { %2739 = vmatprep.mubr.bf16.mxu0 %v8430_v54  ;;  %2780 = vmatprep.mubr.bf16.mxu1 %v8430_v54  ;;  %14355 = vst [vmem:[#allocation27_spill] sm:$0xff] %v8788_v10  ;;  %v6715_v41 = vld [vmem:[%s13891_s3 + $0x370] ss:$24 sps:$4 sm:$0xff]   ;;  %14356 = vst [vmem:[#allocation28_spill] sm:$0xff] %v8797_v8 }
 0x102   : > { %v8808_v54 = vld [vmem:[%s13891_s3 + $0x398] ss:$24 sps:$4 sm:$0xff]  }
 0x103   : > { %2710 = vmatpush1.bf16.msra.mxu0 %v8768_v6  ;;  %2751 = vmatpush1.bf16.msra.mxu1 %v6709_v38  ;;  %v8802_v38 = vld [vmem:[%s13891_s3 + $0x3a4] ss:$24 sps:$4 sm:$0xff]   ;;  %14358 = vst [vmem:[#allocation30_spill] sm:$0xff] %v8808_v54  ;;  %v8831_v6 = vsub.s32 1, %v8333_v32 }
 0x104   : > { %2711 = vmatprep.subr.bf16.mxu0 %v8777_v49  ;;  %2752 = vmatprep.subr.bf16.mxu1 %v6712_v9  ;;  %14357 = vst [vmem:[#allocation29_spill] sm:$0xff] %v8802_v38  ;;  %v8813_v9 = vld [vmem:[%s13891_s3 + $0x3a0] ss:$24 sps:$4 sm:$0xff]   ;;  %v8820_v49 = vld [vmem:[%s13891_s3 + $0x3cc] ss:$24 sps:$4 sm:$0xff]  }
 0x105   : > { %14359 = vst [vmem:[#allocation31_spill] sm:$0xff] %v8813_v9  ;;  %14360 = vst [vmem:[#allocation32_spill] sm:$0xff] %v8820_v49 }
 0x107   : > { %2712 = vmatpush1.bf16.msra.mxu0 %v8788_v10  ;;  %2753 = vmatpush1.bf16.msra.mxu1 %v6715_v41  ;;  %v8825_v41 = vld [vmem:[%s13891_s3 + $0x3d4] ss:$24 sps:$4 sm:$0xff]   ;;  %v8828_v10 = vsub.s32 0, %v8333_v32 }
 0x108   : > { %2713 = vmatprep.subr.bf16.mxu0 %v8797_v8  ;;  %2754 = vmatprep.subr.bf16.mxu1 %v8802_v38  ;;  %14361 = vst [vmem:[#allocation33_spill] sm:$0xff] %v8825_v41  ;;  %v8850_v8 = vld [vmem:[%s13892_s4] sm:$0x3f]  ;;  %v8857_v38 = vld [vmem:[%s13891_s3 + $0x3fc] ss:$24 sps:$4 sm:$0xff]  }
 0x109   : > { %14364 = vst [vmem:[#allocation36_spill] sm:$0xff] %v8857_v38  ;;  %v404_v1 = vrot.slane %v8850_v8, %v14366_v2  ;;  %v408_v2 = vrot.slane %v8850_v8, %v14369_v0 }
 0x10b   : > { %2714 = vmatpush1.bf16.msra.mxu0 %v8808_v54  ;;  %2755 = vmatpush1.bf16.msra.mxu1 %v8813_v9  ;;  %v8862_v9 = vld [vmem:[%s13891_s3 + $0x404] ss:$24 sps:$4 sm:$0xff]   ;;  %v396_v54 = vrot.slane %v8850_v8, %v8828_v10 }
 0x10c   : > { %2715 = vmatprep.subr.bf16.mxu0 %v8820_v49  ;;  %2756 = vmatprep.subr.bf16.mxu1 %v8825_v41  ;;  %14365 = vst [vmem:[#allocation37_spill] sm:$0xff] %v8862_v9  ;;  %v400_v41 = vrot.slane %v8850_v8, %v8831_v6  ;;  %v8876_v49 = vld [vmem:[%s13891_s3 + $0x3f8] ss:$24 sps:$4 sm:$0xff]  }
 0x10d   : > { %14367 = vst [vmem:[#allocation38_spill] sm:$0xff] %v8876_v49 }
 0x10f   : > { %2716 = vmatpush1.bf16.msra.mxu0 %v8840_v4  ;;  %2757 = vmatpush1.bf16.msra.mxu1 %v8845_v5  ;;  %v8891_v5 = vld [vmem:[%s13891_s3 + $0x42c] ss:$24 sps:$4 sm:$0xff]  }
 0x110   : > { %2717 = vmatprep.subr.bf16.mxu0 %v8857_v38  ;;  %2758 = vmatprep.subr.bf16.mxu1 %v8862_v9  ;;  %14370 = vst [vmem:[#allocation40_spill] sm:$0xff] %v8891_v5  ;;  %v8896_v4 = vld [vmem:[%s13891_s3 + $0x434] ss:$24 sps:$4 sm:$0xff]   ;;  %v8903_v9 = vld [vmem:[%s13891_s3 + $0x428] ss:$24 sps:$4 sm:$0xff]  }
 0x111   : > { %14371 = vst [vmem:[#allocation41_spill] sm:$0xff] %v8896_v4  ;;  %v703_v63 = vpop.f32.mrb[0].mxu0  ;;  %v746_v62 = vpop.f32.mrb[0].mxu1  ;;  %14372 = vst [vmem:[#allocation42_spill] sm:$0xff] %v8903_v9 }
 0x112   : > { %v704_v60 = vadd.f32 %v703_v63, %v396_v54  ;;  %v705_v61 = vpop.f32.mrb[1].mxu0  ;;  %v747_v59 = vadd.f32 %v746_v62, %v404_v1  ;;  %v748_v0 = vpop.f32.mrb[1].mxu1 }
 0x113   : > { %v706_v57 = vadd.f32 %v705_v61, %v400_v41  ;;  %v707_v38 = vpop.f32.mrb[2].mxu0  ;;  %2718 = vmatpush1.bf16.msra.mxu0 %v8876_v49  ;;  %2759 = vmatpush1.bf16.msra.mxu1 %v8881_v58  ;;  %v749_v63 = vadd.f32 %v748_v0, %v408_v2  ;;  %v750_v56 = vpop.f32.mrb[2].mxu1  ;;  %v8915_v58 = vld [vmem:[%s13891_s3 + $0x45c] ss:$24 sps:$4 sm:$0xff]  }
 0x114   : > { %798 = vst [vmem:[#allocation4] sm:$0xff] %v704_v60  ;;  %v708_v62 = vadd.f32 %v707_v38, %v396_v54  ;;  %v709_v61 = vpop.f32.mrb[3].mxu0  ;;  %2719 = vmatprep.subr.bf16.mxu0 %v8891_v5  ;;  %2760 = vmatprep.subr.bf16.mxu1 %v8896_v4  ;;  %14374 = vst [vmem:[#allocation44_spill] sm:$0xff] %v8915_v58  ;;  %v8920_v49 = vld [vmem:[%s13891_s3 + $0x464] ss:$24 sps:$4 sm:$0xff]   ;;  %v751_v0 = vadd.f32 %v750_v56, %v404_v1  ;;  %v752_v52 = vpop.f32.mrb[3].mxu1 }
 0x115   : > { %14375 = vst [vmem:[#allocation45_spill] sm:$0xff] %v8920_v49  ;;  %800 = vst [vmem:[#allocation4 + $0x10] sm:$0xff] %v747_v59  ;;  %v710_v60 = vadd.f32 %v709_v61, %v400_v41  ;;  %v753_v38 = vadd.f32 %v752_v52, %v408_v2  ;;  %v8927_v54 = vld [vmem:[%s13891_s3 + $0x458] ss:$24 sps:$4 sm:$0xff]   ;;  %v8939_v52 = vld [vmem:[%s13891_s3 + $0x48c] ss:$24 sps:$4 sm:$0xff]  }
 0x116   : > { %799 = vst [vmem:[#allocation4 + $0x8] sm:$0xff] %v706_v57  ;;  %801 = vst [vmem:[#allocation4 + $0x18] sm:$0xff] %v749_v63  ;;  %v8932_v56 = vld [vmem:[%s13891_s3 + $0x460] ss:$24 sps:$4 sm:$0xff]   ;;  %v8944_v57 = vld [vmem:[%s13891_s3 + $0x494] ss:$24 sps:$4 sm:$0xff]  }
 0x117   : > { %804 = vst [vmem:[#allocation4 + $0x30] sm:$0xff] %v708_v62  ;;  %806 = vst [vmem:[#allocation4 + $0x40] sm:$0xff] %v751_v0  ;;  %2720 = vmatpush1.bf16.msra.mxu0 %v8903_v9  ;;  %2761 = vmatpush1.bf16.msra.mxu1 %v8908_v53  ;;  %v8951_v59 = vld [vmem:[%s13891_s3 + $0x488] ss:$24 sps:$4 sm:$0xff]   ;;  %v8963_v41 = vld [vmem:[%s13891_s3 + $0x4bc] ss:$24 sps:$4 sm:$0xff]  }
 0x118   : > { %805 = vst [vmem:[#allocation4 + $0x38] sm:$0xff] %v710_v60  ;;  %14376 = vst [vmem:[#allocation46_spill] sm:$0xff] %v8927_v54  ;;  %2721 = vmatprep.subr.bf16.mxu0 %v8915_v58  ;;  %2762 = vmatprep.subr.bf16.mxu1 %v8920_v49  ;;  %v8956_v1 = vld [vmem:[%s13891_s3 + $0x490] ss:$24 sps:$4 sm:$0xff]   ;;  %v8968_v2 = vld [vmem:[%s13891_s3 + $0x4c4] ss:$24 sps:$4 sm:$0xff]  }
 0x119   : > { %14377 = vst [vmem:[#allocation47_spill] sm:$0xff] %v8932_v56  ;;  %807 = vst [vmem:[#allocation4 + $0x48] sm:$0xff] %v753_v38  ;;  %v8975_v63 = vld [vmem:[%s13891_s3 + $0x4b8] ss:$24 sps:$4 sm:$0xff]   ;;  %v8987_v61 = vld [vmem:[%s13891_s3 + $0x4ec] ss:$24 sps:$4 sm:$0xff]  }
 0x11a   : > { %14378 = vst [vmem:[#allocation48_spill] sm:$0xff] %v8939_v52  ;;  %14379 = vst [vmem:[#allocation49_spill] sm:$0xff] %v8944_v57  ;;  %v8980_v62 = vld [vmem:[%s13891_s3 + $0x4c0] ss:$24 sps:$4 sm:$0xff]   ;;  %v8992_v0 = vld [vmem:[%s13891_s3 + $0x4f4] ss:$24 sps:$4 sm:$0xff]  }
 0x11b   : > { %2722 = vmatpush1.bf16.msra.mxu0 %v8927_v54  ;;  %2763 = vmatpush1.bf16.msra.mxu1 %v8932_v56  ;;  %14380 = vst [vmem:[#allocation50_spill] sm:$0xff] %v8951_v59  ;;  %14381 = vst [vmem:[#allocation51_spill] sm:$0xff] %v8956_v1  ;;  %v8999_v60 = vld [vmem:[%s13891_s3 + $0x4e8] ss:$24 sps:$4 sm:$0xff]   ;;  %v9066_v49 = vld [vmem:[%s13891_s3 + $0x57c] ss:$24 sps:$4 sm:$0xff]  }
 0x11c   : > { %2723 = vmatprep.subr.bf16.mxu0 %v8939_v52  ;;  %2764 = vmatprep.subr.bf16.mxu1 %v8944_v57  ;;  %14382 = vst [vmem:[#allocation52_spill] sm:$0xff] %v8963_v41  ;;  %14383 = vst [vmem:[#allocation53_spill] sm:$0xff] %v8968_v2  ;;  %v9004_v38 = vld [vmem:[%s13891_s3 + $0x4f0] ss:$24 sps:$4 sm:$0xff]   ;;  %v9035_v57 = vld [vmem:[%s13891_s3 + $0x54c] ss:$24 sps:$4 sm:$0xff]  }
 0x11d   : > { %14384 = vst [vmem:[#allocation54_spill] sm:$0xff] %v8975_v63  ;;  %14385 = vst [vmem:[#allocation55_spill] sm:$0xff] %v8980_v62  ;;  %v9059_v56 = vld [vmem:[%s13892_s4 + $0x6] sm:$0x3f]  ;;  %v9086_v4 = vld [vmem:[%s13891_s3 + $0x578] ss:$24 sps:$4 sm:$0xff]  }
 0x11e   : > { %14386 = vst [vmem:[#allocation56_spill] sm:$0xff] %v8987_v61  ;;  %14387 = vst [vmem:[#allocation57_spill] sm:$0xff] %v8992_v0  ;;  %v9117_v58 = vld [vmem:[%s13891_s3 + $0x5b0] ss:$24 sps:$4 sm:$0xff]  }
 0x11f   : > { %2724 = vmatpush1.bf16.msra.mxu0 %v8951_v59  ;;  %2765 = vmatpush1.bf16.msra.mxu1 %v8956_v1  ;;  %14388 = vst [vmem:[#allocation58_spill] sm:$0xff] %v8999_v60  ;;  %14389 = vst [vmem:[#allocation59_spill] sm:$0xff] %v9004_v38  ;;  %v9023_v1 = vld [vmem:[%s13891_s3 + $0x518] ss:$24 sps:$4 sm:$0xff]  }
 0x120   : > { %2725 = vmatprep.subr.bf16.mxu0 %v8963_v41  ;;  %2766 = vmatprep.subr.bf16.mxu1 %v8968_v2  ;;  %v9011_v2 = vld [vmem:[%s13891_s3 + $0x51c] ss:$24 sps:$4 sm:$0xff]   ;;  %14392 = vst [vmem:[#allocation62_spill] sm:$0xff] %v9023_v1  ;;  %14394 = vst [vmem:[#allocation64_spill] sm:$0xff] %v9035_v57 }
 0x121   : > { %14390 = vst [vmem:[#allocation60_spill] sm:$0xff] %v9011_v2  ;;  %14398 = vst [vmem:[#allocation68_spill] sm:$0xff] %v9066_v49 }
 0x122   : > { %14402 = vst [vmem:[#allocation70_spill] sm:$0xff] %v9086_v4  ;;  %14405 = vst [vmem:[#allocation73_spill] sm:$0xff] %v9117_v58 }
 0x123   : > { %2726 = vmatpush1.bf16.msra.mxu0 %v8975_v63  ;;  %2767 = vmatpush1.bf16.msra.mxu1 %v8980_v62  ;;  %v9016_v62 = vld [vmem:[%s13891_s3 + $0x524] ss:$24 sps:$4 sm:$0xff]  }
 0x124   : > { %2727 = vmatprep.subr.bf16.mxu0 %v8987_v61  ;;  %2768 = vmatprep.subr.bf16.mxu1 %v8992_v0  ;;  %14391 = vst [vmem:[#allocation61_spill] sm:$0xff] %v9016_v62  ;;  %v9028_v0 = vld [vmem:[%s13891_s3 + $0x520] ss:$24 sps:$4 sm:$0xff]   ;;  %v871_v61 = vrot.slane %v9059_v56, %v8831_v6 }
 0x125   : > { %14393 = vst [vmem:[#allocation63_spill] sm:$0xff] %v9028_v0 }
 0x127   : > { %2728 = vmatpush1.bf16.msra.mxu0 %v8999_v60  ;;  %2769 = vmatpush1.bf16.msra.mxu1 %v9004_v38  ;;  %v9040_v38 = vld [vmem:[%s13891_s3 + $0x554] ss:$24 sps:$4 sm:$0xff]   ;;  %v867_v60 = vrot.slane %v9059_v56, %v8828_v10 }
 0x128   : > { %2729 = vmatprep.subr.bf16.mxu0 %v9011_v2  ;;  %2770 = vmatprep.subr.bf16.mxu1 %v9016_v62  ;;  %14395 = vst [vmem:[#allocation65_spill] sm:$0xff] %v9040_v38  ;;  %v9049_v62 = vld [vmem:[%s13891_s3 + $0x548] ss:$24 sps:$4 sm:$0xff]  }
 0x129   : > { %14396 = vst [vmem:[#allocation66_spill] sm:$0xff] %v9049_v62  ;;  %v9054_v2 = vld [vmem:[%s13891_s3 + $0x550] ss:$24 sps:$4 sm:$0xff]  }
 0x12a   : > { %14397 = vst [vmem:[#allocation67_spill] sm:$0xff] %v9054_v2 }
 0x12b   : > { %2730 = vmatpush1.bf16.msra.mxu0 %v9023_v1  ;;  %2771 = vmatpush1.bf16.msra.mxu1 %v9028_v0  ;;  %v9071_v0 = vld [vmem:[%s13891_s3 + $0x584] ss:$24 sps:$4 sm:$0xff]   ;;  %v14400_v1 = vsub.s32 4, %v8333_v32 }
 0x12c   : > { %2731 = vmatprep.subr.bf16.mxu0 %v9035_v57  ;;  %2772 = vmatprep.subr.bf16.mxu1 %v9040_v38  ;;  %14399 = vst [vmem:[#allocation69_spill] sm:$0xff] %v9071_v0  ;;  %v14401_v38 = vsub.s32 5, %v8333_v32 }
 0x12d   : > { %v412_v53 = vrot.slane %v8850_v8, %v14400_v1  ;;  %v9091_v1 = vld [vmem:[%s13891_s3 + $0x580] ss:$24 sps:$4 sm:$0xff]  }
 0x12e   : > { %v416_v57 = vrot.slane %v8850_v8, %v14401_v38  ;;  %14403 = vst [vmem:[#allocation71_spill] sm:$0xff] %v9091_v1  ;;  %v9100_v8 = vld [vmem:[%s13891_s3 + $0x5ac] ss:$24 sps:$4 sm:$0xff]  }
 0x12f   : > { %2732 = vmatpush1.bf16.msra.mxu0 %v9049_v62  ;;  %2773 = vmatpush1.bf16.msra.mxu1 %v9054_v2  ;;  %v9105_v38 = vld [vmem:[%s13891_s3 + $0x5b4] ss:$24 sps:$4 sm:$0xff]  }
 0x130   : > { %2733 = vmatprep.subr.bf16.mxu0 %v9066_v49  ;;  %2774 = vmatprep.subr.bf16.mxu1 %v9071_v0  ;;  %14404 = vst [vmem:[#allocation72_spill] sm:$0xff] %v9105_v38  ;;  %v9112_v0 = vld [vmem:[%s13891_s3 + $0x5a8] ss:$24 sps:$4 sm:$0xff]  }
 0x131   : > { %v789_v2 = vpop.f32.mrb[4].mxu0  ;;  %v1174_v62 = vpop.f32.mrb[4].mxu1 }
 0x132   : > { %v790_v63 = vadd.f32 %v789_v2, %v412_v53  ;;  %v791_v41 = vpop.f32.mrb[5].mxu0  ;;  %v1175_v59 = vadd.f32 %v1174_v62, %v867_v60  ;;  %v1176_v52 = vpop.f32.mrb[5].mxu1 }
 0x133   : > { %v792_v54 = vadd.f32 %v791_v41, %v416_v57  ;;  %v793_v49 = vpop.f32.mrb[6].mxu0  ;;  %2734 = vmatpush1.bf16.msra.mxu0 %v9086_v4  ;;  %2775 = vmatpush1.bf16.msra.mxu1 %v9091_v1  ;;  %v1177_v2 = vadd.f32 %v1176_v52, %v871_v61  ;;  %v1178_v9 = vpop.f32.mrb[6].mxu1  ;;  %v9124_v1 = vld [vmem:[%s13891_s3 + $0x5dc] ss:$24 sps:$4 sm:$0xff]  }
 0x134   : > { %802 = vst [vmem:[#allocation4 + $0x20] sm:$0xff] %v790_v63  ;;  %v794_v62 = vadd.f32 %v793_v49, %v412_v53  ;;  %v795_v41 = vpop.f32.mrb[7].mxu0  ;;  %2735 = vmatprep.subr.bf16.mxu0 %v9100_v8  ;;  %2776 = vmatprep.subr.bf16.mxu1 %v9105_v38  ;;  %v9129_v4 = vld [vmem:[%s13891_s3 + $0x5e4] ss:$24 sps:$4 sm:$0xff]   ;;  %1269 = vst [vmem:[#allocation5] sm:$0xff] %v1175_v59  ;;  %v1179_v52 = vadd.f32 %v1178_v9, %v867_v60  ;;  %v1180_v5 = vpop.f32.mrb[7].mxu1 }
 0x135   : > { %14406 = vst [vmem:[#allocation74_spill] sm:$0xff] %v9129_v4  ;;  %803 = vst [vmem:[#allocation4 + $0x28] sm:$0xff] %v792_v54  ;;  %v796_v53 = vadd.f32 %v795_v41, %v416_v57  ;;  %v1181_v49 = vadd.f32 %v1180_v5, %v871_v61  ;;  %v9136_v63 = vld [vmem:[%s13891_s3 + $0x5d8] ss:$24 sps:$4 sm:$0xff]   ;;  %v9150_v5 = vld [vmem:[%s13891_s3 + $0x4] ss:$24 sps:$4 sm:$0xff]  }
 0x136   : > { %1270 = vst [vmem:[#allocation5 + $0x8] sm:$0xff] %v1177_v2  ;;  %808 = vst [vmem:[#allocation4 + $0x50] sm:$0xff] %v794_v62  ;;  %v9141_v9 = vld [vmem:[%s13891_s3 + $0x5e0] ss:$24 sps:$4 sm:$0xff]   ;;  %v9156_v54 = vld [vmem:[%s13891_s3 + $0xc] ss:$24 sps:$4 sm:$0xff]  }
 0x137   : > { %1275 = vst [vmem:[#allocation5 + $0x30] sm:$0xff] %v1179_v52  ;;  %809 = vst [vmem:[#allocation4 + $0x58] sm:$0xff] %v796_v53  ;;  %2736 = vmatpush1.bf16.msra.mxu0 %v9112_v0  ;;  %2777 = vmatpush1.bf16.msra.mxu1 %v9117_v58  ;;  %v9164_v57 = vld [vmem:[%s13891_s3] ss:$24 sps:$4 sm:$0xff]   ;;  %v9176_v61 = vld [vmem:[%s13891_s3 + $0x34] ss:$24 sps:$4 sm:$0xff]  }
 0x138   : > { %14407 = vst [vmem:[#allocation75_spill] sm:$0xff] %v9141_v9  ;;  %1276 = vst [vmem:[#allocation5 + $0x38] sm:$0xff] %v1181_v49  ;;  %2737 = vmatprep.subr.bf16.mxu0 %v9124_v1  ;;  %2778 = vmatprep.subr.bf16.mxu1 %v9129_v4  ;;  %v9170_v59 = vld [vmem:[%s13891_s3 + $0x8] ss:$24 sps:$4 sm:$0xff]   ;;  %v9194_v2 = vld [vmem:[%s13891_s3 + $0x38] ss:$24 sps:$4 sm:$0xff]  }
 0x139   : > { %14408 = vst [vmem:[#allocation76_spill] sm:$0xff] %v9156_v54  ;;  %14409 = vst [vmem:[#allocation77_spill] sm:$0xff] %v9170_v59  ;;  %v9188_v60 = vld [vmem:[%s13891_s3 + $0x30] ss:$24 sps:$4 sm:$0xff]   ;;  %v9200_v62 = vld [vmem:[%s13891_s3 + $0x64] ss:$24 sps:$4 sm:$0xff]  }
 0x13a   : > { %14410 = vst [vmem:[#allocation78_spill] sm:$0xff] %v9176_v61  ;;  %14412 = vst [vmem:[#allocation80_spill] sm:$0xff] %v9188_v60  ;;  %v9206_v41 = vld [vmem:[%s13891_s3 + $0x6c] ss:$24 sps:$4 sm:$0xff]   ;;  %v9212_v52 = vld [vmem:[%s13891_s3 + $0x60] ss:$24 sps:$4 sm:$0xff]  }
 0x13b   : > { %2738 = vmatpush1.bf16.msra.mxu0 %v9136_v63  ;;  %2779 = vmatpush1.bf16.msra.mxu1 %v9141_v9  ;;  %14413 = vst [vmem:[#allocation81_spill] sm:$0xff] %v9194_v2  ;;  %14414 = vst [vmem:[#allocation82_spill] sm:$0xff] %v9200_v62  ;;  %v9218_v53 = vld [vmem:[%s13891_s3 + $0x68] ss:$24 sps:$4 sm:$0xff]   ;;  %v9224_v49 = vld [vmem:[%s13891_s3 + $0x94] ss:$24 sps:$4 sm:$0xff]  }
 0x13c   : > { %2874 = vmatprep.subr.bf16.mxu0 %v9150_v5  ;;  %2915 = vmatprep.subr.bf16.mxu1 %v9156_v54  ;;  %14415 = vst [vmem:[#allocation83_spill] sm:$0xff] %v9206_v41  ;;  %14416 = vst [vmem:[#allocation84_spill] sm:$0xff] %v9212_v52  ;;  %v14426_v9 = vsub.s32 3, %v8333_v32 }
 0x13d   : > { %14417 = vst [vmem:[#allocation85_spill] sm:$0xff] %v9218_v53  ;;  %14418 = vst [vmem:[#allocation86_spill] sm:$0xff] %v9224_v49 }
 0x13e   : > { %2740 = vmatmul.mubr.bf16.vlgmr.msra.gmra.mrb[20].mxu0 %v8740_v7  ;;  %2781 = vmatmul.mubr.bf16.vlgmr.msra.gmra.mrb[20].mxu1 %v8740_v7  ;;  %v9182_v7 = vld [vmem:[%s13891_s3 + $0x3c] ss:$24 sps:$4 sm:$0xff]  }
 0x13f   : > { %2875 = vmatpush1.bf16.msra.mxu0 %v9164_v57  ;;  %2916 = vmatpush1.bf16.msra.mxu1 %v9170_v59  ;;  %14411 = vst [vmem:[#allocation79_spill] sm:$0xff] %v9182_v7  ;;  %v14424_v59 = vsub.s32 2, %v8333_v32 }
 0x140   : > { %2876 = vmatprep.subr.bf16.mxu0 %v9176_v61  ;;  %2917 = vmatprep.subr.bf16.mxu1 %v9182_v7  ;;  %v9248_v7 = vld [vmem:[%s13891_s3 + $0xc4] ss:$24 sps:$4 sm:$0xff]  }
 0x141   : > { %14422 = vst [vmem:[#allocation90_spill] sm:$0xff] %v9248_v7  ;;  %v875_v54 = vrot.slane %v9059_v56, %v14424_v59  ;;  %v9278_v59 = vld [vmem:[%s13891_s3 + $0xc8] ss:$24 sps:$4 sm:$0xff]   ;;  %v9308_v61 = vld [vmem:[%s13891_s3 + $0x124] ss:$24 sps:$4 sm:$0xff]  }
 0x142   : > { %14429 = vst [vmem:[#allocation93_spill] sm:$0xff] %v9278_v59 }
 0x143   : > { %2877 = vmatpush1.bf16.msra.mxu0 %v9188_v60  ;;  %2918 = vmatpush1.bf16.msra.mxu1 %v9194_v2  ;;  %v9236_v2 = vld [vmem:[%s13891_s3 + $0x90] ss:$24 sps:$4 sm:$0xff]  }
 0x144   : > { %2878 = vmatprep.subr.bf16.mxu0 %v9200_v62  ;;  %2919 = vmatprep.subr.bf16.mxu1 %v9206_v41  ;;  %v9230_v41 = vld [vmem:[%s13891_s3 + $0x9c] ss:$24 sps:$4 sm:$0xff]   ;;  %14420 = vst [vmem:[#allocation88_spill] sm:$0xff] %v9236_v2 }
 0x145   : > { %14419 = vst [vmem:[#allocation87_spill] sm:$0xff] %v9230_v41 }
 0x147   : > { %2879 = vmatpush1.bf16.msra.mxu0 %v9212_v52  ;;  %2920 = vmatpush1.bf16.msra.mxu1 %v9218_v53  ;;  %v9242_v53 = vld [vmem:[%s13891_s3 + $0x98] ss:$24 sps:$4 sm:$0xff]  }
 0x148   : > { %2880 = vmatprep.subr.bf16.mxu0 %v9224_v49  ;;  %2921 = vmatprep.subr.bf16.mxu1 %v9230_v41  ;;  %14421 = vst [vmem:[#allocation89_spill] sm:$0xff] %v9242_v53  ;;  %v9254_v41 = vld [vmem:[%s13891_s3 + $0xcc] ss:$24 sps:$4 sm:$0xff]   ;;  %v879_v49 = vrot.slane %v9059_v56, %v14426_v9 }
 0x149   : > { %14423 = vst [vmem:[#allocation91_spill] sm:$0xff] %v9254_v41 }
 0x14b   : > { %2881 = vmatpush1.bf16.msra.mxu0 %v9236_v2  ;;  %2922 = vmatpush1.bf16.msra.mxu1 %v9242_v53  ;;  %v14425_v53 = vsub.s32 4, %v8333_v32 }
 0x14c   : > { %2882 = vmatprep.subr.bf16.mxu0 %v9248_v7  ;;  %2923 = vmatprep.subr.bf16.mxu1 %v9254_v41  ;;  %v14427_v7 = vsub.s32 5, %v8333_v32  ;;  %v9272_v41 = vld [vmem:[%s13891_s3 + $0xc0] ss:$24 sps:$4 sm:$0xff]   ;;  %v9284_v32 = vld [vmem:[%s13891_s3 + $0xf4] ss:$24 sps:$4 sm:$0xff]  }
 0x14d   : > { %v883_v2 = vrot.slane %v9059_v56, %v14425_v53  ;;  %14428 = vst [vmem:[#allocation92_spill] sm:$0xff] %v9272_v41  ;;  %14430 = vst [vmem:[#allocation94_spill] sm:$0xff] %v9284_v32 }
 0x14e   : > { %v887_v4 = vrot.slane %v9059_v56, %v14427_v7  ;;  %v9290_v56 = vld [vmem:[%s13891_s3 + $0xfc] ss:$24 sps:$4 sm:$0xff]  }
 0x14f   : > { %2883 = vmatpush1.bf16.msra.mxu0 %v9272_v41  ;;  %2924 = vmatpush1.bf16.msra.mxu1 %v9278_v59  ;;  %14431 = vst [vmem:[#allocation95_spill] sm:$0xff] %v9290_v56 }
 0x150   : > { %2884 = vmatprep.subr.bf16.mxu0 %v9284_v32  ;;  %2925 = vmatprep.subr.bf16.mxu1 %v9290_v56  ;;  %v9296_v32 = vld [vmem:[%s13891_s3 + $0xf0] ss:$24 sps:$4 sm:$0xff]  }
 0x151   : > { %v1217_v9 = vpop.f32.mrb[8].mxu0  ;;  %v1260_v7 = vpop.f32.mrb[8].mxu1  ;;  %14432 = vst [vmem:[#allocation96_spill] sm:$0xff] %v9296_v32  ;;  %v9302_v56 = vld [vmem:[%s13891_s3 + $0xf8] ss:$24 sps:$4 sm:$0xff]  }
 0x152   : > { %v1218_v53 = vadd.f32 %v1217_v9, %v875_v54  ;;  %v1219_v41 = vpop.f32.mrb[9].mxu0  ;;  %v1261_v52 = vadd.f32 %v1260_v7, %v883_v2  ;;  %v1262_v59 = vpop.f32.mrb[9].mxu1  ;;  %14433 = vst [vmem:[#allocation97_spill] sm:$0xff] %v9302_v56 }
 0x153   : > { %v1220_v58 = vadd.f32 %v1219_v41, %v879_v49  ;;  %v1221_v62 = vpop.f32.mrb[10].mxu0  ;;  %v1263_v38 = vadd.f32 %v1262_v59, %v887_v4  ;;  %v1264_v60 = vpop.f32.mrb[10].mxu1  ;;  %2885 = vmatpush1.bf16.msra.mxu0 %v9296_v32  ;;  %2926 = vmatpush1.bf16.msra.mxu1 %v9302_v56  ;;  %v9314_v32 = vld [vmem:[%s13891_s3 + $0x12c] ss:$24 sps:$4 sm:$0xff]  }
 0x154   : > { %1271 = vst [vmem:[#allocation5 + $0x10] sm:$0xff] %v1218_v53  ;;  %v1222_v9 = vadd.f32 %v1221_v62, %v875_v54  ;;  %v1223_v41 = vpop.f32.mrb[11].mxu0  ;;  %1273 = vst [vmem:[#allocation5 + $0x20] sm:$0xff] %v1261_v52  ;;  %v1265_v59 = vadd.f32 %v1264_v60, %v883_v2  ;;  %v1266_v7 = vpop.f32.mrb[11].mxu1  ;;  %2886 = vmatprep.subr.bf16.mxu0 %v9308_v61  ;;  %2927 = vmatprep.subr.bf16.mxu1 %v9314_v32  ;;  %v9320_v60 = vld [vmem:[%s13891_s3 + $0x120] ss:$24 sps:$4 sm:$0xff]  }
 0x155   : > { %14434 = vst [vmem:[#allocation98_spill] sm:$0xff] %v9314_v32  ;;  %1272 = vst [vmem:[#allocation5 + $0x18] sm:$0xff] %v1220_v58  ;;  %v1224_v54 = vadd.f32 %v1223_v41, %v879_v49  ;;  %v1267_v62 = vadd.f32 %v1266_v7, %v887_v4  ;;  %v9326_v2 = vld [vmem:[%s13891_s3 + $0x128] ss:$24 sps:$4 sm:$0xff]   ;;  %v9332_v58 = vld [vmem:[%s13891_s3 + $0x154] ss:$24 sps:$4 sm:$0xff]  }
 0x156   : > { %1274 = vst [vmem:[#allocation5 + $0x28] sm:$0xff] %v1263_v38  ;;  %1277 = vst [vmem:[#allocation5 + $0x40] sm:$0xff] %v1222_v9  ;;  %v9338_v4 = vld [vmem:[%s13891_s3 + $0x15c] ss:$24 sps:$4 sm:$0xff]   ;;  %v9344_v38 = vld [vmem:[%s13891_s3 + $0x150] ss:$24 sps:$4 sm:$0xff]  }
 0x157   : > { %1279 = vst [vmem:[#allocation5 + $0x50] sm:$0xff] %v1265_v59  ;;  %1278 = vst [vmem:[#allocation5 + $0x48] sm:$0xff] %v1224_v54  ;;  %2887 = vmatpush1.bf16.msra.mxu0 %v9320_v60  ;;  %2928 = vmatpush1.bf16.msra.mxu1 %v9326_v2  ;;  %v9350_v52 = vld [vmem:[%s13891_s3 + $0x158] ss:$24 sps:$4 sm:$0xff]   ;;  %v9356_v49 = vld [vmem:[%s13891_s3 + $0x184] ss:$24 sps:$4 sm:$0xff]  }
 0x158   : > { %1280 = vst [vmem:[#allocation5 + $0x58] sm:$0xff] %v1267_v62  ;;  %14435 = vst [vmem:[#allocation99_spill] sm:$0xff] %v9326_v2  ;;  %2888 = vmatprep.subr.bf16.mxu0 %v9332_v58  ;;  %2929 = vmatprep.subr.bf16.mxu1 %v9338_v4  ;;  %v9362_v53 = vld [vmem:[%s13891_s3 + $0x18c] ss:$24 sps:$4 sm:$0xff]   ;;  %v9368_v9 = vld [vmem:[%s13891_s3 + $0x180] ss:$24 sps:$4 sm:$0xff]  }
 0x159   : > { %14436 = vst [vmem:[#allocation100_spill] sm:$0xff] %v9338_v4  ;;  %14437 = vst [vmem:[#allocation101_spill] sm:$0xff] %v9350_v52  ;;  %v9374_v41 = vld [vmem:[%s13891_s3 + $0x188] ss:$24 sps:$4 sm:$0xff]   ;;  %v9380_v59 = vld [vmem:[%s13891_s3 + $0x1b4] ss:$24 sps:$4 sm:$0xff]  }
 0x15a   : > { %14438 = vst [vmem:[#allocation102_spill] sm:$0xff] %v9362_v53  ;;  %14439 = vst [vmem:[#allocation103_spill] sm:$0xff] %v9374_v41  ;;  %v9386_v7 = vld [vmem:[%s13891_s3 + $0x1bc] ss:$24 sps:$4 sm:$0xff]   ;;  %v9392_v54 = vld [vmem:[%s13891_s3 + $0x1b0] ss:$24 sps:$4 sm:$0xff]  }
 0x15b   : > { %2889 = vmatpush1.bf16.msra.mxu0 %v9344_v38  ;;  %2930 = vmatpush1.bf16.msra.mxu1 %v9350_v52  ;;  %14440 = vst [vmem:[#allocation104_spill] sm:$0xff] %v9386_v7  ;;  %14441 = vst [vmem:[#allocation105_spill] sm:$0xff] %v9392_v54  ;;  %v9398_v62 = vld [vmem:[%s13891_s3 + $0x1b8] ss:$24 sps:$4 sm:$0xff]   ;;  %v9428_v52 = vld [vmem:[%s13891_s3 + $0x214] ss:$24 sps:$4 sm:$0xff]  }
 0x15c   : > { %2890 = vmatprep.subr.bf16.mxu0 %v9356_v49  ;;  %2931 = vmatprep.subr.bf16.mxu1 %v9362_v53  ;;  %14442 = vst [vmem:[#allocation106_spill] sm:$0xff] %v9398_v62  ;;  %v9416_v53 = vld [vmem:[%s13891_s3 + $0x1e0] ss:$24 sps:$4 sm:$0xff]   ;;  %14447 = vst [vmem:[#allocation111_spill] sm:$0xff] %v9428_v52  ;;  %v9440_v4 = vld [vmem:[%s13891_s3 + $0x210] ss:$24 sps:$4 sm:$0xff]  }
 0x15d   : > { %14445 = vst [vmem:[#allocation109_spill] sm:$0xff] %v9416_v53  ;;  %14449 = vst [vmem:[#allocation113_spill] sm:$0xff] %v9440_v4  ;;  %v1504_v2 = vld [vmem:[#allocation4 + $0x18] sm:$0x3] }
 0x15f   : > { %2891 = vmatpush1.bf16.msra.mxu0 %v9368_v9  ;;  %2932 = vmatpush1.bf16.msra.mxu1 %v9374_v41  ;;  %v9404_v41 = vld [vmem:[%s13891_s3 + $0x1e4] ss:$24 sps:$4 sm:$0xff]  }
 0x160   : > { %2892 = vmatprep.subr.bf16.mxu0 %v9380_v59  ;;  %2933 = vmatprep.subr.bf16.mxu1 %v9386_v7  ;;  %14443 = vst [vmem:[#allocation107_spill] sm:$0xff] %v9404_v41  ;;  %v9410_v7 = vld [vmem:[%s13891_s3 + $0x1ec] ss:$24 sps:$4 sm:$0xff]  }
 0x161   : > { %14444 = vst [vmem:[#allocation108_spill] sm:$0xff] %v9410_v7 }
 0x163   : > { %2893 = vmatpush1.bf16.msra.mxu0 %v9392_v54  ;;  %2934 = vmatpush1.bf16.msra.mxu1 %v9398_v62  ;;  %v9422_v62 = vld [vmem:[%s13891_s3 + $0x1e8] ss:$24 sps:$4 sm:$0xff]  }
 0x164   : > { %2894 = vmatprep.subr.bf16.mxu0 %v9404_v41  ;;  %2935 = vmatprep.subr.bf16.mxu1 %v9410_v7  ;;  %14446 = vst [vmem:[#allocation110_spill] sm:$0xff] %v9422_v62  ;;  %v9434_v7 = vld [vmem:[%s13891_s3 + $0x21c] ss:$24 sps:$4 sm:$0xff]  }
 0x165   : > { %14448 = vst [vmem:[#allocation112_spill] sm:$0xff] %v9434_v7 }
 0x167   : > { %2895 = vmatpush1.bf16.msra.mxu0 %v9416_v53  ;;  %2936 = vmatpush1.bf16.msra.mxu1 %v9422_v62  ;;  %v9446_v62 = vld [vmem:[%s13891_s3 + $0x218] ss:$24 sps:$4 sm:$0xff]  }
 0x168   : > { %2896 = vmatprep.subr.bf16.mxu0 %v9428_v52  ;;  %2937 = vmatprep.subr.bf16.mxu1 %v9434_v7  ;;  %14450 = vst [vmem:[#allocation114_spill] sm:$0xff] %v9446_v62  ;;  %v9452_v52 = vld [vmem:[%s13891_s3 + $0x244] ss:$24 sps:$4 sm:$0xff]  }
 0x169   : > { %14451 = vst [vmem:[#allocation115_spill] sm:$0xff] %v9452_v52  ;;  %v9458_v7 = vld [vmem:[%s13891_s3 + $0x24c] ss:$24 sps:$4 sm:$0xff]  }
 0x16a   : > { %14452 = vst [vmem:[#allocation116_spill] sm:$0xff] %v9458_v7 }
 0x16b   : > { %2897 = vmatpush1.bf16.msra.mxu0 %v9440_v4  ;;  %2938 = vmatpush1.bf16.msra.mxu1 %v9446_v62  ;;  %v9464_v4 = vld [vmem:[%s13891_s3 + $0x240] ss:$24 sps:$4 sm:$0xff]  }
 0x16c   : > { %2898 = vmatprep.subr.bf16.mxu0 %v9452_v52  ;;  %2939 = vmatprep.subr.bf16.mxu1 %v9458_v7  ;;  %14453 = vst [vmem:[#allocation117_spill] sm:$0xff] %v9464_v4  ;;  %v9470_v62 = vld [vmem:[%s13891_s3 + $0x248] ss:$24 sps:$4 sm:$0xff]   ;;  %v9476_v52 = vld [vmem:[%s13891_s3 + $0x274] ss:$24 sps:$4 sm:$0xff]  }
 0x16d   : > { %14454 = vst [vmem:[#allocation118_spill] sm:$0xff] %v9470_v62  ;;  %14455 = vst [vmem:[#allocation119_spill] sm:$0xff] %v9476_v52  ;;  %v9482_v7 = vld [vmem:[%s13891_s3 + $0x27c] ss:$24 sps:$4 sm:$0xff]  }
 0x16e   : > { %14456 = vst [vmem:[#allocation120_spill] sm:$0xff] %v9482_v7 }
 0x16f   : > { %2899 = vmatpush1.bf16.msra.mxu0 %v9464_v4  ;;  %2940 = vmatpush1.bf16.msra.mxu1 %v9470_v62  ;;  %v1502_v4 = vld [vmem:[#allocation4 + $0x8] sm:$0x3] }
 0x170   : > { %2900 = vmatprep.subr.bf16.mxu0 %v9476_v52  ;;  %2941 = vmatprep.subr.bf16.mxu1 %v9482_v7  ;;  %v1501_v52 = vld [vmem:[#allocation4] sm:$0x3] }
 0x173   : > { %2901 = vmatpush1.bf16.msra.mxu0 %v8338_v34  ;;  %2942 = vmatpush1.bf16.msra.mxu1 %v8343_v35 }
 0x174   : > { %2902 = vmatprep.subr.bf16.mxu0 %v8348_v36  ;;  %2943 = vmatprep.subr.bf16.mxu1 %v8353_v37 }
 0x177   : > { %2903 = vmatpush1.bf16.msra.mxu0 %v8361_v39  ;;  %2944 = vmatpush1.bf16.msra.mxu1 %v8366_v40 }
 0x178   : > { %2904 = vmatprep.subr.bf16.mxu0 %v8375_v42  ;;  %2945 = vmatprep.subr.bf16.mxu1 %v8382_v43 }
 0x17b   : > { %2905 = vmatpush1.bf16.msra.mxu0 %v8387_v44  ;;  %2946 = vmatpush1.bf16.msra.mxu1 %v8394_v45  ;;  %v1503_v45 = vld [vmem:[#allocation4 + $0x10] sm:$0x3] }
 0x17c   : > { %2956 = vmatprep.subr.bf16.mxu0 %v8399_v46  ;;  %3079 = vmatprep.subr.bf16.mxu1 %v8406_v47 }
 0x191   : > { %v2034_v34 = vpop.f32.mrb[12].mxu0  ;;  %v2075_v35 = vpop.f32.mrb[12].mxu1 }
 0x192   : > { %v2036_v36 = vpop.f32.mrb[13].mxu0  ;;  %v2077_v37 = vpop.f32.mrb[13].mxu1  ;;  %v2123_v42 = vadd.f32 %v2034_v34, %v1501_v52  ;;  %v2137_v46 = vadd.f32 %v2075_v35, %v1503_v45 }
 0x193   : > { %v2038_v7 = vpop.f32.mrb[14].mxu0  ;;  %v2079_v39 = vpop.f32.mrb[14].mxu1  ;;  %v2124_v43 = vadd.f32 %v2036_v36, %v1502_v4  ;;  %v2138_v47 = vadd.f32 %v2077_v37, %v1504_v2  ;;  %v1474_v4 = vld [vmem:[%s13893_s5] sm:$0x3] }
 0x194   : > { %v2039_v62 = vpop.f32.mrb[15].mxu0  ;;  %v2080_v40 = vpop.f32.mrb[15].mxu1  ;;  %v6183_v53 = vmul.f32 -1.442695, %v2123_v42  ;;  %v6185_v41 = vmul.f32 -1.442695, %v2137_v46  ;;  %v9504_v2 = vrot.slane %v1474_v4, %v8831_v6 }
 0x195   : > { %v6184_v44 = vmul.f32 -1.442695, %v2124_v43  ;;  %v6186_v32 = vmul.f32 -1.442695, %v2138_v47 }
 0x196   : > { %6794 = vpow2.f32 %v6183_v53  ;;  %v9501_v53 = vrot.slane %v1474_v4, %v8828_v10  ;;  %14458 = vst [vmem:[#allocation122_spill] sm:$0xff] %v9504_v2 }
 0x197   : > { %6796 = vpow2.f32 %v6184_v44 }
 0x198   : > { %6798 = vpow2.f32 %v6185_v41  ;;  %14457 = vst [vmem:[#allocation121_spill] sm:$0xff] %v9501_v53 }
 0x199   : > { %6800 = vpow2.f32 %v6186_v32 }
 0x1a0   : > { %v6795_v54 = vpop.eup %6794 }
 0x1a1   : > { %v6797_v56 = vpop.eup %6796  ;;  %v2131_v7 = vadd.f32 1.0, %v6795_v54 }
 0x1a2   : > { %v2132_v62 = vadd.f32 1.0, %v6797_v56  ;;  %v6799_v52 = vpop.eup %6798 }
 0x1a3   : > { %6802 = vrcp.f32 %v2131_v7  ;;  %v6801_v34 = vpop.eup %6800  ;;  %v2145_v35 = vadd.f32 1.0, %v6799_v52  ;;  %v1505_v7 = vld [vmem:[#allocation4 + $0x20] sm:$0x3]  ;;  %v1506_v52 = vld [vmem:[#allocation4 + $0x28] sm:$0x3] }
 0x1a4   : > { %6804 = vrcp.f32 %v2132_v62  ;;  %v2146_v54 = vadd.f32 1.0, %v6801_v34 }
 0x1a5   : > { %6806 = vrcp.f32 %v2145_v35  ;;  %v7168_v35 = vld.sshfl [vmem:[#allocation2] sm:$0x33 pattern:$0x76325410] }
 0x1a6   : > { %6808 = vrcp.f32 %v2146_v54 }
 0x1ad   : > { %v6803_v39 = vpop.eup %6802 }
 0x1ae   : > { %v6805_v44 = vpop.eup %6804 }
 0x1d1   : > { %v2116_v36 = vpop.f32.mrb[16].mxu0  ;;  %v2700_v41 = vpop.f32.mrb[16].mxu1 }
 0x1d2   : > { %v2151_v32 = vadd.f32 %v2116_v36, %v9501_v53  ;;  %v2118_v56 = vpop.f32.mrb[17].mxu0  ;;  %v2702_v37 = vpop.f32.mrb[17].mxu1 }
 0x1d3   : > { %v2152_v40 = vadd.f32 %v2118_v56, %v9504_v2  ;;  %v2120_v42 = vpop.f32.mrb[18].mxu0  ;;  %v2704_v43 = vpop.f32.mrb[18].mxu1 }
 0x1d4   : > { %v2153_v45 = vmul.f32 %v6803_v39, %v2151_v32  ;;  %v2121_v46 = vpop.f32.mrb[19].mxu0  ;;  %v2705_v47 = vpop.f32.mrb[19].mxu1 }
 0x1d5   : > { %v2154_v62 = vmul.f32 %v6805_v44, %v2152_v40  ;;  %v6807_v36 = vpop.eup %6806 }
 0x1d6   : > { %v2155_v4 = vadd.f32 %v2153_v45, %v1505_v7  ;;  %v6809_v53 = vpop.eup %6808  ;;  %v2159_v56 = vsub.f32 1.0, %v6807_v36  ;;  %v2163_v32 = vmul.f32 %v7168_v35, %v6807_v36  ;;  %v9540_v7 = vld [vmem:[%s13891_s3 + $0x300] ss:$24 sps:$4 sm:$0xff]   ;;  %v2168_v36 = vld [vmem:[#allocation5 + $0x38] sm:$0xc0] }
 0x1d7   : > { %v2156_v34 = vadd.f32 %v2154_v62, %v1506_v52  ;;  %v2160_v43 = vsub.f32 1.0, %v6809_v53  ;;  %v2164_v40 = vmul.f32 %v6809_v53, %v8217_v55  ;;  %v9528_v55 = vld [vmem:[%s13891_s3 + $0x10] ss:$24 sps:$4 sm:$0xff]   ;;  %v2791_v53 = vrot.slane %v2700_v41, 2  ;;  %v2167_v41 = vld [vmem:[#allocation5 + $0x30] sm:$0xc0] }
 0x1d8   : > { %6810 = vtanh.f32 %v2155_v4  ;;  %v2792_v62 = vrot.slane %v2702_v37, 2  ;;  %v9546_v4 = vld [vmem:[%s13891_s3 + $0x334] ss:$24 sps:$4 sm:$0xff]   ;;  %v9552_v52 = vld [vmem:[%s13891_s3 + $0x40] ss:$24 sps:$4 sm:$0xff]  }
 0x1d9   : > { %6812 = vtanh.f32 %v2156_v34  ;;  %v2795_v34 = vadd.f32 %v2791_v53, %v2167_v41  ;;  %v9558_v37 = vld [vmem:[%s13891_s3 + $0x74] ss:$24 sps:$4 sm:$0xff]   ;;  %v9576_v35 = vld [vmem:[%s13891_s3 + $0x70] ss:$24 sps:$4 sm:$0xff]   ;;  %v9600_v53 = vld [vmem:[%s13891_s3 + $0xa0] ss:$24 sps:$4 sm:$0xff]  }
 0x1da   : > { %v9612_v41 = vld [vmem:[%s13891_s3 + $0x390] ss:$24 sps:$4 sm:$0xff]  }
 0x1e2   : > { %v6811_v42 = vpop.eup %6810 }
 0x1e3   : > { %v2161_v2 = vmul.f32 %v6811_v42, %v2159_v56  ;;  %v6813_v39 = vpop.eup %6812  ;;  %v9564_v56 = vld [vmem:[%s13891_s3 + $0x330] ss:$24 sps:$4 sm:$0xff]   ;;  %v2796_v42 = vadd.f32 %v2792_v62, %v2168_v36  ;;  %v9606_v62 = vld [vmem:[%s13891_s3 + $0xd4] ss:$24 sps:$4 sm:$0xff]  }
 0x1e4   : > { %v2162_v46 = vmul.f32 %v6813_v39, %v2160_v43  ;;  %v9570_v43 = vld [vmem:[%s13891_s3 + $0x364] ss:$24 sps:$4 sm:$0xff]   ;;  %v9624_v36 = vld [vmem:[%s13891_s3 + $0xd0] ss:$24 sps:$4 sm:$0xff]  }
 0x1e5   : > { %v9509_v54 = vadd.f32 %v2163_v32, %v2161_v2  ;;  %v9534_v2 = vld [vmem:[%s13891_s3 + $0x44] ss:$24 sps:$4 sm:$0xff]   ;;  %v6283_v32 = vmul.f32 -1.442695, %v2795_v34  ;;  %14459 = vst [vmem:[#allocation123_spill] sm:$0xff] %v9624_v36 }
 0x1e6   : > { %v9511_v44 = vadd.f32 %v2164_v40, %v2162_v46  ;;  %v9582_v39 = vld [vmem:[%s13891_s3 + $0xa4] ss:$24 sps:$4 sm:$0xff]   ;;  %v9588_v46 = vld [vmem:[%s13891_s3 + $0x360] ss:$24 sps:$4 sm:$0xff]   ;;  %v6284_v40 = vmul.f32 -1.442695, %v2796_v42 }
 0x1e7   : > { %2862 = vst [vmem:[%s7846_s17] sm:$0x3] %v9509_v54  ;;  %v9521_v47 = vpack.c.bf16 %v9509_v54, %v9509_v54  ;;  %6814 = vpow2.f32 %v6283_v32  ;;  %v9618_v34 = vld [vmem:[%s13891_s3 + $0x3c4] ss:$24 sps:$4 sm:$0xff]   ;;  %v9636_v32 = vld [vmem:[%s13891_s3 + $0x3c0] ss:$24 sps:$4 sm:$0xff]  }
 0x1e8   : > { %2863 = vst [vmem:[%s7846_s17 + $0x8] sm:$0x3] %v9511_v44  ;;  %v2873_v45 = vpack.c.bf16 %v9511_v44, %v9511_v44  ;;  %6816 = vpow2.f32 %v6284_v40  ;;  %v9630_v42 = vld [vmem:[%s13891_s3 + $0x104] ss:$24 sps:$4 sm:$0xff]   ;;  %14461 = vst [vmem:[#allocation125_spill] sm:$0xff] %v9636_v32 }
 0x1e9   : > { %14460 = vst [vmem:[#allocation124_spill] sm:$0xff] %v9630_v42  ;;  %v9642_v40 = vld [vmem:[%s13891_s3 + $0x3f4] ss:$24 sps:$4 sm:$0xff]  }
 0x1ea   : > { %2906 = vmatprep.mubr.bf16.mxu0 %v2873_v45  ;;  %2947 = vmatprep.mubr.bf16.mxu1 %v2873_v45  ;;  %14462 = vst [vmem:[#allocation126_spill] sm:$0xff] %v9642_v40 }
 0x1eb   : > { %2907 = vmatmul.mubr.bf16.vlgmr.msra.gmra.mrb[24].mxu0 %v9521_v47  ;;  %2948 = vmatmul.mubr.bf16.vlgmr.msra.gmra.mrb[24].mxu1 %v9521_v47 }
 0x1ec   : > { %2957 = vmatpush1.bf16.msra.mxu0 %v9528_v55  ;;  %2988 = vmatprep.mubr.bf16.mxu0 %v2873_v45  ;;  %v9594_v45 = vld [vmem:[%s13891_s3 + $0x394] ss:$24 sps:$4 sm:$0xff]  }
 0x1ed   : > { %2958 = vmatprep.subr.bf16.mxu0 %v9534_v2  ;;  %3080 = vmatpush1.bf16.msra.mxu1 %v9540_v7 }
 0x1ee   : > { %3081 = vmatprep.subr.bf16.mxu1 %v9546_v4 }
 0x1f0   : > { %2959 = vmatpush1.bf16.msra.mxu0 %v9552_v52 }
 0x1f1   : > { %2960 = vmatprep.subr.bf16.mxu0 %v9558_v37  ;;  %3082 = vmatpush1.bf16.msra.mxu1 %v9564_v56 }
 0x1f2   : > { %3083 = vmatprep.subr.bf16.mxu1 %v9570_v43 }
 0x1f4   : > { %2961 = vmatpush1.bf16.msra.mxu0 %v9576_v35 }
 0x1f5   : > { %2962 = vmatprep.subr.bf16.mxu0 %v9582_v39  ;;  %3084 = vmatpush1.bf16.msra.mxu1 %v9588_v46 }
 0x1f6   : > { %3085 = vmatprep.subr.bf16.mxu1 %v9594_v45 }
 0x1f8   : > { %2963 = vmatpush1.bf16.msra.mxu0 %v9600_v53 }
 0x1f9   : > { %2964 = vmatprep.subr.bf16.mxu0 %v9606_v62  ;;  %3086 = vmatpush1.bf16.msra.mxu1 %v9612_v41 }
 0x1fa   : > { %3087 = vmatprep.subr.bf16.mxu1 %v9618_v34 }
 0x1fc   : > { %2965 = vmatpush1.bf16.msra.mxu0 %v9624_v36  ;;  %v9648_v36 = vld [vmem:[%s13891_s3 + $0x100] ss:$24 sps:$4 sm:$0xff]  }
 0x1fd   : > { %2966 = vmatprep.subr.bf16.mxu0 %v9630_v42  ;;  %3088 = vmatpush1.bf16.msra.mxu1 %v9636_v32  ;;  %14463 = vst [vmem:[#allocation127_spill] sm:$0xff] %v9648_v36  ;;  %v9655_v32 = vld [vmem:[%s13891_s3 + $0x3f0] ss:$24 sps:$4 sm:$0xff]   ;;  %v6815_v42 = vpop.eup %6814 }
 0x1fe   : > { %3089 = vmatprep.subr.bf16.mxu1 %v9642_v40  ;;  %v6817_v40 = vpop.eup %6816 }
 0x200   : > { %2967 = vmatpush1.bf16.msra.mxu0 %v9648_v36  ;;  %v2803_v36 = vadd.f32 1.0, %v6815_v42 }
 0x201   : > { %2968 = vmatprep.subr.bf16.mxu0 %v8493_v11  ;;  %3090 = vmatpush1.bf16.msra.mxu1 %v9655_v32  ;;  %v2804_v11 = vadd.f32 1.0, %v6817_v40 }
 0x202   : > { %3091 = vmatprep.subr.bf16.mxu1 %v8498_v12  ;;  %v6085_v12 = vld [vmem:[%s13893_s5 + $0x2] sm:$0x3]  ;;  %6818 = vrcp.f32 %v2803_v36  ;;  %v2170_v36 = vld [vmem:[#allocation5 + $0x48] sm:$0xc0] }
 0x203   : > { %6820 = vrcp.f32 %v2804_v11 }
 0x204   : > { %2969 = vmatpush1.bf16.msra.mxu0 %v8503_v13  ;;  %v9672_v13 = vrot.slane %v6085_v12, %v8828_v10 }
 0x205   : > { %2970 = vmatprep.subr.bf16.mxu0 %v8513_v15  ;;  %3092 = vmatpush1.bf16.msra.mxu1 %v8508_v14  ;;  %v9677_v14 = vrot.slane %v6085_v12, %v8831_v6 }
 0x206   : > { %3093 = vmatprep.subr.bf16.mxu1 %v8520_v16  ;;  %14464 = vst [vmem:[#allocation128_spill] sm:$0xff] %v9672_v13 }
 0x208   : > { %2971 = vmatpush1.bf16.msra.mxu0 %v8525_v17 }
 0x209   : > { %2972 = vmatprep.subr.bf16.mxu0 %v8539_v18  ;;  %3094 = vmatpush1.bf16.msra.mxu1 %v8532_v3 }
 0x20a   : > { %3095 = vmatprep.subr.bf16.mxu1 %v8544_v19 }
 0x20c   : > { %2973 = vmatpush1.bf16.msra.mxu0 %v8551_v20  ;;  %v2169_v20 = vld [vmem:[#allocation5 + $0x40] sm:$0xc0]  ;;  %v6819_v11 = vpop.eup %6818 }
 0x20d   : > { %2974 = vmatprep.subr.bf16.mxu0 %v8561_v22  ;;  %3096 = vmatpush1.bf16.msra.mxu1 %v8556_v21 }
 0x20e   : > { %3097 = vmatprep.subr.bf16.mxu1 %v8568_v23 }
 0x210   : > { %2975 = vmatpush1.bf16.msra.mxu0 %v8575_v24 }
 0x211   : > { %v2741_v15 = vpop.f32.mrb[20].mxu0  ;;  %v2782_v16 = vpop.f32.mrb[20].mxu1  ;;  %2976 = vmatprep.subr.bf16.mxu0 %v8587_v26  ;;  %3098 = vmatpush1.bf16.msra.mxu1 %v8580_v25 }
 0x212   : > { %v2811_v17 = vrot.slane %v2741_v15, 2  ;;  %v2829_v3 = vadd.f32 %v2782_v16, %v9672_v13  ;;  %v2743_v18 = vpop.f32.mrb[21].mxu0  ;;  %v2784_v19 = vpop.f32.mrb[21].mxu1  ;;  %3099 = vmatprep.subr.bf16.mxu1 %v8592_v27  ;;  %v14465_v27 = vld [vmem:[#allocation7_spill] sm:$0xff] }
 0x213   : > { %v2812_v21 = vrot.slane %v2743_v18, 2  ;;  %v2830_v22 = vadd.f32 %v2784_v19, %v9677_v14  ;;  %v2745_v6 = vpop.f32.mrb[22].mxu0  ;;  %v2786_v10 = vpop.f32.mrb[22].mxu1 }
 0x214   : > { %v2815_v23 = vadd.f32 %v2811_v17, %v2169_v20  ;;  %v2833_v24 = vrot.slane %v2829_v3, 2  ;;  %v2746_v42 = vpop.f32.mrb[23].mxu0  ;;  %v2787_v40 = vpop.f32.mrb[23].mxu1  ;;  %2977 = vmatpush1.bf16.msra.mxu0 %v8599_v28  ;;  %v14466_v28 = vld [vmem:[#allocation9_spill] sm:$0xff]  ;;  %v14469_v17 = vld [vmem:[#allocation11_spill] sm:$0xff] }
 0x215   : > { %v2816_v12 = vadd.f32 %v2812_v21, %v2170_v36  ;;  %v2834_v15 = vrot.slane %v2830_v22, 2  ;;  %v6821_v26 = vpop.eup %6820  ;;  %2978 = vmatprep.subr.bf16.mxu0 %v8611_v30  ;;  %3100 = vmatpush1.bf16.msra.mxu1 %v8604_v29  ;;  %v14467_v30 = vld [vmem:[#allocation8_spill] sm:$0xff]  ;;  %v14468_v29 = vld [vmem:[#allocation10_spill] sm:$0xff]  ;;  %v14470_v20 = vld [vmem:[#allocation13_spill] sm:$0xff] }
 0x216   : > { %v6285_v25 = vmul.f32 -1.442695, %v2815_v23  ;;  %v2837_v16 = vmul.f32 %v6819_v11, %v2833_v24  ;;  %3101 = vmatprep.subr.bf16.mxu1 %v8616_v31  ;;  %v2171_v3 = vld [vmem:[#allocation5 + $0x50] sm:$0xc0]  ;;  %v14472_v22 = vld [vmem:[#allocation14_spill] sm:$0xff]  ;;  %v14473_v23 = vld [vmem:[#allocation15_spill] sm:$0xff] }
 0x217   : > { %v6286_v18 = vmul.f32 -1.442695, %v2816_v12  ;;  %v2838_v19 = vmul.f32 %v6821_v26, %v2834_v15  ;;  %v7191_v24 = vld [vmem:[#allocation3] sm:$0xf]  ;;  %v14475_v40 = vld [vmem:[#allocation16_spill] sm:$0xff]  ;;  %v14476_v11 = vld [vmem:[#allocation18_spill] sm:$0xff] }
 0x218   : > { %6822 = vpow2.f32 %v6285_v25  ;;  %2979 = vmatpush1.bf16.msra.mxu0 %v8623_v33  ;;  %v14471_v33 = vld [vmem:[#allocation12_spill] sm:$0xff]  ;;  %v2839_v21 = vadd.f32 %v2837_v16, %v2171_v3  ;;  %v2847_v36 = vcombine.low %v7191_v24, %v7191_v24  ;;  %v14474_v42 = vld [vmem:[#allocation17_spill] sm:$0xff]  ;;  %v14477_v12 = vld [vmem:[#allocation19_spill] sm:$0xff] }
 0x219   : > { %6824 = vpow2.f32 %v6286_v18  ;;  %2980 = vmatprep.subr.bf16.mxu0 %v8635_v50  ;;  %3102 = vmatpush1.bf16.msra.mxu1 %v8628_v48  ;;  %v14478_v15 = vld [vmem:[#allocation21_spill] sm:$0xff]  ;;  %v14479_v26 = vld [vmem:[#allocation20_spill] sm:$0xff]  ;;  %v14480_v25 = vld [vmem:[#allocation6_spill] sm:$0xff] }
 0x21a   : > { %3103 = vmatprep.subr.bf16.mxu1 %v8640_v51  ;;  %v2172_v51 = vld [vmem:[#allocation5 + $0x58] sm:$0xc0]  ;;  %v2854_v16 = vrot.slane %v2847_v36, %v14480_v25  ;;  %v14481_v18 = vld [vmem:[#allocation22_spill] sm:$0xff] }
 0x21b   : > { %v2840_v10 = vadd.f32 %v2838_v19, %v2172_v51  ;;  %v14482_v19 = vld [vmem:[#allocation23_spill] sm:$0xff]  ;;  %v14484_v3 = vld [vmem:[#allocation25_spill] sm:$0xff] }
 0x21c   : > { %2981 = vmatpush1.bf16.msra.mxu0 %v14465_v27  ;;  %v14483_v27 = vld [vmem:[#allocation24_spill] sm:$0xff] }
 0x21d   : > { %2982 = vmatprep.subr.bf16.mxu0 %v14466_v28  ;;  %3104 = vmatpush1.bf16.msra.mxu1 %v14467_v30  ;;  %v2855_v28 = vcombine.low %v2854_v16, %v2854_v16 }
 0x21e   : > { %3105 = vmatprep.subr.bf16.mxu1 %v14468_v29 }
 0x220   : > { %2983 = vmatpush1.bf16.msra.mxu0 %v14469_v17 }
 0x221   : > { %2984 = vmatprep.subr.bf16.mxu0 %v14470_v20  ;;  %3106 = vmatpush1.bf16.msra.mxu1 %v14471_v33 }
 0x222   : > { %v6823_v31 = vpop.eup %6822  ;;  %3107 = vmatprep.subr.bf16.mxu1 %v14472_v22 }
 0x223   : > { %v6825_v50 = vpop.eup %6824  ;;  %v2823_v48 = vadd.f32 1.0, %v6823_v31 }
 0x224   : > { %v2824_v6 = vadd.f32 1.0, %v6825_v50  ;;  %2985 = vmatpush1.bf16.msra.mxu0 %v14473_v23  ;;  %v14485_v50 = vld [vmem:[#allocation26_spill] sm:$0xff]  ;;  %v14487_v23 = vld [vmem:[#allocation28_spill] sm:$0xff] }
 0x225   : > { %6826 = vrcp.f32 %v2823_v48  ;;  %2986 = vmatprep.subr.bf16.mxu0 %v14474_v42  ;;  %3108 = vmatpush1.bf16.msra.mxu1 %v14475_v40  ;;  %v14488_v42 = vld [vmem:[#allocation30_spill] sm:$0xff] }
 0x226   : > { %6828 = vrcp.f32 %v2824_v6  ;;  %3109 = vmatprep.subr.bf16.mxu1 %v14476_v11  ;;  %v14486_v6 = vld [vmem:[#allocation27_spill] sm:$0xff]  ;;  %v14489_v11 = vld [vmem:[#allocation32_spill] sm:$0xff] }
 0x227   : > { %6830 = vtanh.f32 %v2839_v21 }
 0x228   : > { %6832 = vtanh.f32 %v2840_v10  ;;  %2987 = vmatpush1.bf16.msra.mxu0 %v14477_v12 }
 0x229   : > { %3120 = vmatprep.subr.bf16.mxu0 %v14478_v15  ;;  %3110 = vmatpush1.bf16.msra.mxu1 %v14479_v26  ;;  %v14490_v15 = vld [vmem:[#allocation34_spill] sm:$0xff] }
 0x22a   : > { %3161 = vmatprep.subr.bf16.mxu1 %v14481_v18  ;;  %v9739_v26 = vld [vmem:[%s13891_s3 + $0x310] ss:$24 sps:$4 sm:$0xff]   ;;  %v9746_v18 = vld [vmem:[%s13891_s3 + $0x344] ss:$24 sps:$4 sm:$0xff]  }
 0x22b   : > { %2989 = vmatmul.mubr.bf16.vlgmr.msra.gmra.mrb[28].mxu0 %v9521_v47 }
 0x22c   : > { %3121 = vmatpush1.bf16.msra.mxu0 %v14482_v19  ;;  %v14492_v19 = vld [vmem:[#allocation38_spill] sm:$0xff] }
 0x22d   : > { %3122 = vmatprep.subr.bf16.mxu0 %v14483_v27  ;;  %v9753_v27 = vld [vmem:[%s13891_s3 + $0x340] ss:$24 sps:$4 sm:$0xff]  }
 0x22f   : > { %v6827_v30 = vpop.eup %6826 }
 0x230   : > { %v6829_v29 = vpop.eup %6828  ;;  %v2843_v17 = vsub.f32 1.0, %v6827_v30  ;;  %3123 = vmatpush1.bf16.msra.mxu0 %v14484_v3  ;;  %v2858_v21 = vmul.f32 %v6827_v30, %v2855_v28  ;;  %v14493_v28 = vld [vmem:[#allocation40_spill] sm:$0xff]  ;;  %v9760_v30 = vld [vmem:[%s13891_s3 + $0x374] ss:$24 sps:$4 sm:$0xff]   ;;  %v14496_v3 = vld [vmem:[#allocation29_spill] sm:$0xff] }
 0x231   : > { %v6831_v31 = vpop.eup %6830  ;;  %v2844_v20 = vsub.f32 1.0, %v6829_v29  ;;  %3124 = vmatprep.subr.bf16.mxu0 %v14485_v50  ;;  %v2859_v51 = vmul.f32 %v6829_v29, %v2854_v16  ;;  %v14491_v16 = vld [vmem:[#allocation36_spill] sm:$0xff]  ;;  %v14494_v29 = vld [vmem:[#allocation42_spill] sm:$0xff] }
 0x232   : > { %v6833_v33 = vpop.eup %6832  ;;  %v2845_v48 = vmul.f32 %v6831_v31, %v2843_v17  ;;  %v9767_v17 = vld [vmem:[%s13891_s3 + $0x370] ss:$24 sps:$4 sm:$0xff]   ;;  %v14495_v31 = vld [vmem:[#allocation44_spill] sm:$0xff] }
 0x233   : > { %v2846_v47 = vmul.f32 %v6833_v33, %v2844_v20  ;;  %v14497_v20 = vld [vmem:[#allocation46_spill] sm:$0xff]  ;;  %v14498_v33 = vld [vmem:[#allocation31_spill] sm:$0xff]  ;;  %v14499_v50 = vld [vmem:[#allocation48_spill] sm:$0xff] }
 0x234   : > { %v9716_v22 = vadd.f32 %v2858_v21, %v2845_v48  ;;  %3125 = vmatpush1.bf16.msra.mxu0 %v14486_v6  ;;  %v14500_v48 = vld [vmem:[#allocation33_spill] sm:$0xff]  ;;  %v14501_v21 = vld [vmem:[#allocation50_spill] sm:$0xff] }
 0x235   : > { %v9719_v10 = vadd.f32 %v2859_v51, %v2846_v47  ;;  %3126 = vmatprep.subr.bf16.mxu0 %v14487_v23  ;;  %v14502_v47 = vld [vmem:[#allocation35_spill] sm:$0xff]  ;;  %v14503_v51 = vld [vmem:[#allocation52_spill] sm:$0xff]  ;;  %v14504_v6 = vld [vmem:[#allocation37_spill] sm:$0xff] }
 0x236   : > { %2864 = vst [vmem:[%s7851_s21 + $0x10] sm:$0xc0] %v9716_v22  ;;  %v3071_v24 = vpack.c.bf16 %v9716_v22, %v9716_v22  ;;  %v14505_v23 = vld [vmem:[#allocation54_spill] sm:$0xff] }
 0x237   : > { %2865 = vst [vmem:[%s7851_s21 + $0x18] sm:$0xc0] %v9719_v10  ;;  %v3072_v36 = vpack.c.bf16 %v9719_v10, %v9719_v10 }
 0x238   : > { %3127 = vmatpush1.bf16.msra.mxu0 %v14488_v42  ;;  %v9732_v12 = vrot.slane %v3071_v24, 3  ;;  %v14506_v24 = vld [vmem:[#allocation39_spill] sm:$0xff]  ;;  %v14508_v42 = vld [vmem:[#allocation41_spill] sm:$0xff] }
 0x239   : > { %v3076_v40 = vrot.slane %v3072_v36, 3  ;;  %3128 = vmatprep.subr.bf16.mxu0 %v14489_v11  ;;  %v14507_v36 = vld [vmem:[#allocation56_spill] sm:$0xff]  ;;  %v14510_v11 = vld [vmem:[#allocation43_spill] sm:$0xff] }
 0x23b   : > { %3111 = vmatprep.mubr.bf16.mxu1 %v3076_v40  ;;  %3152 = vmatprep.mubr.bf16.mxu0 %v3076_v40 }
 0x23c   : > { %3112 = vmatmul.mubr.bf16.vlgmr.msra.gmra.mrb[28].mxu1 %v9732_v12  ;;  %3129 = vmatpush1.bf16.msra.mxu0 %v14490_v15  ;;  %v14511_v15 = vld [vmem:[#allocation60_spill] sm:$0xff] }
 0x23d   : > { %3162 = vmatpush1.bf16.msra.mxu1 %v9739_v26  ;;  %3193 = vmatprep.mubr.bf16.mxu1 %v3076_v40  ;;  %v14509_v40 = vld [vmem:[#allocation58_spill] sm:$0xff] }
 0x23e   : > { %3130 = vmatprep.subr.bf16.mxu0 %v14491_v16  ;;  %3163 = vmatprep.subr.bf16.mxu1 %v9746_v18  ;;  %v14512_v16 = vld [vmem:[#allocation45_spill] sm:$0xff] }
 0x240   : > { %3131 = vmatpush1.bf16.msra.mxu0 %v14492_v19  ;;  %v14513_v19 = vld [vmem:[#allocation62_spill] sm:$0xff] }
 0x241   : > { %3164 = vmatpush1.bf16.msra.mxu1 %v9753_v27  ;;  %3132 = vmatprep.subr.bf16.mxu0 %v14493_v28  ;;  %v14514_v28 = vld [vmem:[#allocation47_spill] sm:$0xff] }
 0x242   : > { %3165 = vmatprep.subr.bf16.mxu1 %v9760_v30 }
 0x244   : > { %3133 = vmatpush1.bf16.msra.mxu0 %v14494_v29  ;;  %v14515_v29 = vld [vmem:[#allocation64_spill] sm:$0xff] }
 0x245   : > { %3166 = vmatpush1.bf16.msra.mxu1 %v9767_v17  ;;  %3134 = vmatprep.subr.bf16.mxu0 %v14495_v31  ;;  %v14516_v31 = vld [vmem:[#allocation49_spill] sm:$0xff] }
 0x246   : > { %3167 = vmatprep.subr.bf16.mxu1 %v14496_v3  ;;  %v14517_v3 = vld [vmem:[#allocation66_spill] sm:$0xff] }
 0x248   : > { %3135 = vmatpush1.bf16.msra.mxu0 %v14497_v20  ;;  %v14518_v20 = vld [vmem:[#allocation51_spill] sm:$0xff] }
 0x249   : > { %3168 = vmatpush1.bf16.msra.mxu1 %v14498_v33  ;;  %3136 = vmatprep.subr.bf16.mxu0 %v14499_v50  ;;  %v14519_v33 = vld [vmem:[#allocation68_spill] sm:$0xff]  ;;  %v14520_v50 = vld [vmem:[#allocation53_spill] sm:$0xff] }
 0x24a   : > { %3169 = vmatprep.subr.bf16.mxu1 %v14500_v48  ;;  %v14521_v48 = vld [vmem:[#allocation70_spill] sm:$0xff] }
 0x24c   : > { %3137 = vmatpush1.bf16.msra.mxu0 %v14501_v21  ;;  %v14522_v21 = vld [vmem:[#allocation55_spill] sm:$0xff] }
 0x24d   : > { %3170 = vmatpush1.bf16.msra.mxu1 %v14502_v47  ;;  %3138 = vmatprep.subr.bf16.mxu0 %v14503_v51  ;;  %v14523_v47 = vld [vmem:[#allocation57_spill] sm:$0xff]  ;;  %v14524_v51 = vld [vmem:[#allocation59_spill] sm:$0xff] }
 0x24e   : > { %3171 = vmatprep.subr.bf16.mxu1 %v14504_v6  ;;  %v14525_v6 = vld [vmem:[#allocation61_spill] sm:$0xff] }
 0x250   : > { %3139 = vmatpush1.bf16.msra.mxu0 %v14505_v23  ;;  %v14526_v23 = vld [vmem:[#allocation63_spill] sm:$0xff] }
 0x251   : > { %3172 = vmatpush1.bf16.msra.mxu1 %v14506_v24  ;;  %3140 = vmatprep.subr.bf16.mxu0 %v14507_v36  ;;  %v14527_v24 = vld [vmem:[#allocation65_spill] sm:$0xff]  ;;  %v14530_v36 = vld [vmem:[#allocation78_spill] sm:$0xff] }
 0x252   : > { %3173 = vmatprep.subr.bf16.mxu1 %v14508_v42  ;;  %v14532_v42 = vld [vmem:[#allocation80_spill] sm:$0xff] }
 0x254   : > { %3141 = vmatpush1.bf16.msra.mxu0 %v14509_v40  ;;  %v14534_v40 = vld [vmem:[#allocation82_spill] sm:$0xff] }
 0x255   : > { %3174 = vmatpush1.bf16.msra.mxu1 %v14510_v11  ;;  %3142 = vmatprep.subr.bf16.mxu0 %v14511_v15  ;;  %v14535_v11 = vld [vmem:[#allocation73_spill] sm:$0xff]  ;;  %v14537_v15 = vld [vmem:[#allocation74_spill] sm:$0xff] }
 0x256   : > { %3175 = vmatprep.subr.bf16.mxu1 %v14512_v16  ;;  %v14538_v16 = vld [vmem:[#allocation86_spill] sm:$0xff] }
 0x258   : > { %3143 = vmatpush1.bf16.msra.mxu0 %v14513_v19  ;;  %v14540_v19 = vld [vmem:[#allocation88_spill] sm:$0xff] }
 0x259   : > { %3176 = vmatpush1.bf16.msra.mxu1 %v14514_v28  ;;  %3144 = vmatprep.subr.bf16.mxu0 %v14515_v29  ;;  %v14541_v28 = vld [vmem:[#allocation76_spill] sm:$0xff]  ;;  %v14542_v29 = vld [vmem:[#allocation90_spill] sm:$0xff] }
 0x25a   : > { %3177 = vmatprep.subr.bf16.mxu1 %v14516_v31  ;;  %v14543_v31 = vld [vmem:[#allocation77_spill] sm:$0xff] }
 0x25c   : > { %3145 = vmatpush1.bf16.msra.mxu0 %v14517_v3  ;;  %v14544_v3 = vld [vmem:[#allocation92_spill] sm:$0xff] }
 0x25d   : > { %3178 = vmatpush1.bf16.msra.mxu1 %v14518_v20  ;;  %3146 = vmatprep.subr.bf16.mxu0 %v14519_v33  ;;  %v14545_v20 = vld [vmem:[#allocation79_spill] sm:$0xff]  ;;  %v14546_v33 = vld [vmem:[#allocation94_spill] sm:$0xff] }
 0x25e   : > { %3179 = vmatprep.subr.bf16.mxu1 %v14520_v50  ;;  %v14547_v50 = vld [vmem:[#allocation81_spill] sm:$0xff] }
 0x260   : > { %3147 = vmatpush1.bf16.msra.mxu0 %v14521_v48  ;;  %v14548_v48 = vld [vmem:[#allocation96_spill] sm:$0xff] }
 0x261   : > { %3180 = vmatpush1.bf16.msra.mxu1 %v14522_v21  ;;  %3148 = vmatprep.subr.bf16.mxu0 %v9100_v8  ;;  %v14528_v8 = vld [vmem:[#allocation67_spill] sm:$0xff] }
 0x262   : > { %3181 = vmatprep.subr.bf16.mxu1 %v14523_v47  ;;  %v14549_v21 = vld [vmem:[#allocation83_spill] sm:$0xff]  ;;  %v14550_v47 = vld [vmem:[#allocation85_spill] sm:$0xff] }
 0x264   : > { %3149 = vmatpush1.bf16.msra.mxu0 %v9112_v0  ;;  %v14529_v0 = vld [vmem:[#allocation69_spill] sm:$0xff] }
 0x265   : > { %3182 = vmatpush1.bf16.msra.mxu1 %v14524_v51  ;;  %3150 = vmatprep.subr.bf16.mxu0 %v9124_v1  ;;  %v14531_v1 = vld [vmem:[#allocation71_spill] sm:$0xff]  ;;  %v14552_v51 = vld [vmem:[#allocation89_spill] sm:$0xff] }
 0x266   : > { %3183 = vmatprep.subr.bf16.mxu1 %v14525_v6  ;;  %v14553_v6 = vld [vmem:[#allocation91_spill] sm:$0xff] }
 0x268   : > { %3151 = vmatpush1.bf16.msra.mxu0 %v9136_v63  ;;  %v14533_v63 = vld [vmem:[#allocation72_spill] sm:$0xff] }
 0x269   : > { %3184 = vmatpush1.bf16.msra.mxu1 %v14526_v23  ;;  %3288 = vmatprep.subr.bf16.mxu0 %v9150_v5  ;;  %v14536_v5 = vld [vmem:[#allocation84_spill] sm:$0xff]  ;;  %v14554_v23 = vld [vmem:[#allocation93_spill] sm:$0xff] }
 0x26a   : > { %3185 = vmatprep.subr.bf16.mxu1 %v14527_v24  ;;  %v14557_v24 = vld [vmem:[#allocation105_spill] sm:$0xff] }
 0x26b   : > { %3153 = vmatmul.mubr.bf16.vlgmr.msra.gmra.mrb[32].mxu0 %v9732_v12 }
 0x26c   : > { %3289 = vmatpush1.bf16.msra.mxu0 %v9164_v57  ;;  %v14539_v57 = vld [vmem:[#allocation75_spill] sm:$0xff] }
 0x26d   : > { %3186 = vmatpush1.bf16.msra.mxu1 %v14528_v8  ;;  %3290 = vmatprep.subr.bf16.mxu0 %v14530_v36  ;;  %v14559_v8 = vld [vmem:[#allocation107_spill] sm:$0xff] }
 0x26e   : > { %3187 = vmatprep.subr.bf16.mxu1 %v14529_v0  ;;  %v14561_v0 = vld [vmem:[#allocation109_spill] sm:$0xff]  ;;  %v14563_v36 = vld [vmem:[#allocation111_spill] sm:$0xff] }
 0x270   : > { %3291 = vmatpush1.bf16.msra.mxu0 %v14532_v42  ;;  %v14567_v42 = vld [vmem:[#allocation115_spill] sm:$0xff] }
 0x271   : > { %3188 = vmatpush1.bf16.msra.mxu1 %v14531_v1  ;;  %3292 = vmatprep.subr.bf16.mxu0 %v14534_v40  ;;  %v14565_v1 = vld [vmem:[#allocation113_spill] sm:$0xff] }
 0x272   : > { %3189 = vmatprep.subr.bf16.mxu1 %v14533_v63  ;;  %v14568_v63 = vld [vmem:[#allocation103_spill] sm:$0xff]  ;;  %v14569_v40 = vld [vmem:[#allocation117_spill] sm:$0xff] }
 0x274   : > { %3293 = vmatpush1.bf16.msra.mxu0 %v14536_v5  ;;  %v14571_v5 = vld [vmem:[#allocation119_spill] sm:$0xff] }
 0x275   : > { %3190 = vmatpush1.bf16.msra.mxu1 %v14535_v11  ;;  %3294 = vmatprep.subr.bf16.mxu0 %v14538_v16  ;;  %v14570_v11 = vld [vmem:[#allocation104_spill] sm:$0xff]  ;;  %v9866_v16 = vld [vmem:[%s13891_s3 + $0x270] ss:$24 sps:$4 sm:$0xff]  }
 0x276   : > { %3191 = vmatprep.subr.bf16.mxu1 %v14537_v15  ;;  %v14572_v15 = vld [vmem:[#allocation106_spill] sm:$0xff] }
 0x278   : > { %3295 = vmatpush1.bf16.msra.mxu0 %v14540_v19  ;;  %v9873_v19 = vld [vmem:[%s13891_s3 + $0x2a4] ss:$24 sps:$4 sm:$0xff]  }
 0x279   : > { %3192 = vmatpush1.bf16.msra.mxu1 %v14539_v57  ;;  %3296 = vmatprep.subr.bf16.mxu0 %v14542_v29  ;;  %v14573_v57 = vld [vmem:[#allocation108_spill] sm:$0xff] }
 0x27a   : > { %3329 = vmatprep.subr.bf16.mxu1 %v14541_v28  ;;  %v14574_v28 = vld [vmem:[#allocation110_spill] sm:$0xff]  ;;  %v9880_v29 = vld [vmem:[%s13891_s3 + $0x2a0] ss:$24 sps:$4 sm:$0xff]  }
 0x27c   : > { %3194 = vmatmul.mubr.bf16.vlgmr.msra.gmra.mrb[32].mxu1 %v9732_v12  ;;  %3297 = vmatpush1.bf16.msra.mxu0 %v14544_v3  ;;  %v14551_v12 = vld [vmem:[#allocation87_spill] sm:$0xff] }
 0x27d   : > { %3330 = vmatpush1.bf16.msra.mxu1 %v14543_v31  ;;  %3298 = vmatprep.subr.bf16.mxu0 %v14546_v33  ;;  %v14575_v31 = vld [vmem:[#allocation112_spill] sm:$0xff]  ;;  %v9887_v3 = vld [vmem:[%s13891_s3 + $0x2d4] ss:$24 sps:$4 sm:$0xff]   ;;  %v9894_v33 = vld [vmem:[%s13891_s3 + $0x2d0] ss:$24 sps:$4 sm:$0xff]  }
 0x27e   : > { %3331 = vmatprep.subr.bf16.mxu1 %v14545_v20  ;;  %v14576_v20 = vld [vmem:[#allocation114_spill] sm:$0xff] }
 0x280   : > { %3299 = vmatpush1.bf16.msra.mxu0 %v14548_v48  ;;  %v9901_v48 = vld [vmem:[%s13891_s3 + $0x14] ss:$24 sps:$4 sm:$0xff]  }
 0x281   : > { %3332 = vmatpush1.bf16.msra.mxu1 %v14547_v50  ;;  %3300 = vmatprep.subr.bf16.mxu0 %v9308_v61  ;;  %v14555_v61 = vld [vmem:[#allocation95_spill] sm:$0xff]  ;;  %v14577_v50 = vld [vmem:[#allocation116_spill] sm:$0xff] }
 0x282   : > { %3333 = vmatprep.subr.bf16.mxu1 %v14549_v21  ;;  %v14578_v21 = vld [vmem:[#allocation118_spill] sm:$0xff] }
 0x284   : > { %3301 = vmatpush1.bf16.msra.mxu0 %v9320_v60  ;;  %v14556_v60 = vld [vmem:[#allocation97_spill] sm:$0xff] }
 0x285   : > { %3334 = vmatpush1.bf16.msra.mxu1 %v14550_v47  ;;  %3302 = vmatprep.subr.bf16.mxu0 %v9332_v58  ;;  %v14558_v58 = vld [vmem:[#allocation98_spill] sm:$0xff]  ;;  %v14579_v47 = vld [vmem:[#allocation120_spill] sm:$0xff] }
 0x286   : > { %3335 = vmatprep.subr.bf16.mxu1 %v14551_v12  ;;  %v9909_v12 = vld [vmem:[%s13891_s3 + $0x278] ss:$24 sps:$4 sm:$0xff]  }
 0x288   : > { %3303 = vmatpush1.bf16.msra.mxu0 %v9344_v38  ;;  %v14560_v38 = vld [vmem:[#allocation99_spill] sm:$0xff] }
 0x289   : > { %3336 = vmatpush1.bf16.msra.mxu1 %v14552_v51  ;;  %3304 = vmatprep.subr.bf16.mxu0 %v9356_v49  ;;  %v14562_v49 = vld [vmem:[#allocation100_spill] sm:$0xff]  ;;  %v9915_v51 = vld [vmem:[%s13891_s3 + $0x2ac] ss:$24 sps:$4 sm:$0xff]  }
 0x28a   : > { %3337 = vmatprep.subr.bf16.mxu1 %v14553_v6  ;;  %v9921_v6 = vld [vmem:[%s13891_s3 + $0x2a8] ss:$24 sps:$4 sm:$0xff]  }
 0x28c   : > { %3305 = vmatpush1.bf16.msra.mxu0 %v9368_v9  ;;  %v14564_v9 = vld [vmem:[#allocation101_spill] sm:$0xff] }
 0x28d   : > { %3338 = vmatpush1.bf16.msra.mxu1 %v14554_v23  ;;  %3306 = vmatprep.subr.bf16.mxu0 %v9380_v59  ;;  %v14566_v59 = vld [vmem:[#allocation102_spill] sm:$0xff]  ;;  %v9927_v23 = vld [vmem:[%s13891_s3 + $0x2dc] ss:$24 sps:$4 sm:$0xff]  }
 0x28e   : > { %3339 = vmatprep.subr.bf16.mxu1 %v14555_v61  ;;  %v9933_v61 = vld [vmem:[%s13891_s3 + $0x2d8] ss:$24 sps:$4 sm:$0xff]  }
 0x290   : > { %3307 = vmatpush1.bf16.msra.mxu0 %v14557_v24 }
 0x291   : > { %3340 = vmatpush1.bf16.msra.mxu1 %v14556_v60  ;;  %3308 = vmatprep.subr.bf16.mxu0 %v14559_v8  ;;  %v9939_v60 = vld [vmem:[%s13891_s3 + $0x304] ss:$24 sps:$4 sm:$0xff]  }
 0x292   : > { %3341 = vmatprep.subr.bf16.mxu1 %v14558_v58 }
 0x294   : > { %3309 = vmatpush1.bf16.msra.mxu0 %v14561_v0 }
 0x295   : > { %3342 = vmatpush1.bf16.msra.mxu1 %v14560_v38  ;;  %3310 = vmatprep.subr.bf16.mxu0 %v14563_v36 }
 0x296   : > { %3343 = vmatprep.subr.bf16.mxu1 %v14562_v49  ;;  %v2868_v49 = vld [vmem:[#allocation4 + $0x10] sm:$0xc] }
 0x298   : > { %3311 = vmatpush1.bf16.msra.mxu0 %v14565_v1 }
 0x299   : > { %3344 = vmatpush1.bf16.msra.mxu1 %v14564_v9  ;;  %3312 = vmatprep.subr.bf16.mxu0 %v14567_v42  ;;  %v2869_v42 = vld [vmem:[#allocation4 + $0x18] sm:$0xc] }
 0x29a   : > { %3345 = vmatprep.subr.bf16.mxu1 %v14566_v59 }
 0x29c   : > { %3313 = vmatpush1.bf16.msra.mxu0 %v14569_v40 }
 0x29d   : > { %3346 = vmatpush1.bf16.msra.mxu1 %v14568_v63  ;;  %3314 = vmatprep.subr.bf16.mxu0 %v14571_v5 }
 0x29e   : > { %3347 = vmatprep.subr.bf16.mxu1 %v14570_v11 }
 0x2a0   : > { %3315 = vmatpush1.bf16.msra.mxu0 %v9866_v16 }
 0x2a1   : > { %3348 = vmatpush1.bf16.msra.mxu1 %v14572_v15  ;;  %3316 = vmatprep.subr.bf16.mxu0 %v9873_v19 }
 0x2a2   : > { %3349 = vmatprep.subr.bf16.mxu1 %v14573_v57 }
 0x2a4   : > { %3317 = vmatpush1.bf16.msra.mxu0 %v9880_v29 }
 0x2a5   : > { %3350 = vmatpush1.bf16.msra.mxu1 %v14574_v28  ;;  %3318 = vmatprep.subr.bf16.mxu0 %v9887_v3 }
 0x2a6   : > { %3351 = vmatprep.subr.bf16.mxu1 %v14575_v31 }
 0x2a8   : > { %3319 = vmatpush1.bf16.msra.mxu0 %v9894_v33 }
 0x2a9   : > { %3352 = vmatpush1.bf16.msra.mxu1 %v14576_v20  ;;  %3370 = vmatprep.subr.bf16.mxu0 %v9901_v48 }
 0x2aa   : > { %3353 = vmatprep.subr.bf16.mxu1 %v14577_v50 }
 0x2ad   : > { %3354 = vmatpush1.bf16.msra.mxu1 %v14578_v21 }
 0x2ae   : > { %3355 = vmatprep.subr.bf16.mxu1 %v14579_v47  ;;  %v3057_v47 = vrot.slane %v9509_v54, 6 }
 0x2b1   : > { %3356 = vmatpush1.bf16.msra.mxu1 %v9909_v12 }
 0x2b2   : > { %3357 = vmatprep.subr.bf16.mxu1 %v9915_v51 }
 0x2b5   : > { %3358 = vmatpush1.bf16.msra.mxu1 %v9921_v6 }
 0x2b6   : > { %3359 = vmatprep.subr.bf16.mxu1 %v9927_v23 }
 0x2b9   : > { %3360 = vmatpush1.bf16.msra.mxu1 %v9933_v61 }
 0x2ba   : > { %3493 = vmatprep.subr.bf16.mxu1 %v9939_v60 }
 0x2be   : > { %v2908_v24 = vpop.f32.mrb[24].mxu0  ;;  %v2949_v58 = vpop.f32.mrb[24].mxu1 }
 0x2bf   : > { %v3019_v8 = vrot.slane %v2949_v58, 6  ;;  %v2910_v38 = vpop.f32.mrb[25].mxu0  ;;  %v2951_v0 = vpop.f32.mrb[25].mxu1  ;;  %v2999_v50 = vrot.slane %v2908_v24, 6 }
 0x2c0   : > { %v3020_v36 = vrot.slane %v2951_v0, 6  ;;  %v2912_v9 = vpop.f32.mrb[26].mxu0  ;;  %v2953_v1 = vpop.f32.mrb[26].mxu1  ;;  %v3000_v21 = vrot.slane %v2910_v38, 6  ;;  %v3058_v0 = vrot.slane %v9511_v44, 6 }
 0x2c1   : > { %v3023_v59 = vadd.f32 %v3019_v8, %v2868_v49  ;;  %v2913_v63 = vpop.f32.mrb[27].mxu0  ;;  %v2954_v40 = vpop.f32.mrb[27].mxu1  ;;  %v2866_v8 = vld [vmem:[#allocation4] sm:$0xc]  ;;  %v2867_v1 = vld [vmem:[#allocation4 + $0x8] sm:$0xc] }
 0x2c2   : > { %v3024_v11 = vadd.f32 %v3020_v36, %v2869_v42  ;;  %v3003_v9 = vadd.f32 %v2999_v50, %v2866_v8 }
 0x2c3   : > { %v6289_v5 = vmul.f32 -1.442695, %v3023_v59  ;;  %v3004_v59 = vadd.f32 %v3000_v21, %v2867_v1  ;;  %v2870_v1 = vld [vmem:[#allocation4 + $0x20] sm:$0xc] }
 0x2c4   : > { %v6290_v15 = vmul.f32 -1.442695, %v3024_v11  ;;  %v6287_v63 = vmul.f32 -1.442695, %v3003_v9 }
 0x2c5   : > { %6834 = vpow2.f32 %v6289_v5  ;;  %v6288_v40 = vmul.f32 -1.442695, %v3004_v59 }
 0x2c6   : > { %6836 = vpow2.f32 %v6290_v15  ;;  %v14580_v15 = vld [vmem:[#allocation121_spill] sm:$0xff] }
 0x2cf   : > { %v6835_v57 = vpop.eup %6834 }
 0x2d0   : > { %v3031_v28 = vadd.f32 1.0, %v6835_v57  ;;  %v6837_v31 = vpop.eup %6836 }
 0x2d1   : > { %v3032_v20 = vadd.f32 1.0, %v6837_v31 }
 0x2d2   : > { %6838 = vrcp.f32 %v3031_v28  ;;  %v14581_v28 = vld [vmem:[#allocation122_spill] sm:$0xff] }
 0x2d3   : > { %6840 = vrcp.f32 %v3032_v20 }
 0x2d4   : > { %6842 = vpow2.f32 %v6287_v63 }
 0x2d5   : > { %6844 = vpow2.f32 %v6288_v40  ;;  %v2871_v40 = vld [vmem:[#allocation4 + $0x28] sm:$0xc] }
 0x2dc   : > { %v6839_v58 = vpop.eup %6838 }
 0x2dd   : > { %v3061_v49 = vmul.f32 %v6839_v58, %v3057_v47  ;;  %v6841_v36 = vpop.eup %6840 }
 0x2de   : > { %v3062_v42 = vmul.f32 %v6841_v36, %v3058_v0  ;;  %v6843_v11 = vpop.eup %6842 }
 0x2df   : > { %v6845_v5 = vpop.eup %6844  ;;  %v3011_v24 = vadd.f32 1.0, %v6843_v11 }
 0x2e0   : > { %v3012_v38 = vadd.f32 1.0, %v6845_v5 }
 0x2e1   : > { %6846 = vrcp.f32 %v3011_v24 }
 0x2e2   : > { %6848 = vrcp.f32 %v3012_v38 }
 0x2eb   : > { %v6847_v47 = vpop.eup %6846 }
 0x2ec   : > { %v6849_v0 = vpop.eup %6848 }
 0x2fe   : > { %v2990_v54 = vpop.f32.mrb[28].mxu0 }
 0x2ff   : > { %v3037_v57 = vadd.f32 %v2990_v54, %v14580_v15  ;;  %v2992_v44 = vpop.f32.mrb[29].mxu0  ;;  %v3051_v54 = vsub.f32 1.0, %v6839_v58 }
 0x300   : > { %v3038_v31 = vadd.f32 %v2992_v44, %v14581_v28  ;;  %v2994_v20 = vpop.f32.mrb[30].mxu0 }
 0x301   : > { %v3041_v50 = vrot.slane %v3037_v57, 6  ;;  %v2995_v21 = vpop.f32.mrb[31].mxu0  ;;  %v3052_v20 = vsub.f32 1.0, %v6841_v36  ;;  %v10023_v36 = vld [vmem:[%s13891_s3 + $0x160] ss:$24 sps:$4 sm:$0xff]  }
 0x302   : > { %v3042_v8 = vrot.slane %v3038_v31, 6 }
 0x303   : > { %v3045_v9 = vmul.f32 %v6847_v47, %v3041_v50 }
 0x304   : > { %v3046_v59 = vmul.f32 %v6849_v0, %v3042_v8 }
 0x305   : > { %v3047_v63 = vadd.f32 %v3045_v9, %v2870_v1  ;;  %v10035_v1 = vld [vmem:[%s13891_s3 + $0x450] ss:$24 sps:$4 sm:$0xff]  }
 0x306   : > { %v3048_v11 = vadd.f32 %v3046_v59, %v2871_v40  ;;  %v10041_v59 = vld [vmem:[%s13891_s3 + $0x484] ss:$24 sps:$4 sm:$0xff]  }
 0x307   : > { %6850 = vtanh.f32 %v3047_v63  ;;  %v10047_v63 = vld [vmem:[%s13891_s3 + $0x190] ss:$24 sps:$4 sm:$0xff]  }
 0x308   : > { %6852 = vtanh.f32 %v3048_v11  ;;  %v10053_v11 = vld [vmem:[%s13891_s3 + $0x1c4] ss:$24 sps:$4 sm:$0xff]  }
 0x30f   : > { %v3113_v5 = vpop.f32.mrb[28].mxu1 }
 0x310   : > { %v3115_v24 = vpop.f32.mrb[29].mxu1 }
 0x311   : > { %v3117_v38 = vpop.f32.mrb[30].mxu1  ;;  %v6851_v44 = vpop.eup %6850 }
 0x312   : > { %v3118_v57 = vpop.f32.mrb[31].mxu1  ;;  %v6853_v21 = vpop.eup %6852  ;;  %v3053_v31 = vmul.f32 %v6851_v44, %v3051_v54  ;;  %v10065_v54 = vld [vmem:[%s13891_s3 + $0x4b4] ss:$24 sps:$4 sm:$0xff]  }
 0x313   : > { %v3054_v25 = vmul.f32 %v6853_v21, %v3052_v20  ;;  %v3067_v44 = vld [vmem:[#allocation5 + $0x40] sm:$0x30] }
 0x314   : > { %v9946_v50 = vadd.f32 %v3061_v49, %v3053_v31  ;;  %v10017_v49 = vld [vmem:[%s13891_s3 + $0x454] ss:$24 sps:$4 sm:$0xff]  }
 0x315   : > { %v9948_v47 = vadd.f32 %v3062_v42, %v3054_v25  ;;  %v10011_v25 = vld [vmem:[%s13891_s3 + $0x420] ss:$24 sps:$4 sm:$0xff]   ;;  %v10029_v42 = vld [vmem:[%s13891_s3 + $0x194] ss:$24 sps:$4 sm:$0xff]  }
 0x316   : > { %3270 = vst [vmem:[%s7846_s17] sm:$0xc] %v9946_v50  ;;  %v3280_v8 = vpack.c.bf16 %v9946_v50, %v9946_v50 }
 0x317   : > { %3271 = vst [vmem:[%s7846_s17 + $0x8] sm:$0xc] %v9948_v47  ;;  %v3281_v58 = vpack.c.bf16 %v9948_v47, %v9948_v47 }
 0x318   : > { %v9958_v9 = vrot.slane %v3280_v8, 1  ;;  %v3068_v8 = vld [vmem:[#allocation5 + $0x48] sm:$0x30] }
 0x319   : > { %v3285_v0 = vrot.slane %v3281_v58, 1  ;;  %v10071_v58 = vld [vmem:[%s13891_s3 + $0x1c0] ss:$24 sps:$4 sm:$0xff]  }
 0x31b   : > { %3320 = vmatprep.mubr.bf16.mxu0 %v3285_v0  ;;  %3361 = vmatprep.mubr.bf16.mxu1 %v3285_v0 }
 0x31c   : > { %3321 = vmatmul.mubr.bf16.vlgmr.msra.gmra.mrb[36].mxu0 %v9958_v9  ;;  %3362 = vmatmul.mubr.bf16.vlgmr.msra.gmra.mrb[36].mxu1 %v9958_v9 }
 0x31d   : > { %3371 = vmatpush1.bf16.msra.mxu0 %v9528_v55  ;;  %3402 = vmatprep.mubr.bf16.mxu0 %v3285_v0  ;;  %v3204_v55 = vrot.slane %v3113_v5, 4  ;;  %v10059_v5 = vld [vmem:[%s13891_s3 + $0x480] ss:$24 sps:$4 sm:$0xff]  }
 0x31e   : > { %3372 = vmatprep.subr.bf16.mxu0 %v9534_v2  ;;  %3494 = vmatpush1.bf16.msra.mxu1 %v9540_v7  ;;  %v3205_v2 = vrot.slane %v3115_v24, 4  ;;  %v14582_v7 = vld [vmem:[#allocation123_spill] sm:$0xff] }
 0x31f   : > { %3495 = vmatprep.subr.bf16.mxu1 %v9546_v4  ;;  %v3065_v4 = vld [vmem:[#allocation5 + $0x30] sm:$0x30] }
 0x321   : > { %3373 = vmatpush1.bf16.msra.mxu0 %v9552_v52  ;;  %v14583_v52 = vld [vmem:[#allocation124_spill] sm:$0xff] }
 0x322   : > { %3374 = vmatprep.subr.bf16.mxu0 %v9558_v37  ;;  %3496 = vmatpush1.bf16.msra.mxu1 %v9564_v56  ;;  %v14584_v37 = vld [vmem:[#allocation125_spill] sm:$0xff]  ;;  %v3208_v56 = vadd.f32 %v3204_v55, %v3065_v4  ;;  %v10083_v4 = vld [vmem:[%s13891_s3 + $0x4b0] ss:$24 sps:$4 sm:$0xff]  }
 0x323   : > { %3497 = vmatprep.subr.bf16.mxu1 %v9570_v43  ;;  %v3066_v43 = vld [vmem:[#allocation5 + $0x38] sm:$0x30] }
 0x325   : > { %3375 = vmatpush1.bf16.msra.mxu0 %v9576_v35  ;;  %v14585_v35 = vld [vmem:[#allocation126_spill] sm:$0xff] }
 0x326   : > { %3376 = vmatprep.subr.bf16.mxu0 %v9582_v39  ;;  %3498 = vmatpush1.bf16.msra.mxu1 %v9588_v46  ;;  %v3209_v39 = vadd.f32 %v3205_v2, %v3066_v43  ;;  %v14586_v46 = vld [vmem:[#allocation127_spill] sm:$0xff] }
 0x327   : > { %3499 = vmatprep.subr.bf16.mxu1 %v9594_v45  ;;  %v9986_v45 = vld [vmem:[%s13891_s3 + $0x134] ss:$24 sps:$4 sm:$0xff]  }
 0x329   : > { %3377 = vmatpush1.bf16.msra.mxu0 %v9600_v53  ;;  %v6291_v53 = vmul.f32 -1.442695, %v3208_v56 }
 0x32a   : > { %3378 = vmatprep.subr.bf16.mxu0 %v9606_v62  ;;  %3500 = vmatpush1.bf16.msra.mxu1 %v9612_v41  ;;  %v9993_v62 = vld [vmem:[%s13891_s3 + $0x424] ss:$24 sps:$4 sm:$0xff]   ;;  %v6292_v41 = vmul.f32 -1.442695, %v3209_v39  ;;  %v10095_v39 = vld [vmem:[%s13891_s3 + $0x1f0] ss:$24 sps:$4 sm:$0xff]  }
 0x32b   : > { %3501 = vmatprep.subr.bf16.mxu1 %v9618_v34  ;;  %v9999_v34 = vld [vmem:[%s13891_s3 + $0x130] ss:$24 sps:$4 sm:$0xff]   ;;  %6854 = vpow2.f32 %v6291_v53  ;;  %v10107_v53 = vld [vmem:[%s13891_s3 + $0x4e0] ss:$24 sps:$4 sm:$0xff]  }
 0x32c   : > { %6856 = vpow2.f32 %v6292_v41  ;;  %v10113_v41 = vld [vmem:[%s13891_s3 + $0x514] ss:$24 sps:$4 sm:$0xff]  }
 0x32d   : > { %3379 = vmatpush1.bf16.msra.mxu0 %v14582_v7  ;;  %v10077_v7 = vld [vmem:[%s13891_s3 + $0x1f4] ss:$24 sps:$4 sm:$0xff]  }
 0x32e   : > { %3380 = vmatprep.subr.bf16.mxu0 %v14583_v52  ;;  %3502 = vmatpush1.bf16.msra.mxu1 %v14584_v37  ;;  %v10089_v37 = vld [vmem:[%s13891_s3 + $0x4e4] ss:$24 sps:$4 sm:$0xff]  }
 0x32f   : > { %3503 = vmatprep.subr.bf16.mxu1 %v14585_v35 }
 0x331   : > { %3381 = vmatpush1.bf16.msra.mxu0 %v14586_v46  ;;  %v10101_v46 = vld [vmem:[%s13891_s3 + $0x224] ss:$24 sps:$4 sm:$0xff]  }
 0x332   : > { %3382 = vmatprep.subr.bf16.mxu0 %v9986_v45  ;;  %3504 = vmatpush1.bf16.msra.mxu1 %v9655_v32  ;;  %v10005_v32 = vld [vmem:[%s13891_s3 + $0x164] ss:$24 sps:$4 sm:$0xff]  }
 0x333   : > { %3505 = vmatprep.subr.bf16.mxu1 %v9993_v62 }
 0x335   : > { %3383 = vmatpush1.bf16.msra.mxu0 %v9999_v34  ;;  %v6855_v21 = vpop.eup %6854 }
 0x336   : > { %3384 = vmatprep.subr.bf16.mxu0 %v10005_v32  ;;  %3506 = vmatpush1.bf16.msra.mxu1 %v10011_v25  ;;  %v6857_v55 = vpop.eup %6856  ;;  %v3216_v56 = vadd.f32 1.0, %v6855_v21  ;;  %v10149_v21 = vld [vmem:[%s13891_s3 + $0x284] ss:$24 sps:$4 sm:$0xff]  }
 0x337   : > { %3507 = vmatprep.subr.bf16.mxu1 %v10017_v49  ;;  %v3217_v35 = vadd.f32 1.0, %v6857_v55  ;;  %14589 = vst [vmem:[#allocation8_spill] sm:$0xff] %v10149_v21 }
 0x339   : > { %3385 = vmatpush1.bf16.msra.mxu0 %v10023_v36 }
 0x33a   : > { %3386 = vmatprep.subr.bf16.mxu0 %v10029_v42  ;;  %3508 = vmatpush1.bf16.msra.mxu1 %v10035_v1 }
 0x33b   : > { %3509 = vmatprep.subr.bf16.mxu1 %v10041_v59 }
 0x33d   : > { %3387 = vmatpush1.bf16.msra.mxu0 %v10047_v63 }
 0x33e   : > { %v3154_v40 = vpop.f32.mrb[32].mxu0  ;;  %3388 = vmatprep.subr.bf16.mxu0 %v10053_v11  ;;  %3510 = vmatpush1.bf16.msra.mxu1 %v10059_v5 }
 0x33f   : > { %v3224_v24 = vrot.slane %v3154_v40, 4  ;;  %v3156_v38 = vpop.f32.mrb[33].mxu0  ;;  %3511 = vmatprep.subr.bf16.mxu1 %v10065_v54  ;;  %v10119_v40 = vld [vmem:[%s13891_s3 + $0x220] ss:$24 sps:$4 sm:$0xff]  }
 0x340   : > { %v3225_v57 = vrot.slane %v3156_v38, 4  ;;  %v3158_v20 = vpop.f32.mrb[34].mxu0  ;;  %v10131_v38 = vld [vmem:[%s13891_s3 + $0x510] ss:$24 sps:$4 sm:$0xff]  }
 0x341   : > { %v3228_v31 = vadd.f32 %v3224_v24, %v3067_v44  ;;  %3389 = vmatpush1.bf16.msra.mxu0 %v10071_v58  ;;  %v3159_v0 = vpop.f32.mrb[35].mxu0  ;;  %v10125_v24 = vld [vmem:[%s13891_s3 + $0x254] ss:$24 sps:$4 sm:$0xff]   ;;  %v10137_v44 = vld [vmem:[%s13891_s3 + $0x544] ss:$24 sps:$4 sm:$0xff]  }
 0x342   : > { %v3229_v2 = vadd.f32 %v3225_v57, %v3068_v8  ;;  %3390 = vmatprep.subr.bf16.mxu0 %v10077_v7  ;;  %3512 = vmatpush1.bf16.msra.mxu1 %v10083_v4  ;;  %14587 = vst [vmem:[#allocation7_spill] sm:$0xff] %v10137_v44  ;;  %v10143_v57 = vld [vmem:[%s13891_s3 + $0x250] ss:$24 sps:$4 sm:$0xff]  }
 0x343   : > { %v6293_v52 = vmul.f32 -1.442695, %v3228_v31  ;;  %3513 = vmatprep.subr.bf16.mxu1 %v10089_v37  ;;  %14588 = vst [vmem:[#allocation9_spill] sm:$0xff] %v10143_v57  ;;  %v10155_v31 = vld [vmem:[%s13891_s3 + $0x540] ss:$24 sps:$4 sm:$0xff]  }
 0x344   : > { %v6294_v43 = vmul.f32 -1.442695, %v3229_v2  ;;  %14590 = vst [vmem:[#allocation10_spill] sm:$0xff] %v10155_v31  ;;  %v10162_v2 = vld [vmem:[%s13891_s3 + $0x574] ss:$24 sps:$4 sm:$0xff]  }
 0x345   : > { %6858 = vpow2.f32 %v6293_v52  ;;  %3391 = vmatpush1.bf16.msra.mxu0 %v10095_v39 }
 0x346   : > { %6860 = vpow2.f32 %v6294_v43  ;;  %3392 = vmatprep.subr.bf16.mxu0 %v10101_v46  ;;  %3514 = vmatpush1.bf16.msra.mxu1 %v10107_v53 }
 0x347   : > { %3515 = vmatprep.subr.bf16.mxu1 %v10113_v41  ;;  %6862 = vrcp.f32 %v3216_v56 }
 0x348   : > { %6864 = vrcp.f32 %v3217_v35 }
 0x349   : > { %3393 = vmatpush1.bf16.msra.mxu0 %v10119_v40 }
 0x34a   : > { %3394 = vmatprep.subr.bf16.mxu0 %v10125_v24  ;;  %3516 = vmatpush1.bf16.msra.mxu1 %v10131_v38 }
 0x34b   : > { %3517 = vmatprep.subr.bf16.mxu1 %v10137_v44 }
 0x34d   : > { %3395 = vmatpush1.bf16.msra.mxu0 %v10143_v57 }
 0x34e   : > { %3396 = vmatprep.subr.bf16.mxu0 %v10149_v21  ;;  %3518 = vmatpush1.bf16.msra.mxu1 %v10155_v31  ;;  %v10169_v31 = vld [vmem:[%s13891_s3 + $0x280] ss:$24 sps:$4 sm:$0xff]  }
 0x34f   : > { %v3195_v20 = vpop.f32.mrb[32].mxu1  ;;  %v6859_v8 = vpop.eup %6858  ;;  %3519 = vmatprep.subr.bf16.mxu1 %v10162_v2  ;;  %14591 = vst [vmem:[#allocation11_spill] sm:$0xff] %v10169_v31 }
 0x350   : > { %v3242_v0 = vadd.f32 %v3195_v20, %v9672_v13  ;;  %v3197_v55 = vpop.f32.mrb[33].mxu1  ;;  %v6861_v52 = vpop.eup %6860  ;;  %v3236_v56 = vadd.f32 1.0, %v6859_v8  ;;  %v10175_v8 = vld [vmem:[%s13891_s3 + $0x2b4] ss:$24 sps:$4 sm:$0xff]  }
 0x351   : > { %v3243_v43 = vadd.f32 %v3197_v55, %v9677_v14  ;;  %v3199_v35 = vpop.f32.mrb[34].mxu1  ;;  %v3237_v21 = vadd.f32 1.0, %v6861_v52  ;;  %3397 = vmatpush1.bf16.msra.mxu0 %v10169_v31  ;;  %v6863_v13 = vpop.eup %6862  ;;  %14592 = vst [vmem:[#allocation13_spill] sm:$0xff] %v10175_v8  ;;  %v10193_v31 = vld [vmem:[%s13891_s3 + $0x2b0] ss:$24 sps:$4 sm:$0xff]  }
 0x352   : > { %v3246_v57 = vrot.slane %v3242_v0, 4  ;;  %v3200_v20 = vpop.f32.mrb[35].mxu1  ;;  %6866 = vrcp.f32 %v3236_v56  ;;  %3398 = vmatprep.subr.bf16.mxu0 %v10175_v8  ;;  %v10181_v0 = vld [vmem:[%s13891_s3 + $0x570] ss:$24 sps:$4 sm:$0xff]   ;;  %v6865_v55 = vpop.eup %6864  ;;  %v10187_v56 = vld [vmem:[%s13891_s3 + $0x5a4] ss:$24 sps:$4 sm:$0xff]  }
 0x353   : > { %v3247_v44 = vrot.slane %v3243_v43, 4  ;;  %3520 = vmatpush1.bf16.msra.mxu1 %v10181_v0  ;;  %6868 = vrcp.f32 %v3237_v21  ;;  %v3069_v43 = vld [vmem:[#allocation5 + $0x50] sm:$0x30]  ;;  %v3070_v8 = vld [vmem:[#allocation5 + $0x58] sm:$0x30] }
 0x354   : > { %v3250_v52 = vmul.f32 %v6863_v13, %v3246_v57  ;;  %3521 = vmatprep.subr.bf16.mxu1 %v10187_v56  ;;  %v10199_v13 = vld [vmem:[%s13891_s3 + $0x2e4] ss:$24 sps:$4 sm:$0xff]   ;;  %v10211_v57 = vld [vmem:[%s13891_s3 + $0x5d4] ss:$24 sps:$4 sm:$0xff]  }
 0x355   : > { %v3251_v35 = vmul.f32 %v6865_v55, %v3247_v44  ;;  %3399 = vmatpush1.bf16.msra.mxu0 %v10193_v31  ;;  %14593 = vst [vmem:[#allocation12_spill] sm:$0xff] %v10199_v13  ;;  %v10205_v44 = vld [vmem:[%s13891_s3 + $0x5a0] ss:$24 sps:$4 sm:$0xff]   ;;  %14595 = vst [vmem:[#allocation15_spill] sm:$0xff] %v10211_v57  ;;  %v10223_v55 = vld [vmem:[%s13891_s3 + $0x30c] ss:$24 sps:$4 sm:$0xff]  }
 0x356   : > { %v3252_v20 = vadd.f32 %v3250_v52, %v3069_v43  ;;  %3400 = vmatprep.subr.bf16.mxu0 %v10199_v13  ;;  %14594 = vst [vmem:[#allocation14_spill] sm:$0xff] %v10205_v44  ;;  %14597 = vst [vmem:[#allocation16_spill] sm:$0xff] %v10223_v55  ;;  %v10229_v52 = vld [vmem:[%s13891_s3 + $0x5d0] ss:$24 sps:$4 sm:$0xff]   ;;  %v10235_v43 = vld [vmem:[%s13891_s3 + $0x314] ss:$24 sps:$4 sm:$0xff]  }
 0x357   : > { %v3253_v21 = vadd.f32 %v3251_v35, %v3070_v8  ;;  %3522 = vmatpush1.bf16.msra.mxu1 %v10205_v44  ;;  %v10217_v8 = vld [vmem:[%s13891_s3 + $0x2e0] ss:$24 sps:$4 sm:$0xff]   ;;  %14598 = vst [vmem:[#allocation18_spill] sm:$0xff] %v10229_v52  ;;  %14599 = vst [vmem:[#allocation19_spill] sm:$0xff] %v10235_v43  ;;  %v3262_v35 = vrot.slane %v9716_v22, 2 }
 0x358   : > { %6870 = vtanh.f32 %v3252_v20  ;;  %3523 = vmatprep.subr.bf16.mxu1 %v10211_v57  ;;  %14596 = vst [vmem:[#allocation17_spill] sm:$0xff] %v10217_v8  ;;  %v10256_v57 = vld [vmem:[%s13891_s3 + $0x338] ss:$24 sps:$4 sm:$0xff]   ;;  %v10262_v44 = vld [vmem:[%s13891_s3 + $0x36c] ss:$24 sps:$4 sm:$0xff]  }
 0x359   : > { %6872 = vtanh.f32 %v3253_v21  ;;  %3401 = vmatpush1.bf16.msra.mxu0 %v10217_v8  ;;  %v3263_v21 = vrot.slane %v9719_v10, 2  ;;  %v10244_v8 = vld [vmem:[%s13891_s3 + $0x308] ss:$24 sps:$4 sm:$0xff]   ;;  %14602 = vst [vmem:[#allocation22_spill] sm:$0xff] %v10256_v57 }
 0x35a   : > { %3534 = vmatprep.subr.bf16.mxu0 %v10223_v55  ;;  %14600 = vst [vmem:[#allocation21_spill] sm:$0xff] %v10244_v8  ;;  %v10270_v13 = vld [vmem:[%s13891_s3 + $0x368] ss:$24 sps:$4 sm:$0xff]  }
 0x35b   : > { %3524 = vmatpush1.bf16.msra.mxu1 %v10229_v52 }
 0x35c   : > { %3575 = vmatprep.subr.bf16.mxu1 %v10235_v43  ;;  %v6867_v20 = vpop.eup %6866  ;;  %3403 = vmatmul.mubr.bf16.vlgmr.msra.gmra.mrb[40].mxu0 %v9958_v9  ;;  %v10250_v43 = vld [vmem:[%s13891_s3 + $0x33c] ss:$24 sps:$4 sm:$0xff]  }
 0x35d   : > { %v6869_v55 = vpop.eup %6868  ;;  %3535 = vmatpush1.bf16.msra.mxu0 %v10244_v8  ;;  %v3266_v52 = vmul.f32 %v6867_v20, %v3262_v35  ;;  %14601 = vst [vmem:[#allocation20_spill] sm:$0xff] %v10250_v43  ;;  %v3256_v9 = vsub.f32 1.0, %v6867_v20 }
 0x35e   : > { %3536 = vmatprep.subr.bf16.mxu0 %v10250_v43  ;;  %v3267_v22 = vmul.f32 %v6869_v55, %v3263_v21  ;;  %v3257_v35 = vsub.f32 1.0, %v6869_v55 }
 0x361   : > { %3537 = vmatpush1.bf16.msra.mxu0 %v10256_v57  ;;  %v10278_v57 = vld [vmem:[%s13891_s3 + $0x39c] ss:$24 sps:$4 sm:$0xff]  }
 0x362   : > { %v6871_v10 = vpop.eup %6870  ;;  %3538 = vmatprep.subr.bf16.mxu0 %v10262_v44 }
 0x363   : > { %v6873_v8 = vpop.eup %6872  ;;  %v3258_v20 = vmul.f32 %v6871_v10, %v3256_v9  ;;  %v10298_v10 = vld [vmem:[%s13891_s3 + $0x3cc] ss:$24 sps:$4 sm:$0xff]  }
 0x364   : > { %v3259_v21 = vmul.f32 %v6873_v8, %v3257_v35 }
 0x365   : > { %v10265_v43 = vadd.f32 %v3266_v52, %v3258_v20  ;;  %3539 = vmatpush1.bf16.msra.mxu0 %v10270_v13  ;;  %v10307_v20 = vld [vmem:[%s13891_s3 + $0x3c8] ss:$24 sps:$4 sm:$0xff]  }
 0x366   : > { %v10273_v55 = vadd.f32 %v3267_v22, %v3259_v21  ;;  %3540 = vmatprep.subr.bf16.mxu0 %v10278_v57  ;;  %v10292_v22 = vld [vmem:[%s13891_s3 + $0x398] ss:$24 sps:$4 sm:$0xff]   ;;  %v10314_v21 = vld [vmem:[%s13891_s3 + $0x3fc] ss:$24 sps:$4 sm:$0xff]  }
 0x367   : > { %3272 = vst [vmem:[%s7851_s21 + $0x10] sm:$0x30] %v10265_v43  ;;  %v3485_v8 = vpack.c.bf16 %v10265_v43, %v10265_v43 }
 0x368   : > { %3273 = vst [vmem:[%s7851_s21 + $0x18] sm:$0x30] %v10273_v55  ;;  %v3486_v52 = vpack.c.bf16 %v10273_v55, %v10273_v55 }
 0x369   : > { %3541 = vmatpush1.bf16.msra.mxu0 %v10292_v22  ;;  %v10301_v35 = vrot.slane %v3485_v8, 2  ;;  %v10321_v8 = vld [vmem:[%s13891_s3 + $0x3f8] ss:$24 sps:$4 sm:$0xff]  }
 0x36a   : > { %v3490_v9 = vrot.slane %v3486_v52, 2  ;;  %3542 = vmatprep.subr.bf16.mxu0 %v10298_v10  ;;  %14603 = vst [vmem:[#allocation23_spill] sm:$0xff] %v10321_v8  ;;  %v10354_v52 = vld [vmem:[%s13891_s3 + $0x458] ss:$24 sps:$4 sm:$0xff]  }
 0x36b   : > { %14608 = vst [vmem:[#allocation28_spill] sm:$0xff] %v10354_v52 }
 0x36c   : > { %3525 = vmatprep.mubr.bf16.mxu1 %v3490_v9  ;;  %3566 = vmatprep.mubr.bf16.mxu0 %v3490_v9 }
 0x36d   : > { %3526 = vmatmul.mubr.bf16.vlgmr.msra.gmra.mrb[40].mxu1 %v10301_v35  ;;  %3543 = vmatpush1.bf16.msra.mxu0 %v10307_v20 }
 0x36e   : > { %3576 = vmatpush1.bf16.msra.mxu1 %v9739_v26  ;;  %3607 = vmatprep.mubr.bf16.mxu1 %v3490_v9  ;;  %v10328_v26 = vld [vmem:[%s13891_s3 + $0x42c] ss:$24 sps:$4 sm:$0xff]  }
 0x36f   : > { %3544 = vmatprep.subr.bf16.mxu0 %v10314_v21  ;;  %3577 = vmatprep.subr.bf16.mxu1 %v9746_v18  ;;  %14604 = vst [vmem:[#allocation24_spill] sm:$0xff] %v10328_v26  ;;  %v10335_v18 = vld [vmem:[%s13891_s3 + $0x428] ss:$24 sps:$4 sm:$0xff]   ;;  %v10366_v9 = vld [vmem:[%s13891_s3 + $0x48c] ss:$24 sps:$4 sm:$0xff]  }
 0x370   : > { %14605 = vst [vmem:[#allocation25_spill] sm:$0xff] %v10335_v18  ;;  %14610 = vst [vmem:[#allocation32_spill] sm:$0xff] %v10366_v9 }
 0x371   : > { %3545 = vmatpush1.bf16.msra.mxu0 %v10321_v8 }
 0x372   : > { %3578 = vmatpush1.bf16.msra.mxu1 %v9753_v27  ;;  %3546 = vmatprep.subr.bf16.mxu0 %v10328_v26  ;;  %v10342_v27 = vld [vmem:[%s13891_s3 + $0x45c] ss:$24 sps:$4 sm:$0xff]  }
 0x373   : > { %3579 = vmatprep.subr.bf16.mxu1 %v9760_v30  ;;  %14606 = vst [vmem:[#allocation26_spill] sm:$0xff] %v10342_v27  ;;  %v10348_v30 = vld [vmem:[%s13891_s3 + $0x3a4] ss:$24 sps:$4 sm:$0xff]  }
 0x374   : > { %14607 = vst [vmem:[#allocation27_spill] sm:$0xff] %v10348_v30 }
 0x375   : > { %3547 = vmatpush1.bf16.msra.mxu0 %v10335_v18 }
 0x376   : > { %3580 = vmatpush1.bf16.msra.mxu1 %v9767_v17  ;;  %3548 = vmatprep.subr.bf16.mxu0 %v10342_v27  ;;  %v10360_v17 = vld [vmem:[%s13891_s3 + $0x3a0] ss:$24 sps:$4 sm:$0xff]  }
 0x377   : > { %3581 = vmatprep.subr.bf16.mxu1 %v10348_v30  ;;  %14609 = vst [vmem:[#allocation30_spill] sm:$0xff] %v10360_v17  ;;  %v10372_v30 = vld [vmem:[%s13891_s3 + $0x3d4] ss:$24 sps:$4 sm:$0xff]  }
 0x378   : > { %14611 = vst [vmem:[#allocation34_spill] sm:$0xff] %v10372_v30 }
 0x379   : > { %3549 = vmatpush1.bf16.msra.mxu0 %v10354_v52  ;;  %v10378_v52 = vld [vmem:[%s13891_s3 + $0x488] ss:$24 sps:$4 sm:$0xff]  }
 0x37a   : > { %3582 = vmatpush1.bf16.msra.mxu1 %v10360_v17  ;;  %3550 = vmatprep.subr.bf16.mxu0 %v10366_v9  ;;  %14612 = vst [vmem:[#allocation36_spill] sm:$0xff] %v10378_v52  ;;  %v10384_v17 = vld [vmem:[%s13891_s3 + $0x3d0] ss:$24 sps:$4 sm:$0xff]   ;;  %v10390_v9 = vld [vmem:[%s13891_s3 + $0x4bc] ss:$24 sps:$4 sm:$0xff]  }
 0x37b   : > { %3583 = vmatprep.subr.bf16.mxu1 %v10372_v30  ;;  %14613 = vst [vmem:[#allocation38_spill] sm:$0xff] %v10384_v17  ;;  %14614 = vst [vmem:[#allocation40_spill] sm:$0xff] %v10390_v9  ;;  %v10396_v30 = vld [vmem:[%s13891_s3 + $0x404] ss:$24 sps:$4 sm:$0xff]  }
 0x37c   : > { %14615 = vst [vmem:[#allocation42_spill] sm:$0xff] %v10396_v30 }
 0x37d   : > { %3551 = vmatpush1.bf16.msra.mxu0 %v10378_v52  ;;  %v10402_v52 = vld [vmem:[%s13891_s3 + $0x4b8] ss:$24 sps:$4 sm:$0xff]  }
 0x37e   : > { %3584 = vmatpush1.bf16.msra.mxu1 %v10384_v17  ;;  %3552 = vmatprep.subr.bf16.mxu0 %v10390_v9  ;;  %14616 = vst [vmem:[#allocation44_spill] sm:$0xff] %v10402_v52  ;;  %v10408_v17 = vld [vmem:[%s13891_s3 + $0x400] ss:$24 sps:$4 sm:$0xff]   ;;  %v10414_v9 = vld [vmem:[%s13891_s3 + $0x4ec] ss:$24 sps:$4 sm:$0xff]  }
 0x37f   : > { %3585 = vmatprep.subr.bf16.mxu1 %v10396_v30  ;;  %14617 = vst [vmem:[#allocation29_spill] sm:$0xff] %v10408_v17  ;;  %14618 = vst [vmem:[#allocation46_spill] sm:$0xff] %v10414_v9  ;;  %v10420_v30 = vld [vmem:[%s13891_s3 + $0x434] ss:$24 sps:$4 sm:$0xff]  }
 0x380   : > { %14619 = vst [vmem:[#allocation31_spill] sm:$0xff] %v10420_v30 }
 0x381   : > { %3553 = vmatpush1.bf16.msra.mxu0 %v10402_v52  ;;  %v10426_v52 = vld [vmem:[%s13891_s3 + $0x4e8] ss:$24 sps:$4 sm:$0xff]  }
 0x382   : > { %3586 = vmatpush1.bf16.msra.mxu1 %v10408_v17  ;;  %3554 = vmatprep.subr.bf16.mxu0 %v10414_v9  ;;  %14620 = vst [vmem:[#allocation48_spill] sm:$0xff] %v10426_v52  ;;  %v10432_v17 = vld [vmem:[%s13891_s3 + $0x430] ss:$24 sps:$4 sm:$0xff]   ;;  %v10438_v9 = vld [vmem:[%s13891_s3 + $0x51c] ss:$24 sps:$4 sm:$0xff]  }
 0x383   : > { %3587 = vmatprep.subr.bf16.mxu1 %v10420_v30  ;;  %14621 = vst [vmem:[#allocation33_spill] sm:$0xff] %v10432_v17  ;;  %14622 = vst [vmem:[#allocation50_spill] sm:$0xff] %v10438_v9  ;;  %v10444_v30 = vld [vmem:[%s13891_s3 + $0x464] ss:$24 sps:$4 sm:$0xff]  }
 0x384   : > { %14623 = vst [vmem:[#allocation35_spill] sm:$0xff] %v10444_v30 }
 0x385   : > { %3555 = vmatpush1.bf16.msra.mxu0 %v10426_v52  ;;  %v10450_v52 = vld [vmem:[%s13891_s3 + $0x518] ss:$24 sps:$4 sm:$0xff]  }
 0x386   : > { %3588 = vmatpush1.bf16.msra.mxu1 %v10432_v17  ;;  %3556 = vmatprep.subr.bf16.mxu0 %v10438_v9  ;;  %14624 = vst [vmem:[#allocation52_spill] sm:$0xff] %v10450_v52  ;;  %v10456_v17 = vld [vmem:[%s13891_s3 + $0x460] ss:$24 sps:$4 sm:$0xff]   ;;  %v10462_v9 = vld [vmem:[%s13891_s3 + $0x54c] ss:$24 sps:$4 sm:$0xff]  }
 0x387   : > { %3589 = vmatprep.subr.bf16.mxu1 %v10444_v30  ;;  %14625 = vst [vmem:[#allocation37_spill] sm:$0xff] %v10456_v17  ;;  %14626 = vst [vmem:[#allocation54_spill] sm:$0xff] %v10462_v9  ;;  %v10468_v30 = vld [vmem:[%s13891_s3 + $0x494] ss:$24 sps:$4 sm:$0xff]  }
 0x388   : > { %14627 = vst [vmem:[#allocation39_spill] sm:$0xff] %v10468_v30 }
 0x389   : > { %3557 = vmatpush1.bf16.msra.mxu0 %v10450_v52  ;;  %v10474_v52 = vld [vmem:[%s13891_s3 + $0x548] ss:$24 sps:$4 sm:$0xff]  }
 0x38a   : > { %3590 = vmatpush1.bf16.msra.mxu1 %v10456_v17  ;;  %3558 = vmatprep.subr.bf16.mxu0 %v10462_v9  ;;  %14628 = vst [vmem:[#allocation56_spill] sm:$0xff] %v10474_v52  ;;  %v10480_v17 = vld [vmem:[%s13891_s3 + $0x490] ss:$24 sps:$4 sm:$0xff]   ;;  %v10486_v9 = vld [vmem:[%s13891_s3 + $0x57c] ss:$24 sps:$4 sm:$0xff]  }
 0x38b   : > { %3591 = vmatprep.subr.bf16.mxu1 %v10468_v30  ;;  %14629 = vst [vmem:[#allocation41_spill] sm:$0xff] %v10480_v17  ;;  %14630 = vst [vmem:[#allocation58_spill] sm:$0xff] %v10486_v9  ;;  %v10492_v30 = vld [vmem:[%s13891_s3 + $0x4c4] ss:$24 sps:$4 sm:$0xff]  }
 0x38c   : > { %14631 = vst [vmem:[#allocation43_spill] sm:$0xff] %v10492_v30 }
 0x38d   : > { %3559 = vmatpush1.bf16.msra.mxu0 %v10474_v52  ;;  %v10498_v52 = vld [vmem:[%s13891_s3 + $0x578] ss:$24 sps:$4 sm:$0xff]  }
 0x38e   : > { %3592 = vmatpush1.bf16.msra.mxu1 %v10480_v17  ;;  %3560 = vmatprep.subr.bf16.mxu0 %v10486_v9  ;;  %14632 = vst [vmem:[#allocation60_spill] sm:$0xff] %v10498_v52  ;;  %v10504_v17 = vld [vmem:[%s13891_s3 + $0x4c0] ss:$24 sps:$4 sm:$0xff]   ;;  %v10510_v9 = vld [vmem:[%s13891_s3 + $0x5ac] ss:$24 sps:$4 sm:$0xff]  }
 0x38f   : > { %3593 = vmatprep.subr.bf16.mxu1 %v10492_v30  ;;  %14633 = vst [vmem:[#allocation45_spill] sm:$0xff] %v10504_v17  ;;  %14634 = vst [vmem:[#allocation62_spill] sm:$0xff] %v10510_v9  ;;  %v10516_v30 = vld [vmem:[%s13891_s3 + $0x4f4] ss:$24 sps:$4 sm:$0xff]  }
 0x390   : > { %14635 = vst [vmem:[#allocation47_spill] sm:$0xff] %v10516_v30 }
 0x391   : > { %3561 = vmatpush1.bf16.msra.mxu0 %v10498_v52  ;;  %v10522_v52 = vld [vmem:[%s13891_s3 + $0x5a8] ss:$24 sps:$4 sm:$0xff]  }
 0x392   : > { %3594 = vmatpush1.bf16.msra.mxu1 %v10504_v17  ;;  %3562 = vmatprep.subr.bf16.mxu0 %v10510_v9  ;;  %14636 = vst [vmem:[#allocation64_spill] sm:$0xff] %v10522_v52  ;;  %v10528_v17 = vld [vmem:[%s13891_s3 + $0x4f0] ss:$24 sps:$4 sm:$0xff]   ;;  %v10534_v9 = vld [vmem:[%s13891_s3 + $0x5dc] ss:$24 sps:$4 sm:$0xff]  }
 0x393   : > { %3595 = vmatprep.subr.bf16.mxu1 %v10516_v30  ;;  %14637 = vst [vmem:[#allocation49_spill] sm:$0xff] %v10528_v17  ;;  %14638 = vst [vmem:[#allocation66_spill] sm:$0xff] %v10534_v9  ;;  %v10540_v30 = vld [vmem:[%s13891_s3 + $0x524] ss:$24 sps:$4 sm:$0xff]  }
 0x394   : > { %14639 = vst [vmem:[#allocation51_spill] sm:$0xff] %v10540_v30 }
 0x395   : > { %3563 = vmatpush1.bf16.msra.mxu0 %v10522_v52  ;;  %v10546_v52 = vld [vmem:[%s13891_s3 + $0x5d8] ss:$24 sps:$4 sm:$0xff]  }
 0x396   : > { %3596 = vmatpush1.bf16.msra.mxu1 %v10528_v17  ;;  %3564 = vmatprep.subr.bf16.mxu0 %v10534_v9  ;;  %14640 = vst [vmem:[#allocation68_spill] sm:$0xff] %v10546_v52  ;;  %v10552_v17 = vld [vmem:[%s13891_s3 + $0x520] ss:$24 sps:$4 sm:$0xff]   ;;  %v10558_v9 = vld [vmem:[%s13891_s3 + $0x554] ss:$24 sps:$4 sm:$0xff]  }
 0x397   : > { %3597 = vmatprep.subr.bf16.mxu1 %v10540_v30  ;;  %14641 = vst [vmem:[#allocation53_spill] sm:$0xff] %v10552_v17  ;;  %14642 = vst [vmem:[#allocation70_spill] sm:$0xff] %v10558_v9  ;;  %v10564_v30 = vld [vmem:[%s13891_s3 + $0x4] ss:$24 sps:$4 sm:$0xff]  }
 0x398   : > { %14643 = vst [vmem:[#allocation55_spill] sm:$0xff] %v10564_v30 }
 0x399   : > { %3565 = vmatpush1.bf16.msra.mxu0 %v10546_v52  ;;  %v10589_v52 = vld [vmem:[%s13891_s3 + $0x34] ss:$24 sps:$4 sm:$0xff]  }
 0x39a   : > { %3598 = vmatpush1.bf16.msra.mxu1 %v10552_v17  ;;  %3702 = vmatprep.subr.bf16.mxu0 %v10564_v30  ;;  %v10571_v17 = vld [vmem:[%s13891_s3 + $0x550] ss:$24 sps:$4 sm:$0xff]   ;;  %v10583_v30 = vld [vmem:[%s13891_s3 + $0x584] ss:$24 sps:$4 sm:$0xff]   ;;  %14647 = vst [vmem:[#allocation63_spill] sm:$0xff] %v10589_v52 }
 0x39b   : > { %3599 = vmatprep.subr.bf16.mxu1 %v10558_v9  ;;  %14644 = vst [vmem:[#allocation57_spill] sm:$0xff] %v10571_v17  ;;  %v10577_v9 = vld [vmem:[%s13891_s3] ss:$24 sps:$4 sm:$0xff]   ;;  %14646 = vst [vmem:[#allocation61_spill] sm:$0xff] %v10583_v30 }
 0x39c   : > { %3567 = vmatmul.mubr.bf16.vlgmr.msra.gmra.mrb[44].mxu0 %v10301_v35  ;;  %14645 = vst [vmem:[#allocation59_spill] sm:$0xff] %v10577_v9 }
 0x39d   : > { %3703 = vmatpush1.bf16.msra.mxu0 %v10577_v9  ;;  %v10601_v9 = vld [vmem:[%s13891_s3 + $0x30] ss:$24 sps:$4 sm:$0xff]  }
 0x39e   : > { %3600 = vmatpush1.bf16.msra.mxu1 %v10571_v17  ;;  %3704 = vmatprep.subr.bf16.mxu0 %v10589_v52  ;;  %v10595_v17 = vld [vmem:[%s13891_s3 + $0x580] ss:$24 sps:$4 sm:$0xff]   ;;  %14649 = vst [vmem:[#allocation67_spill] sm:$0xff] %v10601_v9  ;;  %v10613_v52 = vld [vmem:[%s13891_s3 + $0x64] ss:$24 sps:$4 sm:$0xff]  }
 0x39f   : > { %3601 = vmatprep.subr.bf16.mxu1 %v10583_v30  ;;  %14648 = vst [vmem:[#allocation65_spill] sm:$0xff] %v10595_v17  ;;  %v10607_v30 = vld [vmem:[%s13891_s3 + $0x5b4] ss:$24 sps:$4 sm:$0xff]   ;;  %14651 = vst [vmem:[#allocation78_spill] sm:$0xff] %v10613_v52 }
 0x3a0   : > { %14650 = vst [vmem:[#allocation69_spill] sm:$0xff] %v10607_v30 }
 0x3a1   : > { %3705 = vmatpush1.bf16.msra.mxu0 %v10601_v9  ;;  %v10625_v9 = vld [vmem:[%s13891_s3 + $0x60] ss:$24 sps:$4 sm:$0xff]  }
 0x3a2   : > { %3602 = vmatpush1.bf16.msra.mxu1 %v10595_v17  ;;  %3706 = vmatprep.subr.bf16.mxu0 %v10613_v52  ;;  %v10619_v17 = vld [vmem:[%s13891_s3 + $0x5b0] ss:$24 sps:$4 sm:$0xff]   ;;  %14653 = vst [vmem:[#allocation80_spill] sm:$0xff] %v10625_v9  ;;  %v10637_v52 = vld [vmem:[%s13891_s3 + $0x94] ss:$24 sps:$4 sm:$0xff]  }
 0x3a3   : > { %3603 = vmatprep.subr.bf16.mxu1 %v10607_v30  ;;  %14652 = vst [vmem:[#allocation71_spill] sm:$0xff] %v10619_v17  ;;  %v10631_v30 = vld [vmem:[%s13891_s3 + $0x5e4] ss:$24 sps:$4 sm:$0xff]   ;;  %14655 = vst [vmem:[#allocation82_spill] sm:$0xff] %v10637_v52 }
 0x3a4   : > { %14654 = vst [vmem:[#allocation72_spill] sm:$0xff] %v10631_v30 }
 0x3a5   : > { %3707 = vmatpush1.bf16.msra.mxu0 %v10625_v9  ;;  %v10649_v9 = vld [vmem:[%s13891_s3 + $0x90] ss:$24 sps:$4 sm:$0xff]  }
 0x3a6   : > { %3604 = vmatpush1.bf16.msra.mxu1 %v10619_v17  ;;  %3708 = vmatprep.subr.bf16.mxu0 %v10637_v52  ;;  %v10643_v17 = vld [vmem:[%s13891_s3 + $0x5e0] ss:$24 sps:$4 sm:$0xff]   ;;  %14657 = vst [vmem:[#allocation84_spill] sm:$0xff] %v10649_v9  ;;  %v10661_v52 = vld [vmem:[%s13891_s3 + $0xc4] ss:$24 sps:$4 sm:$0xff]  }
 0x3a7   : > { %3605 = vmatprep.subr.bf16.mxu1 %v10631_v30  ;;  %14656 = vst [vmem:[#allocation73_spill] sm:$0xff] %v10643_v17  ;;  %v10655_v30 = vld [vmem:[%s13891_s3 + $0xc] ss:$24 sps:$4 sm:$0xff]   ;;  %14659 = vst [vmem:[#allocation86_spill] sm:$0xff] %v10661_v52 }
 0x3a8   : > { %14658 = vst [vmem:[#allocation74_spill] sm:$0xff] %v10655_v30 }
 0x3a9   : > { %3709 = vmatpush1.bf16.msra.mxu0 %v10649_v9  ;;  %v10668_v9 = vld [vmem:[%s13891_s3 + $0x8] ss:$24 sps:$4 sm:$0xff]  }
 0x3aa   : > { %3606 = vmatpush1.bf16.msra.mxu1 %v10643_v17  ;;  %3710 = vmatprep.subr.bf16.mxu0 %v10661_v52  ;;  %14660 = vst [vmem:[#allocation75_spill] sm:$0xff] %v10668_v9  ;;  %v10680_v52 = vld [vmem:[%s13891_s3 + $0x3c] ss:$24 sps:$4 sm:$0xff]  }
 0x3ab   : > { %3743 = vmatprep.subr.bf16.mxu1 %v10655_v30  ;;  %v10674_v30 = vld [vmem:[%s13891_s3 + $0xc0] ss:$24 sps:$4 sm:$0xff]   ;;  %14662 = vst [vmem:[#allocation76_spill] sm:$0xff] %v10680_v52 }
 0x3ac   : > { %14661 = vst [vmem:[#allocation88_spill] sm:$0xff] %v10674_v30 }
 0x3ad   : > { %3608 = vmatmul.mubr.bf16.vlgmr.msra.gmra.mrb[44].mxu1 %v10301_v35  ;;  %3711 = vmatpush1.bf16.msra.mxu0 %v10674_v30  ;;  %v10686_v35 = vld [vmem:[%s13891_s3 + $0xf4] ss:$24 sps:$4 sm:$0xff]   ;;  %v10698_v30 = vld [vmem:[%s13891_s3 + $0xf0] ss:$24 sps:$4 sm:$0xff]  }
 0x3ae   : > { %3744 = vmatpush1.bf16.msra.mxu1 %v10668_v9  ;;  %14663 = vst [vmem:[#allocation90_spill] sm:$0xff] %v10686_v35  ;;  %3712 = vmatprep.subr.bf16.mxu0 %v10686_v35  ;;  %v10692_v9 = vld [vmem:[%s13891_s3 + $0x38] ss:$24 sps:$4 sm:$0xff]   ;;  %14665 = vst [vmem:[#allocation92_spill] sm:$0xff] %v10698_v30  ;;  %v10710_v35 = vld [vmem:[%s13891_s3 + $0x124] ss:$24 sps:$4 sm:$0xff]  }
 0x3af   : > { %3745 = vmatprep.subr.bf16.mxu1 %v10680_v52  ;;  %14664 = vst [vmem:[#allocation77_spill] sm:$0xff] %v10692_v9  ;;  %v10704_v52 = vld [vmem:[%s13891_s3 + $0x6c] ss:$24 sps:$4 sm:$0xff]   ;;  %14667 = vst [vmem:[#allocation94_spill] sm:$0xff] %v10710_v35 }
 0x3b0   : > { %14666 = vst [vmem:[#allocation79_spill] sm:$0xff] %v10704_v52 }
 0x3b1   : > { %3713 = vmatpush1.bf16.msra.mxu0 %v10698_v30  ;;  %v10722_v30 = vld [vmem:[%s13891_s3 + $0x120] ss:$24 sps:$4 sm:$0xff]  }
 0x3b2   : > { %3746 = vmatpush1.bf16.msra.mxu1 %v10692_v9  ;;  %3714 = vmatprep.subr.bf16.mxu0 %v10710_v35  ;;  %v10716_v9 = vld [vmem:[%s13891_s3 + $0x68] ss:$24 sps:$4 sm:$0xff]   ;;  %14669 = vst [vmem:[#allocation96_spill] sm:$0xff] %v10722_v30  ;;  %v10734_v35 = vld [vmem:[%s13891_s3 + $0x154] ss:$24 sps:$4 sm:$0xff]  }
 0x3b3   : > { %3747 = vmatprep.subr.bf16.mxu1 %v10704_v52  ;;  %14668 = vst [vmem:[#allocation81_spill] sm:$0xff] %v10716_v9  ;;  %v10728_v52 = vld [vmem:[%s13891_s3 + $0x9c] ss:$24 sps:$4 sm:$0xff]   ;;  %14671 = vst [vmem:[#allocation85_spill] sm:$0xff] %v10734_v35 }
 0x3b4   : > { %14670 = vst [vmem:[#allocation83_spill] sm:$0xff] %v10728_v52 }
 0x3b5   : > { %3715 = vmatpush1.bf16.msra.mxu0 %v10722_v30  ;;  %v10746_v30 = vld [vmem:[%s13891_s3 + $0x150] ss:$24 sps:$4 sm:$0xff]  }
 0x3b6   : > { %3748 = vmatpush1.bf16.msra.mxu1 %v10716_v9  ;;  %3716 = vmatprep.subr.bf16.mxu0 %v10734_v35  ;;  %v10740_v9 = vld [vmem:[%s13891_s3 + $0x98] ss:$24 sps:$4 sm:$0xff]   ;;  %14673 = vst [vmem:[#allocation89_spill] sm:$0xff] %v10746_v30  ;;  %v10758_v35 = vld [vmem:[%s13891_s3 + $0x184] ss:$24 sps:$4 sm:$0xff]  }
 0x3b7   : > { %3749 = vmatprep.subr.bf16.mxu1 %v10728_v52  ;;  %14672 = vst [vmem:[#allocation87_spill] sm:$0xff] %v10740_v9  ;;  %v10752_v52 = vld [vmem:[%s13891_s3 + $0xcc] ss:$24 sps:$4 sm:$0xff]   ;;  %14675 = vst [vmem:[#allocation93_spill] sm:$0xff] %v10758_v35 }
 0x3b8   : > { %14674 = vst [vmem:[#allocation91_spill] sm:$0xff] %v10752_v52 }
 0x3b9   : > { %3717 = vmatpush1.bf16.msra.mxu0 %v10746_v30  ;;  %v10770_v30 = vld [vmem:[%s13891_s3 + $0x180] ss:$24 sps:$4 sm:$0xff]  }
 0x3ba   : > { %3750 = vmatpush1.bf16.msra.mxu1 %v10740_v9  ;;  %3718 = vmatprep.subr.bf16.mxu0 %v10758_v35  ;;  %v10764_v9 = vld [vmem:[%s13891_s3 + $0xc8] ss:$24 sps:$4 sm:$0xff]   ;;  %14677 = vst [vmem:[#allocation97_spill] sm:$0xff] %v10770_v30  ;;  %v10782_v35 = vld [vmem:[%s13891_s3 + $0x1b4] ss:$24 sps:$4 sm:$0xff]  }
 0x3bb   : > { %3751 = vmatprep.subr.bf16.mxu1 %v10752_v52  ;;  %14676 = vst [vmem:[#allocation95_spill] sm:$0xff] %v10764_v9  ;;  %v10776_v52 = vld [vmem:[%s13891_s3 + $0xfc] ss:$24 sps:$4 sm:$0xff]   ;;  %14679 = vst [vmem:[#allocation98_spill] sm:$0xff] %v10782_v35 }
 0x3bc   : > { %14678 = vst [vmem:[#allocation105_spill] sm:$0xff] %v10776_v52 }
 0x3bd   : > { %3719 = vmatpush1.bf16.msra.mxu0 %v10770_v30  ;;  %v10794_v30 = vld [vmem:[%s13891_s3 + $0x1b0] ss:$24 sps:$4 sm:$0xff]  }
 0x3be   : > { %3752 = vmatpush1.bf16.msra.mxu1 %v10764_v9  ;;  %3720 = vmatprep.subr.bf16.mxu0 %v10782_v35  ;;  %v10788_v9 = vld [vmem:[%s13891_s3 + $0xf8] ss:$24 sps:$4 sm:$0xff]   ;;  %14681 = vst [vmem:[#allocation99_spill] sm:$0xff] %v10794_v30  ;;  %v10806_v35 = vld [vmem:[%s13891_s3 + $0x1e4] ss:$24 sps:$4 sm:$0xff]  }
 0x3bf   : > { %3753 = vmatprep.subr.bf16.mxu1 %v10776_v52  ;;  %14680 = vst [vmem:[#allocation107_spill] sm:$0xff] %v10788_v9  ;;  %v10800_v52 = vld [vmem:[%s13891_s3 + $0x12c] ss:$24 sps:$4 sm:$0xff]   ;;  %14683 = vst [vmem:[#allocation100_spill] sm:$0xff] %v10806_v35 }
 0x3c0   : > { %14682 = vst [vmem:[#allocation109_spill] sm:$0xff] %v10800_v52 }
 0x3c1   : > { %3721 = vmatpush1.bf16.msra.mxu0 %v10794_v30  ;;  %v10818_v30 = vld [vmem:[%s13891_s3 + $0x1e0] ss:$24 sps:$4 sm:$0xff]  }
 0x3c2   : > { %3754 = vmatpush1.bf16.msra.mxu1 %v10788_v9  ;;  %3722 = vmatprep.subr.bf16.mxu0 %v10806_v35  ;;  %v10812_v9 = vld [vmem:[%s13891_s3 + $0x128] ss:$24 sps:$4 sm:$0xff]   ;;  %14685 = vst [vmem:[#allocation101_spill] sm:$0xff] %v10818_v30  ;;  %v10830_v35 = vld [vmem:[%s13891_s3 + $0x214] ss:$24 sps:$4 sm:$0xff]  }
 0x3c3   : > { %3755 = vmatprep.subr.bf16.mxu1 %v10800_v52  ;;  %14684 = vst [vmem:[#allocation111_spill] sm:$0xff] %v10812_v9  ;;  %v10824_v52 = vld [vmem:[%s13891_s3 + $0x15c] ss:$24 sps:$4 sm:$0xff]   ;;  %14687 = vst [vmem:[#allocation102_spill] sm:$0xff] %v10830_v35 }
 0x3c4   : > { %14686 = vst [vmem:[#allocation113_spill] sm:$0xff] %v10824_v52 }
 0x3c5   : > { %3723 = vmatpush1.bf16.msra.mxu0 %v10818_v30  ;;  %v10842_v30 = vld [vmem:[%s13891_s3 + $0x210] ss:$24 sps:$4 sm:$0xff]  }
 0x3c6   : > { %3756 = vmatpush1.bf16.msra.mxu1 %v10812_v9  ;;  %3724 = vmatprep.subr.bf16.mxu0 %v10830_v35  ;;  %v10836_v9 = vld [vmem:[%s13891_s3 + $0x158] ss:$24 sps:$4 sm:$0xff]   ;;  %14689 = vst [vmem:[#allocation103_spill] sm:$0xff] %v10842_v30  ;;  %v10854_v35 = vld [vmem:[%s13891_s3 + $0x244] ss:$24 sps:$4 sm:$0xff]  }
 0x3c7   : > { %3757 = vmatprep.subr.bf16.mxu1 %v10824_v52  ;;  %14688 = vst [vmem:[#allocation115_spill] sm:$0xff] %v10836_v9  ;;  %v10848_v52 = vld [vmem:[%s13891_s3 + $0x18c] ss:$24 sps:$4 sm:$0xff]   ;;  %14691 = vst [vmem:[#allocation104_spill] sm:$0xff] %v10854_v35 }
 0x3c8   : > { %14690 = vst [vmem:[#allocation117_spill] sm:$0xff] %v10848_v52 }
 0x3c9   : > { %3725 = vmatpush1.bf16.msra.mxu0 %v10842_v30  ;;  %v10866_v30 = vld [vmem:[%s13891_s3 + $0x240] ss:$24 sps:$4 sm:$0xff]  }
 0x3ca   : > { %3758 = vmatpush1.bf16.msra.mxu1 %v10836_v9  ;;  %3726 = vmatprep.subr.bf16.mxu0 %v10854_v35  ;;  %v10860_v9 = vld [vmem:[%s13891_s3 + $0x188] ss:$24 sps:$4 sm:$0xff]   ;;  %14693 = vst [vmem:[#allocation106_spill] sm:$0xff] %v10866_v30  ;;  %v10878_v35 = vld [vmem:[%s13891_s3 + $0x274] ss:$24 sps:$4 sm:$0xff]  }
 0x3cb   : > { %3759 = vmatprep.subr.bf16.mxu1 %v10848_v52  ;;  %14692 = vst [vmem:[#allocation119_spill] sm:$0xff] %v10860_v9  ;;  %v10872_v52 = vld [vmem:[%s13891_s3 + $0x1bc] ss:$24 sps:$4 sm:$0xff]   ;;  %14695 = vst [vmem:[#allocation110_spill] sm:$0xff] %v10878_v35 }
 0x3cc   : > { %14694 = vst [vmem:[#allocation108_spill] sm:$0xff] %v10872_v52 }
 0x3cd   : > { %3727 = vmatpush1.bf16.msra.mxu0 %v10866_v30  ;;  %v3277_v30 = vld [vmem:[#allocation4 + $0x18] sm:$0x30] }
 0x3ce   : > { %3760 = vmatpush1.bf16.msra.mxu1 %v10860_v9  ;;  %3728 = vmatprep.subr.bf16.mxu0 %v10878_v35  ;;  %v10884_v9 = vld [vmem:[%s13891_s3 + $0x1b8] ss:$24 sps:$4 sm:$0xff]   ;;  %v10898_v35 = vld [vmem:[%s13891_s3 + $0x1e8] ss:$24 sps:$4 sm:$0xff]  }
 0x3cf   : > { %3761 = vmatprep.subr.bf16.mxu1 %v10872_v52  ;;  %14696 = vst [vmem:[#allocation112_spill] sm:$0xff] %v10884_v9  ;;  %v10891_v52 = vld [vmem:[%s13891_s3 + $0x1ec] ss:$24 sps:$4 sm:$0xff]   ;;  %14698 = vst [vmem:[#allocation116_spill] sm:$0xff] %v10898_v35 }
 0x3d0   : > { %14697 = vst [vmem:[#allocation114_spill] sm:$0xff] %v10891_v52 }
 0x3d1   : > { %3729 = vmatpush1.bf16.msra.mxu0 %v9866_v16  ;;  %v10905_v16 = vld [vmem:[%s13891_s3 + $0x21c] ss:$24 sps:$4 sm:$0xff]  }
 0x3d2   : > { %3762 = vmatpush1.bf16.msra.mxu1 %v10884_v9  ;;  %3730 = vmatprep.subr.bf16.mxu0 %v9873_v19  ;;  %14699 = vst [vmem:[#allocation118_spill] sm:$0xff] %v10905_v16  ;;  %v10912_v19 = vld [vmem:[%s13891_s3 + $0x218] ss:$24 sps:$4 sm:$0xff]  }
 0x3d3   : > { %3763 = vmatprep.subr.bf16.mxu1 %v10891_v52  ;;  %14700 = vst [vmem:[#allocation120_spill] sm:$0xff] %v10912_v19 }
 0x3d5   : > { %3731 = vmatpush1.bf16.msra.mxu0 %v9880_v29  ;;  %v10919_v29 = vld [vmem:[%s13891_s3 + $0x24c] ss:$24 sps:$4 sm:$0xff]  }
 0x3d6   : > { %3764 = vmatpush1.bf16.msra.mxu1 %v10898_v35  ;;  %3732 = vmatprep.subr.bf16.mxu0 %v9887_v3  ;;  %14701 = vst [vmem:[#allocation123_spill] sm:$0xff] %v10919_v29  ;;  %v10926_v3 = vld [vmem:[%s13891_s3 + $0x248] ss:$24 sps:$4 sm:$0xff]   ;;  %v3276_v35 = vld [vmem:[#allocation4 + $0x10] sm:$0x30] }
 0x3d7   : > { %3765 = vmatprep.subr.bf16.mxu1 %v10905_v16  ;;  %14702 = vst [vmem:[#allocation124_spill] sm:$0xff] %v10926_v3 }
 0x3d9   : > { %3733 = vmatpush1.bf16.msra.mxu0 %v9894_v33  ;;  %v10932_v33 = vld [vmem:[%s13891_s3 + $0x27c] ss:$24 sps:$4 sm:$0xff]  }
 0x3da   : > { %3766 = vmatpush1.bf16.msra.mxu1 %v10912_v19  ;;  %3784 = vmatprep.subr.bf16.mxu0 %v9901_v48  ;;  %14703 = vst [vmem:[#allocation125_spill] sm:$0xff] %v10932_v33 }
 0x3db   : > { %3767 = vmatprep.subr.bf16.mxu1 %v10919_v29 }
 0x3de   : > { %3768 = vmatpush1.bf16.msra.mxu1 %v10926_v3 }
 0x3df   : > { %3769 = vmatprep.subr.bf16.mxu1 %v10932_v33 }
 0x3e2   : > { %3770 = vmatpush1.bf16.msra.mxu1 %v9909_v12 }
 0x3e3   : > { %3771 = vmatprep.subr.bf16.mxu1 %v9915_v51 }
 0x3e6   : > { %3772 = vmatpush1.bf16.msra.mxu1 %v9921_v6 }
 0x3e7   : > { %3773 = vmatprep.subr.bf16.mxu1 %v9927_v23 }
 0x3ea   : > { %3774 = vmatpush1.bf16.msra.mxu1 %v9933_v61 }
 0x3eb   : > { %3907 = vmatprep.subr.bf16.mxu1 %v9939_v60 }
 0x3ef   : > { %v3322_v48 = vpop.f32.mrb[36].mxu0  ;;  %v3363_v3 = vpop.f32.mrb[36].mxu1 }
 0x3f0   : > { %v3433_v29 = vrot.slane %v3363_v3, 4  ;;  %v3324_v19 = vpop.f32.mrb[37].mxu0  ;;  %v3365_v16 = vpop.f32.mrb[37].mxu1  ;;  %v3413_v26 = vrot.slane %v3322_v48, 4 }
 0x3f1   : > { %v3434_v52 = vrot.slane %v3365_v16, 4  ;;  %v3326_v33 = vpop.f32.mrb[38].mxu0  ;;  %v3367_v9 = vpop.f32.mrb[38].mxu1  ;;  %v3414_v8 = vrot.slane %v3324_v19, 4  ;;  %v3471_v16 = vrot.slane %v9946_v50, 6 }
 0x3f2   : > { %v3437_v12 = vadd.f32 %v3433_v29, %v3276_v35  ;;  %v3327_v51 = vpop.f32.mrb[39].mxu0  ;;  %v3368_v17 = vpop.f32.mrb[39].mxu1  ;;  %v3274_v35 = vld [vmem:[#allocation4] sm:$0x30]  ;;  %v3472_v29 = vrot.slane %v9948_v47, 6 }
 0x3f3   : > { %v3438_v6 = vadd.f32 %v3434_v52, %v3277_v30  ;;  %v3417_v52 = vadd.f32 %v3413_v26, %v3274_v35  ;;  %v3275_v33 = vld [vmem:[#allocation4 + $0x8] sm:$0x30] }
 0x3f4   : > { %v6297_v27 = vmul.f32 -1.442695, %v3437_v12 }
 0x3f5   : > { %v6298_v23 = vmul.f32 -1.442695, %v3438_v6  ;;  %v6295_v51 = vmul.f32 -1.442695, %v3417_v52 }
 0x3f6   : > { %6874 = vpow2.f32 %v6297_v27  ;;  %v3418_v27 = vadd.f32 %v3414_v8, %v3275_v33  ;;  %v3278_v33 = vld [vmem:[#allocation4 + $0x20] sm:$0x30] }
 0x3f7   : > { %6876 = vpow2.f32 %v6298_v23 }
 0x3f8   : > { %v6296_v6 = vmul.f32 -1.442695, %v3418_v27 }
 0x400   : > { %v6875_v61 = vpop.eup %6874 }
 0x401   : > { %v3445_v60 = vadd.f32 1.0, %v6875_v61  ;;  %v6877_v18 = vpop.eup %6876 }
 0x402   : > { %v3446_v3 = vadd.f32 1.0, %v6877_v18 }
 0x403   : > { %6878 = vrcp.f32 %v3445_v60 }
 0x404   : > { %6880 = vrcp.f32 %v3446_v3 }
 0x405   : > { %6882 = vpow2.f32 %v6295_v51 }
 0x406   : > { %6884 = vpow2.f32 %v6296_v6  ;;  %v3279_v6 = vld [vmem:[#allocation4 + $0x28] sm:$0x30] }
 0x40d   : > { %v6879_v9 = vpop.eup %6878 }
 0x40e   : > { %v3475_v17 = vmul.f32 %v6879_v9, %v3471_v16  ;;  %v6881_v30 = vpop.eup %6880 }
 0x40f   : > { %v3476_v12 = vmul.f32 %v6881_v30, %v3472_v29  ;;  %v6883_v18 = vpop.eup %6882 }
 0x410   : > { %v6885_v23 = vpop.eup %6884  ;;  %v3425_v48 = vadd.f32 1.0, %v6883_v18 }
 0x411   : > { %v3426_v19 = vadd.f32 1.0, %v6885_v23 }
 0x412   : > { %6886 = vrcp.f32 %v3425_v48 }
 0x413   : > { %6888 = vrcp.f32 %v3426_v19 }
 0x41c   : > { %v6887_v16 = vpop.eup %6886 }
 0x41d   : > { %v6889_v29 = vpop.eup %6888 }
 0x42f   : > { %v3404_v50 = vpop.f32.mrb[40].mxu0 }
 0x430   : > { %v3451_v61 = vadd.f32 %v3404_v50, %v14580_v15  ;;  %v3406_v47 = vpop.f32.mrb[41].mxu0  ;;  %v3465_v50 = vsub.f32 1.0, %v6879_v9 }
 0x431   : > { %v3452_v60 = vadd.f32 %v3406_v47, %v14581_v28  ;;  %v3408_v26 = vpop.f32.mrb[42].mxu0 }
 0x432   : > { %v3455_v3 = vrot.slane %v3451_v61, 4  ;;  %v3409_v8 = vpop.f32.mrb[43].mxu0 }
 0x433   : > { %v3456_v35 = vrot.slane %v3452_v60, 4  ;;  %v3466_v60 = vsub.f32 1.0, %v6881_v30  ;;  %v10974_v30 = vld [vmem:[%s13891_s3 + $0x44] ss:$24 sps:$4 sm:$0xff]  }
 0x434   : > { %v3459_v52 = vmul.f32 %v6887_v16, %v3455_v3 }
 0x435   : > { %v3460_v27 = vmul.f32 %v6889_v29, %v3456_v35 }
 0x436   : > { %v3461_v51 = vadd.f32 %v3459_v52, %v3278_v33 }
 0x437   : > { %v3462_v18 = vadd.f32 %v3460_v27, %v3279_v6  ;;  %v10986_v27 = vld [vmem:[%s13891_s3 + $0x334] ss:$24 sps:$4 sm:$0xff]  }
 0x438   : > { %6890 = vtanh.f32 %v3461_v51  ;;  %v10992_v51 = vld [vmem:[%s13891_s3 + $0x40] ss:$24 sps:$4 sm:$0xff]   ;;  %v10998_v6 = vld [vmem:[%s13891_s3 + $0x74] ss:$24 sps:$4 sm:$0xff]  }
 0x439   : > { %6892 = vtanh.f32 %v3462_v18  ;;  %v11004_v18 = vld [vmem:[%s13891_s3 + $0x330] ss:$24 sps:$4 sm:$0xff]  }
 0x440   : > { %v10945_v23 = vpop.f32.mrb[40].mxu1 }
 0x441   : > { %v10947_v48 = vpop.f32.mrb[41].mxu1 }
 0x442   : > { %v3531_v19 = vpop.f32.mrb[42].mxu1  ;;  %v6891_v61 = vpop.eup %6890 }
 0x443   : > { %v3532_v47 = vpop.f32.mrb[43].mxu1  ;;  %v6893_v26 = vpop.eup %6892  ;;  %v3467_v3 = vmul.f32 %v6891_v61, %v3465_v50  ;;  %v11010_v19 = vld [vmem:[%s13891_s3 + $0x364] ss:$24 sps:$4 sm:$0xff]   ;;  %v11016_v50 = vld [vmem:[%s13891_s3 + $0x70] ss:$24 sps:$4 sm:$0xff]  }
 0x444   : > { %v3468_v8 = vmul.f32 %v6893_v26, %v3466_v60  ;;  %v11022_v61 = vld [vmem:[%s13891_s3 + $0xa4] ss:$24 sps:$4 sm:$0xff]   ;;  %v11028_v47 = vld [vmem:[%s13891_s3 + $0x360] ss:$24 sps:$4 sm:$0xff]   ;;  %v11034_v60 = vld [vmem:[%s13891_s3 + $0x394] ss:$24 sps:$4 sm:$0xff]  }
 0x445   : > { %v10949_v16 = vadd.f32 %v3475_v17, %v3467_v3  ;;  %v10968_v17 = vld [vmem:[%s13891_s3 + $0x10] ss:$24 sps:$4 sm:$0xff]   ;;  %14704 = vst [vmem:[#allocation126_spill] sm:$0xff] %v11034_v60  ;;  %v11040_v26 = vld [vmem:[%s13891_s3 + $0xa0] ss:$24 sps:$4 sm:$0xff]  }
 0x446   : > { %v10951_v35 = vadd.f32 %v3476_v12, %v3468_v8  ;;  %v10980_v12 = vld [vmem:[%s13891_s3 + $0x300] ss:$24 sps:$4 sm:$0xff]   ;;  %14705 = vst [vmem:[#allocation127_spill] sm:$0xff] %v11040_v26  ;;  %v11046_v3 = vld [vmem:[%s13891_s3 + $0xd4] ss:$24 sps:$4 sm:$0xff]  }
 0x447   : > { %3684 = vst [vmem:[%s7846_s17] sm:$0x30] %v10949_v16  ;;  %v3694_v29 = vpack.c.bf16 %v10949_v16, %v10949_v16  ;;  %14706 = vst [vmem:[#allocation129_spill] sm:$0xff] %v11046_v3  ;;  %v11052_v8 = vld [vmem:[%s13891_s3 + $0x390] ss:$24 sps:$4 sm:$0xff]  }
 0x448   : > { %3685 = vst [vmem:[%s7846_s17 + $0x8] sm:$0x30] %v10951_v35  ;;  %v3695_v9 = vpack.c.bf16 %v10951_v35, %v10951_v35  ;;  %14707 = vst [vmem:[#allocation130_spill] sm:$0xff] %v11052_v8 }
 0x449   : > { %v10961_v33 = vrot.slane %v3694_v29, 2  ;;  %v3618_v29 = vrot.slane %v10945_v23, 6  ;;  %v11072_v23 = vld [vmem:[%s13891_s3 + $0x104] ss:$24 sps:$4 sm:$0xff]  }
 0x44a   : > { %v3699_v52 = vrot.slane %v3695_v9, 2  ;;  %v11059_v9 = vld [vmem:[%s13891_s3 + $0x3c4] ss:$24 sps:$4 sm:$0xff]   ;;  %14710 = vst [vmem:[#allocation133_spill] sm:$0xff] %v11072_v23 }
 0x44b   : > { %14708 = vst [vmem:[#allocation131_spill] sm:$0xff] %v11059_v9 }
 0x44c   : > { %3734 = vmatprep.mubr.bf16.mxu0 %v3699_v52  ;;  %3775 = vmatprep.mubr.bf16.mxu1 %v3699_v52 }
 0x44d   : > { %3735 = vmatmul.mubr.bf16.vlgmr.msra.gmra.mrb[48].mxu0 %v10961_v33  ;;  %3776 = vmatmul.mubr.bf16.vlgmr.msra.gmra.mrb[48].mxu1 %v10961_v33 }
 0x44e   : > { %3785 = vmatpush1.bf16.msra.mxu0 %v10968_v17  ;;  %3816 = vmatprep.mubr.bf16.mxu0 %v3699_v52  ;;  %v3619_v52 = vrot.slane %v10947_v48, 6 }
 0x44f   : > { %3786 = vmatprep.subr.bf16.mxu0 %v10974_v30  ;;  %3908 = vmatpush1.bf16.msra.mxu1 %v10980_v12 }
 0x450   : > { %3909 = vmatprep.subr.bf16.mxu1 %v10986_v27 }
 0x452   : > { %3787 = vmatpush1.bf16.msra.mxu0 %v10992_v51 }
 0x453   : > { %3788 = vmatprep.subr.bf16.mxu0 %v10998_v6  ;;  %3910 = vmatpush1.bf16.msra.mxu1 %v11004_v18 }
 0x454   : > { %3911 = vmatprep.subr.bf16.mxu1 %v11010_v19 }
 0x456   : > { %3789 = vmatpush1.bf16.msra.mxu0 %v11016_v50 }
 0x457   : > { %3790 = vmatprep.subr.bf16.mxu0 %v11022_v61  ;;  %3912 = vmatpush1.bf16.msra.mxu1 %v11028_v47 }
 0x458   : > { %3913 = vmatprep.subr.bf16.mxu1 %v11034_v60 }
 0x45a   : > { %3791 = vmatpush1.bf16.msra.mxu0 %v11040_v26  ;;  %v3479_v26 = vld [vmem:[#allocation5 + $0x30] sm:$0xc] }
 0x45b   : > { %3792 = vmatprep.subr.bf16.mxu0 %v11046_v3  ;;  %3914 = vmatpush1.bf16.msra.mxu1 %v11052_v8  ;;  %v11066_v3 = vld [vmem:[%s13891_s3 + $0xd0] ss:$24 sps:$4 sm:$0xff]   ;;  %v3622_v48 = vadd.f32 %v3618_v29, %v3479_v26  ;;  %v3480_v8 = vld [vmem:[#allocation5 + $0x38] sm:$0xc] }
 0x45c   : > { %3915 = vmatprep.subr.bf16.mxu1 %v11059_v9  ;;  %14709 = vst [vmem:[#allocation132_spill] sm:$0xff] %v11066_v3  ;;  %v11078_v9 = vld [vmem:[%s13891_s3 + $0x3c0] ss:$24 sps:$4 sm:$0xff]   ;;  %v3623_v60 = vadd.f32 %v3619_v52, %v3480_v8  ;;  %v11097_v26 = vld [vmem:[%s13891_s3 + $0x3f0] ss:$24 sps:$4 sm:$0xff]  }
 0x45d   : > { %v6299_v29 = vmul.f32 -1.442695, %v3622_v48 }
 0x45e   : > { %3793 = vmatpush1.bf16.msra.mxu0 %v11066_v3  ;;  %v11084_v3 = vld [vmem:[%s13891_s3 + $0x3f4] ss:$24 sps:$4 sm:$0xff]   ;;  %v6300_v8 = vmul.f32 -1.442695, %v3623_v60  ;;  %v3482_v60 = vld [vmem:[#allocation5 + $0x48] sm:$0xc] }
 0x45f   : > { %3794 = vmatprep.subr.bf16.mxu0 %v11072_v23  ;;  %3916 = vmatpush1.bf16.msra.mxu1 %v11078_v9  ;;  %v11090_v23 = vld [vmem:[%s13891_s3 + $0x100] ss:$24 sps:$4 sm:$0xff]   ;;  %6894 = vpow2.f32 %v6299_v29 }
 0x460   : > { %3917 = vmatprep.subr.bf16.mxu1 %v11084_v3  ;;  %6896 = vpow2.f32 %v6300_v8 }
 0x462   : > { %3795 = vmatpush1.bf16.msra.mxu0 %v11090_v23 }
 0x463   : > { %3796 = vmatprep.subr.bf16.mxu0 %v9986_v45  ;;  %3918 = vmatpush1.bf16.msra.mxu1 %v11097_v26 }
 0x464   : > { %3919 = vmatprep.subr.bf16.mxu1 %v9993_v62 }
 0x466   : > { %3797 = vmatpush1.bf16.msra.mxu0 %v9999_v34 }
 0x467   : > { %3798 = vmatprep.subr.bf16.mxu0 %v10005_v32  ;;  %3920 = vmatpush1.bf16.msra.mxu1 %v10011_v25  ;;  %v3481_v32 = vld [vmem:[#allocation5 + $0x40] sm:$0xc] }
 0x468   : > { %3921 = vmatprep.subr.bf16.mxu1 %v10017_v49 }
 0x46a   : > { %3799 = vmatpush1.bf16.msra.mxu0 %v10023_v36  ;;  %v6895_v36 = vpop.eup %6894 }
 0x46b   : > { %3800 = vmatprep.subr.bf16.mxu0 %v10029_v42  ;;  %3922 = vmatpush1.bf16.msra.mxu1 %v10035_v1 }
 0x46c   : > { %3923 = vmatprep.subr.bf16.mxu1 %v10041_v59  ;;  %v6897_v59 = vpop.eup %6896 }
 0x46d   : > { %v3631_v52 = vadd.f32 1.0, %v6897_v59  ;;  %v3484_v59 = vld [vmem:[#allocation5 + $0x58] sm:$0xc] }
 0x46e   : > { %3801 = vmatpush1.bf16.msra.mxu0 %v10047_v63 }
 0x46f   : > { %v3568_v45 = vpop.f32.mrb[44].mxu0  ;;  %3802 = vmatprep.subr.bf16.mxu0 %v10053_v11  ;;  %3924 = vmatpush1.bf16.msra.mxu1 %v10059_v5  ;;  %v3630_v5 = vadd.f32 1.0, %v6895_v36 }
 0x470   : > { %v3638_v62 = vrot.slane %v3568_v45, 6  ;;  %v3570_v34 = vpop.f32.mrb[45].mxu0  ;;  %3925 = vmatprep.subr.bf16.mxu1 %v10065_v54 }
 0x471   : > { %v3639_v25 = vrot.slane %v3570_v34, 6  ;;  %v3572_v49 = vpop.f32.mrb[46].mxu0 }
 0x472   : > { %v3642_v42 = vadd.f32 %v3638_v62, %v3481_v32  ;;  %3803 = vmatpush1.bf16.msra.mxu0 %v10071_v58  ;;  %v3573_v1 = vpop.f32.mrb[47].mxu0  ;;  %v14711_v58 = vld [vmem:[#allocation7_spill] sm:$0xff]  ;;  %v14717_v49 = vld [vmem:[#allocation13_spill] sm:$0xff] }
 0x473   : > { %v3643_v63 = vadd.f32 %v3639_v25, %v3482_v60  ;;  %3804 = vmatprep.subr.bf16.mxu0 %v10077_v7  ;;  %3926 = vmatpush1.bf16.msra.mxu1 %v10083_v4  ;;  %v14712_v7 = vld [vmem:[#allocation9_spill] sm:$0xff]  ;;  %v14716_v62 = vld [vmem:[#allocation11_spill] sm:$0xff] }
 0x474   : > { %v6301_v11 = vmul.f32 -1.442695, %v3642_v42  ;;  %3927 = vmatprep.subr.bf16.mxu1 %v10089_v37  ;;  %v14713_v37 = vld [vmem:[#allocation8_spill] sm:$0xff] }
 0x475   : > { %v6302_v54 = vmul.f32 -1.442695, %v3643_v63  ;;  %v3483_v42 = vld [vmem:[#allocation5 + $0x50] sm:$0xc] }
 0x476   : > { %6898 = vpow2.f32 %v6301_v11  ;;  %3805 = vmatpush1.bf16.msra.mxu0 %v10095_v39  ;;  %v14714_v39 = vld [vmem:[#allocation10_spill] sm:$0xff]  ;;  %v14718_v11 = vld [vmem:[#allocation12_spill] sm:$0xff] }
 0x477   : > { %6900 = vpow2.f32 %v6302_v54  ;;  %3806 = vmatprep.subr.bf16.mxu0 %v10101_v46  ;;  %3928 = vmatpush1.bf16.msra.mxu1 %v10107_v53  ;;  %v14715_v53 = vld [vmem:[#allocation128_spill] sm:$0xff]  ;;  %v14720_v54 = vld [vmem:[#allocation15_spill] sm:$0xff] }
 0x478   : > { %3929 = vmatprep.subr.bf16.mxu1 %v10113_v41  ;;  %6902 = vrcp.f32 %v3630_v5  ;;  %v14719_v5 = vld [vmem:[#allocation14_spill] sm:$0xff] }
 0x479   : > { %6904 = vrcp.f32 %v3631_v52  ;;  %v14722_v52 = vld [vmem:[#allocation16_spill] sm:$0xff] }
 0x47a   : > { %3807 = vmatpush1.bf16.msra.mxu0 %v10119_v40 }
 0x47b   : > { %3808 = vmatprep.subr.bf16.mxu0 %v10125_v24  ;;  %3930 = vmatpush1.bf16.msra.mxu1 %v10131_v38 }
 0x47c   : > { %3931 = vmatprep.subr.bf16.mxu1 %v14711_v58  ;;  %v14724_v58 = vld [vmem:[#allocation19_spill] sm:$0xff] }
 0x47e   : > { %3809 = vmatpush1.bf16.msra.mxu0 %v14712_v7  ;;  %v3676_v7 = vrot.slane %v10265_v43, 2 }
 0x47f   : > { %3810 = vmatprep.subr.bf16.mxu0 %v14713_v37  ;;  %3932 = vmatpush1.bf16.msra.mxu1 %v14714_v39  ;;  %v14725_v39 = vld [vmem:[#allocation21_spill] sm:$0xff] }
 0x480   : > { %v3609_v4 = vpop.f32.mrb[44].mxu1  ;;  %v6899_v46 = vpop.eup %6898  ;;  %3933 = vmatprep.subr.bf16.mxu1 %v10162_v2 }
 0x481   : > { %v3656_v41 = vadd.f32 %v3609_v4, %v14715_v53  ;;  %v3611_v48 = vpop.f32.mrb[45].mxu1  ;;  %v6901_v40 = vpop.eup %6900  ;;  %v3650_v29 = vadd.f32 1.0, %v6899_v46  ;;  %v3677_v4 = vrot.slane %v10273_v55, 2 }
 0x482   : > { %v3657_v24 = vadd.f32 %v3611_v48, %v9677_v14  ;;  %v3613_v38 = vpop.f32.mrb[46].mxu1  ;;  %v3651_v8 = vadd.f32 1.0, %v6901_v40  ;;  %3811 = vmatpush1.bf16.msra.mxu0 %v14716_v62  ;;  %v6903_v32 = vpop.eup %6902 }
 0x483   : > { %v3660_v45 = vrot.slane %v3656_v41, 6  ;;  %v3614_v34 = vpop.f32.mrb[47].mxu1  ;;  %6906 = vrcp.f32 %v3650_v29  ;;  %3812 = vmatprep.subr.bf16.mxu0 %v14717_v49  ;;  %3934 = vmatpush1.bf16.msra.mxu1 %v10181_v0  ;;  %v6905_v36 = vpop.eup %6904  ;;  %v14721_v0 = vld [vmem:[#allocation17_spill] sm:$0xff]  ;;  %v14726_v41 = vld [vmem:[#allocation20_spill] sm:$0xff]  ;;  %v11201_v49 = vld [vmem:[%s13891_s3 + $0x370] ss:$24 sps:$4 sm:$0xff]  }
 0x484   : > { %v3661_v25 = vrot.slane %v3657_v24, 6  ;;  %6908 = vrcp.f32 %v3651_v8  ;;  %3935 = vmatprep.subr.bf16.mxu1 %v10187_v56  ;;  %v14723_v56 = vld [vmem:[#allocation18_spill] sm:$0xff] }
 0x485   : > { %v3664_v2 = vmul.f32 %v6903_v32, %v3660_v45  ;;  %v14727_v24 = vld [vmem:[#allocation22_spill] sm:$0xff]  ;;  %v14729_v32 = vld [vmem:[#allocation24_spill] sm:$0xff] }
 0x486   : > { %v3665_v60 = vmul.f32 %v6905_v36, %v3661_v25  ;;  %3813 = vmatpush1.bf16.msra.mxu0 %v10193_v31  ;;  %v14730_v25 = vld [vmem:[#allocation25_spill] sm:$0xff]  ;;  %v14731_v36 = vld [vmem:[#allocation26_spill] sm:$0xff] }
 0x487   : > { %v3666_v1 = vadd.f32 %v3664_v2, %v3483_v42  ;;  %3814 = vmatprep.subr.bf16.mxu0 %v14718_v11  ;;  %3936 = vmatpush1.bf16.msra.mxu1 %v14719_v5  ;;  %v14732_v2 = vld [vmem:[#allocation27_spill] sm:$0xff]  ;;  %v14733_v42 = vld [vmem:[#allocation28_spill] sm:$0xff]  ;;  %v14738_v11 = vld [vmem:[#allocation38_spill] sm:$0xff] }
 0x488   : > { %v3667_v63 = vadd.f32 %v3665_v60, %v3484_v59  ;;  %3937 = vmatprep.subr.bf16.mxu1 %v14720_v54  ;;  %v14734_v60 = vld [vmem:[#allocation30_spill] sm:$0xff]  ;;  %v14739_v5 = vld [vmem:[#allocation40_spill] sm:$0xff] }
 0x489   : > { %6910 = vtanh.f32 %v3666_v1  ;;  %v14735_v1 = vld [vmem:[#allocation32_spill] sm:$0xff]  ;;  %v14736_v59 = vld [vmem:[#allocation34_spill] sm:$0xff] }
 0x48a   : > { %6912 = vtanh.f32 %v3667_v63  ;;  %3815 = vmatpush1.bf16.msra.mxu0 %v14721_v0  ;;  %v14737_v63 = vld [vmem:[#allocation36_spill] sm:$0xff]  ;;  %v14740_v54 = vld [vmem:[#allocation42_spill] sm:$0xff] }
 0x48b   : > { %3948 = vmatprep.subr.bf16.mxu0 %v14722_v52  ;;  %3938 = vmatpush1.bf16.msra.mxu1 %v14723_v56  ;;  %v14741_v0 = vld [vmem:[#allocation44_spill] sm:$0xff]  ;;  %v14742_v52 = vld [vmem:[#allocation29_spill] sm:$0xff]  ;;  %v14743_v56 = vld [vmem:[#allocation46_spill] sm:$0xff] }
 0x48c   : > { %3989 = vmatprep.subr.bf16.mxu1 %v14724_v58  ;;  %v14744_v58 = vld [vmem:[#allocation31_spill] sm:$0xff] }
 0x48d   : > { %v6907_v31 = vpop.eup %6906  ;;  %3817 = vmatmul.mubr.bf16.vlgmr.msra.gmra.mrb[52].mxu0 %v10961_v33 }
 0x48e   : > { %v6909_v37 = vpop.eup %6908  ;;  %3949 = vmatpush1.bf16.msra.mxu0 %v14725_v39  ;;  %v3680_v46 = vmul.f32 %v6907_v31, %v3676_v7  ;;  %v3670_v40 = vsub.f32 1.0, %v6907_v31  ;;  %v14745_v7 = vld [vmem:[#allocation48_spill] sm:$0xff]  ;;  %v14746_v31 = vld [vmem:[#allocation33_spill] sm:$0xff] }
 0x48f   : > { %3950 = vmatprep.subr.bf16.mxu0 %v14726_v41  ;;  %v3681_v48 = vmul.f32 %v6909_v37, %v3677_v4  ;;  %v3671_v38 = vsub.f32 1.0, %v6909_v37  ;;  %v14747_v4 = vld [vmem:[#allocation50_spill] sm:$0xff]  ;;  %v14748_v37 = vld [vmem:[#allocation35_spill] sm:$0xff]  ;;  %v14749_v39 = vld [vmem:[#allocation52_spill] sm:$0xff] }
 0x490   : > { %v14751_v41 = vld [vmem:[#allocation54_spill] sm:$0xff] }
 0x492   : > { %3951 = vmatpush1.bf16.msra.mxu0 %v14727_v24  ;;  %v14755_v24 = vld [vmem:[#allocation58_spill] sm:$0xff] }
 0x493   : > { %v6911_v29 = vpop.eup %6910  ;;  %3952 = vmatprep.subr.bf16.mxu0 %v10262_v44 }
 0x494   : > { %v6913_v43 = vpop.eup %6912  ;;  %v3672_v33 = vmul.f32 %v6911_v29, %v3670_v40  ;;  %v14753_v40 = vld [vmem:[#allocation56_spill] sm:$0xff]  ;;  %v14754_v29 = vld [vmem:[#allocation41_spill] sm:$0xff] }
 0x495   : > { %v3673_v8 = vmul.f32 %v6913_v43, %v3671_v38  ;;  %v14756_v38 = vld [vmem:[#allocation43_spill] sm:$0xff]  ;;  %v14757_v43 = vld [vmem:[#allocation60_spill] sm:$0xff] }
 0x496   : > { %v11150_v55 = vadd.f32 %v3680_v46, %v3672_v33  ;;  %3953 = vmatpush1.bf16.msra.mxu0 %v10270_v13  ;;  %v14750_v46 = vld [vmem:[#allocation37_spill] sm:$0xff] }
 0x497   : > { %v11153_v45 = vadd.f32 %v3681_v48, %v3673_v8  ;;  %3954 = vmatprep.subr.bf16.mxu0 %v10278_v57  ;;  %v11173_v57 = vld [vmem:[%s13891_s3 + $0x310] ss:$24 sps:$4 sm:$0xff]   ;;  %v14758_v33 = vld [vmem:[#allocation45_spill] sm:$0xff] }
 0x498   : > { %3686 = vst [vmem:[%s7851_s21 + $0x10] sm:$0xc] %v11150_v55  ;;  %v3899_v62 = vpack.c.bf16 %v11150_v55, %v11150_v55  ;;  %v14752_v48 = vld [vmem:[#allocation39_spill] sm:$0xff]  ;;  %v14759_v8 = vld [vmem:[#allocation62_spill] sm:$0xff] }
 0x499   : > { %3687 = vst [vmem:[%s7851_s21 + $0x18] sm:$0xc] %v11153_v45  ;;  %v3900_v44 = vpack.c.bf16 %v11153_v45, %v11153_v45 }
 0x49a   : > { %3955 = vmatpush1.bf16.msra.mxu0 %v10292_v22  ;;  %v11166_v13 = vrot.slane %v3899_v62, 1  ;;  %v11180_v22 = vld [vmem:[%s13891_s3 + $0x344] ss:$24 sps:$4 sm:$0xff]   ;;  %v14760_v62 = vld [vmem:[#allocation47_spill] sm:$0xff] }
 0x49b   : > { %v3904_v34 = vrot.slane %v3900_v44, 1  ;;  %3956 = vmatprep.subr.bf16.mxu0 %v10298_v10  ;;  %v14728_v10 = vld [vmem:[#allocation23_spill] sm:$0xff]  ;;  %v14761_v44 = vld [vmem:[#allocation64_spill] sm:$0xff] }
 0x49d   : > { %3939 = vmatprep.mubr.bf16.mxu1 %v3904_v34  ;;  %3980 = vmatprep.mubr.bf16.mxu0 %v3904_v34 }
 0x49e   : > { %3940 = vmatmul.mubr.bf16.vlgmr.msra.gmra.mrb[52].mxu1 %v11166_v13  ;;  %3957 = vmatpush1.bf16.msra.mxu0 %v10307_v20  ;;  %v11187_v20 = vld [vmem:[%s13891_s3 + $0x340] ss:$24 sps:$4 sm:$0xff]  }
 0x49f   : > { %3990 = vmatpush1.bf16.msra.mxu1 %v11173_v57  ;;  %4021 = vmatprep.mubr.bf16.mxu1 %v3904_v34  ;;  %v14762_v34 = vld [vmem:[#allocation49_spill] sm:$0xff] }
 0x4a0   : > { %3958 = vmatprep.subr.bf16.mxu0 %v10314_v21  ;;  %3991 = vmatprep.subr.bf16.mxu1 %v11180_v22  ;;  %v11194_v21 = vld [vmem:[%s13891_s3 + $0x374] ss:$24 sps:$4 sm:$0xff]  }
 0x4a2   : > { %3959 = vmatpush1.bf16.msra.mxu0 %v14728_v10  ;;  %v14763_v10 = vld [vmem:[#allocation66_spill] sm:$0xff] }
 0x4a3   : > { %3992 = vmatpush1.bf16.msra.mxu1 %v11187_v20  ;;  %3960 = vmatprep.subr.bf16.mxu0 %v14729_v32  ;;  %v14764_v32 = vld [vmem:[#allocation51_spill] sm:$0xff] }
 0x4a4   : > { %3993 = vmatprep.subr.bf16.mxu1 %v11194_v21 }
 0x4a6   : > { %3961 = vmatpush1.bf16.msra.mxu0 %v14730_v25  ;;  %v14765_v25 = vld [vmem:[#allocation68_spill] sm:$0xff] }
 0x4a7   : > { %3994 = vmatpush1.bf16.msra.mxu1 %v11201_v49  ;;  %3962 = vmatprep.subr.bf16.mxu0 %v14731_v36  ;;  %v14766_v36 = vld [vmem:[#allocation53_spill] sm:$0xff] }
 0x4a8   : > { %3995 = vmatprep.subr.bf16.mxu1 %v14732_v2  ;;  %v14767_v2 = vld [vmem:[#allocation70_spill] sm:$0xff] }
 0x4aa   : > { %3963 = vmatpush1.bf16.msra.mxu0 %v14733_v42  ;;  %v14768_v42 = vld [vmem:[#allocation55_spill] sm:$0xff] }
 0x4ab   : > { %3996 = vmatpush1.bf16.msra.mxu1 %v14734_v60  ;;  %3964 = vmatprep.subr.bf16.mxu0 %v14735_v1  ;;  %v14769_v60 = vld [vmem:[#allocation57_spill] sm:$0xff]  ;;  %v14770_v1 = vld [vmem:[#allocation59_spill] sm:$0xff] }
 0x4ac   : > { %3997 = vmatprep.subr.bf16.mxu1 %v14736_v59  ;;  %v14771_v59 = vld [vmem:[#allocation61_spill] sm:$0xff] }
 0x4ae   : > { %3965 = vmatpush1.bf16.msra.mxu0 %v14737_v63  ;;  %v14772_v63 = vld [vmem:[#allocation63_spill] sm:$0xff] }
 0x4af   : > { %3998 = vmatpush1.bf16.msra.mxu1 %v14738_v11  ;;  %3966 = vmatprep.subr.bf16.mxu0 %v14739_v5  ;;  %v14773_v11 = vld [vmem:[#allocation65_spill] sm:$0xff]  ;;  %v14774_v5 = vld [vmem:[#allocation67_spill] sm:$0xff] }
 0x4b0   : > { %3999 = vmatprep.subr.bf16.mxu1 %v14740_v54  ;;  %v14775_v54 = vld [vmem:[#allocation69_spill] sm:$0xff] }
 0x4b2   : > { %3967 = vmatpush1.bf16.msra.mxu0 %v14741_v0  ;;  %v14776_v0 = vld [vmem:[#allocation78_spill] sm:$0xff] }
 0x4b3   : > { %4000 = vmatpush1.bf16.msra.mxu1 %v14742_v52  ;;  %3968 = vmatprep.subr.bf16.mxu0 %v14743_v56  ;;  %v14777_v52 = vld [vmem:[#allocation71_spill] sm:$0xff]  ;;  %v14778_v56 = vld [vmem:[#allocation80_spill] sm:$0xff] }
 0x4b4   : > { %4001 = vmatprep.subr.bf16.mxu1 %v14744_v58  ;;  %v14779_v58 = vld [vmem:[#allocation72_spill] sm:$0xff] }
 0x4b6   : > { %3969 = vmatpush1.bf16.msra.mxu0 %v14745_v7  ;;  %v14780_v7 = vld [vmem:[#allocation82_spill] sm:$0xff] }
 0x4b7   : > { %4002 = vmatpush1.bf16.msra.mxu1 %v14746_v31  ;;  %3970 = vmatprep.subr.bf16.mxu0 %v14747_v4  ;;  %v14781_v31 = vld [vmem:[#allocation73_spill] sm:$0xff]  ;;  %v14782_v4 = vld [vmem:[#allocation84_spill] sm:$0xff] }
 0x4b8   : > { %4003 = vmatprep.subr.bf16.mxu1 %v14748_v37  ;;  %v14783_v37 = vld [vmem:[#allocation74_spill] sm:$0xff] }
 0x4ba   : > { %3971 = vmatpush1.bf16.msra.mxu0 %v14749_v39  ;;  %v14784_v39 = vld [vmem:[#allocation86_spill] sm:$0xff] }
 0x4bb   : > { %4004 = vmatpush1.bf16.msra.mxu1 %v14750_v46  ;;  %3972 = vmatprep.subr.bf16.mxu0 %v14751_v41  ;;  %v14785_v46 = vld [vmem:[#allocation75_spill] sm:$0xff]  ;;  %v14786_v41 = vld [vmem:[#allocation88_spill] sm:$0xff] }
 0x4bc   : > { %4005 = vmatprep.subr.bf16.mxu1 %v14752_v48  ;;  %v14787_v48 = vld [vmem:[#allocation76_spill] sm:$0xff] }
 0x4be   : > { %3973 = vmatpush1.bf16.msra.mxu0 %v14753_v40  ;;  %v14788_v40 = vld [vmem:[#allocation90_spill] sm:$0xff] }
 0x4bf   : > { %4006 = vmatpush1.bf16.msra.mxu1 %v14754_v29  ;;  %3974 = vmatprep.subr.bf16.mxu0 %v14755_v24  ;;  %v14789_v29 = vld [vmem:[#allocation77_spill] sm:$0xff]  ;;  %v14790_v24 = vld [vmem:[#allocation92_spill] sm:$0xff] }
 0x4c0   : > { %4007 = vmatprep.subr.bf16.mxu1 %v14756_v38  ;;  %v14791_v38 = vld [vmem:[#allocation79_spill] sm:$0xff] }
 0x4c2   : > { %3975 = vmatpush1.bf16.msra.mxu0 %v14757_v43  ;;  %v14792_v43 = vld [vmem:[#allocation94_spill] sm:$0xff] }
 0x4c3   : > { %4008 = vmatpush1.bf16.msra.mxu1 %v14758_v33  ;;  %3976 = vmatprep.subr.bf16.mxu0 %v14759_v8  ;;  %v14793_v33 = vld [vmem:[#allocation81_spill] sm:$0xff]  ;;  %v14794_v8 = vld [vmem:[#allocation96_spill] sm:$0xff] }
 0x4c4   : > { %4009 = vmatprep.subr.bf16.mxu1 %v14760_v62  ;;  %v14796_v62 = vld [vmem:[#allocation85_spill] sm:$0xff] }
 0x4c6   : > { %3977 = vmatpush1.bf16.msra.mxu0 %v14761_v44  ;;  %v14797_v44 = vld [vmem:[#allocation87_spill] sm:$0xff] }
 0x4c7   : > { %4010 = vmatpush1.bf16.msra.mxu1 %v14762_v34  ;;  %3978 = vmatprep.subr.bf16.mxu0 %v14763_v10  ;;  %v14798_v34 = vld [vmem:[#allocation89_spill] sm:$0xff]  ;;  %v14799_v10 = vld [vmem:[#allocation91_spill] sm:$0xff] }
 0x4c8   : > { %4011 = vmatprep.subr.bf16.mxu1 %v14764_v32  ;;  %v14800_v32 = vld [vmem:[#allocation93_spill] sm:$0xff] }
 0x4ca   : > { %3979 = vmatpush1.bf16.msra.mxu0 %v14765_v25  ;;  %v14801_v25 = vld [vmem:[#allocation95_spill] sm:$0xff] }
 0x4cb   : > { %4012 = vmatpush1.bf16.msra.mxu1 %v14766_v36  ;;  %4098 = vmatprep.subr.bf16.mxu0 %v14768_v42  ;;  %v14802_v36 = vld [vmem:[#allocation97_spill] sm:$0xff]  ;;  %v14804_v42 = vld [vmem:[#allocation98_spill] sm:$0xff] }
 0x4cc   : > { %4013 = vmatprep.subr.bf16.mxu1 %v14767_v2  ;;  %v14803_v2 = vld [vmem:[#allocation105_spill] sm:$0xff] }
 0x4cd   : > { %3981 = vmatmul.mubr.bf16.vlgmr.msra.gmra.mrb[56].mxu0 %v11166_v13 }
 0x4ce   : > { %4099 = vmatpush1.bf16.msra.mxu0 %v14770_v1  ;;  %v14806_v1 = vld [vmem:[#allocation99_spill] sm:$0xff] }
 0x4cf   : > { %4014 = vmatpush1.bf16.msra.mxu1 %v14769_v60  ;;  %4100 = vmatprep.subr.bf16.mxu0 %v14772_v63  ;;  %v14805_v60 = vld [vmem:[#allocation107_spill] sm:$0xff]  ;;  %v14808_v63 = vld [vmem:[#allocation100_spill] sm:$0xff] }
 0x4d0   : > { %4015 = vmatprep.subr.bf16.mxu1 %v14771_v59  ;;  %v14807_v59 = vld [vmem:[#allocation109_spill] sm:$0xff] }
 0x4d2   : > { %4101 = vmatpush1.bf16.msra.mxu0 %v14774_v5  ;;  %v14810_v5 = vld [vmem:[#allocation101_spill] sm:$0xff] }
 0x4d3   : > { %4016 = vmatpush1.bf16.msra.mxu1 %v14773_v11  ;;  %4102 = vmatprep.subr.bf16.mxu0 %v14776_v0  ;;  %v14809_v11 = vld [vmem:[#allocation111_spill] sm:$0xff]  ;;  %v14812_v0 = vld [vmem:[#allocation102_spill] sm:$0xff] }
 0x4d4   : > { %4017 = vmatprep.subr.bf16.mxu1 %v14775_v54  ;;  %v14811_v54 = vld [vmem:[#allocation113_spill] sm:$0xff] }
 0x4d6   : > { %4103 = vmatpush1.bf16.msra.mxu0 %v14778_v56  ;;  %v14814_v56 = vld [vmem:[#allocation103_spill] sm:$0xff] }
 0x4d7   : > { %4018 = vmatpush1.bf16.msra.mxu1 %v14777_v52  ;;  %4104 = vmatprep.subr.bf16.mxu0 %v14780_v7  ;;  %v14813_v52 = vld [vmem:[#allocation115_spill] sm:$0xff]  ;;  %v14816_v7 = vld [vmem:[#allocation104_spill] sm:$0xff] }
 0x4d8   : > { %4019 = vmatprep.subr.bf16.mxu1 %v14779_v58  ;;  %v14815_v58 = vld [vmem:[#allocation117_spill] sm:$0xff] }
 0x4da   : > { %4105 = vmatpush1.bf16.msra.mxu0 %v14782_v4  ;;  %v14818_v4 = vld [vmem:[#allocation106_spill] sm:$0xff] }
 0x4db   : > { %4020 = vmatpush1.bf16.msra.mxu1 %v14781_v31  ;;  %4106 = vmatprep.subr.bf16.mxu0 %v14784_v39  ;;  %v14817_v31 = vld [vmem:[#allocation119_spill] sm:$0xff]  ;;  %v14820_v39 = vld [vmem:[#allocation110_spill] sm:$0xff] }
 0x4dc   : > { %4139 = vmatprep.subr.bf16.mxu1 %v14783_v37  ;;  %v14819_v37 = vld [vmem:[#allocation108_spill] sm:$0xff] }
 0x4de   : > { %4022 = vmatmul.mubr.bf16.vlgmr.msra.gmra.mrb[56].mxu1 %v11166_v13  ;;  %4107 = vmatpush1.bf16.msra.mxu0 %v14786_v41  ;;  %v14795_v13 = vld [vmem:[#allocation83_spill] sm:$0xff] }
 0x4df   : > { %4140 = vmatpush1.bf16.msra.mxu1 %v14785_v46  ;;  %4108 = vmatprep.subr.bf16.mxu0 %v14788_v40  ;;  %v14821_v46 = vld [vmem:[#allocation112_spill] sm:$0xff]  ;;  %v11300_v41 = vld [vmem:[%s13891_s3 + $0x270] ss:$24 sps:$4 sm:$0xff]  }
 0x4e0   : > { %4141 = vmatprep.subr.bf16.mxu1 %v14787_v48  ;;  %v14822_v48 = vld [vmem:[#allocation114_spill] sm:$0xff]  ;;  %v11307_v40 = vld [vmem:[%s13891_s3 + $0x2a4] ss:$24 sps:$4 sm:$0xff]  }
 0x4e2   : > { %4109 = vmatpush1.bf16.msra.mxu0 %v14790_v24  ;;  %v11314_v24 = vld [vmem:[%s13891_s3 + $0x2a0] ss:$24 sps:$4 sm:$0xff]  }
 0x4e3   : > { %4142 = vmatpush1.bf16.msra.mxu1 %v14789_v29  ;;  %4110 = vmatprep.subr.bf16.mxu0 %v14792_v43  ;;  %v14823_v29 = vld [vmem:[#allocation116_spill] sm:$0xff]  ;;  %v11321_v43 = vld [vmem:[%s13891_s3 + $0x2d4] ss:$24 sps:$4 sm:$0xff]  }
 0x4e4   : > { %4143 = vmatprep.subr.bf16.mxu1 %v14791_v38  ;;  %v14824_v38 = vld [vmem:[#allocation118_spill] sm:$0xff] }
 0x4e6   : > { %4111 = vmatpush1.bf16.msra.mxu0 %v14794_v8  ;;  %v11328_v8 = vld [vmem:[%s13891_s3 + $0x2d0] ss:$24 sps:$4 sm:$0xff]  }
 0x4e7   : > { %4144 = vmatpush1.bf16.msra.mxu1 %v14793_v33  ;;  %4112 = vmatprep.subr.bf16.mxu0 %v14796_v62  ;;  %v14825_v33 = vld [vmem:[#allocation120_spill] sm:$0xff]  ;;  %v11335_v62 = vld [vmem:[%s13891_s3 + $0x14] ss:$24 sps:$4 sm:$0xff]  }
 0x4e8   : > { %4145 = vmatprep.subr.bf16.mxu1 %v14795_v13  ;;  %v14826_v13 = vld [vmem:[#allocation123_spill] sm:$0xff] }
 0x4ea   : > { %4113 = vmatpush1.bf16.msra.mxu0 %v14798_v34  ;;  %v14828_v34 = vld [vmem:[#allocation125_spill] sm:$0xff] }
 0x4eb   : > { %4146 = vmatpush1.bf16.msra.mxu1 %v14797_v44  ;;  %4114 = vmatprep.subr.bf16.mxu0 %v14800_v32  ;;  %v14827_v44 = vld [vmem:[#allocation124_spill] sm:$0xff]  ;;  %v11349_v32 = vld [vmem:[%s13891_s3 + $0x2ac] ss:$24 sps:$4 sm:$0xff]  }
 0x4ec   : > { %4147 = vmatprep.subr.bf16.mxu1 %v14799_v10  ;;  %v11343_v10 = vld [vmem:[%s13891_s3 + $0x278] ss:$24 sps:$4 sm:$0xff]  }
 0x4ee   : > { %4115 = vmatpush1.bf16.msra.mxu0 %v14802_v36  ;;  %v11361_v36 = vld [vmem:[%s13891_s3 + $0x2dc] ss:$24 sps:$4 sm:$0xff]  }
 0x4ef   : > { %4148 = vmatpush1.bf16.msra.mxu1 %v14801_v25  ;;  %4116 = vmatprep.subr.bf16.mxu0 %v14804_v42  ;;  %v11355_v25 = vld [vmem:[%s13891_s3 + $0x2a8] ss:$24 sps:$4 sm:$0xff]   ;;  %v11373_v42 = vld [vmem:[%s13891_s3 + $0x304] ss:$24 sps:$4 sm:$0xff]  }
 0x4f0   : > { %4149 = vmatprep.subr.bf16.mxu1 %v14803_v2  ;;  %v11367_v2 = vld [vmem:[%s13891_s3 + $0x2d8] ss:$24 sps:$4 sm:$0xff]  }
 0x4f2   : > { %4117 = vmatpush1.bf16.msra.mxu0 %v14806_v1 }
 0x4f3   : > { %4150 = vmatpush1.bf16.msra.mxu1 %v14805_v60  ;;  %4118 = vmatprep.subr.bf16.mxu0 %v14808_v63 }
 0x4f4   : > { %4151 = vmatprep.subr.bf16.mxu1 %v14807_v59 }
 0x4f6   : > { %4119 = vmatpush1.bf16.msra.mxu0 %v14810_v5  ;;  %v3690_v5 = vld [vmem:[#allocation4 + $0x10] sm:$0xc0] }
 0x4f7   : > { %4152 = vmatpush1.bf16.msra.mxu1 %v14809_v11  ;;  %4120 = vmatprep.subr.bf16.mxu0 %v14812_v0 }
 0x4f8   : > { %4153 = vmatprep.subr.bf16.mxu1 %v14811_v54 }
 0x4fa   : > { %4121 = vmatpush1.bf16.msra.mxu0 %v14814_v56 }
 0x4fb   : > { %4154 = vmatpush1.bf16.msra.mxu1 %v14813_v52  ;;  %4122 = vmatprep.subr.bf16.mxu0 %v14816_v7 }
 0x4fc   : > { %4155 = vmatprep.subr.bf16.mxu1 %v14815_v58  ;;  %v3691_v58 = vld [vmem:[#allocation4 + $0x18] sm:$0xc0] }
 0x4fe   : > { %4123 = vmatpush1.bf16.msra.mxu0 %v14818_v4 }
 0x4ff   : > { %4156 = vmatpush1.bf16.msra.mxu1 %v14817_v31  ;;  %4124 = vmatprep.subr.bf16.mxu0 %v14820_v39 }
 0x500   : > { %4157 = vmatprep.subr.bf16.mxu1 %v14819_v37 }
 0x502   : > { %4125 = vmatpush1.bf16.msra.mxu0 %v11300_v41 }
 0x503   : > { %4158 = vmatpush1.bf16.msra.mxu1 %v14821_v46  ;;  %4126 = vmatprep.subr.bf16.mxu0 %v11307_v40 }
 0x504   : > { %4159 = vmatprep.subr.bf16.mxu1 %v14822_v48 }
 0x506   : > { %4127 = vmatpush1.bf16.msra.mxu0 %v11314_v24 }
 0x507   : > { %4160 = vmatpush1.bf16.msra.mxu1 %v14823_v29  ;;  %4128 = vmatprep.subr.bf16.mxu0 %v11321_v43 }
 0x508   : > { %4161 = vmatprep.subr.bf16.mxu1 %v14824_v38 }
 0x50a   : > { %4129 = vmatpush1.bf16.msra.mxu0 %v11328_v8 }
 0x50b   : > { %4162 = vmatpush1.bf16.msra.mxu1 %v14825_v33  ;;  %4180 = vmatprep.subr.bf16.mxu0 %v11335_v62 }
 0x50c   : > { %4163 = vmatprep.subr.bf16.mxu1 %v14826_v13 }
 0x50f   : > { %4164 = vmatpush1.bf16.msra.mxu1 %v14827_v44  ;;  %v3885_v44 = vrot.slane %v10949_v16, 6 }
 0x510   : > { %4165 = vmatprep.subr.bf16.mxu1 %v14828_v34 }
 0x513   : > { %4166 = vmatpush1.bf16.msra.mxu1 %v11343_v10 }
 0x514   : > { %4167 = vmatprep.subr.bf16.mxu1 %v11349_v32 }
 0x517   : > { %4168 = vmatpush1.bf16.msra.mxu1 %v11355_v25 }
 0x518   : > { %4169 = vmatprep.subr.bf16.mxu1 %v11361_v36 }
 0x51b   : > { %4170 = vmatpush1.bf16.msra.mxu1 %v11367_v2 }
 0x51c   : > { %4279 = vmatprep.subr.bf16.mxu1 %v11373_v42 }
 0x520   : > { %v3736_v60 = vpop.f32.mrb[48].mxu0  ;;  %v3777_v1 = vpop.f32.mrb[48].mxu1 }
 0x521   : > { %v3847_v59 = vrot.slane %v3777_v1, 2  ;;  %v3738_v63 = vpop.f32.mrb[49].mxu0  ;;  %v3779_v11 = vpop.f32.mrb[49].mxu1  ;;  %v3827_v33 = vrot.slane %v3736_v60, 2  ;;  %v3688_v1 = vld [vmem:[#allocation4] sm:$0xc0] }
 0x522   : > { %v3848_v54 = vrot.slane %v3779_v11, 2  ;;  %v3740_v0 = vpop.f32.mrb[50].mxu0  ;;  %v3781_v52 = vpop.f32.mrb[50].mxu1  ;;  %v3828_v13 = vrot.slane %v3738_v63, 2 }
 0x523   : > { %v3851_v56 = vadd.f32 %v3847_v59, %v3690_v5  ;;  %v3741_v7 = vpop.f32.mrb[51].mxu0  ;;  %v3782_v31 = vpop.f32.mrb[51].mxu1  ;;  %v3886_v59 = vrot.slane %v10951_v35, 6  ;;  %v3689_v0 = vld [vmem:[#allocation4 + $0x8] sm:$0xc0] }
 0x524   : > { %v3852_v4 = vadd.f32 %v3848_v54, %v3691_v58  ;;  %v3831_v54 = vadd.f32 %v3827_v33, %v3688_v1  ;;  %v3832_v52 = vadd.f32 %v3828_v13, %v3689_v0  ;;  %v3692_v1 = vld [vmem:[#allocation4 + $0x20] sm:$0xc0]  ;;  %v3693_v0 = vld [vmem:[#allocation4 + $0x28] sm:$0xc0] }
 0x525   : > { %v6305_v37 = vmul.f32 -1.442695, %v3851_v56 }
 0x526   : > { %v6306_v39 = vmul.f32 -1.442695, %v3852_v4  ;;  %v6303_v58 = vmul.f32 -1.442695, %v3831_v54  ;;  %v6304_v7 = vmul.f32 -1.442695, %v3832_v52 }
 0x527   : > { %6914 = vpow2.f32 %v6305_v37 }
 0x528   : > { %6916 = vpow2.f32 %v6306_v39 }
 0x531   : > { %v6915_v46 = vpop.eup %6914 }
 0x532   : > { %v3859_v48 = vadd.f32 1.0, %v6915_v46  ;;  %v6917_v29 = vpop.eup %6916 }
 0x533   : > { %v3860_v38 = vadd.f32 1.0, %v6917_v29 }
 0x534   : > { %6918 = vrcp.f32 %v3859_v48 }
 0x535   : > { %6920 = vrcp.f32 %v3860_v38 }
 0x536   : > { %6922 = vpow2.f32 %v6303_v58 }
 0x537   : > { %6924 = vpow2.f32 %v6304_v7 }
 0x53e   : > { %v6919_v34 = vpop.eup %6918 }
 0x53f   : > { %v3889_v11 = vmul.f32 %v6919_v34, %v3885_v44  ;;  %v6921_v5 = vpop.eup %6920 }
 0x540   : > { %v3890_v56 = vmul.f32 %v6921_v5, %v3886_v59  ;;  %v6923_v31 = vpop.eup %6922 }
 0x541   : > { %v6925_v4 = vpop.eup %6924  ;;  %v3839_v60 = vadd.f32 1.0, %v6923_v31 }
 0x542   : > { %v3840_v63 = vadd.f32 1.0, %v6925_v4  ;;  %v3879_v4 = vsub.f32 1.0, %v6919_v34 }
 0x543   : > { %6926 = vrcp.f32 %v3839_v60 }
 0x544   : > { %6928 = vrcp.f32 %v3840_v63 }
 0x54d   : > { %v6927_v38 = vpop.eup %6926 }
 0x54e   : > { %v6929_v13 = vpop.eup %6928 }
 0x560   : > { %v3818_v16 = vpop.f32.mrb[52].mxu0 }
 0x561   : > { %v3865_v37 = vadd.f32 %v3818_v16, %v14580_v15  ;;  %v3820_v35 = vpop.f32.mrb[53].mxu0  ;;  %v3880_v16 = vsub.f32 1.0, %v6921_v5  ;;  %v14835_v5 = vld [vmem:[#allocation133_spill] sm:$0xff] }
 0x562   : > { %v3866_v39 = vadd.f32 %v3820_v35, %v14581_v28  ;;  %v3822_v46 = vpop.f32.mrb[54].mxu0 }
 0x563   : > { %v3869_v48 = vrot.slane %v3865_v37, 2  ;;  %v3823_v29 = vpop.f32.mrb[55].mxu0 }
 0x564   : > { %v3870_v33 = vrot.slane %v3866_v39, 2 }
 0x565   : > { %v3873_v44 = vmul.f32 %v6927_v38, %v3869_v48 }
 0x566   : > { %v3874_v59 = vmul.f32 %v6929_v13, %v3870_v33  ;;  %v11427_v13 = vld [vmem:[%s13891_s3 + $0x424] ss:$24 sps:$4 sm:$0xff]  }
 0x567   : > { %v3875_v54 = vadd.f32 %v3873_v44, %v3692_v1  ;;  %v11457_v44 = vld [vmem:[%s13891_s3 + $0x160] ss:$24 sps:$4 sm:$0xff]   ;;  %v11463_v1 = vld [vmem:[%s13891_s3 + $0x194] ss:$24 sps:$4 sm:$0xff]  }
 0x568   : > { %v3876_v52 = vadd.f32 %v3874_v59, %v3693_v0  ;;  %v11469_v59 = vld [vmem:[%s13891_s3 + $0x450] ss:$24 sps:$4 sm:$0xff]  }
 0x569   : > { %6930 = vtanh.f32 %v3875_v54  ;;  %v11475_v54 = vld [vmem:[%s13891_s3 + $0x484] ss:$24 sps:$4 sm:$0xff]   ;;  %v11481_v0 = vld [vmem:[%s13891_s3 + $0x190] ss:$24 sps:$4 sm:$0xff]  }
 0x56a   : > { %6932 = vtanh.f32 %v3876_v52  ;;  %v3895_v52 = vld [vmem:[#allocation5 + $0x40] sm:$0x3] }
 0x571   : > { %v3941_v58 = vpop.f32.mrb[52].mxu1 }
 0x572   : > { %v3943_v7 = vpop.f32.mrb[53].mxu1 }
 0x573   : > { %v3945_v31 = vpop.f32.mrb[54].mxu1  ;;  %v6931_v60 = vpop.eup %6930 }
 0x574   : > { %v3946_v63 = vpop.f32.mrb[55].mxu1  ;;  %v6933_v37 = vpop.eup %6932  ;;  %v3881_v35 = vmul.f32 %v6931_v60, %v3879_v4  ;;  %v11493_v31 = vld [vmem:[%s13891_s3 + $0x480] ss:$24 sps:$4 sm:$0xff]  }
 0x575   : > { %v3882_v39 = vmul.f32 %v6933_v37, %v3880_v16  ;;  %v3896_v63 = vld [vmem:[#allocation5 + $0x48] sm:$0x3]  ;;  %v11499_v37 = vld [vmem:[%s13891_s3 + $0x4b4] ss:$24 sps:$4 sm:$0xff]  }
 0x576   : > { %v11380_v46 = vadd.f32 %v3889_v11, %v3881_v35  ;;  %v3894_v11 = vld [vmem:[#allocation5 + $0x38] sm:$0x3] }
 0x577   : > { %v11382_v48 = vadd.f32 %v3890_v56, %v3882_v39  ;;  %v11420_v56 = vld [vmem:[%s13891_s3 + $0x134] ss:$24 sps:$4 sm:$0xff]  }
 0x578   : > { %4080 = vst [vmem:[%s7846_s17] sm:$0xc0] %v11380_v46  ;;  %v4090_v29 = vpack.c.bf16 %v11380_v46, %v11380_v46 }
 0x579   : > { %4081 = vst [vmem:[%s7846_s17 + $0x8] sm:$0xc0] %v11382_v48  ;;  %v4091_v34 = vpack.c.bf16 %v11382_v48, %v11382_v48 }
 0x57a   : > { %v11392_v33 = vrot.slane %v4090_v29, 3 }
 0x57b   : > { %v4095_v38 = vrot.slane %v4091_v34, 3 }
 0x57d   : > { %4130 = vmatprep.mubr.bf16.mxu0 %v4095_v38  ;;  %4171 = vmatprep.mubr.bf16.mxu1 %v4095_v38 }
 0x57e   : > { %4131 = vmatmul.mubr.bf16.vlgmr.msra.gmra.mrb[60].mxu0 %v11392_v33  ;;  %4172 = vmatmul.mubr.bf16.vlgmr.msra.gmra.mrb[60].mxu1 %v11392_v33 }
 0x57f   : > { %4181 = vmatpush1.bf16.msra.mxu0 %v10968_v17  ;;  %4212 = vmatprep.mubr.bf16.mxu0 %v4095_v38  ;;  %v14829_v17 = vld [vmem:[#allocation126_spill] sm:$0xff]  ;;  %v11505_v38 = vld [vmem:[%s13891_s3 + $0x1c0] ss:$24 sps:$4 sm:$0xff]  }
 0x580   : > { %4182 = vmatprep.subr.bf16.mxu0 %v10974_v30  ;;  %4280 = vmatpush1.bf16.msra.mxu1 %v10980_v12  ;;  %v14830_v30 = vld [vmem:[#allocation127_spill] sm:$0xff]  ;;  %v14831_v12 = vld [vmem:[#allocation129_spill] sm:$0xff] }
 0x581   : > { %4281 = vmatprep.subr.bf16.mxu1 %v10986_v27  ;;  %v14832_v27 = vld [vmem:[#allocation130_spill] sm:$0xff] }
 0x583   : > { %4183 = vmatpush1.bf16.msra.mxu0 %v10992_v51  ;;  %v14833_v51 = vld [vmem:[#allocation131_spill] sm:$0xff] }
 0x584   : > { %4184 = vmatprep.subr.bf16.mxu0 %v10998_v6  ;;  %4282 = vmatpush1.bf16.msra.mxu1 %v11004_v18  ;;  %v3893_v6 = vld [vmem:[#allocation5 + $0x30] sm:$0x3] }
 0x585   : > { %4283 = vmatprep.subr.bf16.mxu1 %v11010_v19  ;;  %v4030_v18 = vadd.f32 %v3941_v58, %v3893_v6  ;;  %v14834_v19 = vld [vmem:[#allocation132_spill] sm:$0xff] }
 0x587   : > { %4185 = vmatpush1.bf16.msra.mxu0 %v11016_v50  ;;  %v4031_v50 = vadd.f32 %v3943_v7, %v3894_v11  ;;  %v11487_v7 = vld [vmem:[%s13891_s3 + $0x1c4] ss:$24 sps:$4 sm:$0xff]   ;;  %v11529_v11 = vld [vmem:[%s13891_s3 + $0x1f0] ss:$24 sps:$4 sm:$0xff]  }
 0x588   : > { %4186 = vmatprep.subr.bf16.mxu0 %v11022_v61  ;;  %4284 = vmatpush1.bf16.msra.mxu1 %v11028_v47  ;;  %v6307_v61 = vmul.f32 -1.442695, %v4030_v18  ;;  %v11523_v18 = vld [vmem:[%s13891_s3 + $0x4e4] ss:$24 sps:$4 sm:$0xff]  }
 0x589   : > { %4285 = vmatprep.subr.bf16.mxu1 %v14829_v17  ;;  %v6308_v47 = vmul.f32 -1.442695, %v4031_v50  ;;  %v11541_v50 = vld [vmem:[%s13891_s3 + $0x4e0] ss:$24 sps:$4 sm:$0xff]  }
 0x58a   : > { %6934 = vpow2.f32 %v6307_v61  ;;  %v11553_v61 = vld [vmem:[%s13891_s3 + $0x220] ss:$24 sps:$4 sm:$0xff]  }
 0x58b   : > { %4187 = vmatpush1.bf16.msra.mxu0 %v14830_v30  ;;  %6936 = vpow2.f32 %v6308_v47  ;;  %v11559_v47 = vld [vmem:[%s13891_s3 + $0x254] ss:$24 sps:$4 sm:$0xff]  }
 0x58c   : > { %4188 = vmatprep.subr.bf16.mxu0 %v14831_v12  ;;  %4286 = vmatpush1.bf16.msra.mxu1 %v14832_v27  ;;  %v11511_v27 = vld [vmem:[%s13891_s3 + $0x1f4] ss:$24 sps:$4 sm:$0xff]  }
 0x58d   : > { %4287 = vmatprep.subr.bf16.mxu1 %v14833_v51  ;;  %v11517_v51 = vld [vmem:[%s13891_s3 + $0x4b0] ss:$24 sps:$4 sm:$0xff]  }
 0x58f   : > { %4189 = vmatpush1.bf16.msra.mxu0 %v14834_v19  ;;  %v11535_v19 = vld [vmem:[%s13891_s3 + $0x224] ss:$24 sps:$4 sm:$0xff]  }
 0x590   : > { %4190 = vmatprep.subr.bf16.mxu0 %v14835_v5  ;;  %4288 = vmatpush1.bf16.msra.mxu1 %v11078_v9  ;;  %v11439_v9 = vld [vmem:[%s13891_s3 + $0x164] ss:$24 sps:$4 sm:$0xff]   ;;  %v11547_v5 = vld [vmem:[%s13891_s3 + $0x514] ss:$24 sps:$4 sm:$0xff]  }
 0x591   : > { %4289 = vmatprep.subr.bf16.mxu1 %v11084_v3  ;;  %v11433_v3 = vld [vmem:[%s13891_s3 + $0x130] ss:$24 sps:$4 sm:$0xff]  }
 0x593   : > { %4191 = vmatpush1.bf16.msra.mxu0 %v11090_v23  ;;  %v11445_v23 = vld [vmem:[%s13891_s3 + $0x420] ss:$24 sps:$4 sm:$0xff]  }
 0x594   : > { %4192 = vmatprep.subr.bf16.mxu0 %v11420_v56  ;;  %4290 = vmatpush1.bf16.msra.mxu1 %v11097_v26  ;;  %v11451_v26 = vld [vmem:[%s13891_s3 + $0x454] ss:$24 sps:$4 sm:$0xff]   ;;  %v6935_v4 = vpop.eup %6934 }
 0x595   : > { %4291 = vmatprep.subr.bf16.mxu1 %v11427_v13  ;;  %v6937_v35 = vpop.eup %6936  ;;  %v4038_v30 = vadd.f32 1.0, %v6935_v4 }
 0x596   : > { %v4039_v6 = vadd.f32 1.0, %v6937_v35 }
 0x597   : > { %4193 = vmatpush1.bf16.msra.mxu0 %v11433_v3 }
 0x598   : > { %4194 = vmatprep.subr.bf16.mxu0 %v11439_v9  ;;  %4292 = vmatpush1.bf16.msra.mxu1 %v11445_v23 }
 0x599   : > { %4293 = vmatprep.subr.bf16.mxu1 %v11451_v26 }
 0x59b   : > { %4195 = vmatpush1.bf16.msra.mxu0 %v11457_v44 }
 0x59c   : > { %4196 = vmatprep.subr.bf16.mxu0 %v11463_v1  ;;  %4294 = vmatpush1.bf16.msra.mxu1 %v11469_v59 }
 0x59d   : > { %4295 = vmatprep.subr.bf16.mxu1 %v11475_v54 }
 0x59f   : > { %4197 = vmatpush1.bf16.msra.mxu0 %v11481_v0 }
 0x5a0   : > { %v3982_v58 = vpop.f32.mrb[56].mxu0  ;;  %4198 = vmatprep.subr.bf16.mxu0 %v11487_v7  ;;  %4296 = vmatpush1.bf16.msra.mxu1 %v11493_v31 }
 0x5a1   : > { %v4044_v60 = vadd.f32 %v3982_v58, %v3895_v52  ;;  %v3984_v16 = vpop.f32.mrb[57].mxu0  ;;  %4297 = vmatprep.subr.bf16.mxu1 %v11499_v37  ;;  %v11565_v52 = vld [vmem:[%s13891_s3 + $0x510] ss:$24 sps:$4 sm:$0xff]   ;;  %v11571_v58 = vld [vmem:[%s13891_s3 + $0x544] ss:$24 sps:$4 sm:$0xff]  }
 0x5a2   : > { %v4045_v39 = vadd.f32 %v3984_v16, %v3896_v63  ;;  %v3986_v29 = vpop.f32.mrb[58].mxu0  ;;  %14836 = vst [vmem:[#allocation7_spill] sm:$0xff] %v11571_v58 }
 0x5a3   : > { %v6309_v34 = vmul.f32 -1.442695, %v4044_v60  ;;  %4199 = vmatpush1.bf16.msra.mxu0 %v11505_v38  ;;  %v3987_v17 = vpop.f32.mrb[59].mxu0  ;;  %v11577_v60 = vld [vmem:[%s13891_s3 + $0x250] ss:$24 sps:$4 sm:$0xff]  }
 0x5a4   : > { %v6310_v12 = vmul.f32 -1.442695, %v4045_v39  ;;  %4200 = vmatprep.subr.bf16.mxu0 %v11511_v27  ;;  %4298 = vmatpush1.bf16.msra.mxu1 %v11517_v51  ;;  %14837 = vst [vmem:[#allocation9_spill] sm:$0xff] %v11577_v60  ;;  %v11583_v39 = vld [vmem:[%s13891_s3 + $0x284] ss:$24 sps:$4 sm:$0xff]  }
 0x5a5   : > { %6938 = vpow2.f32 %v6309_v34  ;;  %4299 = vmatprep.subr.bf16.mxu1 %v11523_v18  ;;  %14838 = vst [vmem:[#allocation8_spill] sm:$0xff] %v11583_v39  ;;  %v11589_v29 = vld [vmem:[%s13891_s3 + $0x540] ss:$24 sps:$4 sm:$0xff]  }
 0x5a6   : > { %6940 = vpow2.f32 %v6310_v12  ;;  %14839 = vst [vmem:[#allocation10_spill] sm:$0xff] %v11589_v29  ;;  %v11596_v12 = vld [vmem:[%s13891_s3 + $0x574] ss:$24 sps:$4 sm:$0xff]  }
 0x5a7   : > { %4201 = vmatpush1.bf16.msra.mxu0 %v11529_v11  ;;  %6942 = vrcp.f32 %v4038_v30 }
 0x5a8   : > { %4202 = vmatprep.subr.bf16.mxu0 %v11535_v19  ;;  %4300 = vmatpush1.bf16.msra.mxu1 %v11541_v50  ;;  %6944 = vrcp.f32 %v4039_v6 }
 0x5a9   : > { %4301 = vmatprep.subr.bf16.mxu1 %v11547_v5 }
 0x5ab   : > { %4203 = vmatpush1.bf16.msra.mxu0 %v11553_v61 }
 0x5ac   : > { %4204 = vmatprep.subr.bf16.mxu0 %v11559_v47  ;;  %4302 = vmatpush1.bf16.msra.mxu1 %v11565_v52 }
 0x5ad   : > { %4303 = vmatprep.subr.bf16.mxu1 %v11571_v58 }
 0x5af   : > { %v6939_v4 = vpop.eup %6938  ;;  %4205 = vmatpush1.bf16.msra.mxu0 %v11577_v60 }
 0x5b0   : > { %v6941_v63 = vpop.eup %6940  ;;  %v4052_v16 = vadd.f32 1.0, %v6939_v4  ;;  %4206 = vmatprep.subr.bf16.mxu0 %v11583_v39  ;;  %4304 = vmatpush1.bf16.msra.mxu1 %v11589_v29 }
 0x5b1   : > { %v4023_v35 = vpop.f32.mrb[56].mxu1  ;;  %v4053_v34 = vadd.f32 1.0, %v6941_v63  ;;  %4305 = vmatprep.subr.bf16.mxu1 %v11596_v12  ;;  %v6943_v6 = vpop.eup %6942  ;;  %v11603_v63 = vld [vmem:[%s13891_s3 + $0x280] ss:$24 sps:$4 sm:$0xff]  }
 0x5b2   : > { %v4058_v17 = vadd.f32 %v4023_v35, %v14715_v53  ;;  %v4025_v30 = vpop.f32.mrb[57].mxu1  ;;  %6946 = vrcp.f32 %v4052_v16  ;;  %v6945_v60 = vpop.eup %6944  ;;  %v3897_v53 = vld [vmem:[#allocation5 + $0x50] sm:$0x3]  ;;  %v11609_v16 = vld [vmem:[%s13891_s3 + $0x2b4] ss:$24 sps:$4 sm:$0xff]  }
 0x5b3   : > { %v4059_v4 = vadd.f32 %v4025_v30, %v9677_v14  ;;  %v4027_v39 = vpop.f32.mrb[58].mxu1  ;;  %6948 = vrcp.f32 %v4053_v34  ;;  %4207 = vmatpush1.bf16.msra.mxu0 %v11603_v63 }
 0x5b4   : > { %v4060_v58 = vmul.f32 %v6943_v6, %v4058_v17  ;;  %v4028_v35 = vpop.f32.mrb[59].mxu1  ;;  %4208 = vmatprep.subr.bf16.mxu0 %v11609_v16  ;;  %v11615_v39 = vld [vmem:[%s13891_s3 + $0x570] ss:$24 sps:$4 sm:$0xff]   ;;  %v3898_v17 = vld [vmem:[#allocation5 + $0x58] sm:$0x3] }
 0x5b5   : > { %v4061_v29 = vmul.f32 %v6945_v60, %v4059_v4  ;;  %4306 = vmatpush1.bf16.msra.mxu1 %v11615_v39  ;;  %v11621_v60 = vld [vmem:[%s13891_s3 + $0x5a4] ss:$24 sps:$4 sm:$0xff]   ;;  %v11627_v6 = vld [vmem:[%s13891_s3 + $0x2b0] ss:$24 sps:$4 sm:$0xff]   ;;  %v11651_v4 = vld [vmem:[%s13891_s3 + $0x2e0] ss:$24 sps:$4 sm:$0xff]  }
 0x5b6   : > { %v4062_v34 = vadd.f32 %v4060_v58, %v3897_v53  ;;  %4307 = vmatprep.subr.bf16.mxu1 %v11621_v60  ;;  %14840 = vst [vmem:[#allocation11_spill] sm:$0xff] %v11627_v6  ;;  %v11633_v53 = vld [vmem:[%s13891_s3 + $0x2e4] ss:$24 sps:$4 sm:$0xff]   ;;  %v11639_v58 = vld [vmem:[%s13891_s3 + $0x5a0] ss:$24 sps:$4 sm:$0xff]   ;;  %14844 = vst [vmem:[#allocation15_spill] sm:$0xff] %v11651_v4 }
 0x5b7   : > { %v4063_v30 = vadd.f32 %v4061_v29, %v3898_v17  ;;  %4209 = vmatpush1.bf16.msra.mxu0 %v11627_v6  ;;  %14841 = vst [vmem:[#allocation13_spill] sm:$0xff] %v11633_v53  ;;  %14842 = vst [vmem:[#allocation12_spill] sm:$0xff] %v11639_v58  ;;  %v11645_v29 = vld [vmem:[%s13891_s3 + $0x5d4] ss:$24 sps:$4 sm:$0xff]   ;;  %v4072_v35 = vrot.slane %v11150_v55, 2 }
 0x5b8   : > { %6950 = vtanh.f32 %v4062_v34  ;;  %4210 = vmatprep.subr.bf16.mxu0 %v11633_v53  ;;  %14843 = vst [vmem:[#allocation14_spill] sm:$0xff] %v11645_v29  ;;  %v11658_v17 = vld [vmem:[%s13891_s3 + $0x30c] ss:$24 sps:$4 sm:$0xff]   ;;  %v11678_v53 = vld [vmem:[%s13891_s3 + $0x308] ss:$24 sps:$4 sm:$0xff]  }
 0x5b9   : > { %6952 = vtanh.f32 %v4063_v30  ;;  %4308 = vmatpush1.bf16.msra.mxu1 %v11639_v58  ;;  %14845 = vst [vmem:[#allocation17_spill] sm:$0xff] %v11658_v17  ;;  %v11664_v30 = vld [vmem:[%s13891_s3 + $0x5d0] ss:$24 sps:$4 sm:$0xff]   ;;  %v11671_v55 = vld [vmem:[%s13891_s3 + $0x314] ss:$24 sps:$4 sm:$0xff]   ;;  %14848 = vst [vmem:[#allocation19_spill] sm:$0xff] %v11678_v53 }
 0x5ba   : > { %4309 = vmatprep.subr.bf16.mxu1 %v11645_v29  ;;  %14846 = vst [vmem:[#allocation16_spill] sm:$0xff] %v11664_v30  ;;  %v4073_v29 = vrot.slane %v11153_v45, 2  ;;  %14847 = vst [vmem:[#allocation18_spill] sm:$0xff] %v11671_v55  ;;  %v11690_v6 = vld [vmem:[%s13891_s3 + $0x338] ss:$24 sps:$4 sm:$0xff]  }
 0x5bb   : > { %4211 = vmatpush1.bf16.msra.mxu0 %v11651_v4 }
 0x5bc   : > { %v6947_v34 = vpop.eup %6946  ;;  %4320 = vmatprep.subr.bf16.mxu0 %v11658_v17 }
 0x5bd   : > { %4310 = vmatpush1.bf16.msra.mxu1 %v11664_v30  ;;  %v6949_v4 = vpop.eup %6948  ;;  %v4076_v58 = vmul.f32 %v6947_v34, %v4072_v35  ;;  %v4066_v45 = vsub.f32 1.0, %v6947_v34  ;;  %v11684_v30 = vld [vmem:[%s13891_s3 + $0x33c] ss:$24 sps:$4 sm:$0xff]  }
 0x5be   : > { %4361 = vmatprep.subr.bf16.mxu1 %v11671_v55  ;;  %4213 = vmatmul.mubr.bf16.vlgmr.msra.gmra.mrb[64].mxu0 %v11392_v33  ;;  %v4077_v17 = vmul.f32 %v6949_v4, %v4073_v29  ;;  %14849 = vst [vmem:[#allocation21_spill] sm:$0xff] %v11684_v30  ;;  %v4067_v33 = vsub.f32 1.0, %v6949_v4 }
 0x5bf   : > { %4321 = vmatpush1.bf16.msra.mxu0 %v11678_v53  ;;  %v11696_v53 = vld [vmem:[%s13891_s3 + $0x36c] ss:$24 sps:$4 sm:$0xff]  }
 0x5c0   : > { %4322 = vmatprep.subr.bf16.mxu0 %v11684_v30 }
 0x5c2   : > { %v6951_v35 = vpop.eup %6950 }
 0x5c3   : > { %v6953_v29 = vpop.eup %6952  ;;  %v4068_v55 = vmul.f32 %v6951_v35, %v4066_v45  ;;  %4323 = vmatpush1.bf16.msra.mxu0 %v11690_v6  ;;  %v11708_v45 = vld [vmem:[%s13891_s3 + $0x368] ss:$24 sps:$4 sm:$0xff]  }
 0x5c4   : > { %v4069_v34 = vmul.f32 %v6953_v29, %v4067_v33  ;;  %4324 = vmatprep.subr.bf16.mxu0 %v11696_v53  ;;  %v11736_v33 = vld [vmem:[%s13891_s3 + $0x3cc] ss:$24 sps:$4 sm:$0xff]   ;;  %v11743_v29 = vld [vmem:[%s13891_s3 + $0x3c8] ss:$24 sps:$4 sm:$0xff]  }
 0x5c5   : > { %v11699_v30 = vadd.f32 %v4076_v58, %v4068_v55  ;;  %v11718_v58 = vld [vmem:[%s13891_s3 + $0x39c] ss:$24 sps:$4 sm:$0xff]   ;;  %v11729_v55 = vld [vmem:[%s13891_s3 + $0x398] ss:$24 sps:$4 sm:$0xff]  }
 0x5c6   : > { %v11701_v4 = vadd.f32 %v4077_v17, %v4069_v34  ;;  %v11776_v34 = vld [vmem:[%s13891_s3 + $0x428] ss:$24 sps:$4 sm:$0xff]  }
 0x5c7   : > { %4082 = vst [vmem:[%s7851_s21 + $0x10] sm:$0x3] %v11699_v30  ;;  %4325 = vmatpush1.bf16.msra.mxu0 %v11708_v45  ;;  %v11723_v17 = vpack.c.bf16 %v11699_v30, %v11699_v30  ;;  %14853 = vst [vmem:[#allocation24_spill] sm:$0xff] %v11776_v34 }
 0x5c8   : > { %4083 = vst [vmem:[%s7851_s21 + $0x18] sm:$0x3] %v11701_v4  ;;  %v4278_v35 = vpack.c.bf16 %v11701_v4, %v11701_v4  ;;  %4326 = vmatprep.subr.bf16.mxu0 %v11718_v58 }
 0x5ca   : > { %4311 = vmatprep.mubr.bf16.mxu1 %v4278_v35  ;;  %4352 = vmatprep.mubr.bf16.mxu0 %v4278_v35 }
 0x5cb   : > { %4312 = vmatmul.mubr.bf16.vlgmr.msra.gmra.mrb[64].mxu1 %v11723_v17  ;;  %4327 = vmatpush1.bf16.msra.mxu0 %v11729_v55 }
 0x5cc   : > { %4362 = vmatpush1.bf16.msra.mxu1 %v11173_v57  ;;  %4393 = vmatprep.mubr.bf16.mxu1 %v4278_v35  ;;  %v11750_v57 = vld [vmem:[%s13891_s3 + $0x3fc] ss:$24 sps:$4 sm:$0xff]  }
 0x5cd   : > { %4328 = vmatprep.subr.bf16.mxu0 %v11736_v33  ;;  %4363 = vmatprep.subr.bf16.mxu1 %v11180_v22  ;;  %v11757_v22 = vld [vmem:[%s13891_s3 + $0x3f8] ss:$24 sps:$4 sm:$0xff]   ;;  %v11788_v35 = vld [vmem:[%s13891_s3 + $0x45c] ss:$24 sps:$4 sm:$0xff]  }
 0x5ce   : > { %14850 = vst [vmem:[#allocation20_spill] sm:$0xff] %v11757_v22  ;;  %14855 = vst [vmem:[#allocation26_spill] sm:$0xff] %v11788_v35 }
 0x5cf   : > { %4329 = vmatpush1.bf16.msra.mxu0 %v11743_v29 }
 0x5d0   : > { %4364 = vmatpush1.bf16.msra.mxu1 %v11187_v20  ;;  %4330 = vmatprep.subr.bf16.mxu0 %v11750_v57  ;;  %v11764_v20 = vld [vmem:[%s13891_s3 + $0x42c] ss:$24 sps:$4 sm:$0xff]  }
 0x5d1   : > { %4365 = vmatprep.subr.bf16.mxu1 %v11194_v21  ;;  %14851 = vst [vmem:[#allocation22_spill] sm:$0xff] %v11764_v20  ;;  %v11770_v21 = vld [vmem:[%s13891_s3 + $0x3a4] ss:$24 sps:$4 sm:$0xff]  }
 0x5d2   : > { %14852 = vst [vmem:[#allocation23_spill] sm:$0xff] %v11770_v21 }
 0x5d3   : > { %4331 = vmatpush1.bf16.msra.mxu0 %v11757_v22  ;;  %v4084_v22 = vld [vmem:[#allocation4 + $0x30] sm:$0x3] }
 0x5d4   : > { %4366 = vmatpush1.bf16.msra.mxu1 %v11201_v49  ;;  %4332 = vmatprep.subr.bf16.mxu0 %v11764_v20  ;;  %v11782_v49 = vld [vmem:[%s13891_s3 + $0x3a0] ss:$24 sps:$4 sm:$0xff]  }
 0x5d5   : > { %4367 = vmatprep.subr.bf16.mxu1 %v11770_v21  ;;  %14854 = vst [vmem:[#allocation25_spill] sm:$0xff] %v11782_v49  ;;  %v11794_v21 = vld [vmem:[%s13891_s3 + $0x3d4] ss:$24 sps:$4 sm:$0xff]  }
 0x5d6   : > { %14856 = vst [vmem:[#allocation27_spill] sm:$0xff] %v11794_v21 }
 0x5d7   : > { %4333 = vmatpush1.bf16.msra.mxu0 %v11776_v34  ;;  %v11800_v34 = vld [vmem:[%s13891_s3 + $0x458] ss:$24 sps:$4 sm:$0xff]  }
 0x5d8   : > { %4368 = vmatpush1.bf16.msra.mxu1 %v11782_v49  ;;  %4334 = vmatprep.subr.bf16.mxu0 %v11788_v35  ;;  %14857 = vst [vmem:[#allocation28_spill] sm:$0xff] %v11800_v34  ;;  %v11806_v49 = vld [vmem:[%s13891_s3 + $0x3d0] ss:$24 sps:$4 sm:$0xff]   ;;  %v11812_v35 = vld [vmem:[%s13891_s3 + $0x48c] ss:$24 sps:$4 sm:$0xff]  }
 0x5d9   : > { %4369 = vmatprep.subr.bf16.mxu1 %v11794_v21  ;;  %14858 = vst [vmem:[#allocation30_spill] sm:$0xff] %v11806_v49  ;;  %14859 = vst [vmem:[#allocation32_spill] sm:$0xff] %v11812_v35  ;;  %v11818_v21 = vld [vmem:[%s13891_s3 + $0x404] ss:$24 sps:$4 sm:$0xff]  }
 0x5da   : > { %14860 = vst [vmem:[#allocation34_spill] sm:$0xff] %v11818_v21 }
 0x5db   : > { %4335 = vmatpush1.bf16.msra.mxu0 %v11800_v34  ;;  %v11824_v34 = vld [vmem:[%s13891_s3 + $0x488] ss:$24 sps:$4 sm:$0xff]  }
 0x5dc   : > { %4370 = vmatpush1.bf16.msra.mxu1 %v11806_v49  ;;  %4336 = vmatprep.subr.bf16.mxu0 %v11812_v35  ;;  %14861 = vst [vmem:[#allocation36_spill] sm:$0xff] %v11824_v34  ;;  %v11830_v49 = vld [vmem:[%s13891_s3 + $0x400] ss:$24 sps:$4 sm:$0xff]   ;;  %v11836_v35 = vld [vmem:[%s13891_s3 + $0x4bc] ss:$24 sps:$4 sm:$0xff]  }
 0x5dd   : > { %4371 = vmatprep.subr.bf16.mxu1 %v11818_v21  ;;  %14862 = vst [vmem:[#allocation38_spill] sm:$0xff] %v11830_v49  ;;  %14863 = vst [vmem:[#allocation40_spill] sm:$0xff] %v11836_v35  ;;  %v11842_v21 = vld [vmem:[%s13891_s3 + $0x434] ss:$24 sps:$4 sm:$0xff]  }
 0x5de   : > { %14864 = vst [vmem:[#allocation42_spill] sm:$0xff] %v11842_v21 }
 0x5df   : > { %4337 = vmatpush1.bf16.msra.mxu0 %v11824_v34  ;;  %v11848_v34 = vld [vmem:[%s13891_s3 + $0x4b8] ss:$24 sps:$4 sm:$0xff]  }
 0x5e0   : > { %4372 = vmatpush1.bf16.msra.mxu1 %v11830_v49  ;;  %4338 = vmatprep.subr.bf16.mxu0 %v11836_v35  ;;  %14865 = vst [vmem:[#allocation44_spill] sm:$0xff] %v11848_v34  ;;  %v11854_v49 = vld [vmem:[%s13891_s3 + $0x430] ss:$24 sps:$4 sm:$0xff]   ;;  %v11860_v35 = vld [vmem:[%s13891_s3 + $0x4ec] ss:$24 sps:$4 sm:$0xff]  }
 0x5e1   : > { %4373 = vmatprep.subr.bf16.mxu1 %v11842_v21  ;;  %14866 = vst [vmem:[#allocation29_spill] sm:$0xff] %v11854_v49  ;;  %14867 = vst [vmem:[#allocation46_spill] sm:$0xff] %v11860_v35  ;;  %v11866_v21 = vld [vmem:[%s13891_s3 + $0x464] ss:$24 sps:$4 sm:$0xff]  }
 0x5e2   : > { %14868 = vst [vmem:[#allocation31_spill] sm:$0xff] %v11866_v21 }
 0x5e3   : > { %4339 = vmatpush1.bf16.msra.mxu0 %v11848_v34  ;;  %v11872_v34 = vld [vmem:[%s13891_s3 + $0x4e8] ss:$24 sps:$4 sm:$0xff]  }
 0x5e4   : > { %4374 = vmatpush1.bf16.msra.mxu1 %v11854_v49  ;;  %4340 = vmatprep.subr.bf16.mxu0 %v11860_v35  ;;  %14869 = vst [vmem:[#allocation48_spill] sm:$0xff] %v11872_v34  ;;  %v11878_v49 = vld [vmem:[%s13891_s3 + $0x460] ss:$24 sps:$4 sm:$0xff]   ;;  %v11884_v35 = vld [vmem:[%s13891_s3 + $0x51c] ss:$24 sps:$4 sm:$0xff]  }
 0x5e5   : > { %4375 = vmatprep.subr.bf16.mxu1 %v11866_v21  ;;  %14870 = vst [vmem:[#allocation33_spill] sm:$0xff] %v11878_v49  ;;  %14871 = vst [vmem:[#allocation50_spill] sm:$0xff] %v11884_v35  ;;  %v11890_v21 = vld [vmem:[%s13891_s3 + $0x494] ss:$24 sps:$4 sm:$0xff]  }
 0x5e6   : > { %14872 = vst [vmem:[#allocation35_spill] sm:$0xff] %v11890_v21 }
 0x5e7   : > { %4341 = vmatpush1.bf16.msra.mxu0 %v11872_v34  ;;  %v11896_v34 = vld [vmem:[%s13891_s3 + $0x518] ss:$24 sps:$4 sm:$0xff]  }
 0x5e8   : > { %4376 = vmatpush1.bf16.msra.mxu1 %v11878_v49  ;;  %4342 = vmatprep.subr.bf16.mxu0 %v11884_v35  ;;  %14873 = vst [vmem:[#allocation52_spill] sm:$0xff] %v11896_v34  ;;  %v11902_v49 = vld [vmem:[%s13891_s3 + $0x490] ss:$24 sps:$4 sm:$0xff]   ;;  %v11908_v35 = vld [vmem:[%s13891_s3 + $0x54c] ss:$24 sps:$4 sm:$0xff]  }
 0x5e9   : > { %4377 = vmatprep.subr.bf16.mxu1 %v11890_v21  ;;  %14874 = vst [vmem:[#allocation37_spill] sm:$0xff] %v11902_v49  ;;  %14875 = vst [vmem:[#allocation54_spill] sm:$0xff] %v11908_v35  ;;  %v11914_v21 = vld [vmem:[%s13891_s3 + $0x4c4] ss:$24 sps:$4 sm:$0xff]  }
 0x5ea   : > { %14876 = vst [vmem:[#allocation39_spill] sm:$0xff] %v11914_v21 }
 0x5eb   : > { %4343 = vmatpush1.bf16.msra.mxu0 %v11896_v34  ;;  %v11920_v34 = vld [vmem:[%s13891_s3 + $0x548] ss:$24 sps:$4 sm:$0xff]  }
 0x5ec   : > { %4378 = vmatpush1.bf16.msra.mxu1 %v11902_v49  ;;  %4344 = vmatprep.subr.bf16.mxu0 %v11908_v35  ;;  %14877 = vst [vmem:[#allocation56_spill] sm:$0xff] %v11920_v34  ;;  %v11926_v49 = vld [vmem:[%s13891_s3 + $0x4c0] ss:$24 sps:$4 sm:$0xff]   ;;  %v11932_v35 = vld [vmem:[%s13891_s3 + $0x57c] ss:$24 sps:$4 sm:$0xff]  }
 0x5ed   : > { %4379 = vmatprep.subr.bf16.mxu1 %v11914_v21  ;;  %14878 = vst [vmem:[#allocation41_spill] sm:$0xff] %v11926_v49  ;;  %14879 = vst [vmem:[#allocation58_spill] sm:$0xff] %v11932_v35  ;;  %v11938_v21 = vld [vmem:[%s13891_s3 + $0x4f4] ss:$24 sps:$4 sm:$0xff]  }
 0x5ee   : > { %14880 = vst [vmem:[#allocation43_spill] sm:$0xff] %v11938_v21 }
 0x5ef   : > { %4345 = vmatpush1.bf16.msra.mxu0 %v11920_v34  ;;  %v11944_v34 = vld [vmem:[%s13891_s3 + $0x578] ss:$24 sps:$4 sm:$0xff]  }
 0x5f0   : > { %4380 = vmatpush1.bf16.msra.mxu1 %v11926_v49  ;;  %4346 = vmatprep.subr.bf16.mxu0 %v11932_v35  ;;  %14881 = vst [vmem:[#allocation60_spill] sm:$0xff] %v11944_v34  ;;  %v11950_v49 = vld [vmem:[%s13891_s3 + $0x4f0] ss:$24 sps:$4 sm:$0xff]   ;;  %v11956_v35 = vld [vmem:[%s13891_s3 + $0x5ac] ss:$24 sps:$4 sm:$0xff]  }
 0x5f1   : > { %4381 = vmatprep.subr.bf16.mxu1 %v11938_v21  ;;  %14882 = vst [vmem:[#allocation45_spill] sm:$0xff] %v11950_v49  ;;  %14883 = vst [vmem:[#allocation62_spill] sm:$0xff] %v11956_v35  ;;  %v11962_v21 = vld [vmem:[%s13891_s3 + $0x524] ss:$24 sps:$4 sm:$0xff]  }
 0x5f2   : > { %14884 = vst [vmem:[#allocation47_spill] sm:$0xff] %v11962_v21 }
 0x5f3   : > { %4347 = vmatpush1.bf16.msra.mxu0 %v11944_v34  ;;  %v11968_v34 = vld [vmem:[%s13891_s3 + $0x5a8] ss:$24 sps:$4 sm:$0xff]  }
 0x5f4   : > { %4382 = vmatpush1.bf16.msra.mxu1 %v11950_v49  ;;  %4348 = vmatprep.subr.bf16.mxu0 %v11956_v35  ;;  %14885 = vst [vmem:[#allocation64_spill] sm:$0xff] %v11968_v34  ;;  %v11974_v49 = vld [vmem:[%s13891_s3 + $0x520] ss:$24 sps:$4 sm:$0xff]   ;;  %v11980_v35 = vld [vmem:[%s13891_s3 + $0x5dc] ss:$24 sps:$4 sm:$0xff]  }
 0x5f5   : > { %4383 = vmatprep.subr.bf16.mxu1 %v11962_v21  ;;  %14886 = vst [vmem:[#allocation49_spill] sm:$0xff] %v11974_v49  ;;  %14887 = vst [vmem:[#allocation66_spill] sm:$0xff] %v11980_v35  ;;  %v11986_v21 = vld [vmem:[%s13891_s3 + $0x554] ss:$24 sps:$4 sm:$0xff]  }
 0x5f6   : > { %14888 = vst [vmem:[#allocation51_spill] sm:$0xff] %v11986_v21 }
 0x5f7   : > { %4349 = vmatpush1.bf16.msra.mxu0 %v11968_v34  ;;  %v11992_v34 = vld [vmem:[%s13891_s3 + $0x5d8] ss:$24 sps:$4 sm:$0xff]  }
 0x5f8   : > { %4384 = vmatpush1.bf16.msra.mxu1 %v11974_v49  ;;  %4350 = vmatprep.subr.bf16.mxu0 %v11980_v35  ;;  %14889 = vst [vmem:[#allocation68_spill] sm:$0xff] %v11992_v34  ;;  %v11998_v49 = vld [vmem:[%s13891_s3 + $0x550] ss:$24 sps:$4 sm:$0xff]   ;;  %v12004_v35 = vld [vmem:[%s13891_s3 + $0x584] ss:$24 sps:$4 sm:$0xff]  }
 0x5f9   : > { %4385 = vmatprep.subr.bf16.mxu1 %v11986_v21  ;;  %14890 = vst [vmem:[#allocation53_spill] sm:$0xff] %v11998_v49  ;;  %14891 = vst [vmem:[#allocation70_spill] sm:$0xff] %v12004_v35  ;;  %v12010_v21 = vld [vmem:[%s13891_s3 + $0x4] ss:$24 sps:$4 sm:$0xff]  }
 0x5fa   : > { %14892 = vst [vmem:[#allocation55_spill] sm:$0xff] %v12010_v21 }
 0x5fb   : > { %4351 = vmatpush1.bf16.msra.mxu0 %v11992_v34  ;;  %v12035_v34 = vld [vmem:[%s13891_s3 + $0x34] ss:$24 sps:$4 sm:$0xff]  }
 0x5fc   : > { %4386 = vmatpush1.bf16.msra.mxu1 %v11998_v49  ;;  %4482 = vmatprep.subr.bf16.mxu0 %v12010_v21  ;;  %v12017_v49 = vld [vmem:[%s13891_s3 + $0x580] ss:$24 sps:$4 sm:$0xff]   ;;  %v12029_v21 = vld [vmem:[%s13891_s3 + $0x5b4] ss:$24 sps:$4 sm:$0xff]   ;;  %14896 = vst [vmem:[#allocation63_spill] sm:$0xff] %v12035_v34 }
 0x5fd   : > { %4387 = vmatprep.subr.bf16.mxu1 %v12004_v35  ;;  %14893 = vst [vmem:[#allocation57_spill] sm:$0xff] %v12017_v49  ;;  %v12023_v35 = vld [vmem:[%s13891_s3] ss:$24 sps:$4 sm:$0xff]   ;;  %14895 = vst [vmem:[#allocation61_spill] sm:$0xff] %v12029_v21 }
 0x5fe   : > { %4353 = vmatmul.mubr.bf16.vlgmr.msra.gmra.mrb[68].mxu0 %v11723_v17  ;;  %14894 = vst [vmem:[#allocation59_spill] sm:$0xff] %v12023_v35 }
 0x5ff   : > { %4483 = vmatpush1.bf16.msra.mxu0 %v12023_v35  ;;  %v12047_v35 = vld [vmem:[%s13891_s3 + $0x30] ss:$24 sps:$4 sm:$0xff]  }
 0x600   : > { %4388 = vmatpush1.bf16.msra.mxu1 %v12017_v49  ;;  %4484 = vmatprep.subr.bf16.mxu0 %v12035_v34  ;;  %v12041_v49 = vld [vmem:[%s13891_s3 + $0x5b0] ss:$24 sps:$4 sm:$0xff]   ;;  %14898 = vst [vmem:[#allocation67_spill] sm:$0xff] %v12047_v35  ;;  %v12059_v34 = vld [vmem:[%s13891_s3 + $0x64] ss:$24 sps:$4 sm:$0xff]  }
 0x601   : > { %4389 = vmatprep.subr.bf16.mxu1 %v12029_v21  ;;  %14897 = vst [vmem:[#allocation65_spill] sm:$0xff] %v12041_v49  ;;  %v12053_v21 = vld [vmem:[%s13891_s3 + $0x5e4] ss:$24 sps:$4 sm:$0xff]   ;;  %14900 = vst [vmem:[#allocation78_spill] sm:$0xff] %v12059_v34 }
 0x602   : > { %14899 = vst [vmem:[#allocation69_spill] sm:$0xff] %v12053_v21 }
 0x603   : > { %4485 = vmatpush1.bf16.msra.mxu0 %v12047_v35  ;;  %v12071_v35 = vld [vmem:[%s13891_s3 + $0x60] ss:$24 sps:$4 sm:$0xff]  }
 0x604   : > { %4390 = vmatpush1.bf16.msra.mxu1 %v12041_v49  ;;  %4486 = vmatprep.subr.bf16.mxu0 %v12059_v34  ;;  %v12065_v49 = vld [vmem:[%s13891_s3 + $0x5e0] ss:$24 sps:$4 sm:$0xff]   ;;  %14902 = vst [vmem:[#allocation80_spill] sm:$0xff] %v12071_v35  ;;  %v12083_v34 = vld [vmem:[%s13891_s3 + $0x94] ss:$24 sps:$4 sm:$0xff]  }
 0x605   : > { %4391 = vmatprep.subr.bf16.mxu1 %v12053_v21  ;;  %14901 = vst [vmem:[#allocation71_spill] sm:$0xff] %v12065_v49  ;;  %v12077_v21 = vld [vmem:[%s13891_s3 + $0xc] ss:$24 sps:$4 sm:$0xff]   ;;  %14904 = vst [vmem:[#allocation82_spill] sm:$0xff] %v12083_v34 }
 0x606   : > { %14903 = vst [vmem:[#allocation72_spill] sm:$0xff] %v12077_v21 }
 0x607   : > { %4487 = vmatpush1.bf16.msra.mxu0 %v12071_v35 }
 0x608   : > { %4392 = vmatpush1.bf16.msra.mxu1 %v12065_v49  ;;  %4488 = vmatprep.subr.bf16.mxu0 %v12083_v34  ;;  %v12090_v49 = vld [vmem:[%s13891_s3 + $0x8] ss:$24 sps:$4 sm:$0xff]   ;;  %v12102_v34 = vld [vmem:[%s13891_s3 + $0x3c] ss:$24 sps:$4 sm:$0xff]  }
 0x609   : > { %4523 = vmatprep.subr.bf16.mxu1 %v12077_v21  ;;  %14905 = vst [vmem:[#allocation73_spill] sm:$0xff] %v12090_v49  ;;  %v12096_v21 = vld [vmem:[%s13891_s3 + $0x90] ss:$24 sps:$4 sm:$0xff]   ;;  %14907 = vst [vmem:[#allocation74_spill] sm:$0xff] %v12102_v34 }
 0x60a   : > { %14906 = vst [vmem:[#allocation84_spill] sm:$0xff] %v12096_v21 }
 0x60b   : > { %4394 = vmatmul.mubr.bf16.vlgmr.msra.gmra.mrb[68].mxu1 %v11723_v17  ;;  %4489 = vmatpush1.bf16.msra.mxu0 %v12096_v21  ;;  %v12108_v17 = vld [vmem:[%s13891_s3 + $0xc4] ss:$24 sps:$4 sm:$0xff]   ;;  %v12120_v21 = vld [vmem:[%s13891_s3 + $0xc0] ss:$24 sps:$4 sm:$0xff]  }
 0x60c   : > { %4524 = vmatpush1.bf16.msra.mxu1 %v12090_v49  ;;  %14908 = vst [vmem:[#allocation86_spill] sm:$0xff] %v12108_v17  ;;  %4490 = vmatprep.subr.bf16.mxu0 %v12108_v17  ;;  %v12114_v49 = vld [vmem:[%s13891_s3 + $0x38] ss:$24 sps:$4 sm:$0xff]   ;;  %14910 = vst [vmem:[#allocation88_spill] sm:$0xff] %v12120_v21  ;;  %v12132_v17 = vld [vmem:[%s13891_s3 + $0xf4] ss:$24 sps:$4 sm:$0xff]  }
 0x60d   : > { %4525 = vmatprep.subr.bf16.mxu1 %v12102_v34  ;;  %14909 = vst [vmem:[#allocation75_spill] sm:$0xff] %v12114_v49  ;;  %v12126_v34 = vld [vmem:[%s13891_s3 + $0x6c] ss:$24 sps:$4 sm:$0xff]   ;;  %14912 = vst [vmem:[#allocation90_spill] sm:$0xff] %v12132_v17 }
 0x60e   : > { %14911 = vst [vmem:[#allocation76_spill] sm:$0xff] %v12126_v34 }
 0x60f   : > { %4491 = vmatpush1.bf16.msra.mxu0 %v12120_v21  ;;  %v12144_v21 = vld [vmem:[%s13891_s3 + $0xf0] ss:$24 sps:$4 sm:$0xff]  }
 0x610   : > { %4526 = vmatpush1.bf16.msra.mxu1 %v12114_v49  ;;  %4492 = vmatprep.subr.bf16.mxu0 %v12132_v17  ;;  %v12138_v49 = vld [vmem:[%s13891_s3 + $0x68] ss:$24 sps:$4 sm:$0xff]   ;;  %14914 = vst [vmem:[#allocation92_spill] sm:$0xff] %v12144_v21  ;;  %v12156_v17 = vld [vmem:[%s13891_s3 + $0x124] ss:$24 sps:$4 sm:$0xff]  }
 0x611   : > { %4527 = vmatprep.subr.bf16.mxu1 %v12126_v34  ;;  %14913 = vst [vmem:[#allocation77_spill] sm:$0xff] %v12138_v49  ;;  %v12150_v34 = vld [vmem:[%s13891_s3 + $0x9c] ss:$24 sps:$4 sm:$0xff]   ;;  %14916 = vst [vmem:[#allocation94_spill] sm:$0xff] %v12156_v17 }
 0x612   : > { %14915 = vst [vmem:[#allocation79_spill] sm:$0xff] %v12150_v34 }
 0x613   : > { %4493 = vmatpush1.bf16.msra.mxu0 %v12144_v21  ;;  %v12168_v21 = vld [vmem:[%s13891_s3 + $0x120] ss:$24 sps:$4 sm:$0xff]  }
 0x614   : > { %4528 = vmatpush1.bf16.msra.mxu1 %v12138_v49  ;;  %4494 = vmatprep.subr.bf16.mxu0 %v12156_v17  ;;  %v12162_v49 = vld [vmem:[%s13891_s3 + $0x98] ss:$24 sps:$4 sm:$0xff]   ;;  %14918 = vst [vmem:[#allocation96_spill] sm:$0xff] %v12168_v21  ;;  %v12180_v17 = vld [vmem:[%s13891_s3 + $0x154] ss:$24 sps:$4 sm:$0xff]  }
 0x615   : > { %4529 = vmatprep.subr.bf16.mxu1 %v12150_v34  ;;  %14917 = vst [vmem:[#allocation81_spill] sm:$0xff] %v12162_v49  ;;  %v12174_v34 = vld [vmem:[%s13891_s3 + $0xcc] ss:$24 sps:$4 sm:$0xff]   ;;  %14920 = vst [vmem:[#allocation85_spill] sm:$0xff] %v12180_v17 }
 0x616   : > { %14919 = vst [vmem:[#allocation83_spill] sm:$0xff] %v12174_v34 }
 0x617   : > { %4495 = vmatpush1.bf16.msra.mxu0 %v12168_v21  ;;  %v12192_v21 = vld [vmem:[%s13891_s3 + $0x150] ss:$24 sps:$4 sm:$0xff]  }
 0x618   : > { %4530 = vmatpush1.bf16.msra.mxu1 %v12162_v49  ;;  %4496 = vmatprep.subr.bf16.mxu0 %v12180_v17  ;;  %v12186_v49 = vld [vmem:[%s13891_s3 + $0xc8] ss:$24 sps:$4 sm:$0xff]   ;;  %14922 = vst [vmem:[#allocation89_spill] sm:$0xff] %v12192_v21  ;;  %v12204_v17 = vld [vmem:[%s13891_s3 + $0x184] ss:$24 sps:$4 sm:$0xff]  }
 0x619   : > { %4531 = vmatprep.subr.bf16.mxu1 %v12174_v34  ;;  %14921 = vst [vmem:[#allocation87_spill] sm:$0xff] %v12186_v49  ;;  %v12198_v34 = vld [vmem:[%s13891_s3 + $0xfc] ss:$24 sps:$4 sm:$0xff]   ;;  %14924 = vst [vmem:[#allocation93_spill] sm:$0xff] %v12204_v17 }
 0x61a   : > { %14923 = vst [vmem:[#allocation91_spill] sm:$0xff] %v12198_v34 }
 0x61b   : > { %4497 = vmatpush1.bf16.msra.mxu0 %v12192_v21  ;;  %v12216_v21 = vld [vmem:[%s13891_s3 + $0x180] ss:$24 sps:$4 sm:$0xff]  }
 0x61c   : > { %4532 = vmatpush1.bf16.msra.mxu1 %v12186_v49  ;;  %4498 = vmatprep.subr.bf16.mxu0 %v12204_v17  ;;  %v12210_v49 = vld [vmem:[%s13891_s3 + $0xf8] ss:$24 sps:$4 sm:$0xff]   ;;  %14926 = vst [vmem:[#allocation97_spill] sm:$0xff] %v12216_v21  ;;  %v12228_v17 = vld [vmem:[%s13891_s3 + $0x1b4] ss:$24 sps:$4 sm:$0xff]  }
 0x61d   : > { %4533 = vmatprep.subr.bf16.mxu1 %v12198_v34  ;;  %14925 = vst [vmem:[#allocation95_spill] sm:$0xff] %v12210_v49  ;;  %v12222_v34 = vld [vmem:[%s13891_s3 + $0x12c] ss:$24 sps:$4 sm:$0xff]   ;;  %14928 = vst [vmem:[#allocation98_spill] sm:$0xff] %v12228_v17 }
 0x61e   : > { %14927 = vst [vmem:[#allocation105_spill] sm:$0xff] %v12222_v34 }
 0x61f   : > { %4499 = vmatpush1.bf16.msra.mxu0 %v12216_v21  ;;  %v12240_v21 = vld [vmem:[%s13891_s3 + $0x1b0] ss:$24 sps:$4 sm:$0xff]  }
 0x620   : > { %4534 = vmatpush1.bf16.msra.mxu1 %v12210_v49  ;;  %4500 = vmatprep.subr.bf16.mxu0 %v12228_v17  ;;  %v12234_v49 = vld [vmem:[%s13891_s3 + $0x128] ss:$24 sps:$4 sm:$0xff]   ;;  %14930 = vst [vmem:[#allocation99_spill] sm:$0xff] %v12240_v21  ;;  %v12252_v17 = vld [vmem:[%s13891_s3 + $0x1e4] ss:$24 sps:$4 sm:$0xff]  }
 0x621   : > { %4535 = vmatprep.subr.bf16.mxu1 %v12222_v34  ;;  %14929 = vst [vmem:[#allocation107_spill] sm:$0xff] %v12234_v49  ;;  %v12246_v34 = vld [vmem:[%s13891_s3 + $0x15c] ss:$24 sps:$4 sm:$0xff]   ;;  %14932 = vst [vmem:[#allocation100_spill] sm:$0xff] %v12252_v17 }
 0x622   : > { %14931 = vst [vmem:[#allocation109_spill] sm:$0xff] %v12246_v34 }
 0x623   : > { %4501 = vmatpush1.bf16.msra.mxu0 %v12240_v21  ;;  %v12264_v21 = vld [vmem:[%s13891_s3 + $0x1e0] ss:$24 sps:$4 sm:$0xff]  }
 0x624   : > { %4536 = vmatpush1.bf16.msra.mxu1 %v12234_v49  ;;  %4502 = vmatprep.subr.bf16.mxu0 %v12252_v17  ;;  %v12258_v49 = vld [vmem:[%s13891_s3 + $0x158] ss:$24 sps:$4 sm:$0xff]   ;;  %14934 = vst [vmem:[#allocation101_spill] sm:$0xff] %v12264_v21  ;;  %v12276_v17 = vld [vmem:[%s13891_s3 + $0x214] ss:$24 sps:$4 sm:$0xff]  }
 0x625   : > { %4537 = vmatprep.subr.bf16.mxu1 %v12246_v34  ;;  %14933 = vst [vmem:[#allocation111_spill] sm:$0xff] %v12258_v49  ;;  %v12270_v34 = vld [vmem:[%s13891_s3 + $0x18c] ss:$24 sps:$4 sm:$0xff]   ;;  %14936 = vst [vmem:[#allocation102_spill] sm:$0xff] %v12276_v17 }
 0x626   : > { %14935 = vst [vmem:[#allocation113_spill] sm:$0xff] %v12270_v34 }
 0x627   : > { %4503 = vmatpush1.bf16.msra.mxu0 %v12264_v21  ;;  %v12288_v21 = vld [vmem:[%s13891_s3 + $0x210] ss:$24 sps:$4 sm:$0xff]  }
 0x628   : > { %4538 = vmatpush1.bf16.msra.mxu1 %v12258_v49  ;;  %4504 = vmatprep.subr.bf16.mxu0 %v12276_v17  ;;  %v12282_v49 = vld [vmem:[%s13891_s3 + $0x188] ss:$24 sps:$4 sm:$0xff]   ;;  %14938 = vst [vmem:[#allocation103_spill] sm:$0xff] %v12288_v21  ;;  %v12300_v17 = vld [vmem:[%s13891_s3 + $0x244] ss:$24 sps:$4 sm:$0xff]  }
 0x629   : > { %4539 = vmatprep.subr.bf16.mxu1 %v12270_v34  ;;  %14937 = vst [vmem:[#allocation115_spill] sm:$0xff] %v12282_v49  ;;  %v12294_v34 = vld [vmem:[%s13891_s3 + $0x1bc] ss:$24 sps:$4 sm:$0xff]   ;;  %14940 = vst [vmem:[#allocation104_spill] sm:$0xff] %v12300_v17 }
 0x62a   : > { %14939 = vst [vmem:[#allocation117_spill] sm:$0xff] %v12294_v34 }
 0x62b   : > { %4505 = vmatpush1.bf16.msra.mxu0 %v12288_v21  ;;  %v12312_v21 = vld [vmem:[%s13891_s3 + $0x240] ss:$24 sps:$4 sm:$0xff]  }
 0x62c   : > { %4540 = vmatpush1.bf16.msra.mxu1 %v12282_v49  ;;  %4506 = vmatprep.subr.bf16.mxu0 %v12300_v17  ;;  %v12306_v49 = vld [vmem:[%s13891_s3 + $0x1b8] ss:$24 sps:$4 sm:$0xff]   ;;  %14942 = vst [vmem:[#allocation106_spill] sm:$0xff] %v12312_v21  ;;  %v12324_v17 = vld [vmem:[%s13891_s3 + $0x274] ss:$24 sps:$4 sm:$0xff]  }
 0x62d   : > { %4541 = vmatprep.subr.bf16.mxu1 %v12294_v34  ;;  %14941 = vst [vmem:[#allocation119_spill] sm:$0xff] %v12306_v49  ;;  %v12318_v34 = vld [vmem:[%s13891_s3 + $0x1ec] ss:$24 sps:$4 sm:$0xff]   ;;  %14944 = vst [vmem:[#allocation110_spill] sm:$0xff] %v12324_v17 }
 0x62e   : > { %14943 = vst [vmem:[#allocation108_spill] sm:$0xff] %v12318_v34 }
 0x62f   : > { %4507 = vmatpush1.bf16.msra.mxu0 %v12312_v21 }
 0x630   : > { %4542 = vmatpush1.bf16.msra.mxu1 %v12306_v49  ;;  %4508 = vmatprep.subr.bf16.mxu0 %v12324_v17  ;;  %v12330_v49 = vld [vmem:[%s13891_s3 + $0x1e8] ss:$24 sps:$4 sm:$0xff]   ;;  %v12344_v17 = vld [vmem:[%s13891_s3 + $0x218] ss:$24 sps:$4 sm:$0xff]  }
 0x631   : > { %4543 = vmatprep.subr.bf16.mxu1 %v12318_v34  ;;  %14945 = vst [vmem:[#allocation112_spill] sm:$0xff] %v12330_v49  ;;  %v12337_v34 = vld [vmem:[%s13891_s3 + $0x21c] ss:$24 sps:$4 sm:$0xff]   ;;  %14947 = vst [vmem:[#allocation116_spill] sm:$0xff] %v12344_v17 }
 0x632   : > { %14946 = vst [vmem:[#allocation114_spill] sm:$0xff] %v12337_v34 }
 0x633   : > { %4509 = vmatpush1.bf16.msra.mxu0 %v11300_v41  ;;  %v12351_v41 = vld [vmem:[%s13891_s3 + $0x24c] ss:$24 sps:$4 sm:$0xff]  }
 0x634   : > { %4544 = vmatpush1.bf16.msra.mxu1 %v12330_v49  ;;  %4510 = vmatprep.subr.bf16.mxu0 %v11307_v40  ;;  %14948 = vst [vmem:[#allocation118_spill] sm:$0xff] %v12351_v41  ;;  %v12358_v40 = vld [vmem:[%s13891_s3 + $0x248] ss:$24 sps:$4 sm:$0xff]  }
 0x635   : > { %4545 = vmatprep.subr.bf16.mxu1 %v12337_v34  ;;  %14949 = vst [vmem:[#allocation120_spill] sm:$0xff] %v12358_v40 }
 0x637   : > { %4511 = vmatpush1.bf16.msra.mxu0 %v11314_v24  ;;  %v12365_v24 = vld [vmem:[%s13891_s3 + $0x27c] ss:$24 sps:$4 sm:$0xff]  }
 0x638   : > { %4546 = vmatpush1.bf16.msra.mxu1 %v12344_v17  ;;  %4512 = vmatprep.subr.bf16.mxu0 %v11321_v43  ;;  %14950 = vst [vmem:[#allocation123_spill] sm:$0xff] %v12365_v24 }
 0x639   : > { %4547 = vmatprep.subr.bf16.mxu1 %v12351_v41 }
 0x63b   : > { %4513 = vmatpush1.bf16.msra.mxu0 %v11328_v8  ;;  %v4086_v8 = vld [vmem:[#allocation4 + $0x40] sm:$0x3] }
 0x63c   : > { %4548 = vmatpush1.bf16.msra.mxu1 %v12358_v40  ;;  %4564 = vmatprep.subr.bf16.mxu0 %v11335_v62 }
 0x63d   : > { %4549 = vmatprep.subr.bf16.mxu1 %v12365_v24  ;;  %v4087_v24 = vld [vmem:[#allocation4 + $0x48] sm:$0x3] }
 0x640   : > { %4550 = vmatpush1.bf16.msra.mxu1 %v11343_v10 }
 0x641   : > { %4551 = vmatprep.subr.bf16.mxu1 %v11349_v32 }
 0x644   : > { %4552 = vmatpush1.bf16.msra.mxu1 %v11355_v25 }
 0x645   : > { %4553 = vmatprep.subr.bf16.mxu1 %v11361_v36 }
 0x648   : > { %4554 = vmatpush1.bf16.msra.mxu1 %v11367_v2 }
 0x649   : > { %4687 = vmatprep.subr.bf16.mxu1 %v11373_v42 }
 0x651   : > { %v4132_v43 = vpop.f32.mrb[60].mxu0  ;;  %v4173_v40 = vpop.f32.mrb[60].mxu1 }
 0x652   : > { %v4235_v41 = vadd.f32 %v4173_v40, %v4086_v8  ;;  %v4134_v17 = vpop.f32.mrb[61].mxu0  ;;  %v4175_v34 = vpop.f32.mrb[61].mxu1  ;;  %v4263_v40 = vrot.slane %v11380_v46, 6 }
 0x653   : > { %v4236_v62 = vadd.f32 %v4175_v34, %v4087_v24  ;;  %v4136_v49 = vpop.f32.mrb[62].mxu0  ;;  %v4177_v10 = vpop.f32.mrb[62].mxu1  ;;  %v4264_v34 = vrot.slane %v11382_v48, 6 }
 0x654   : > { %v6313_v21 = vmul.f32 -1.442695, %v4235_v41  ;;  %v4137_v32 = vpop.f32.mrb[63].mxu0  ;;  %v4178_v35 = vpop.f32.mrb[63].mxu1  ;;  %v4221_v41 = vadd.f32 %v4132_v43, %v4084_v22  ;;  %v4085_v10 = vld [vmem:[#allocation4 + $0x38] sm:$0x3] }
 0x655   : > { %v6314_v25 = vmul.f32 -1.442695, %v4236_v62  ;;  %v4222_v35 = vadd.f32 %v4134_v17, %v4085_v10  ;;  %v4088_v10 = vld [vmem:[#allocation4 + $0x50] sm:$0x3] }
 0x656   : > { %6954 = vpow2.f32 %v6313_v21  ;;  %v6311_v21 = vmul.f32 -1.442695, %v4221_v41 }
 0x657   : > { %6956 = vpow2.f32 %v6314_v25  ;;  %v6312_v32 = vmul.f32 -1.442695, %v4222_v35 }
 0x660   : > { %v6955_v36 = vpop.eup %6954 }
 0x661   : > { %v4243_v2 = vadd.f32 1.0, %v6955_v36  ;;  %v6957_v20 = vpop.eup %6956 }
 0x662   : > { %v4244_v42 = vadd.f32 1.0, %v6957_v20 }
 0x663   : > { %6958 = vrcp.f32 %v4243_v2 }
 0x664   : > { %6960 = vrcp.f32 %v4244_v42 }
 0x665   : > { %6962 = vpow2.f32 %v6311_v21 }
 0x666   : > { %6964 = vpow2.f32 %v6312_v32  ;;  %v4089_v32 = vld [vmem:[#allocation4 + $0x58] sm:$0x3] }
 0x66d   : > { %v6959_v8 = vpop.eup %6958 }
 0x66e   : > { %v4267_v49 = vmul.f32 %v6959_v8, %v4263_v40  ;;  %v6961_v24 = vpop.eup %6960 }
 0x66f   : > { %v4268_v62 = vmul.f32 %v6961_v24, %v4264_v34  ;;  %v6963_v25 = vpop.eup %6962 }
 0x670   : > { %v6965_v36 = vpop.eup %6964  ;;  %v4229_v20 = vadd.f32 1.0, %v6963_v25 }
 0x671   : > { %v4230_v2 = vadd.f32 1.0, %v6965_v36 }
 0x672   : > { %6966 = vrcp.f32 %v4229_v20 }
 0x673   : > { %6968 = vrcp.f32 %v4230_v2 }
 0x67c   : > { %v6967_v40 = vpop.eup %6966 }
 0x67d   : > { %v6969_v17 = vpop.eup %6968 }
 0x691   : > { %v4214_v46 = vpop.f32.mrb[64].mxu0 }
 0x692   : > { %v4249_v42 = vadd.f32 %v4214_v46, %v14580_v15  ;;  %v4216_v48 = vpop.f32.mrb[65].mxu0  ;;  %v4257_v15 = vsub.f32 1.0, %v6959_v8  ;;  %v12412_v8 = vld [vmem:[%s13891_s3 + $0x300] ss:$24 sps:$4 sm:$0xff]  }
 0x693   : > { %v4250_v22 = vadd.f32 %v4216_v48, %v14581_v28  ;;  %v4218_v43 = vpop.f32.mrb[66].mxu0 }
 0x694   : > { %v4251_v34 = vmul.f32 %v6967_v40, %v4249_v42  ;;  %v4219_v41 = vpop.f32.mrb[67].mxu0  ;;  %v4258_v43 = vsub.f32 1.0, %v6961_v24  ;;  %v12424_v24 = vld [vmem:[%s13891_s3 + $0x40] ss:$24 sps:$4 sm:$0xff]  }
 0x695   : > { %v4252_v35 = vmul.f32 %v6969_v17, %v4250_v22 }
 0x696   : > { %v4253_v21 = vadd.f32 %v4251_v34, %v4088_v10  ;;  %v12436_v10 = vld [vmem:[%s13891_s3 + $0x330] ss:$24 sps:$4 sm:$0xff]  }
 0x697   : > { %v4254_v25 = vadd.f32 %v4252_v35, %v4089_v32  ;;  %v12442_v35 = vld [vmem:[%s13891_s3 + $0x364] ss:$24 sps:$4 sm:$0xff]  }
 0x698   : > { %6970 = vtanh.f32 %v4253_v21  ;;  %v12448_v21 = vld [vmem:[%s13891_s3 + $0x70] ss:$24 sps:$4 sm:$0xff]   ;;  %v12454_v32 = vld [vmem:[%s13891_s3 + $0xa4] ss:$24 sps:$4 sm:$0xff]  }
 0x699   : > { %6972 = vtanh.f32 %v4254_v25  ;;  %v12460_v25 = vld [vmem:[%s13891_s3 + $0x360] ss:$24 sps:$4 sm:$0xff]  }
 0x69e   : > { %v4313_v36 = vpop.f32.mrb[64].mxu1 }
 0x69f   : > { %v12379_v20 = vpop.f32.mrb[65].mxu1 }
 0x6a0   : > { %v4317_v2 = vpop.f32.mrb[66].mxu1 }
 0x6a1   : > { %v4318_v46 = vpop.f32.mrb[67].mxu1  ;;  %v12466_v2 = vld [vmem:[%s13891_s3 + $0x394] ss:$24 sps:$4 sm:$0xff]  }
 0x6a2   : > { %v6971_v48 = vpop.eup %6970  ;;  %14951 = vst [vmem:[#allocation124_spill] sm:$0xff] %v12466_v2  ;;  %v12472_v46 = vld [vmem:[%s13891_s3 + $0xa0] ss:$24 sps:$4 sm:$0xff]  }
 0x6a3   : > { %v6973_v28 = vpop.eup %6972  ;;  %v4259_v42 = vmul.f32 %v6971_v48, %v4257_v15  ;;  %v12400_v15 = vld [vmem:[%s13891_s3 + $0x10] ss:$24 sps:$4 sm:$0xff]   ;;  %14952 = vst [vmem:[#allocation125_spill] sm:$0xff] %v12472_v46  ;;  %v4404_v48 = vrot.slane %v4313_v36, 2  ;;  %v12491_v36 = vld [vmem:[%s13891_s3 + $0x3c4] ss:$24 sps:$4 sm:$0xff]  }
 0x6a4   : > { %v4260_v40 = vmul.f32 %v6973_v28, %v4258_v43  ;;  %v12406_v28 = vld [vmem:[%s13891_s3 + $0x44] ss:$24 sps:$4 sm:$0xff]   ;;  %v12478_v43 = vld [vmem:[%s13891_s3 + $0xd4] ss:$24 sps:$4 sm:$0xff]   ;;  %14955 = vst [vmem:[#allocation129_spill] sm:$0xff] %v12491_v36 }
 0x6a5   : > { %v12381_v41 = vadd.f32 %v4267_v49, %v4259_v42  ;;  %v12418_v49 = vld [vmem:[%s13891_s3 + $0x334] ss:$24 sps:$4 sm:$0xff]   ;;  %14953 = vst [vmem:[#allocation126_spill] sm:$0xff] %v12478_v43  ;;  %v12484_v42 = vld [vmem:[%s13891_s3 + $0x390] ss:$24 sps:$4 sm:$0xff]  }
 0x6a6   : > { %v12383_v22 = vadd.f32 %v4268_v62, %v4260_v40  ;;  %v12430_v62 = vld [vmem:[%s13891_s3 + $0x74] ss:$24 sps:$4 sm:$0xff]   ;;  %14954 = vst [vmem:[#allocation127_spill] sm:$0xff] %v12484_v42  ;;  %v4405_v40 = vrot.slane %v12379_v20, 2  ;;  %v12503_v20 = vld [vmem:[%s13891_s3 + $0x104] ss:$24 sps:$4 sm:$0xff]  }
 0x6a7   : > { %4470 = vst [vmem:[%s7846_s17 + $0x10] sm:$0x3] %v12381_v41  ;;  %v12393_v34 = vpack.c.bf16 %v12381_v41, %v12381_v41  ;;  %14956 = vst [vmem:[#allocation130_spill] sm:$0xff] %v12503_v20 }
 0x6a8   : > { %4471 = vst [vmem:[%s7846_s17 + $0x18] sm:$0x3] %v12383_v22  ;;  %v4481_v17 = vpack.c.bf16 %v12383_v22, %v12383_v22 }
 0x6aa   : > { %4514 = vmatprep.mubr.bf16.mxu0 %v4481_v17  ;;  %4555 = vmatprep.mubr.bf16.mxu1 %v4481_v17 }
 0x6ab   : > { %4515 = vmatmul.mubr.bf16.vlgmr.msra.gmra.mrb[72].mxu0 %v12393_v34  ;;  %4556 = vmatmul.mubr.bf16.vlgmr.msra.gmra.mrb[72].mxu1 %v12393_v34 }
 0x6ac   : > { %4565 = vmatpush1.bf16.msra.mxu0 %v12400_v15  ;;  %4596 = vmatprep.mubr.bf16.mxu0 %v4481_v17  ;;  %v4271_v17 = vld [vmem:[#allocation5] sm:$0xc0] }
 0x6ad   : > { %4566 = vmatprep.subr.bf16.mxu0 %v12406_v28  ;;  %4688 = vmatpush1.bf16.msra.mxu1 %v12412_v8 }
 0x6ae   : > { %4689 = vmatprep.subr.bf16.mxu1 %v12418_v49 }
 0x6b0   : > { %4567 = vmatpush1.bf16.msra.mxu0 %v12424_v24 }
 0x6b1   : > { %4568 = vmatprep.subr.bf16.mxu0 %v12430_v62  ;;  %4690 = vmatpush1.bf16.msra.mxu1 %v12436_v10 }
 0x6b2   : > { %4691 = vmatprep.subr.bf16.mxu1 %v12442_v35 }
 0x6b4   : > { %4569 = vmatpush1.bf16.msra.mxu0 %v12448_v21 }
 0x6b5   : > { %4570 = vmatprep.subr.bf16.mxu0 %v12454_v32  ;;  %4692 = vmatpush1.bf16.msra.mxu1 %v12460_v25 }
 0x6b6   : > { %4693 = vmatprep.subr.bf16.mxu1 %v12466_v2  ;;  %v4272_v2 = vld [vmem:[#allocation5 + $0x8] sm:$0xc0] }
 0x6b8   : > { %4571 = vmatpush1.bf16.msra.mxu0 %v12472_v46  ;;  %v4408_v46 = vadd.f32 %v4404_v48, %v4271_v17  ;;  %v12515_v48 = vld [vmem:[%s13891_s3 + $0x3f4] ss:$24 sps:$4 sm:$0xff]   ;;  %v12521_v17 = vld [vmem:[%s13891_s3 + $0x100] ss:$24 sps:$4 sm:$0xff]  }
 0x6b9   : > { %4572 = vmatprep.subr.bf16.mxu0 %v12478_v43  ;;  %4694 = vmatpush1.bf16.msra.mxu1 %v12484_v42  ;;  %v12497_v43 = vld [vmem:[%s13891_s3 + $0xd0] ss:$24 sps:$4 sm:$0xff]   ;;  %v4409_v42 = vadd.f32 %v4405_v40, %v4272_v2 }
 0x6ba   : > { %4695 = vmatprep.subr.bf16.mxu1 %v12491_v36  ;;  %v12509_v36 = vld [vmem:[%s13891_s3 + $0x3c0] ss:$24 sps:$4 sm:$0xff]   ;;  %v12528_v2 = vld [vmem:[%s13891_s3 + $0x3f0] ss:$24 sps:$4 sm:$0xff]  }
 0x6bb   : > { %v6316_v40 = vmul.f32 -1.442695, %v4409_v42 }
 0x6bc   : > { %4573 = vmatpush1.bf16.msra.mxu0 %v12497_v43 }
 0x6bd   : > { %4574 = vmatprep.subr.bf16.mxu0 %v12503_v20  ;;  %4696 = vmatpush1.bf16.msra.mxu1 %v12509_v36  ;;  %v6315_v20 = vmul.f32 -1.442695, %v4408_v46 }
 0x6be   : > { %4697 = vmatprep.subr.bf16.mxu1 %v12515_v48 }
 0x6bf   : > { %6974 = vpow2.f32 %v6315_v20 }
 0x6c0   : > { %4575 = vmatpush1.bf16.msra.mxu0 %v12521_v17  ;;  %6976 = vpow2.f32 %v6316_v40 }
 0x6c1   : > { %4576 = vmatprep.subr.bf16.mxu0 %v11420_v56  ;;  %4698 = vmatpush1.bf16.msra.mxu1 %v12528_v2 }
 0x6c2   : > { %4699 = vmatprep.subr.bf16.mxu1 %v11427_v13 }
 0x6c4   : > { %4577 = vmatpush1.bf16.msra.mxu0 %v11433_v3 }
 0x6c5   : > { %4578 = vmatprep.subr.bf16.mxu0 %v11439_v9  ;;  %4700 = vmatpush1.bf16.msra.mxu1 %v11445_v23 }
 0x6c6   : > { %4701 = vmatprep.subr.bf16.mxu1 %v11451_v26 }
 0x6c8   : > { %4579 = vmatpush1.bf16.msra.mxu0 %v11457_v44 }
 0x6c9   : > { %4580 = vmatprep.subr.bf16.mxu0 %v11463_v1  ;;  %4702 = vmatpush1.bf16.msra.mxu1 %v11469_v59  ;;  %v6975_v56 = vpop.eup %6974  ;;  %v4273_v1 = vld [vmem:[#allocation5 + $0x10] sm:$0xc0] }
 0x6ca   : > { %4703 = vmatprep.subr.bf16.mxu1 %v11475_v54  ;;  %v6977_v13 = vpop.eup %6976  ;;  %v4416_v9 = vadd.f32 1.0, %v6975_v56 }
 0x6cb   : > { %v4417_v44 = vadd.f32 1.0, %v6977_v13 }
 0x6cc   : > { %4581 = vmatpush1.bf16.msra.mxu0 %v11481_v0  ;;  %6978 = vrcp.f32 %v4416_v9 }
 0x6cd   : > { %4582 = vmatprep.subr.bf16.mxu0 %v11487_v7  ;;  %4704 = vmatpush1.bf16.msra.mxu1 %v11493_v31  ;;  %v4274_v7 = vld [vmem:[#allocation5 + $0x18] sm:$0xc0]  ;;  %6980 = vrcp.f32 %v4417_v44 }
 0x6ce   : > { %4705 = vmatprep.subr.bf16.mxu1 %v11499_v37 }
 0x6d0   : > { %4583 = vmatpush1.bf16.msra.mxu0 %v11505_v38 }
 0x6d1   : > { %v4354_v3 = vpop.f32.mrb[68].mxu0  ;;  %4584 = vmatprep.subr.bf16.mxu0 %v11511_v27  ;;  %4706 = vmatpush1.bf16.msra.mxu1 %v11517_v51  ;;  %v14957_v51 = vld [vmem:[#allocation7_spill] sm:$0xff] }
 0x6d2   : > { %v4424_v23 = vrot.slane %v4354_v3, 2  ;;  %v4356_v26 = vpop.f32.mrb[69].mxu0  ;;  %4707 = vmatprep.subr.bf16.mxu1 %v11523_v18  ;;  %v14958_v18 = vld [vmem:[#allocation9_spill] sm:$0xff] }
 0x6d3   : > { %v4425_v59 = vrot.slane %v4356_v26, 2  ;;  %v4358_v54 = vpop.f32.mrb[70].mxu0  ;;  %v4275_v26 = vld [vmem:[#allocation5 + $0x20] sm:$0xc0] }
 0x6d4   : > { %v4428_v0 = vadd.f32 %v4424_v23, %v4273_v1  ;;  %4585 = vmatpush1.bf16.msra.mxu0 %v11529_v11  ;;  %v4359_v31 = vpop.f32.mrb[71].mxu0  ;;  %v4276_v54 = vld [vmem:[#allocation5 + $0x28] sm:$0xc0] }
 0x6d5   : > { %v4429_v37 = vadd.f32 %v4425_v59, %v4274_v7  ;;  %4586 = vmatprep.subr.bf16.mxu0 %v11535_v19  ;;  %4708 = vmatpush1.bf16.msra.mxu1 %v11541_v50  ;;  %v14959_v19 = vld [vmem:[#allocation8_spill] sm:$0xff]  ;;  %v14960_v50 = vld [vmem:[#allocation10_spill] sm:$0xff]  ;;  %v14963_v7 = vld [vmem:[#allocation13_spill] sm:$0xff] }
 0x6d6   : > { %v6317_v38 = vmul.f32 -1.442695, %v4428_v0  ;;  %4709 = vmatprep.subr.bf16.mxu1 %v11547_v5  ;;  %v14961_v5 = vld [vmem:[#allocation128_spill] sm:$0xff]  ;;  %v14962_v0 = vld [vmem:[#allocation11_spill] sm:$0xff]  ;;  %v14967_v31 = vld [vmem:[#allocation17_spill] sm:$0xff] }
 0x6d7   : > { %v6318_v27 = vmul.f32 -1.442695, %v4429_v37  ;;  %v14968_v37 = vld [vmem:[#allocation16_spill] sm:$0xff] }
 0x6d8   : > { %6982 = vpow2.f32 %v6317_v38  ;;  %4587 = vmatpush1.bf16.msra.mxu0 %v11553_v61  ;;  %v14969_v38 = vld [vmem:[#allocation18_spill] sm:$0xff] }
 0x6d9   : > { %6984 = vpow2.f32 %v6318_v27  ;;  %4588 = vmatprep.subr.bf16.mxu0 %v11559_v47  ;;  %4710 = vmatpush1.bf16.msra.mxu1 %v11565_v52  ;;  %v6979_v47 = vpop.eup %6978  ;;  %v14970_v27 = vld [vmem:[#allocation19_spill] sm:$0xff] }
 0x6da   : > { %4711 = vmatprep.subr.bf16.mxu1 %v14957_v51  ;;  %v6981_v56 = vpop.eup %6980  ;;  %v14971_v51 = vld [vmem:[#allocation21_spill] sm:$0xff] }
 0x6dc   : > { %4589 = vmatpush1.bf16.msra.mxu0 %v14958_v18  ;;  %v4462_v18 = vrot.slane %v11699_v30, 2 }
 0x6dd   : > { %4590 = vmatprep.subr.bf16.mxu0 %v14959_v19  ;;  %4712 = vmatpush1.bf16.msra.mxu1 %v14960_v50  ;;  %v4463_v19 = vrot.slane %v11701_v4, 2 }
 0x6de   : > { %v4395_v11 = vpop.f32.mrb[68].mxu1  ;;  %4713 = vmatprep.subr.bf16.mxu1 %v11596_v12 }
 0x6df   : > { %v4442_v46 = vadd.f32 %v4395_v11, %v14961_v5  ;;  %v4397_v42 = vpop.f32.mrb[69].mxu1 }
 0x6e0   : > { %v4443_v61 = vadd.f32 %v4397_v42, %v9677_v14  ;;  %v4399_v20 = vpop.f32.mrb[70].mxu1  ;;  %4591 = vmatpush1.bf16.msra.mxu0 %v11603_v63 }
 0x6e1   : > { %v4446_v40 = vrot.slane %v4442_v46, 2  ;;  %v4400_v52 = vpop.f32.mrb[71].mxu1  ;;  %4592 = vmatprep.subr.bf16.mxu0 %v11609_v16  ;;  %4714 = vmatpush1.bf16.msra.mxu1 %v11615_v39  ;;  %v14964_v16 = vld [vmem:[#allocation12_spill] sm:$0xff]  ;;  %v14965_v39 = vld [vmem:[#allocation14_spill] sm:$0xff] }
 0x6e2   : > { %v4447_v13 = vrot.slane %v4443_v61, 2  ;;  %v6983_v3 = vpop.eup %6982  ;;  %4715 = vmatprep.subr.bf16.mxu1 %v11621_v60  ;;  %v14966_v60 = vld [vmem:[#allocation15_spill] sm:$0xff] }
 0x6e3   : > { %v4450_v9 = vmul.f32 %v6979_v47, %v4446_v40  ;;  %v6985_v23 = vpop.eup %6984  ;;  %v4436_v12 = vadd.f32 1.0, %v6983_v3  ;;  %v14974_v3 = vld [vmem:[#allocation24_spill] sm:$0xff] }
 0x6e4   : > { %v4451_v44 = vmul.f32 %v6981_v56, %v4447_v13  ;;  %v4437_v1 = vadd.f32 1.0, %v6985_v23  ;;  %4593 = vmatpush1.bf16.msra.mxu0 %v14962_v0  ;;  %v14973_v13 = vld [vmem:[#allocation22_spill] sm:$0xff] }
 0x6e5   : > { %v4452_v59 = vadd.f32 %v4450_v9, %v4275_v26  ;;  %6986 = vrcp.f32 %v4436_v12  ;;  %4594 = vmatprep.subr.bf16.mxu0 %v14963_v7  ;;  %4716 = vmatpush1.bf16.msra.mxu1 %v14964_v16  ;;  %v12632_v9 = vld [vmem:[%s13891_s3 + $0x370] ss:$24 sps:$4 sm:$0xff]   ;;  %v14977_v26 = vld [vmem:[#allocation28_spill] sm:$0xff] }
 0x6e6   : > { %v4453_v63 = vadd.f32 %v4451_v44, %v4276_v54  ;;  %6988 = vrcp.f32 %v4437_v1  ;;  %4717 = vmatprep.subr.bf16.mxu1 %v14965_v39  ;;  %v14975_v23 = vld [vmem:[#allocation26_spill] sm:$0xff]  ;;  %v14976_v12 = vld [vmem:[#allocation23_spill] sm:$0xff]  ;;  %v14978_v44 = vld [vmem:[#allocation25_spill] sm:$0xff] }
 0x6e7   : > { %6990 = vtanh.f32 %v4452_v59  ;;  %v14979_v1 = vld [vmem:[#allocation32_spill] sm:$0xff]  ;;  %v14980_v59 = vld [vmem:[#allocation27_spill] sm:$0xff]  ;;  %v14982_v0 = vld [vmem:[#allocation30_spill] sm:$0xff] }
 0x6e8   : > { %6992 = vtanh.f32 %v4453_v63  ;;  %4595 = vmatpush1.bf16.msra.mxu0 %v14966_v60  ;;  %v14981_v54 = vld [vmem:[#allocation36_spill] sm:$0xff]  ;;  %v14984_v7 = vld [vmem:[#allocation34_spill] sm:$0xff] }
 0x6e9   : > { %4728 = vmatprep.subr.bf16.mxu0 %v14967_v31  ;;  %4718 = vmatpush1.bf16.msra.mxu1 %v14968_v37  ;;  %v14983_v63 = vld [vmem:[#allocation40_spill] sm:$0xff]  ;;  %v14986_v39 = vld [vmem:[#allocation38_spill] sm:$0xff] }
 0x6ea   : > { %4769 = vmatprep.subr.bf16.mxu1 %v14969_v38  ;;  %v14985_v16 = vld [vmem:[#allocation44_spill] sm:$0xff]  ;;  %v14987_v60 = vld [vmem:[#allocation46_spill] sm:$0xff]  ;;  %v14990_v38 = vld [vmem:[#allocation29_spill] sm:$0xff] }
 0x6eb   : > { %4597 = vmatmul.mubr.bf16.vlgmr.msra.gmra.mrb[76].mxu0 %v12393_v34  ;;  %v14988_v31 = vld [vmem:[#allocation42_spill] sm:$0xff]  ;;  %v14989_v37 = vld [vmem:[#allocation48_spill] sm:$0xff] }
 0x6ec   : > { %4729 = vmatpush1.bf16.msra.mxu0 %v14970_v27  ;;  %v14991_v27 = vld [vmem:[#allocation50_spill] sm:$0xff] }
 0x6ed   : > { %4730 = vmatprep.subr.bf16.mxu0 %v14971_v51  ;;  %v14992_v51 = vld [vmem:[#allocation31_spill] sm:$0xff] }
 0x6ef   : > { %v6987_v11 = vpop.eup %6986 }
 0x6f0   : > { %v6989_v50 = vpop.eup %6988  ;;  %4731 = vmatpush1.bf16.msra.mxu0 %v11690_v6  ;;  %v4456_v46 = vsub.f32 1.0, %v6987_v11  ;;  %v4466_v42 = vmul.f32 %v6987_v11, %v4462_v18  ;;  %v14993_v18 = vld [vmem:[#allocation52_spill] sm:$0xff]  ;;  %v14994_v11 = vld [vmem:[#allocation33_spill] sm:$0xff] }
 0x6f1   : > { %v6991_v61 = vpop.eup %6990  ;;  %4732 = vmatprep.subr.bf16.mxu0 %v11696_v53  ;;  %v4457_v34 = vsub.f32 1.0, %v6989_v50  ;;  %v4467_v20 = vmul.f32 %v6989_v50, %v4463_v19  ;;  %v14995_v19 = vld [vmem:[#allocation54_spill] sm:$0xff]  ;;  %v14996_v50 = vld [vmem:[#allocation35_spill] sm:$0xff] }
 0x6f2   : > { %v6993_v47 = vpop.eup %6992  ;;  %v4458_v40 = vmul.f32 %v6991_v61, %v4456_v46  ;;  %v14997_v46 = vld [vmem:[#allocation56_spill] sm:$0xff]  ;;  %v14999_v61 = vld [vmem:[#allocation58_spill] sm:$0xff] }
 0x6f3   : > { %v4459_v52 = vmul.f32 %v6993_v47, %v4457_v34  ;;  %v15000_v34 = vld [vmem:[#allocation39_spill] sm:$0xff]  ;;  %v15002_v47 = vld [vmem:[#allocation41_spill] sm:$0xff] }
 0x6f4   : > { %4733 = vmatpush1.bf16.msra.mxu0 %v11708_v45  ;;  %v12582_v30 = vadd.f32 %v4466_v42, %v4458_v40  ;;  %v14998_v42 = vld [vmem:[#allocation37_spill] sm:$0xff]  ;;  %v15003_v40 = vld [vmem:[#allocation62_spill] sm:$0xff] }
 0x6f5   : > { %4734 = vmatprep.subr.bf16.mxu0 %v11718_v58  ;;  %v12585_v4 = vadd.f32 %v4467_v20, %v4459_v52  ;;  %v12604_v58 = vld [vmem:[%s13891_s3 + $0x310] ss:$24 sps:$4 sm:$0xff]   ;;  %v15001_v20 = vld [vmem:[#allocation60_spill] sm:$0xff] }
 0x6f6   : > { %4472 = vst [vmem:[%s7851_s21] sm:$0xc0] %v12582_v30  ;;  %v4679_v6 = vpack.c.bf16 %v12582_v30, %v12582_v30  ;;  %v15004_v52 = vld [vmem:[#allocation43_spill] sm:$0xff] }
 0x6f7   : > { %4473 = vst [vmem:[%s7851_s21 + $0x8] sm:$0xc0] %v12585_v4  ;;  %v4680_v53 = vpack.c.bf16 %v12585_v4, %v12585_v4 }
 0x6f8   : > { %4735 = vmatpush1.bf16.msra.mxu0 %v11729_v55  ;;  %v12597_v56 = vrot.slane %v4679_v6, 3  ;;  %v12611_v55 = vld [vmem:[%s13891_s3 + $0x344] ss:$24 sps:$4 sm:$0xff]  }
 0x6f9   : > { %4736 = vmatprep.subr.bf16.mxu0 %v11736_v33  ;;  %v4684_v45 = vrot.slane %v4680_v53, 3  ;;  %v14972_v33 = vld [vmem:[#allocation20_spill] sm:$0xff]  ;;  %v15006_v53 = vld [vmem:[#allocation45_spill] sm:$0xff] }
 0x6fa   : > { %v15005_v6 = vld [vmem:[#allocation64_spill] sm:$0xff] }
 0x6fb   : > { %4719 = vmatprep.mubr.bf16.mxu1 %v4684_v45  ;;  %4760 = vmatprep.mubr.bf16.mxu0 %v4684_v45 }
 0x6fc   : > { %4737 = vmatpush1.bf16.msra.mxu0 %v11743_v29  ;;  %4720 = vmatmul.mubr.bf16.vlgmr.msra.gmra.mrb[76].mxu1 %v12597_v56  ;;  %v12618_v29 = vld [vmem:[%s13891_s3 + $0x340] ss:$24 sps:$4 sm:$0xff]  }
 0x6fd   : > { %4770 = vmatpush1.bf16.msra.mxu1 %v12604_v58  ;;  %4801 = vmatprep.mubr.bf16.mxu1 %v4684_v45  ;;  %v15007_v45 = vld [vmem:[#allocation66_spill] sm:$0xff] }
 0x6fe   : > { %4738 = vmatprep.subr.bf16.mxu0 %v11750_v57  ;;  %4771 = vmatprep.subr.bf16.mxu1 %v12611_v55  ;;  %v12625_v57 = vld [vmem:[%s13891_s3 + $0x374] ss:$24 sps:$4 sm:$0xff]  }
 0x700   : > { %4739 = vmatpush1.bf16.msra.mxu0 %v14972_v33  ;;  %v15008_v33 = vld [vmem:[#allocation47_spill] sm:$0xff] }
 0x701   : > { %4772 = vmatpush1.bf16.msra.mxu1 %v12618_v29  ;;  %4740 = vmatprep.subr.bf16.mxu0 %v14973_v13  ;;  %v15009_v13 = vld [vmem:[#allocation68_spill] sm:$0xff] }
 0x702   : > { %4773 = vmatprep.subr.bf16.mxu1 %v12625_v57 }
 0x704   : > { %4741 = vmatpush1.bf16.msra.mxu0 %v14974_v3  ;;  %v15010_v3 = vld [vmem:[#allocation49_spill] sm:$0xff] }
 0x705   : > { %4774 = vmatpush1.bf16.msra.mxu1 %v12632_v9  ;;  %4742 = vmatprep.subr.bf16.mxu0 %v14975_v23  ;;  %v15011_v23 = vld [vmem:[#allocation55_spill] sm:$0xff] }
 0x706   : > { %4775 = vmatprep.subr.bf16.mxu1 %v14976_v12  ;;  %v15012_v12 = vld [vmem:[#allocation51_spill] sm:$0xff] }
 0x708   : > { %4743 = vmatpush1.bf16.msra.mxu0 %v14977_v26  ;;  %v15013_v26 = vld [vmem:[#allocation59_spill] sm:$0xff] }
 0x709   : > { %4776 = vmatpush1.bf16.msra.mxu1 %v14978_v44  ;;  %4744 = vmatprep.subr.bf16.mxu0 %v14979_v1  ;;  %v15014_v44 = vld [vmem:[#allocation53_spill] sm:$0xff]  ;;  %v15015_v1 = vld [vmem:[#allocation63_spill] sm:$0xff] }
 0x70a   : > { %4777 = vmatprep.subr.bf16.mxu1 %v14980_v59  ;;  %v15016_v59 = vld [vmem:[#allocation70_spill] sm:$0xff] }
 0x70c   : > { %4745 = vmatpush1.bf16.msra.mxu0 %v14981_v54  ;;  %v15017_v54 = vld [vmem:[#allocation67_spill] sm:$0xff] }
 0x70d   : > { %4778 = vmatpush1.bf16.msra.mxu1 %v14982_v0  ;;  %4746 = vmatprep.subr.bf16.mxu0 %v14983_v63  ;;  %v15018_v0 = vld [vmem:[#allocation57_spill] sm:$0xff]  ;;  %v15019_v63 = vld [vmem:[#allocation78_spill] sm:$0xff] }
 0x70e   : > { %4779 = vmatprep.subr.bf16.mxu1 %v14984_v7  ;;  %v15020_v7 = vld [vmem:[#allocation61_spill] sm:$0xff] }
 0x710   : > { %4747 = vmatpush1.bf16.msra.mxu0 %v14985_v16  ;;  %v15021_v16 = vld [vmem:[#allocation80_spill] sm:$0xff] }
 0x711   : > { %4780 = vmatpush1.bf16.msra.mxu1 %v14986_v39  ;;  %4748 = vmatprep.subr.bf16.mxu0 %v14987_v60  ;;  %v15022_v39 = vld [vmem:[#allocation65_spill] sm:$0xff]  ;;  %v15023_v60 = vld [vmem:[#allocation82_spill] sm:$0xff] }
 0x712   : > { %4781 = vmatprep.subr.bf16.mxu1 %v14988_v31  ;;  %v15024_v31 = vld [vmem:[#allocation69_spill] sm:$0xff] }
 0x714   : > { %4749 = vmatpush1.bf16.msra.mxu0 %v14989_v37  ;;  %v15025_v37 = vld [vmem:[#allocation84_spill] sm:$0xff] }
 0x715   : > { %4782 = vmatpush1.bf16.msra.mxu1 %v14990_v38  ;;  %4750 = vmatprep.subr.bf16.mxu0 %v14991_v27  ;;  %v15026_v38 = vld [vmem:[#allocation71_spill] sm:$0xff]  ;;  %v15027_v27 = vld [vmem:[#allocation86_spill] sm:$0xff] }
 0x716   : > { %4783 = vmatprep.subr.bf16.mxu1 %v14992_v51  ;;  %v15028_v51 = vld [vmem:[#allocation72_spill] sm:$0xff] }
 0x718   : > { %4751 = vmatpush1.bf16.msra.mxu0 %v14993_v18  ;;  %v15029_v18 = vld [vmem:[#allocation88_spill] sm:$0xff] }
 0x719   : > { %4784 = vmatpush1.bf16.msra.mxu1 %v14994_v11  ;;  %4752 = vmatprep.subr.bf16.mxu0 %v14995_v19  ;;  %v15030_v11 = vld [vmem:[#allocation73_spill] sm:$0xff]  ;;  %v15031_v19 = vld [vmem:[#allocation90_spill] sm:$0xff] }
 0x71a   : > { %4785 = vmatprep.subr.bf16.mxu1 %v14996_v50  ;;  %v15032_v50 = vld [vmem:[#allocation74_spill] sm:$0xff] }
 0x71c   : > { %4753 = vmatpush1.bf16.msra.mxu0 %v14997_v46  ;;  %v15033_v46 = vld [vmem:[#allocation92_spill] sm:$0xff] }
 0x71d   : > { %4786 = vmatpush1.bf16.msra.mxu1 %v14998_v42  ;;  %4754 = vmatprep.subr.bf16.mxu0 %v14999_v61  ;;  %v15034_v42 = vld [vmem:[#allocation75_spill] sm:$0xff]  ;;  %v15035_v61 = vld [vmem:[#allocation94_spill] sm:$0xff] }
 0x71e   : > { %4787 = vmatprep.subr.bf16.mxu1 %v15000_v34  ;;  %v15036_v34 = vld [vmem:[#allocation76_spill] sm:$0xff] }
 0x720   : > { %4755 = vmatpush1.bf16.msra.mxu0 %v15001_v20  ;;  %v15037_v20 = vld [vmem:[#allocation96_spill] sm:$0xff] }
 0x721   : > { %4788 = vmatpush1.bf16.msra.mxu1 %v15002_v47  ;;  %4756 = vmatprep.subr.bf16.mxu0 %v15003_v40  ;;  %v15038_v47 = vld [vmem:[#allocation77_spill] sm:$0xff]  ;;  %v15040_v40 = vld [vmem:[#allocation79_spill] sm:$0xff] }
 0x722   : > { %4789 = vmatprep.subr.bf16.mxu1 %v15004_v52  ;;  %v15041_v52 = vld [vmem:[#allocation89_spill] sm:$0xff] }
 0x724   : > { %4757 = vmatpush1.bf16.msra.mxu0 %v15005_v6  ;;  %v15042_v6 = vld [vmem:[#allocation81_spill] sm:$0xff] }
 0x725   : > { %4790 = vmatpush1.bf16.msra.mxu1 %v15006_v53  ;;  %4758 = vmatprep.subr.bf16.mxu0 %v15007_v45  ;;  %v15043_v53 = vld [vmem:[#allocation93_spill] sm:$0xff]  ;;  %v15044_v45 = vld [vmem:[#allocation83_spill] sm:$0xff] }
 0x726   : > { %4791 = vmatprep.subr.bf16.mxu1 %v15008_v33  ;;  %v15045_v33 = vld [vmem:[#allocation97_spill] sm:$0xff] }
 0x728   : > { %4759 = vmatpush1.bf16.msra.mxu0 %v15009_v13  ;;  %v15046_v13 = vld [vmem:[#allocation87_spill] sm:$0xff] }
 0x729   : > { %4792 = vmatpush1.bf16.msra.mxu1 %v15010_v3  ;;  %4896 = vmatprep.subr.bf16.mxu0 %v15011_v23  ;;  %v15047_v3 = vld [vmem:[#allocation98_spill] sm:$0xff]  ;;  %v15048_v23 = vld [vmem:[#allocation91_spill] sm:$0xff] }
 0x72a   : > { %4793 = vmatprep.subr.bf16.mxu1 %v15012_v12  ;;  %v15049_v12 = vld [vmem:[#allocation99_spill] sm:$0xff] }
 0x72b   : > { %4761 = vmatmul.mubr.bf16.vlgmr.msra.gmra.mrb[80].mxu0 %v12597_v56 }
 0x72c   : > { %4897 = vmatpush1.bf16.msra.mxu0 %v15013_v26  ;;  %v15050_v26 = vld [vmem:[#allocation95_spill] sm:$0xff] }
 0x72d   : > { %4794 = vmatpush1.bf16.msra.mxu1 %v15014_v44  ;;  %4898 = vmatprep.subr.bf16.mxu0 %v15015_v1  ;;  %v15051_v44 = vld [vmem:[#allocation100_spill] sm:$0xff]  ;;  %v15052_v1 = vld [vmem:[#allocation105_spill] sm:$0xff] }
 0x72e   : > { %4795 = vmatprep.subr.bf16.mxu1 %v15016_v59  ;;  %v15053_v59 = vld [vmem:[#allocation101_spill] sm:$0xff] }
 0x730   : > { %4899 = vmatpush1.bf16.msra.mxu0 %v15017_v54  ;;  %v15054_v54 = vld [vmem:[#allocation107_spill] sm:$0xff] }
 0x731   : > { %4796 = vmatpush1.bf16.msra.mxu1 %v15018_v0  ;;  %4900 = vmatprep.subr.bf16.mxu0 %v15019_v63  ;;  %v15055_v0 = vld [vmem:[#allocation102_spill] sm:$0xff]  ;;  %v15056_v63 = vld [vmem:[#allocation109_spill] sm:$0xff] }
 0x732   : > { %4797 = vmatprep.subr.bf16.mxu1 %v15020_v7  ;;  %v15057_v7 = vld [vmem:[#allocation103_spill] sm:$0xff] }
 0x734   : > { %4901 = vmatpush1.bf16.msra.mxu0 %v15021_v16  ;;  %v15058_v16 = vld [vmem:[#allocation111_spill] sm:$0xff] }
 0x735   : > { %4798 = vmatpush1.bf16.msra.mxu1 %v15022_v39  ;;  %4902 = vmatprep.subr.bf16.mxu0 %v15023_v60  ;;  %v15059_v39 = vld [vmem:[#allocation104_spill] sm:$0xff]  ;;  %v15060_v60 = vld [vmem:[#allocation113_spill] sm:$0xff] }
 0x736   : > { %4799 = vmatprep.subr.bf16.mxu1 %v15024_v31  ;;  %v15061_v31 = vld [vmem:[#allocation106_spill] sm:$0xff] }
 0x738   : > { %4903 = vmatpush1.bf16.msra.mxu0 %v15025_v37  ;;  %v15062_v37 = vld [vmem:[#allocation115_spill] sm:$0xff] }
 0x739   : > { %4800 = vmatpush1.bf16.msra.mxu1 %v15026_v38  ;;  %4904 = vmatprep.subr.bf16.mxu0 %v15027_v27  ;;  %v15063_v38 = vld [vmem:[#allocation110_spill] sm:$0xff]  ;;  %v15064_v27 = vld [vmem:[#allocation117_spill] sm:$0xff] }
 0x73a   : > { %4937 = vmatprep.subr.bf16.mxu1 %v15028_v51  ;;  %v12730_v51 = vld [vmem:[%s13891_s3 + $0x270] ss:$24 sps:$4 sm:$0xff]  }
 0x73c   : > { %4802 = vmatmul.mubr.bf16.vlgmr.msra.gmra.mrb[80].mxu1 %v12597_v56  ;;  %4905 = vmatpush1.bf16.msra.mxu0 %v15029_v18  ;;  %v15039_v56 = vld [vmem:[#allocation85_spill] sm:$0xff]  ;;  %v15065_v18 = vld [vmem:[#allocation119_spill] sm:$0xff] }
 0x73d   : > { %4938 = vmatpush1.bf16.msra.mxu1 %v15030_v11  ;;  %4906 = vmatprep.subr.bf16.mxu0 %v15031_v19  ;;  %v12737_v11 = vld [vmem:[%s13891_s3 + $0x2a4] ss:$24 sps:$4 sm:$0xff]  }
 0x73e   : > { %4939 = vmatprep.subr.bf16.mxu1 %v15032_v50  ;;  %v15066_v19 = vld [vmem:[#allocation108_spill] sm:$0xff] }
 0x73f   : > { %v12744_v50 = vld [vmem:[%s13891_s3 + $0x2a0] ss:$24 sps:$4 sm:$0xff]  }
 0x740   : > { %4907 = vmatpush1.bf16.msra.mxu0 %v15033_v46  ;;  %v15067_v46 = vld [vmem:[#allocation112_spill] sm:$0xff] }
 0x741   : > { %4940 = vmatpush1.bf16.msra.mxu1 %v15034_v42  ;;  %4908 = vmatprep.subr.bf16.mxu0 %v15035_v61  ;;  %v12751_v42 = vld [vmem:[%s13891_s3 + $0x2d4] ss:$24 sps:$4 sm:$0xff]  }
 0x742   : > { %4941 = vmatprep.subr.bf16.mxu1 %v15036_v34  ;;  %v15068_v61 = vld [vmem:[#allocation114_spill] sm:$0xff] }
 0x743   : > { %v12758_v34 = vld [vmem:[%s13891_s3 + $0x2d0] ss:$24 sps:$4 sm:$0xff]  }
 0x744   : > { %4909 = vmatpush1.bf16.msra.mxu0 %v15037_v20  ;;  %v15069_v20 = vld [vmem:[#allocation116_spill] sm:$0xff] }
 0x745   : > { %4942 = vmatpush1.bf16.msra.mxu1 %v15038_v47  ;;  %4910 = vmatprep.subr.bf16.mxu0 %v15039_v56  ;;  %v12765_v47 = vld [vmem:[%s13891_s3 + $0x14] ss:$24 sps:$4 sm:$0xff]  }
 0x746   : > { %4943 = vmatprep.subr.bf16.mxu1 %v15040_v40  ;;  %v15070_v56 = vld [vmem:[#allocation118_spill] sm:$0xff]  ;;  %v15071_v40 = vld [vmem:[#allocation120_spill] sm:$0xff] }
 0x748   : > { %4911 = vmatpush1.bf16.msra.mxu0 %v15041_v52  ;;  %v15072_v52 = vld [vmem:[#allocation123_spill] sm:$0xff] }
 0x749   : > { %4944 = vmatpush1.bf16.msra.mxu1 %v15042_v6  ;;  %4912 = vmatprep.subr.bf16.mxu0 %v15043_v53  ;;  %v12774_v6 = vld [vmem:[%s13891_s3 + $0x278] ss:$24 sps:$4 sm:$0xff]   ;;  %v12780_v53 = vld [vmem:[%s13891_s3 + $0x2ac] ss:$24 sps:$4 sm:$0xff]  }
 0x74a   : > { %4945 = vmatprep.subr.bf16.mxu1 %v15044_v45  ;;  %v12786_v45 = vld [vmem:[%s13891_s3 + $0x2a8] ss:$24 sps:$4 sm:$0xff]  }
 0x74c   : > { %4913 = vmatpush1.bf16.msra.mxu0 %v15045_v33  ;;  %v12792_v33 = vld [vmem:[%s13891_s3 + $0x2dc] ss:$24 sps:$4 sm:$0xff]  }
 0x74d   : > { %4946 = vmatpush1.bf16.msra.mxu1 %v15046_v13  ;;  %4914 = vmatprep.subr.bf16.mxu0 %v15047_v3  ;;  %v12798_v13 = vld [vmem:[%s13891_s3 + $0x2d8] ss:$24 sps:$4 sm:$0xff]   ;;  %v12804_v3 = vld [vmem:[%s13891_s3 + $0x304] ss:$24 sps:$4 sm:$0xff]  }
 0x74e   : > { %4947 = vmatprep.subr.bf16.mxu1 %v15048_v23 }
 0x750   : > { %4915 = vmatpush1.bf16.msra.mxu0 %v15049_v12 }
 0x751   : > { %4948 = vmatpush1.bf16.msra.mxu1 %v15050_v26  ;;  %4916 = vmatprep.subr.bf16.mxu0 %v15051_v44 }
 0x752   : > { %4949 = vmatprep.subr.bf16.mxu1 %v15052_v1 }
 0x754   : > { %4917 = vmatpush1.bf16.msra.mxu0 %v15053_v59  ;;  %v4476_v59 = vld [vmem:[#allocation4 + $0x40] sm:$0xc] }
 0x755   : > { %4950 = vmatpush1.bf16.msra.mxu1 %v15054_v54  ;;  %4918 = vmatprep.subr.bf16.mxu0 %v15055_v0 }
 0x756   : > { %4951 = vmatprep.subr.bf16.mxu1 %v15056_v63 }
 0x758   : > { %4919 = vmatpush1.bf16.msra.mxu0 %v15057_v7 }
 0x759   : > { %4952 = vmatpush1.bf16.msra.mxu1 %v15058_v16  ;;  %4920 = vmatprep.subr.bf16.mxu0 %v15059_v39  ;;  %v4477_v16 = vld [vmem:[#allocation4 + $0x48] sm:$0xc] }
 0x75a   : > { %4953 = vmatprep.subr.bf16.mxu1 %v15060_v60 }
 0x75c   : > { %4921 = vmatpush1.bf16.msra.mxu0 %v15061_v31 }
 0x75d   : > { %4954 = vmatpush1.bf16.msra.mxu1 %v15062_v37  ;;  %4922 = vmatprep.subr.bf16.mxu0 %v15063_v38 }
 0x75e   : > { %4955 = vmatprep.subr.bf16.mxu1 %v15064_v27 }
 0x760   : > { %4923 = vmatpush1.bf16.msra.mxu0 %v12730_v51 }
 0x761   : > { %4956 = vmatpush1.bf16.msra.mxu1 %v15065_v18  ;;  %4924 = vmatprep.subr.bf16.mxu0 %v12737_v11 }
 0x762   : > { %4957 = vmatprep.subr.bf16.mxu1 %v15066_v19 }
 0x764   : > { %4925 = vmatpush1.bf16.msra.mxu0 %v12744_v50 }
 0x765   : > { %4958 = vmatpush1.bf16.msra.mxu1 %v15067_v46  ;;  %4926 = vmatprep.subr.bf16.mxu0 %v12751_v42 }
 0x766   : > { %4959 = vmatprep.subr.bf16.mxu1 %v15068_v61 }
 0x768   : > { %4927 = vmatpush1.bf16.msra.mxu0 %v12758_v34 }
 0x769   : > { %4960 = vmatpush1.bf16.msra.mxu1 %v15069_v20  ;;  %4978 = vmatprep.subr.bf16.mxu0 %v12765_v47 }
 0x76a   : > { %4961 = vmatprep.subr.bf16.mxu1 %v15070_v56  ;;  %v4665_v56 = vrot.slane %v12381_v41, 6 }
 0x76d   : > { %4962 = vmatpush1.bf16.msra.mxu1 %v15071_v40 }
 0x76e   : > { %4963 = vmatprep.subr.bf16.mxu1 %v15072_v52  ;;  %v4474_v52 = vld [vmem:[#allocation4 + $0x30] sm:$0xc] }
 0x771   : > { %4964 = vmatpush1.bf16.msra.mxu1 %v12774_v6 }
 0x772   : > { %4965 = vmatprep.subr.bf16.mxu1 %v12780_v53 }
 0x775   : > { %4966 = vmatpush1.bf16.msra.mxu1 %v12786_v45 }
 0x776   : > { %4967 = vmatprep.subr.bf16.mxu1 %v12792_v33 }
 0x779   : > { %4968 = vmatpush1.bf16.msra.mxu1 %v12798_v13 }
 0x77a   : > { %5101 = vmatprep.subr.bf16.mxu1 %v12804_v3 }
 0x77e   : > { %v4516_v23 = vpop.f32.mrb[72].mxu0  ;;  %v4557_v12 = vpop.f32.mrb[72].mxu1 }
 0x77f   : > { %v4627_v26 = vrot.slane %v4557_v12, 6  ;;  %v4518_v44 = vpop.f32.mrb[73].mxu0  ;;  %v4559_v1 = vpop.f32.mrb[73].mxu1  ;;  %v4607_v61 = vrot.slane %v4516_v23, 6  ;;  %v4666_v12 = vrot.slane %v12383_v22, 6 }
 0x780   : > { %v4628_v54 = vrot.slane %v4559_v1, 6  ;;  %v4520_v0 = vpop.f32.mrb[74].mxu0  ;;  %v4561_v63 = vpop.f32.mrb[74].mxu1  ;;  %v4608_v20 = vrot.slane %v4518_v44, 6 }
 0x781   : > { %v4631_v7 = vadd.f32 %v4627_v26, %v4476_v59  ;;  %v4521_v39 = vpop.f32.mrb[75].mxu0  ;;  %v4562_v60 = vpop.f32.mrb[75].mxu1  ;;  %v4611_v59 = vadd.f32 %v4607_v61, %v4474_v52 }
 0x782   : > { %v4632_v31 = vadd.f32 %v4628_v54, %v4477_v16  ;;  %v4475_v54 = vld [vmem:[#allocation4 + $0x38] sm:$0xc] }
 0x783   : > { %v6321_v37 = vmul.f32 -1.442695, %v4631_v7  ;;  %v4612_v0 = vadd.f32 %v4608_v20, %v4475_v54  ;;  %v6319_v7 = vmul.f32 -1.442695, %v4611_v59 }
 0x784   : > { %v6322_v38 = vmul.f32 -1.442695, %v4632_v31  ;;  %v15073_v31 = vld [vmem:[#allocation121_spill] sm:$0xff] }
 0x785   : > { %6994 = vpow2.f32 %v6321_v37  ;;  %v6320_v16 = vmul.f32 -1.442695, %v4612_v0  ;;  %v4479_v0 = vld [vmem:[#allocation4 + $0x58] sm:$0xc] }
 0x786   : > { %6996 = vpow2.f32 %v6322_v38  ;;  %v15074_v38 = vld [vmem:[#allocation122_spill] sm:$0xff] }
 0x78f   : > { %v6995_v27 = vpop.eup %6994 }
 0x790   : > { %v4639_v18 = vadd.f32 1.0, %v6995_v27  ;;  %v6997_v19 = vpop.eup %6996 }
 0x791   : > { %v4640_v46 = vadd.f32 1.0, %v6997_v19 }
 0x792   : > { %6998 = vrcp.f32 %v4639_v18 }
 0x793   : > { %7000 = vrcp.f32 %v4640_v46 }
 0x794   : > { %7002 = vpow2.f32 %v6319_v7 }
 0x795   : > { %7004 = vpow2.f32 %v6320_v16 }
 0x79c   : > { %v6999_v40 = vpop.eup %6998 }
 0x79d   : > { %v4669_v26 = vmul.f32 %v6999_v40, %v4665_v56  ;;  %v7001_v1 = vpop.eup %7000 }
 0x79e   : > { %v4670_v63 = vmul.f32 %v7001_v1, %v4666_v12  ;;  %v7003_v39 = vpop.eup %7002  ;;  %v4478_v12 = vld [vmem:[#allocation4 + $0x50] sm:$0xc] }
 0x79f   : > { %v7005_v60 = vpop.eup %7004  ;;  %v4619_v23 = vadd.f32 1.0, %v7003_v39 }
 0x7a0   : > { %v4620_v44 = vadd.f32 1.0, %v7005_v60  ;;  %v4659_v60 = vsub.f32 1.0, %v6999_v40 }
 0x7a1   : > { %7006 = vrcp.f32 %v4619_v23 }
 0x7a2   : > { %7008 = vrcp.f32 %v4620_v44 }
 0x7ab   : > { %v7007_v61 = vpop.eup %7006 }
 0x7ac   : > { %v7009_v56 = vpop.eup %7008 }
 0x7be   : > { %v4598_v41 = vpop.f32.mrb[76].mxu0 }
 0x7bf   : > { %v4645_v37 = vadd.f32 %v4598_v41, %v15073_v31  ;;  %v4600_v22 = vpop.f32.mrb[77].mxu0  ;;  %v4660_v41 = vsub.f32 1.0, %v7001_v1 }
 0x7c0   : > { %v4646_v27 = vadd.f32 %v4600_v22, %v15074_v38  ;;  %v4602_v18 = vpop.f32.mrb[78].mxu0 }
 0x7c1   : > { %v4649_v19 = vrot.slane %v4645_v37, 6  ;;  %v4603_v46 = vpop.f32.mrb[79].mxu0 }
 0x7c2   : > { %v4650_v20 = vrot.slane %v4646_v27, 6 }
 0x7c3   : > { %v4653_v52 = vmul.f32 %v7007_v61, %v4649_v19 }
 0x7c4   : > { %v4654_v59 = vmul.f32 %v7009_v56, %v4650_v20  ;;  %v12876_v56 = vld [vmem:[%s13891_s3 + $0x420] ss:$24 sps:$4 sm:$0xff]  }
 0x7c5   : > { %v4655_v54 = vadd.f32 %v4653_v52, %v4478_v12  ;;  %v12882_v52 = vld [vmem:[%s13891_s3 + $0x454] ss:$24 sps:$4 sm:$0xff]   ;;  %v12888_v12 = vld [vmem:[%s13891_s3 + $0x160] ss:$24 sps:$4 sm:$0xff]  }
 0x7c6   : > { %v4656_v7 = vadd.f32 %v4654_v59, %v4479_v0  ;;  %v12894_v59 = vld [vmem:[%s13891_s3 + $0x194] ss:$24 sps:$4 sm:$0xff]   ;;  %v12906_v0 = vld [vmem:[%s13891_s3 + $0x484] ss:$24 sps:$4 sm:$0xff]  }
 0x7c7   : > { %7010 = vtanh.f32 %v4655_v54  ;;  %v12900_v54 = vld [vmem:[%s13891_s3 + $0x450] ss:$24 sps:$4 sm:$0xff]  }
 0x7c8   : > { %7012 = vtanh.f32 %v4656_v7  ;;  %v12912_v7 = vld [vmem:[%s13891_s3 + $0x190] ss:$24 sps:$4 sm:$0xff]  }
 0x7cf   : > { %v4721_v16 = vpop.f32.mrb[76].mxu1 }
 0x7d0   : > { %v4723_v39 = vpop.f32.mrb[77].mxu1 }
 0x7d1   : > { %v7011_v23 = vpop.eup %7010  ;;  %v4725_v44 = vpop.f32.mrb[78].mxu1 }
 0x7d2   : > { %v7013_v37 = vpop.eup %7012  ;;  %v4726_v22 = vpop.f32.mrb[79].mxu1  ;;  %v4661_v27 = vmul.f32 %v7011_v23, %v4659_v60  ;;  %v12924_v60 = vld [vmem:[%s13891_s3 + $0x480] ss:$24 sps:$4 sm:$0xff]  }
 0x7d3   : > { %v4662_v18 = vmul.f32 %v7013_v37, %v4660_v41  ;;  %v12930_v41 = vld [vmem:[%s13891_s3 + $0x4b4] ss:$24 sps:$4 sm:$0xff]   ;;  %v4675_v37 = vld [vmem:[#allocation5 + $0x10] sm:$0x30] }
 0x7d4   : > { %v12811_v19 = vadd.f32 %v4669_v26, %v4661_v27 }
 0x7d5   : > { %v12813_v46 = vadd.f32 %v4670_v63, %v4662_v18  ;;  %v12851_v63 = vld [vmem:[%s13891_s3 + $0x134] ss:$24 sps:$4 sm:$0xff]  }
 0x7d6   : > { %4878 = vst [vmem:[%s7846_s17 + $0x10] sm:$0xc] %v12811_v19  ;;  %v4888_v61 = vpack.c.bf16 %v12811_v19, %v12811_v19 }
 0x7d7   : > { %4879 = vst [vmem:[%s7846_s17 + $0x18] sm:$0xc] %v12813_v46  ;;  %v4889_v40 = vpack.c.bf16 %v12813_v46, %v12813_v46 }
 0x7d8   : > { %v12823_v1 = vrot.slane %v4888_v61, 1  ;;  %v4676_v61 = vld [vmem:[#allocation5 + $0x18] sm:$0x30] }
 0x7d9   : > { %v4893_v20 = vrot.slane %v4889_v40, 1  ;;  %v12936_v40 = vld [vmem:[%s13891_s3 + $0x1c0] ss:$24 sps:$4 sm:$0xff]  }
 0x7db   : > { %4928 = vmatprep.mubr.bf16.mxu0 %v4893_v20  ;;  %4969 = vmatprep.mubr.bf16.mxu1 %v4893_v20 }
 0x7dc   : > { %4929 = vmatmul.mubr.bf16.vlgmr.msra.gmra.mrb[84].mxu0 %v12823_v1  ;;  %4970 = vmatmul.mubr.bf16.vlgmr.msra.gmra.mrb[84].mxu1 %v12823_v1 }
 0x7dd   : > { %4979 = vmatpush1.bf16.msra.mxu0 %v12400_v15  ;;  %5010 = vmatprep.mubr.bf16.mxu0 %v4893_v20  ;;  %v15075_v15 = vld [vmem:[#allocation124_spill] sm:$0xff] }
 0x7de   : > { %4980 = vmatprep.subr.bf16.mxu0 %v12406_v28  ;;  %5102 = vmatpush1.bf16.msra.mxu1 %v12412_v8  ;;  %v15076_v28 = vld [vmem:[#allocation125_spill] sm:$0xff]  ;;  %v15077_v8 = vld [vmem:[#allocation126_spill] sm:$0xff] }
 0x7df   : > { %5103 = vmatprep.subr.bf16.mxu1 %v12418_v49  ;;  %v15078_v49 = vld [vmem:[#allocation127_spill] sm:$0xff] }
 0x7e1   : > { %4981 = vmatpush1.bf16.msra.mxu0 %v12424_v24  ;;  %v15079_v24 = vld [vmem:[#allocation129_spill] sm:$0xff] }
 0x7e2   : > { %4982 = vmatprep.subr.bf16.mxu0 %v12430_v62  ;;  %5104 = vmatpush1.bf16.msra.mxu1 %v12436_v10  ;;  %v4812_v62 = vrot.slane %v4721_v16, 4  ;;  %v4813_v10 = vrot.slane %v4723_v39, 4  ;;  %v12918_v39 = vld [vmem:[%s13891_s3 + $0x1c4] ss:$24 sps:$4 sm:$0xff]  }
 0x7e3   : > { %5105 = vmatprep.subr.bf16.mxu1 %v12442_v35  ;;  %v15080_v35 = vld [vmem:[#allocation130_spill] sm:$0xff] }
 0x7e5   : > { %4983 = vmatpush1.bf16.msra.mxu0 %v12448_v21  ;;  %v4673_v21 = vld [vmem:[#allocation5] sm:$0x30] }
 0x7e6   : > { %4984 = vmatprep.subr.bf16.mxu0 %v12454_v32  ;;  %5106 = vmatpush1.bf16.msra.mxu1 %v12460_v25  ;;  %v4816_v32 = vadd.f32 %v4812_v62, %v4673_v21  ;;  %v4674_v25 = vld [vmem:[#allocation5 + $0x8] sm:$0x30] }
 0x7e7   : > { %5107 = vmatprep.subr.bf16.mxu1 %v15075_v15  ;;  %v4817_v26 = vadd.f32 %v4813_v10, %v4674_v25  ;;  %v12954_v10 = vld [vmem:[%s13891_s3 + $0x4e4] ss:$24 sps:$4 sm:$0xff]  }
 0x7e9   : > { %4985 = vmatpush1.bf16.msra.mxu0 %v15076_v28 }
 0x7ea   : > { %4986 = vmatprep.subr.bf16.mxu0 %v15077_v8  ;;  %5108 = vmatpush1.bf16.msra.mxu1 %v15078_v49  ;;  %v12942_v8 = vld [vmem:[%s13891_s3 + $0x1f4] ss:$24 sps:$4 sm:$0xff]   ;;  %v12948_v49 = vld [vmem:[%s13891_s3 + $0x4b0] ss:$24 sps:$4 sm:$0xff]  }
 0x7eb   : > { %5109 = vmatprep.subr.bf16.mxu1 %v15079_v24 }
 0x7ed   : > { %4987 = vmatpush1.bf16.msra.mxu0 %v12497_v43  ;;  %v12858_v43 = vld [vmem:[%s13891_s3 + $0x424] ss:$24 sps:$4 sm:$0xff]  }
 0x7ee   : > { %4988 = vmatprep.subr.bf16.mxu0 %v15080_v35  ;;  %5110 = vmatpush1.bf16.msra.mxu1 %v12509_v36  ;;  %v6323_v36 = vmul.f32 -1.442695, %v4816_v32  ;;  %v12960_v32 = vld [vmem:[%s13891_s3 + $0x1f0] ss:$24 sps:$4 sm:$0xff]  }
 0x7ef   : > { %5111 = vmatprep.subr.bf16.mxu1 %v12515_v48  ;;  %v6324_v48 = vmul.f32 -1.442695, %v4817_v26  ;;  %v12966_v26 = vld [vmem:[%s13891_s3 + $0x224] ss:$24 sps:$4 sm:$0xff]  }
 0x7f0   : > { %7014 = vpow2.f32 %v6323_v36  ;;  %v12972_v36 = vld [vmem:[%s13891_s3 + $0x4e0] ss:$24 sps:$4 sm:$0xff]  }
 0x7f1   : > { %4989 = vmatpush1.bf16.msra.mxu0 %v12521_v17  ;;  %v12864_v17 = vld [vmem:[%s13891_s3 + $0x130] ss:$24 sps:$4 sm:$0xff]   ;;  %7016 = vpow2.f32 %v6324_v48  ;;  %v12978_v48 = vld [vmem:[%s13891_s3 + $0x514] ss:$24 sps:$4 sm:$0xff]  }
 0x7f2   : > { %4990 = vmatprep.subr.bf16.mxu0 %v12851_v63  ;;  %5112 = vmatpush1.bf16.msra.mxu1 %v12528_v2  ;;  %v12870_v2 = vld [vmem:[%s13891_s3 + $0x164] ss:$24 sps:$4 sm:$0xff]  }
 0x7f3   : > { %5113 = vmatprep.subr.bf16.mxu1 %v12858_v43 }
 0x7f5   : > { %4991 = vmatpush1.bf16.msra.mxu0 %v12864_v17 }
 0x7f6   : > { %4992 = vmatprep.subr.bf16.mxu0 %v12870_v2  ;;  %5114 = vmatpush1.bf16.msra.mxu1 %v12876_v56 }
 0x7f7   : > { %5115 = vmatprep.subr.bf16.mxu1 %v12882_v52 }
 0x7f9   : > { %4993 = vmatpush1.bf16.msra.mxu0 %v12888_v12 }
 0x7fa   : > { %4994 = vmatprep.subr.bf16.mxu0 %v12894_v59  ;;  %5116 = vmatpush1.bf16.msra.mxu1 %v12900_v54  ;;  %v7015_v15 = vpop.eup %7014 }
 0x7fb   : > { %5117 = vmatprep.subr.bf16.mxu1 %v12906_v0  ;;  %v7017_v24 = vpop.eup %7016  ;;  %v4824_v21 = vadd.f32 1.0, %v7015_v15  ;;  %v13026_v15 = vld [vmem:[%s13891_s3 + $0x574] ss:$24 sps:$4 sm:$0xff]  }
 0x7fc   : > { %v4825_v25 = vadd.f32 1.0, %v7017_v24 }
 0x7fd   : > { %4995 = vmatpush1.bf16.msra.mxu0 %v12912_v7 }
 0x7fe   : > { %v4762_v16 = vpop.f32.mrb[80].mxu0  ;;  %4996 = vmatprep.subr.bf16.mxu0 %v12918_v39  ;;  %5118 = vmatpush1.bf16.msra.mxu1 %v12924_v60 }
 0x7ff   : > { %v4832_v23 = vrot.slane %v4762_v16, 4  ;;  %v4764_v44 = vpop.f32.mrb[81].mxu0  ;;  %5119 = vmatprep.subr.bf16.mxu1 %v12930_v41  ;;  %v12984_v16 = vld [vmem:[%s13891_s3 + $0x220] ss:$24 sps:$4 sm:$0xff]  }
 0x800   : > { %v4833_v22 = vrot.slane %v4764_v44, 4  ;;  %v4766_v27 = vpop.f32.mrb[82].mxu0  ;;  %v12996_v44 = vld [vmem:[%s13891_s3 + $0x510] ss:$24 sps:$4 sm:$0xff]  }
 0x801   : > { %v4836_v18 = vadd.f32 %v4832_v23, %v4675_v37  ;;  %4997 = vmatpush1.bf16.msra.mxu0 %v12936_v40  ;;  %v4767_v20 = vpop.f32.mrb[83].mxu0  ;;  %v12990_v23 = vld [vmem:[%s13891_s3 + $0x254] ss:$24 sps:$4 sm:$0xff]   ;;  %v13002_v37 = vld [vmem:[%s13891_s3 + $0x544] ss:$24 sps:$4 sm:$0xff]  }
 0x802   : > { %v4837_v28 = vadd.f32 %v4833_v22, %v4676_v61  ;;  %4998 = vmatprep.subr.bf16.mxu0 %v12942_v8  ;;  %5120 = vmatpush1.bf16.msra.mxu1 %v12948_v49  ;;  %15081 = vst [vmem:[#allocation131_spill] sm:$0xff] %v13002_v37  ;;  %v13008_v22 = vld [vmem:[%s13891_s3 + $0x250] ss:$24 sps:$4 sm:$0xff]   ;;  %v13014_v27 = vld [vmem:[%s13891_s3 + $0x284] ss:$24 sps:$4 sm:$0xff]  }
 0x803   : > { %v6325_v62 = vmul.f32 -1.442695, %v4836_v18  ;;  %5121 = vmatprep.subr.bf16.mxu1 %v12954_v10  ;;  %15082 = vst [vmem:[#allocation132_spill] sm:$0xff] %v13008_v22  ;;  %15083 = vst [vmem:[#allocation133_spill] sm:$0xff] %v13014_v27  ;;  %v13020_v18 = vld [vmem:[%s13891_s3 + $0x540] ss:$24 sps:$4 sm:$0xff]  }
 0x804   : > { %v6326_v35 = vmul.f32 -1.442695, %v4837_v28  ;;  %15084 = vst [vmem:[#allocation7_spill] sm:$0xff] %v13020_v18 }
 0x805   : > { %7018 = vpow2.f32 %v6325_v62  ;;  %4999 = vmatpush1.bf16.msra.mxu0 %v12960_v32 }
 0x806   : > { %7020 = vpow2.f32 %v6326_v35  ;;  %5000 = vmatprep.subr.bf16.mxu0 %v12966_v26  ;;  %5122 = vmatpush1.bf16.msra.mxu1 %v12972_v36 }
 0x807   : > { %5123 = vmatprep.subr.bf16.mxu1 %v12978_v48  ;;  %7022 = vrcp.f32 %v4824_v21 }
 0x808   : > { %7024 = vrcp.f32 %v4825_v25 }
 0x809   : > { %5001 = vmatpush1.bf16.msra.mxu0 %v12984_v16 }
 0x80a   : > { %5002 = vmatprep.subr.bf16.mxu0 %v12990_v23  ;;  %5124 = vmatpush1.bf16.msra.mxu1 %v12996_v44 }
 0x80b   : > { %5125 = vmatprep.subr.bf16.mxu1 %v13002_v37 }
 0x80d   : > { %5003 = vmatpush1.bf16.msra.mxu0 %v13008_v22 }
 0x80e   : > { %5004 = vmatprep.subr.bf16.mxu0 %v13014_v27  ;;  %5126 = vmatpush1.bf16.msra.mxu1 %v13020_v18  ;;  %v13034_v18 = vld [vmem:[%s13891_s3 + $0x280] ss:$24 sps:$4 sm:$0xff]  }
 0x80f   : > { %v7019_v61 = vpop.eup %7018  ;;  %v4803_v20 = vpop.f32.mrb[80].mxu1  ;;  %5127 = vmatprep.subr.bf16.mxu1 %v13026_v15  ;;  %15085 = vst [vmem:[#allocation9_spill] sm:$0xff] %v13034_v18 }
 0x810   : > { %v7021_v28 = vpop.eup %7020  ;;  %v4844_v24 = vadd.f32 1.0, %v7019_v61  ;;  %v4850_v62 = vadd.f32 %v4803_v20, %v14961_v5  ;;  %v4805_v35 = vpop.f32.mrb[81].mxu1  ;;  %v13040_v61 = vld [vmem:[%s13891_s3 + $0x2b4] ss:$24 sps:$4 sm:$0xff]   ;;  %v13046_v20 = vld [vmem:[%s13891_s3 + $0x570] ss:$24 sps:$4 sm:$0xff]  }
 0x811   : > { %v4845_v21 = vadd.f32 1.0, %v7021_v28  ;;  %v4851_v25 = vadd.f32 %v4805_v35, %v9677_v14  ;;  %5005 = vmatpush1.bf16.msra.mxu0 %v13034_v18  ;;  %v4807_v27 = vpop.f32.mrb[82].mxu1  ;;  %15086 = vst [vmem:[#allocation8_spill] sm:$0xff] %v13040_v61  ;;  %15087 = vst [vmem:[#allocation10_spill] sm:$0xff] %v13046_v20  ;;  %v7023_v28 = vpop.eup %7022  ;;  %v4677_v35 = vld [vmem:[#allocation5 + $0x20] sm:$0x30] }
 0x812   : > { %7026 = vrcp.f32 %v4844_v24  ;;  %v4854_v22 = vrot.slane %v4850_v62, 4  ;;  %v4808_v37 = vpop.f32.mrb[83].mxu1  ;;  %5006 = vmatprep.subr.bf16.mxu0 %v13040_v61  ;;  %5128 = vmatpush1.bf16.msra.mxu1 %v13046_v20  ;;  %v7025_v24 = vpop.eup %7024  ;;  %v13058_v18 = vld [vmem:[%s13891_s3 + $0x2b0] ss:$24 sps:$4 sm:$0xff]   ;;  %v13064_v20 = vld [vmem:[%s13891_s3 + $0x2e4] ss:$24 sps:$4 sm:$0xff]  }
 0x813   : > { %7028 = vrcp.f32 %v4845_v21  ;;  %v4855_v27 = vrot.slane %v4851_v25, 4  ;;  %v13052_v37 = vld [vmem:[%s13891_s3 + $0x5a4] ss:$24 sps:$4 sm:$0xff]   ;;  %v4678_v25 = vld [vmem:[#allocation5 + $0x28] sm:$0x30]  ;;  %15088 = vst [vmem:[#allocation128_spill] sm:$0xff] %v13064_v20 }
 0x814   : > { %5129 = vmatprep.subr.bf16.mxu1 %v13052_v37  ;;  %v4858_v62 = vmul.f32 %v7023_v28, %v4854_v22  ;;  %v13070_v22 = vld [vmem:[%s13891_s3 + $0x5a0] ss:$24 sps:$4 sm:$0xff]  }
 0x815   : > { %v4859_v61 = vmul.f32 %v7025_v24, %v4855_v27  ;;  %5007 = vmatpush1.bf16.msra.mxu0 %v13058_v18  ;;  %15089 = vst [vmem:[#allocation11_spill] sm:$0xff] %v13070_v22  ;;  %v13076_v27 = vld [vmem:[%s13891_s3 + $0x5d4] ss:$24 sps:$4 sm:$0xff]   ;;  %v13082_v24 = vld [vmem:[%s13891_s3 + $0x2e0] ss:$24 sps:$4 sm:$0xff]  }
 0x816   : > { %v4860_v21 = vadd.f32 %v4858_v62, %v4677_v35  ;;  %5008 = vmatprep.subr.bf16.mxu0 %v13064_v20  ;;  %5130 = vmatpush1.bf16.msra.mxu1 %v13070_v22  ;;  %15090 = vst [vmem:[#allocation13_spill] sm:$0xff] %v13076_v27  ;;  %15091 = vst [vmem:[#allocation12_spill] sm:$0xff] %v13082_v24  ;;  %v13094_v62 = vld [vmem:[%s13891_s3 + $0x5d0] ss:$24 sps:$4 sm:$0xff]   ;;  %v13100_v35 = vld [vmem:[%s13891_s3 + $0x314] ss:$24 sps:$4 sm:$0xff]  }
 0x817   : > { %v4861_v28 = vadd.f32 %v4859_v61, %v4678_v25  ;;  %5131 = vmatprep.subr.bf16.mxu1 %v13076_v27  ;;  %v13088_v61 = vld [vmem:[%s13891_s3 + $0x30c] ss:$24 sps:$4 sm:$0xff]   ;;  %15093 = vst [vmem:[#allocation15_spill] sm:$0xff] %v13094_v62  ;;  %15094 = vst [vmem:[#allocation17_spill] sm:$0xff] %v13100_v35  ;;  %v13133_v20 = vld [vmem:[%s13891_s3 + $0x368] ss:$24 sps:$4 sm:$0xff]  }
 0x818   : > { %7030 = vtanh.f32 %v4860_v21  ;;  %15092 = vst [vmem:[#allocation14_spill] sm:$0xff] %v13088_v61  ;;  %v4870_v21 = vrot.slane %v12582_v30, 2 }
 0x819   : > { %7032 = vtanh.f32 %v4861_v28  ;;  %5009 = vmatpush1.bf16.msra.mxu0 %v13082_v24  ;;  %v4871_v28 = vrot.slane %v12585_v4, 2  ;;  %v13109_v24 = vld [vmem:[%s13891_s3 + $0x308] ss:$24 sps:$4 sm:$0xff]   ;;  %v13121_v4 = vld [vmem:[%s13891_s3 + $0x338] ss:$24 sps:$4 sm:$0xff]  }
 0x81a   : > { %5142 = vmatprep.subr.bf16.mxu0 %v13088_v61  ;;  %5132 = vmatpush1.bf16.msra.mxu1 %v13094_v62  ;;  %15095 = vst [vmem:[#allocation16_spill] sm:$0xff] %v13109_v24  ;;  %15097 = vst [vmem:[#allocation19_spill] sm:$0xff] %v13121_v4 }
 0x81b   : > { %5183 = vmatprep.subr.bf16.mxu1 %v13100_v35  ;;  %v13115_v35 = vld [vmem:[%s13891_s3 + $0x33c] ss:$24 sps:$4 sm:$0xff]  }
 0x81c   : > { %v7027_v25 = vpop.eup %7026  ;;  %5011 = vmatmul.mubr.bf16.vlgmr.msra.gmra.mrb[88].mxu0 %v12823_v1  ;;  %15096 = vst [vmem:[#allocation18_spill] sm:$0xff] %v13115_v35 }
 0x81d   : > { %v7029_v61 = vpop.eup %7028  ;;  %5143 = vmatpush1.bf16.msra.mxu0 %v13109_v24  ;;  %v4874_v62 = vmul.f32 %v7027_v25, %v4870_v21  ;;  %v4864_v1 = vsub.f32 1.0, %v7027_v25  ;;  %v13127_v21 = vld [vmem:[%s13891_s3 + $0x36c] ss:$24 sps:$4 sm:$0xff]  }
 0x81e   : > { %5144 = vmatprep.subr.bf16.mxu0 %v13115_v35  ;;  %v4875_v30 = vmul.f32 %v7029_v61, %v4871_v28  ;;  %v4865_v35 = vsub.f32 1.0, %v7029_v61 }
 0x821   : > { %5145 = vmatpush1.bf16.msra.mxu0 %v13121_v4  ;;  %v13141_v4 = vld [vmem:[%s13891_s3 + $0x39c] ss:$24 sps:$4 sm:$0xff]  }
 0x822   : > { %v7031_v24 = vpop.eup %7030  ;;  %5146 = vmatprep.subr.bf16.mxu0 %v13127_v21 }
 0x823   : > { %v7033_v28 = vpop.eup %7032  ;;  %v4866_v27 = vmul.f32 %v7031_v24, %v4864_v1  ;;  %v13171_v1 = vld [vmem:[%s13891_s3 + $0x3c8] ss:$24 sps:$4 sm:$0xff]  }
 0x824   : > { %v4867_v22 = vmul.f32 %v7033_v28, %v4865_v35  ;;  %v13179_v28 = vld [vmem:[%s13891_s3 + $0x3fc] ss:$24 sps:$4 sm:$0xff]  }
 0x825   : > { %5147 = vmatpush1.bf16.msra.mxu0 %v13133_v20  ;;  %v13136_v25 = vadd.f32 %v4874_v62, %v4866_v27  ;;  %v13157_v62 = vld [vmem:[%s13891_s3 + $0x398] ss:$24 sps:$4 sm:$0xff]  }
 0x826   : > { %5148 = vmatprep.subr.bf16.mxu0 %v13141_v4  ;;  %v13144_v61 = vadd.f32 %v4875_v30, %v4867_v22  ;;  %v13163_v22 = vld [vmem:[%s13891_s3 + $0x3cc] ss:$24 sps:$4 sm:$0xff]  }
 0x827   : > { %4880 = vst [vmem:[%s7851_s21] sm:$0x30] %v13136_v25  ;;  %v5093_v24 = vpack.c.bf16 %v13136_v25, %v13136_v25 }
 0x828   : > { %4881 = vst [vmem:[%s7851_s21 + $0x8] sm:$0x30] %v13144_v61  ;;  %v5094_v27 = vpack.c.bf16 %v13144_v61, %v13144_v61 }
 0x829   : > { %5149 = vmatpush1.bf16.msra.mxu0 %v13157_v62  ;;  %v13166_v30 = vrot.slane %v5093_v24, 2  ;;  %v13186_v24 = vld [vmem:[%s13891_s3 + $0x3f8] ss:$24 sps:$4 sm:$0xff]  }
 0x82a   : > { %5150 = vmatprep.subr.bf16.mxu0 %v13163_v22  ;;  %v5098_v35 = vrot.slane %v5094_v27, 2  ;;  %15098 = vst [vmem:[#allocation21_spill] sm:$0xff] %v13186_v24  ;;  %v13219_v27 = vld [vmem:[%s13891_s3 + $0x458] ss:$24 sps:$4 sm:$0xff]  }
 0x82b   : > { %15103 = vst [vmem:[#allocation23_spill] sm:$0xff] %v13219_v27 }
 0x82c   : > { %5133 = vmatprep.mubr.bf16.mxu1 %v5098_v35  ;;  %5174 = vmatprep.mubr.bf16.mxu0 %v5098_v35 }
 0x82d   : > { %5151 = vmatpush1.bf16.msra.mxu0 %v13171_v1  ;;  %5134 = vmatmul.mubr.bf16.vlgmr.msra.gmra.mrb[88].mxu1 %v13166_v30 }
 0x82e   : > { %5184 = vmatpush1.bf16.msra.mxu1 %v12604_v58  ;;  %5215 = vmatprep.mubr.bf16.mxu1 %v5098_v35  ;;  %v13193_v58 = vld [vmem:[%s13891_s3 + $0x42c] ss:$24 sps:$4 sm:$0xff]  }
 0x82f   : > { %5152 = vmatprep.subr.bf16.mxu0 %v13179_v28  ;;  %5185 = vmatprep.subr.bf16.mxu1 %v12611_v55  ;;  %15099 = vst [vmem:[#allocation20_spill] sm:$0xff] %v13193_v58  ;;  %v13200_v55 = vld [vmem:[%s13891_s3 + $0x428] ss:$24 sps:$4 sm:$0xff]   ;;  %v13231_v35 = vld [vmem:[%s13891_s3 + $0x48c] ss:$24 sps:$4 sm:$0xff]  }
 0x830   : > { %15100 = vst [vmem:[#allocation22_spill] sm:$0xff] %v13200_v55  ;;  %15105 = vst [vmem:[#allocation25_spill] sm:$0xff] %v13231_v35 }
 0x831   : > { %5153 = vmatpush1.bf16.msra.mxu0 %v13186_v24 }
 0x832   : > { %5186 = vmatpush1.bf16.msra.mxu1 %v12618_v29  ;;  %5154 = vmatprep.subr.bf16.mxu0 %v13193_v58  ;;  %v13207_v29 = vld [vmem:[%s13891_s3 + $0x45c] ss:$24 sps:$4 sm:$0xff]  }
 0x833   : > { %5187 = vmatprep.subr.bf16.mxu1 %v12625_v57  ;;  %15101 = vst [vmem:[#allocation24_spill] sm:$0xff] %v13207_v29  ;;  %v13213_v57 = vld [vmem:[%s13891_s3 + $0x3a4] ss:$24 sps:$4 sm:$0xff]  }
 0x834   : > { %15102 = vst [vmem:[#allocation26_spill] sm:$0xff] %v13213_v57 }
 0x835   : > { %5155 = vmatpush1.bf16.msra.mxu0 %v13200_v55 }
 0x836   : > { %5188 = vmatpush1.bf16.msra.mxu1 %v12632_v9  ;;  %5156 = vmatprep.subr.bf16.mxu0 %v13207_v29  ;;  %v13225_v9 = vld [vmem:[%s13891_s3 + $0x3a0] ss:$24 sps:$4 sm:$0xff]  }
 0x837   : > { %5189 = vmatprep.subr.bf16.mxu1 %v13213_v57  ;;  %15104 = vst [vmem:[#allocation28_spill] sm:$0xff] %v13225_v9  ;;  %v13237_v57 = vld [vmem:[%s13891_s3 + $0x3d4] ss:$24 sps:$4 sm:$0xff]  }
 0x838   : > { %15106 = vst [vmem:[#allocation32_spill] sm:$0xff] %v13237_v57 }
 0x839   : > { %5157 = vmatpush1.bf16.msra.mxu0 %v13219_v27  ;;  %v13243_v27 = vld [vmem:[%s13891_s3 + $0x488] ss:$24 sps:$4 sm:$0xff]  }
 0x83a   : > { %5190 = vmatpush1.bf16.msra.mxu1 %v13225_v9  ;;  %5158 = vmatprep.subr.bf16.mxu0 %v13231_v35  ;;  %15107 = vst [vmem:[#allocation27_spill] sm:$0xff] %v13243_v27  ;;  %v13249_v9 = vld [vmem:[%s13891_s3 + $0x3d0] ss:$24 sps:$4 sm:$0xff]   ;;  %v13255_v35 = vld [vmem:[%s13891_s3 + $0x4bc] ss:$24 sps:$4 sm:$0xff]  }
 0x83b   : > { %5191 = vmatprep.subr.bf16.mxu1 %v13237_v57  ;;  %15108 = vst [vmem:[#allocation36_spill] sm:$0xff] %v13249_v9  ;;  %15109 = vst [vmem:[#allocation30_spill] sm:$0xff] %v13255_v35  ;;  %v13261_v57 = vld [vmem:[%s13891_s3 + $0x404] ss:$24 sps:$4 sm:$0xff]  }
 0x83c   : > { %15110 = vst [vmem:[#allocation40_spill] sm:$0xff] %v13261_v57 }
 0x83d   : > { %5159 = vmatpush1.bf16.msra.mxu0 %v13243_v27  ;;  %v13267_v27 = vld [vmem:[%s13891_s3 + $0x4b8] ss:$24 sps:$4 sm:$0xff]  }
 0x83e   : > { %5192 = vmatpush1.bf16.msra.mxu1 %v13249_v9  ;;  %5160 = vmatprep.subr.bf16.mxu0 %v13255_v35  ;;  %15111 = vst [vmem:[#allocation34_spill] sm:$0xff] %v13267_v27  ;;  %v13273_v9 = vld [vmem:[%s13891_s3 + $0x400] ss:$24 sps:$4 sm:$0xff]   ;;  %v13279_v35 = vld [vmem:[%s13891_s3 + $0x4ec] ss:$24 sps:$4 sm:$0xff]  }
 0x83f   : > { %5193 = vmatprep.subr.bf16.mxu1 %v13261_v57  ;;  %15112 = vst [vmem:[#allocation44_spill] sm:$0xff] %v13273_v9  ;;  %15113 = vst [vmem:[#allocation38_spill] sm:$0xff] %v13279_v35  ;;  %v13285_v57 = vld [vmem:[%s13891_s3 + $0x434] ss:$24 sps:$4 sm:$0xff]  }
 0x840   : > { %15114 = vst [vmem:[#allocation46_spill] sm:$0xff] %v13285_v57 }
 0x841   : > { %5161 = vmatpush1.bf16.msra.mxu0 %v13267_v27  ;;  %v13291_v27 = vld [vmem:[%s13891_s3 + $0x4e8] ss:$24 sps:$4 sm:$0xff]  }
 0x842   : > { %5194 = vmatpush1.bf16.msra.mxu1 %v13273_v9  ;;  %5162 = vmatprep.subr.bf16.mxu0 %v13279_v35  ;;  %15115 = vst [vmem:[#allocation42_spill] sm:$0xff] %v13291_v27  ;;  %v13297_v9 = vld [vmem:[%s13891_s3 + $0x430] ss:$24 sps:$4 sm:$0xff]   ;;  %v13303_v35 = vld [vmem:[%s13891_s3 + $0x51c] ss:$24 sps:$4 sm:$0xff]  }
 0x843   : > { %5195 = vmatprep.subr.bf16.mxu1 %v13285_v57  ;;  %15116 = vst [vmem:[#allocation48_spill] sm:$0xff] %v13297_v9  ;;  %15117 = vst [vmem:[#allocation29_spill] sm:$0xff] %v13303_v35  ;;  %v13309_v57 = vld [vmem:[%s13891_s3 + $0x464] ss:$24 sps:$4 sm:$0xff]  }
 0x844   : > { %15118 = vst [vmem:[#allocation50_spill] sm:$0xff] %v13309_v57 }
 0x845   : > { %5163 = vmatpush1.bf16.msra.mxu0 %v13291_v27  ;;  %v13315_v27 = vld [vmem:[%s13891_s3 + $0x518] ss:$24 sps:$4 sm:$0xff]  }
 0x846   : > { %5196 = vmatpush1.bf16.msra.mxu1 %v13297_v9  ;;  %5164 = vmatprep.subr.bf16.mxu0 %v13303_v35  ;;  %15119 = vst [vmem:[#allocation31_spill] sm:$0xff] %v13315_v27  ;;  %v13321_v9 = vld [vmem:[%s13891_s3 + $0x460] ss:$24 sps:$4 sm:$0xff]   ;;  %v13327_v35 = vld [vmem:[%s13891_s3 + $0x54c] ss:$24 sps:$4 sm:$0xff]  }
 0x847   : > { %5197 = vmatprep.subr.bf16.mxu1 %v13309_v57  ;;  %15120 = vst [vmem:[#allocation52_spill] sm:$0xff] %v13321_v9  ;;  %15121 = vst [vmem:[#allocation33_spill] sm:$0xff] %v13327_v35  ;;  %v13333_v57 = vld [vmem:[%s13891_s3 + $0x494] ss:$24 sps:$4 sm:$0xff]  }
 0x848   : > { %15122 = vst [vmem:[#allocation54_spill] sm:$0xff] %v13333_v57 }
 0x849   : > { %5165 = vmatpush1.bf16.msra.mxu0 %v13315_v27  ;;  %v13339_v27 = vld [vmem:[%s13891_s3 + $0x548] ss:$24 sps:$4 sm:$0xff]  }
 0x84a   : > { %5198 = vmatpush1.bf16.msra.mxu1 %v13321_v9  ;;  %5166 = vmatprep.subr.bf16.mxu0 %v13327_v35  ;;  %15123 = vst [vmem:[#allocation35_spill] sm:$0xff] %v13339_v27  ;;  %v13345_v9 = vld [vmem:[%s13891_s3 + $0x490] ss:$24 sps:$4 sm:$0xff]   ;;  %v13351_v35 = vld [vmem:[%s13891_s3 + $0x57c] ss:$24 sps:$4 sm:$0xff]  }
 0x84b   : > { %5199 = vmatprep.subr.bf16.mxu1 %v13333_v57  ;;  %15124 = vst [vmem:[#allocation56_spill] sm:$0xff] %v13345_v9  ;;  %15125 = vst [vmem:[#allocation37_spill] sm:$0xff] %v13351_v35  ;;  %v13357_v57 = vld [vmem:[%s13891_s3 + $0x4c4] ss:$24 sps:$4 sm:$0xff]  }
 0x84c   : > { %15126 = vst [vmem:[#allocation58_spill] sm:$0xff] %v13357_v57 }
 0x84d   : > { %5167 = vmatpush1.bf16.msra.mxu0 %v13339_v27  ;;  %v13363_v27 = vld [vmem:[%s13891_s3 + $0x578] ss:$24 sps:$4 sm:$0xff]  }
 0x84e   : > { %5200 = vmatpush1.bf16.msra.mxu1 %v13345_v9  ;;  %5168 = vmatprep.subr.bf16.mxu0 %v13351_v35  ;;  %15127 = vst [vmem:[#allocation39_spill] sm:$0xff] %v13363_v27  ;;  %v13369_v9 = vld [vmem:[%s13891_s3 + $0x4c0] ss:$24 sps:$4 sm:$0xff]   ;;  %v13375_v35 = vld [vmem:[%s13891_s3 + $0x5ac] ss:$24 sps:$4 sm:$0xff]  }
 0x84f   : > { %5201 = vmatprep.subr.bf16.mxu1 %v13357_v57  ;;  %15128 = vst [vmem:[#allocation60_spill] sm:$0xff] %v13369_v9  ;;  %15129 = vst [vmem:[#allocation41_spill] sm:$0xff] %v13375_v35  ;;  %v13381_v57 = vld [vmem:[%s13891_s3 + $0x4f4] ss:$24 sps:$4 sm:$0xff]  }
 0x850   : > { %15130 = vst [vmem:[#allocation62_spill] sm:$0xff] %v13381_v57 }
 0x851   : > { %5169 = vmatpush1.bf16.msra.mxu0 %v13363_v27  ;;  %v13387_v27 = vld [vmem:[%s13891_s3 + $0x5a8] ss:$24 sps:$4 sm:$0xff]  }
 0x852   : > { %5202 = vmatpush1.bf16.msra.mxu1 %v13369_v9  ;;  %5170 = vmatprep.subr.bf16.mxu0 %v13375_v35  ;;  %15131 = vst [vmem:[#allocation43_spill] sm:$0xff] %v13387_v27  ;;  %v13393_v9 = vld [vmem:[%s13891_s3 + $0x4f0] ss:$24 sps:$4 sm:$0xff]   ;;  %v13399_v35 = vld [vmem:[%s13891_s3 + $0x5dc] ss:$24 sps:$4 sm:$0xff]  }
 0x853   : > { %5203 = vmatprep.subr.bf16.mxu1 %v13381_v57  ;;  %15132 = vst [vmem:[#allocation64_spill] sm:$0xff] %v13393_v9  ;;  %15133 = vst [vmem:[#allocation45_spill] sm:$0xff] %v13399_v35  ;;  %v13405_v57 = vld [vmem:[%s13891_s3 + $0x524] ss:$24 sps:$4 sm:$0xff]  }
 0x854   : > { %15134 = vst [vmem:[#allocation66_spill] sm:$0xff] %v13405_v57 }
 0x855   : > { %5171 = vmatpush1.bf16.msra.mxu0 %v13387_v27  ;;  %v13411_v27 = vld [vmem:[%s13891_s3 + $0x5d8] ss:$24 sps:$4 sm:$0xff]  }
 0x856   : > { %5204 = vmatpush1.bf16.msra.mxu1 %v13393_v9  ;;  %5172 = vmatprep.subr.bf16.mxu0 %v13399_v35  ;;  %15135 = vst [vmem:[#allocation47_spill] sm:$0xff] %v13411_v27  ;;  %v13417_v9 = vld [vmem:[%s13891_s3 + $0x520] ss:$24 sps:$4 sm:$0xff]   ;;  %v7684_v35 = vld [vmem:[%s13891_s3 + $0x4] ss:$24 sps:$4 sm:$0xff]  }
 0x857   : > { %5205 = vmatprep.subr.bf16.mxu1 %v13405_v57  ;;  %15136 = vst [vmem:[#allocation68_spill] sm:$0xff] %v13417_v9  ;;  %v13426_v57 = vld [vmem:[%s13891_s3 + $0x554] ss:$24 sps:$4 sm:$0xff]  }
 0x858   : > { %15137 = vst [vmem:[#allocation49_spill] sm:$0xff] %v13426_v57 }
 0x859   : > { %5173 = vmatpush1.bf16.msra.mxu0 %v13411_v27  ;;  %v7686_v27 = vld [vmem:[%s13891_s3] ss:$24 sps:$4 sm:$0xff]  }
 0x85a   : > { %5206 = vmatpush1.bf16.msra.mxu1 %v13417_v9  ;;  %5310 = vmatprep.subr.bf16.mxu0 %v7684_v35  ;;  %v13436_v9 = vld [vmem:[%s13891_s3 + $0x550] ss:$24 sps:$4 sm:$0xff]   ;;  %v7688_v35 = vld [vmem:[%s13891_s3 + $0x34] ss:$24 sps:$4 sm:$0xff]  }
 0x85b   : > { %5207 = vmatprep.subr.bf16.mxu1 %v13426_v57  ;;  %15138 = vst [vmem:[#allocation55_spill] sm:$0xff] %v13436_v9  ;;  %v13445_v57 = vld [vmem:[%s13891_s3 + $0x584] ss:$24 sps:$4 sm:$0xff]  }
 0x85c   : > { %5175 = vmatmul.mubr.bf16.vlgmr.msra.gmra.mrb[92].mxu0 %v13166_v30  ;;  %15139 = vst [vmem:[#allocation51_spill] sm:$0xff] %v13445_v57 }
 0x85d   : > { %5311 = vmatpush1.bf16.msra.mxu0 %v7686_v27  ;;  %v7690_v27 = vld [vmem:[%s13891_s3 + $0x30] ss:$24 sps:$4 sm:$0xff]  }
 0x85e   : > { %5208 = vmatpush1.bf16.msra.mxu1 %v13436_v9  ;;  %5312 = vmatprep.subr.bf16.mxu0 %v7688_v35  ;;  %v13454_v9 = vld [vmem:[%s13891_s3 + $0x580] ss:$24 sps:$4 sm:$0xff]   ;;  %v7692_v35 = vld [vmem:[%s13891_s3 + $0x64] ss:$24 sps:$4 sm:$0xff]  }
 0x85f   : > { %5209 = vmatprep.subr.bf16.mxu1 %v13445_v57  ;;  %15140 = vst [vmem:[#allocation59_spill] sm:$0xff] %v13454_v9  ;;  %v13463_v57 = vld [vmem:[%s13891_s3 + $0x5b4] ss:$24 sps:$4 sm:$0xff]  }
 0x860   : > { %15141 = vst [vmem:[#allocation53_spill] sm:$0xff] %v13463_v57 }
 0x861   : > { %5313 = vmatpush1.bf16.msra.mxu0 %v7690_v27  ;;  %v7694_v27 = vld [vmem:[%s13891_s3 + $0x60] ss:$24 sps:$4 sm:$0xff]  }
 0x862   : > { %5210 = vmatpush1.bf16.msra.mxu1 %v13454_v9  ;;  %5314 = vmatprep.subr.bf16.mxu0 %v7692_v35  ;;  %v13472_v9 = vld [vmem:[%s13891_s3 + $0x5b0] ss:$24 sps:$4 sm:$0xff]   ;;  %v7696_v35 = vld [vmem:[%s13891_s3 + $0x94] ss:$24 sps:$4 sm:$0xff]  }
 0x863   : > { %5211 = vmatprep.subr.bf16.mxu1 %v13463_v57  ;;  %15142 = vst [vmem:[#allocation63_spill] sm:$0xff] %v13472_v9  ;;  %v13481_v57 = vld [vmem:[%s13891_s3 + $0x5e4] ss:$24 sps:$4 sm:$0xff]  }
 0x864   : > { %15143 = vst [vmem:[#allocation70_spill] sm:$0xff] %v13481_v57 }
 0x865   : > { %5315 = vmatpush1.bf16.msra.mxu0 %v7694_v27  ;;  %v7698_v27 = vld [vmem:[%s13891_s3 + $0x90] ss:$24 sps:$4 sm:$0xff]  }
 0x866   : > { %5212 = vmatpush1.bf16.msra.mxu1 %v13472_v9  ;;  %5316 = vmatprep.subr.bf16.mxu0 %v7696_v35  ;;  %v13490_v9 = vld [vmem:[%s13891_s3 + $0x5e0] ss:$24 sps:$4 sm:$0xff]   ;;  %v7700_v35 = vld [vmem:[%s13891_s3 + $0xc4] ss:$24 sps:$4 sm:$0xff]  }
 0x867   : > { %5213 = vmatprep.subr.bf16.mxu1 %v13481_v57  ;;  %15144 = vst [vmem:[#allocation67_spill] sm:$0xff] %v13490_v9  ;;  %v7701_v57 = vld [vmem:[%s13891_s3 + $0xc] ss:$24 sps:$4 sm:$0xff]  }
 0x869   : > { %5317 = vmatpush1.bf16.msra.mxu0 %v7698_v27  ;;  %v7702_v27 = vld [vmem:[%s13891_s3 + $0xc0] ss:$24 sps:$4 sm:$0xff]  }
 0x86a   : > { %5214 = vmatpush1.bf16.msra.mxu1 %v13490_v9  ;;  %5318 = vmatprep.subr.bf16.mxu0 %v7700_v35  ;;  %v7703_v9 = vld [vmem:[%s13891_s3 + $0x8] ss:$24 sps:$4 sm:$0xff]   ;;  %v7704_v35 = vld [vmem:[%s13891_s3 + $0xf4] ss:$24 sps:$4 sm:$0xff]  }
 0x86b   : > { %5351 = vmatprep.subr.bf16.mxu1 %v7701_v57  ;;  %v7705_v57 = vld [vmem:[%s13891_s3 + $0x3c] ss:$24 sps:$4 sm:$0xff]  }
 0x86d   : > { %5216 = vmatmul.mubr.bf16.vlgmr.msra.gmra.mrb[92].mxu1 %v13166_v30  ;;  %5319 = vmatpush1.bf16.msra.mxu0 %v7702_v27  ;;  %v7706_v30 = vld [vmem:[%s13891_s3 + $0xf0] ss:$24 sps:$4 sm:$0xff]  }
 0x86e   : > { %5352 = vmatpush1.bf16.msra.mxu1 %v7703_v9  ;;  %5320 = vmatprep.subr.bf16.mxu0 %v7704_v35  ;;  %v7707_v27 = vld [vmem:[%s13891_s3 + $0x38] ss:$24 sps:$4 sm:$0xff]   ;;  %v7708_v9 = vld [vmem:[%s13891_s3 + $0x124] ss:$24 sps:$4 sm:$0xff]  }
 0x86f   : > { %5353 = vmatprep.subr.bf16.mxu1 %v7705_v57  ;;  %v7709_v35 = vld [vmem:[%s13891_s3 + $0x6c] ss:$24 sps:$4 sm:$0xff]   ;;  %v7710_v57 = vld [vmem:[%s13891_s3 + $0x120] ss:$24 sps:$4 sm:$0xff]  }
 0x871   : > { %5321 = vmatpush1.bf16.msra.mxu0 %v7706_v30  ;;  %v7711_v30 = vld [vmem:[%s13891_s3 + $0x68] ss:$24 sps:$4 sm:$0xff]  }
 0x872   : > { %5354 = vmatpush1.bf16.msra.mxu1 %v7707_v27  ;;  %5322 = vmatprep.subr.bf16.mxu0 %v7708_v9  ;;  %v7712_v27 = vld [vmem:[%s13891_s3 + $0x154] ss:$24 sps:$4 sm:$0xff]  }
 0x873   : > { %5355 = vmatprep.subr.bf16.mxu1 %v7709_v35  ;;  %v7713_v9 = vld [vmem:[%s13891_s3 + $0x9c] ss:$24 sps:$4 sm:$0xff]   ;;  %v7714_v35 = vld [vmem:[%s13891_s3 + $0x150] ss:$24 sps:$4 sm:$0xff]  }
 0x875   : > { %5323 = vmatpush1.bf16.msra.mxu0 %v7710_v57  ;;  %v7715_v57 = vld [vmem:[%s13891_s3 + $0x98] ss:$24 sps:$4 sm:$0xff]  }
 0x876   : > { %5356 = vmatpush1.bf16.msra.mxu1 %v7711_v30  ;;  %5324 = vmatprep.subr.bf16.mxu0 %v7712_v27  ;;  %v7716_v30 = vld [vmem:[%s13891_s3 + $0x184] ss:$24 sps:$4 sm:$0xff]  }
 0x877   : > { %5357 = vmatprep.subr.bf16.mxu1 %v7713_v9  ;;  %v7717_v27 = vld [vmem:[%s13891_s3 + $0xcc] ss:$24 sps:$4 sm:$0xff]   ;;  %v7718_v9 = vld [vmem:[%s13891_s3 + $0x180] ss:$24 sps:$4 sm:$0xff]  }
 0x879   : > { %5325 = vmatpush1.bf16.msra.mxu0 %v7714_v35  ;;  %v7719_v35 = vld [vmem:[%s13891_s3 + $0xc8] ss:$24 sps:$4 sm:$0xff]  }
 0x87a   : > { %5358 = vmatpush1.bf16.msra.mxu1 %v7715_v57  ;;  %5326 = vmatprep.subr.bf16.mxu0 %v7716_v30  ;;  %v7720_v57 = vld [vmem:[%s13891_s3 + $0x1b4] ss:$24 sps:$4 sm:$0xff]  }
 0x87b   : > { %5359 = vmatprep.subr.bf16.mxu1 %v7717_v27  ;;  %v7721_v30 = vld [vmem:[%s13891_s3 + $0xfc] ss:$24 sps:$4 sm:$0xff]   ;;  %v7722_v27 = vld [vmem:[%s13891_s3 + $0x1b0] ss:$24 sps:$4 sm:$0xff]  }
 0x87d   : > { %5327 = vmatpush1.bf16.msra.mxu0 %v7718_v9  ;;  %v7723_v9 = vld [vmem:[%s13891_s3 + $0xf8] ss:$24 sps:$4 sm:$0xff]  }
 0x87e   : > { %5360 = vmatpush1.bf16.msra.mxu1 %v7719_v35  ;;  %5328 = vmatprep.subr.bf16.mxu0 %v7720_v57  ;;  %v7724_v35 = vld [vmem:[%s13891_s3 + $0x1e4] ss:$24 sps:$4 sm:$0xff]  }
 0x87f   : > { %5361 = vmatprep.subr.bf16.mxu1 %v7721_v30  ;;  %v7725_v57 = vld [vmem:[%s13891_s3 + $0x12c] ss:$24 sps:$4 sm:$0xff]   ;;  %v7726_v30 = vld [vmem:[%s13891_s3 + $0x1e0] ss:$24 sps:$4 sm:$0xff]  }
 0x881   : > { %5329 = vmatpush1.bf16.msra.mxu0 %v7722_v27  ;;  %v7727_v27 = vld [vmem:[%s13891_s3 + $0x128] ss:$24 sps:$4 sm:$0xff]  }
 0x882   : > { %5362 = vmatpush1.bf16.msra.mxu1 %v7723_v9  ;;  %5330 = vmatprep.subr.bf16.mxu0 %v7724_v35  ;;  %v7728_v9 = vld [vmem:[%s13891_s3 + $0x214] ss:$24 sps:$4 sm:$0xff]  }
 0x883   : > { %5363 = vmatprep.subr.bf16.mxu1 %v7725_v57  ;;  %v7729_v35 = vld [vmem:[%s13891_s3 + $0x15c] ss:$24 sps:$4 sm:$0xff]   ;;  %v7730_v57 = vld [vmem:[%s13891_s3 + $0x210] ss:$24 sps:$4 sm:$0xff]  }
 0x885   : > { %5331 = vmatpush1.bf16.msra.mxu0 %v7726_v30  ;;  %v7731_v30 = vld [vmem:[%s13891_s3 + $0x158] ss:$24 sps:$4 sm:$0xff]  }
 0x886   : > { %5364 = vmatpush1.bf16.msra.mxu1 %v7727_v27  ;;  %5332 = vmatprep.subr.bf16.mxu0 %v7728_v9  ;;  %v7732_v27 = vld [vmem:[%s13891_s3 + $0x244] ss:$24 sps:$4 sm:$0xff]  }
 0x887   : > { %5365 = vmatprep.subr.bf16.mxu1 %v7729_v35  ;;  %v7733_v9 = vld [vmem:[%s13891_s3 + $0x18c] ss:$24 sps:$4 sm:$0xff]   ;;  %v7734_v35 = vld [vmem:[%s13891_s3 + $0x240] ss:$24 sps:$4 sm:$0xff]  }
 0x889   : > { %5333 = vmatpush1.bf16.msra.mxu0 %v7730_v57  ;;  %v7735_v57 = vld [vmem:[%s13891_s3 + $0x188] ss:$24 sps:$4 sm:$0xff]  }
 0x88a   : > { %5366 = vmatpush1.bf16.msra.mxu1 %v7731_v30  ;;  %5334 = vmatprep.subr.bf16.mxu0 %v7732_v27  ;;  %v7736_v30 = vld [vmem:[%s13891_s3 + $0x274] ss:$24 sps:$4 sm:$0xff]  }
 0x88b   : > { %5367 = vmatprep.subr.bf16.mxu1 %v7733_v9  ;;  %v7737_v27 = vld [vmem:[%s13891_s3 + $0x1bc] ss:$24 sps:$4 sm:$0xff]   ;;  %v7738_v9 = vld [vmem:[%s13891_s3 + $0x1b8] ss:$24 sps:$4 sm:$0xff]  }
 0x88d   : > { %5335 = vmatpush1.bf16.msra.mxu0 %v7734_v35  ;;  %v7739_v35 = vld [vmem:[%s13891_s3 + $0x1ec] ss:$24 sps:$4 sm:$0xff]  }
 0x88e   : > { %5368 = vmatpush1.bf16.msra.mxu1 %v7735_v57  ;;  %5336 = vmatprep.subr.bf16.mxu0 %v7736_v30  ;;  %v7740_v57 = vld [vmem:[%s13891_s3 + $0x1e8] ss:$24 sps:$4 sm:$0xff]  }
 0x88f   : > { %5369 = vmatprep.subr.bf16.mxu1 %v7737_v27 }
 0x891   : > { %5337 = vmatpush1.bf16.msra.mxu0 %v12730_v51  ;;  %v7741_v51 = vld [vmem:[%s13891_s3 + $0x21c] ss:$24 sps:$4 sm:$0xff]  }
 0x892   : > { %5370 = vmatpush1.bf16.msra.mxu1 %v7738_v9  ;;  %5338 = vmatprep.subr.bf16.mxu0 %v12737_v11  ;;  %v7742_v11 = vld [vmem:[%s13891_s3 + $0x218] ss:$24 sps:$4 sm:$0xff]  }
 0x893   : > { %5371 = vmatprep.subr.bf16.mxu1 %v7739_v35 }
 0x895   : > { %5339 = vmatpush1.bf16.msra.mxu0 %v12744_v50  ;;  %v7743_v50 = vld [vmem:[%s13891_s3 + $0x24c] ss:$24 sps:$4 sm:$0xff]  }
 0x896   : > { %5372 = vmatpush1.bf16.msra.mxu1 %v7740_v57  ;;  %5340 = vmatprep.subr.bf16.mxu0 %v12751_v42  ;;  %v7744_v42 = vld [vmem:[%s13891_s3 + $0x248] ss:$24 sps:$4 sm:$0xff]   ;;  %v4884_v57 = vld [vmem:[#allocation4 + $0x40] sm:$0x30] }
 0x897   : > { %5373 = vmatprep.subr.bf16.mxu1 %v7741_v51 }
 0x899   : > { %5341 = vmatpush1.bf16.msra.mxu0 %v12758_v34  ;;  %v7745_v34 = vld [vmem:[%s13891_s3 + $0x27c] ss:$24 sps:$4 sm:$0xff]  }
 0x89a   : > { %5374 = vmatpush1.bf16.msra.mxu1 %v7742_v11  ;;  %5392 = vmatprep.subr.bf16.mxu0 %v12765_v47 }
 0x89b   : > { %5375 = vmatprep.subr.bf16.mxu1 %v7743_v50 }
 0x89e   : > { %5376 = vmatpush1.bf16.msra.mxu1 %v7744_v42  ;;  %v4885_v42 = vld [vmem:[#allocation4 + $0x48] sm:$0x30] }
 0x89f   : > { %5377 = vmatprep.subr.bf16.mxu1 %v7745_v34 }
 0x8a2   : > { %5378 = vmatpush1.bf16.msra.mxu1 %v12774_v6 }
 0x8a3   : > { %5379 = vmatprep.subr.bf16.mxu1 %v12780_v53 }
 0x8a6   : > { %5380 = vmatpush1.bf16.msra.mxu1 %v12786_v45 }
 0x8a7   : > { %5381 = vmatprep.subr.bf16.mxu1 %v12792_v33 }
 0x8aa   : > { %5382 = vmatpush1.bf16.msra.mxu1 %v12798_v13 }
 0x8ab   : > { %5515 = vmatprep.subr.bf16.mxu1 %v12804_v3 }
 0x8af   : > { %v4930_v47 = vpop.f32.mrb[84].mxu0  ;;  %v4971_v30 = vpop.f32.mrb[84].mxu1 }
 0x8b0   : > { %v5041_v27 = vrot.slane %v4971_v30, 4  ;;  %v4932_v9 = vpop.f32.mrb[85].mxu0  ;;  %v4973_v35 = vpop.f32.mrb[85].mxu1  ;;  %v5021_v58 = vrot.slane %v4930_v47, 4 }
 0x8b1   : > { %v5042_v51 = vrot.slane %v4973_v35, 4  ;;  %v4934_v11 = vpop.f32.mrb[86].mxu0  ;;  %v4975_v50 = vpop.f32.mrb[86].mxu1  ;;  %v5022_v24 = vrot.slane %v4932_v9, 4  ;;  %v5079_v35 = vrot.slane %v12811_v19, 6 }
 0x8b2   : > { %v5045_v6 = vadd.f32 %v5041_v27, %v4884_v57  ;;  %v4935_v53 = vpop.f32.mrb[87].mxu0  ;;  %v4976_v34 = vpop.f32.mrb[87].mxu1  ;;  %v4882_v27 = vld [vmem:[#allocation4 + $0x30] sm:$0x30]  ;;  %v5080_v57 = vrot.slane %v12813_v46, 6 }
 0x8b3   : > { %v5046_v45 = vadd.f32 %v5042_v51, %v4885_v42  ;;  %v4883_v42 = vld [vmem:[#allocation4 + $0x38] sm:$0x30] }
 0x8b4   : > { %v6329_v29 = vmul.f32 -1.442695, %v5045_v6  ;;  %v5025_v6 = vadd.f32 %v5021_v58, %v4882_v27 }
 0x8b5   : > { %v6330_v33 = vmul.f32 -1.442695, %v5046_v45 }
 0x8b6   : > { %7034 = vpow2.f32 %v6329_v29  ;;  %v5026_v29 = vadd.f32 %v5022_v24, %v4883_v42  ;;  %v6327_v34 = vmul.f32 -1.442695, %v5025_v6  ;;  %v4886_v42 = vld [vmem:[#allocation4 + $0x50] sm:$0x30] }
 0x8b7   : > { %7036 = vpow2.f32 %v6330_v33 }
 0x8b8   : > { %v6328_v45 = vmul.f32 -1.442695, %v5026_v29 }
 0x8c0   : > { %v7035_v13 = vpop.eup %7034 }
 0x8c1   : > { %v5053_v3 = vadd.f32 1.0, %v7035_v13  ;;  %v7037_v55 = vpop.eup %7036 }
 0x8c2   : > { %v5054_v30 = vadd.f32 1.0, %v7037_v55 }
 0x8c3   : > { %7038 = vrcp.f32 %v5053_v3 }
 0x8c4   : > { %7040 = vrcp.f32 %v5054_v30 }
 0x8c5   : > { %7042 = vpow2.f32 %v6327_v34 }
 0x8c6   : > { %7044 = vpow2.f32 %v6328_v45  ;;  %v4887_v45 = vld [vmem:[#allocation4 + $0x58] sm:$0x30] }
 0x8cd   : > { %v7039_v11 = vpop.eup %7038 }
 0x8ce   : > { %v5083_v50 = vmul.f32 %v7039_v11, %v5079_v35  ;;  %v7041_v51 = vpop.eup %7040 }
 0x8cf   : > { %v5084_v53 = vmul.f32 %v7041_v51, %v5080_v57  ;;  %v7043_v55 = vpop.eup %7042 }
 0x8d0   : > { %v7045_v33 = vpop.eup %7044  ;;  %v5033_v47 = vadd.f32 1.0, %v7043_v55 }
 0x8d1   : > { %v5034_v9 = vadd.f32 1.0, %v7045_v33 }
 0x8d2   : > { %7046 = vrcp.f32 %v5033_v47 }
 0x8d3   : > { %7048 = vrcp.f32 %v5034_v9  ;;  %v5073_v9 = vsub.f32 1.0, %v7039_v11 }
 0x8dc   : > { %v7047_v35 = vpop.eup %7046 }
 0x8dd   : > { %v7049_v57 = vpop.eup %7048 }
 0x8ef   : > { %v5012_v19 = vpop.f32.mrb[88].mxu0 }
 0x8f0   : > { %v5059_v13 = vadd.f32 %v5012_v19, %v15073_v31  ;;  %v5014_v46 = vpop.f32.mrb[89].mxu0 }
 0x8f1   : > { %v5060_v3 = vadd.f32 %v5014_v46, %v15074_v38  ;;  %v5016_v58 = vpop.f32.mrb[90].mxu0  ;;  %v5074_v46 = vsub.f32 1.0, %v7041_v51 }
 0x8f2   : > { %v5063_v30 = vrot.slane %v5059_v13, 4  ;;  %v5017_v24 = vpop.f32.mrb[91].mxu0 }
 0x8f3   : > { %v5064_v27 = vrot.slane %v5060_v3, 4 }
 0x8f4   : > { %v5067_v6 = vmul.f32 %v7047_v35, %v5063_v30 }
 0x8f5   : > { %v5068_v29 = vmul.f32 %v7049_v57, %v5064_v27 }
 0x8f6   : > { %v5069_v34 = vadd.f32 %v5067_v6, %v4886_v42  ;;  %v7748_v42 = vld [vmem:[%s13891_s3 + $0x300] ss:$24 sps:$4 sm:$0xff]  }
 0x8f7   : > { %v5070_v55 = vadd.f32 %v5068_v29, %v4887_v45  ;;  %v7749_v29 = vld [vmem:[%s13891_s3 + $0x334] ss:$24 sps:$4 sm:$0xff]  }
 0x8f8   : > { %7050 = vtanh.f32 %v5069_v34  ;;  %v7750_v34 = vld [vmem:[%s13891_s3 + $0x40] ss:$24 sps:$4 sm:$0xff]   ;;  %v7751_v45 = vld [vmem:[%s13891_s3 + $0x74] ss:$24 sps:$4 sm:$0xff]  }
 0x8f9   : > { %7052 = vtanh.f32 %v5070_v55  ;;  %v7752_v55 = vld [vmem:[%s13891_s3 + $0x330] ss:$24 sps:$4 sm:$0xff]  }
 0x900   : > { %v13648_v33 = vpop.f32.mrb[88].mxu1 }
 0x901   : > { %v13650_v47 = vpop.f32.mrb[89].mxu1 }
 0x902   : > { %v7051_v19 = vpop.eup %7050  ;;  %v5139_v13 = vpop.f32.mrb[90].mxu1 }
 0x903   : > { %v7053_v3 = vpop.eup %7052  ;;  %v5140_v58 = vpop.f32.mrb[91].mxu1  ;;  %v5075_v30 = vmul.f32 %v7051_v19, %v5073_v9  ;;  %v7753_v9 = vld [vmem:[%s13891_s3 + $0x364] ss:$24 sps:$4 sm:$0xff]   ;;  %v7754_v19 = vld [vmem:[%s13891_s3 + $0x70] ss:$24 sps:$4 sm:$0xff]  }
 0x904   : > { %v5076_v24 = vmul.f32 %v7053_v3, %v5074_v46  ;;  %v7755_v13 = vld [vmem:[%s13891_s3 + $0xa4] ss:$24 sps:$4 sm:$0xff]   ;;  %v7756_v46 = vld [vmem:[%s13891_s3 + $0x360] ss:$24 sps:$4 sm:$0xff]   ;;  %v7757_v3 = vld [vmem:[%s13891_s3 + $0x394] ss:$24 sps:$4 sm:$0xff]  }
 0x905   : > { %v13652_v35 = vadd.f32 %v5083_v50, %v5075_v30  ;;  %v7746_v50 = vld [vmem:[%s13891_s3 + $0x10] ss:$24 sps:$4 sm:$0xff]   ;;  %v7758_v58 = vld [vmem:[%s13891_s3 + $0xa0] ss:$24 sps:$4 sm:$0xff]   ;;  %v7759_v30 = vld [vmem:[%s13891_s3 + $0xd4] ss:$24 sps:$4 sm:$0xff]  }
 0x906   : > { %v13654_v27 = vadd.f32 %v5084_v53, %v5076_v24  ;;  %v7747_v53 = vld [vmem:[%s13891_s3 + $0x44] ss:$24 sps:$4 sm:$0xff]   ;;  %v7760_v24 = vld [vmem:[%s13891_s3 + $0x390] ss:$24 sps:$4 sm:$0xff]  }
 0x907   : > { %5292 = vst [vmem:[%s7846_s17 + $0x10] sm:$0x30] %v13652_v35  ;;  %v5302_v57 = vpack.c.bf16 %v13652_v35, %v13652_v35 }
 0x908   : > { %5293 = vst [vmem:[%s7846_s17 + $0x18] sm:$0x30] %v13654_v27  ;;  %v5303_v11 = vpack.c.bf16 %v13654_v27, %v13654_v27 }
 0x909   : > { %v13664_v51 = vrot.slane %v5302_v57, 2  ;;  %v7761_v57 = vld [vmem:[%s13891_s3 + $0x3c4] ss:$24 sps:$4 sm:$0xff]  }
 0x90a   : > { %v5307_v6 = vrot.slane %v5303_v11, 2  ;;  %v5226_v11 = vrot.slane %v13648_v33, 6  ;;  %v7765_v33 = vld [vmem:[%s13891_s3 + $0x3f4] ss:$24 sps:$4 sm:$0xff]  }
 0x90c   : > { %5342 = vmatprep.mubr.bf16.mxu0 %v5307_v6  ;;  %5383 = vmatprep.mubr.bf16.mxu1 %v5307_v6 }
 0x90d   : > { %5343 = vmatmul.mubr.bf16.vlgmr.msra.gmra.mrb[96].mxu0 %v13664_v51  ;;  %5384 = vmatmul.mubr.bf16.vlgmr.msra.gmra.mrb[96].mxu1 %v13664_v51 }
 0x90e   : > { %5393 = vmatpush1.bf16.msra.mxu0 %v7746_v50  ;;  %5424 = vmatprep.mubr.bf16.mxu0 %v5307_v6  ;;  %v5227_v6 = vrot.slane %v13650_v47, 6  ;;  %v7762_v50 = vld [vmem:[%s13891_s3 + $0xd0] ss:$24 sps:$4 sm:$0xff]  }
 0x90f   : > { %5394 = vmatprep.subr.bf16.mxu0 %v7747_v53  ;;  %5516 = vmatpush1.bf16.msra.mxu1 %v7748_v42  ;;  %v7763_v53 = vld [vmem:[%s13891_s3 + $0x104] ss:$24 sps:$4 sm:$0xff]   ;;  %v7764_v42 = vld [vmem:[%s13891_s3 + $0x3c0] ss:$24 sps:$4 sm:$0xff]  }
 0x910   : > { %5517 = vmatprep.subr.bf16.mxu1 %v7749_v29  ;;  %v5087_v29 = vld [vmem:[#allocation5] sm:$0xc] }
 0x911   : > { %v5230_v47 = vadd.f32 %v5226_v11, %v5087_v29 }
 0x912   : > { %5395 = vmatpush1.bf16.msra.mxu0 %v7750_v34  ;;  %v5088_v34 = vld [vmem:[#allocation5 + $0x8] sm:$0xc] }
 0x913   : > { %5396 = vmatprep.subr.bf16.mxu0 %v7751_v45  ;;  %5518 = vmatpush1.bf16.msra.mxu1 %v7752_v55  ;;  %v5231_v45 = vadd.f32 %v5227_v6, %v5088_v34  ;;  %v7766_v55 = vld [vmem:[%s13891_s3 + $0x100] ss:$24 sps:$4 sm:$0xff]  }
 0x914   : > { %5519 = vmatprep.subr.bf16.mxu1 %v7753_v9  ;;  %v7767_v9 = vld [vmem:[%s13891_s3 + $0x3f0] ss:$24 sps:$4 sm:$0xff]   ;;  %v15150_v6 = vld [vmem:[#allocation8_spill] sm:$0xff] }
 0x916   : > { %5397 = vmatpush1.bf16.msra.mxu0 %v7754_v19  ;;  %v6331_v19 = vmul.f32 -1.442695, %v5230_v47 }
 0x917   : > { %5398 = vmatprep.subr.bf16.mxu0 %v7755_v13  ;;  %5520 = vmatpush1.bf16.msra.mxu1 %v7756_v46  ;;  %v6332_v13 = vmul.f32 -1.442695, %v5231_v45  ;;  %v5092_v45 = vld [vmem:[#allocation5 + $0x28] sm:$0xc] }
 0x918   : > { %5521 = vmatprep.subr.bf16.mxu1 %v7757_v3  ;;  %7054 = vpow2.f32 %v6331_v19 }
 0x919   : > { %7056 = vpow2.f32 %v6332_v13  ;;  %v15154_v13 = vld [vmem:[#allocation13_spill] sm:$0xff] }
 0x91a   : > { %5399 = vmatpush1.bf16.msra.mxu0 %v7758_v58 }
 0x91b   : > { %5400 = vmatprep.subr.bf16.mxu0 %v7759_v30  ;;  %5522 = vmatpush1.bf16.msra.mxu1 %v7760_v24  ;;  %v15149_v30 = vld [vmem:[#allocation9_spill] sm:$0xff] }
 0x91c   : > { %5523 = vmatprep.subr.bf16.mxu1 %v7761_v57 }
 0x91e   : > { %5401 = vmatpush1.bf16.msra.mxu0 %v7762_v50  ;;  %v15151_v50 = vld [vmem:[#allocation10_spill] sm:$0xff] }
 0x91f   : > { %5402 = vmatprep.subr.bf16.mxu0 %v7763_v53  ;;  %5524 = vmatpush1.bf16.msra.mxu1 %v7764_v42 }
 0x920   : > { %5525 = vmatprep.subr.bf16.mxu1 %v7765_v33  ;;  %v5091_v33 = vld [vmem:[#allocation5 + $0x20] sm:$0xc] }
 0x922   : > { %5403 = vmatpush1.bf16.msra.mxu0 %v7766_v55  ;;  %v15152_v55 = vld [vmem:[#allocation128_spill] sm:$0xff] }
 0x923   : > { %5404 = vmatprep.subr.bf16.mxu0 %v12851_v63  ;;  %5526 = vmatpush1.bf16.msra.mxu1 %v7767_v9  ;;  %v15153_v9 = vld [vmem:[#allocation11_spill] sm:$0xff] }
 0x924   : > { %5527 = vmatprep.subr.bf16.mxu1 %v12858_v43 }
 0x926   : > { %5405 = vmatpush1.bf16.msra.mxu0 %v12864_v17 }
 0x927   : > { %5406 = vmatprep.subr.bf16.mxu0 %v12870_v2  ;;  %5528 = vmatpush1.bf16.msra.mxu1 %v12876_v56  ;;  %v5089_v2 = vld [vmem:[#allocation5 + $0x10] sm:$0xc] }
 0x928   : > { %5529 = vmatprep.subr.bf16.mxu1 %v12882_v52 }
 0x92a   : > { %5407 = vmatpush1.bf16.msra.mxu0 %v12888_v12 }
 0x92b   : > { %5408 = vmatprep.subr.bf16.mxu0 %v12894_v59  ;;  %5530 = vmatpush1.bf16.msra.mxu1 %v12900_v54  ;;  %v5090_v59 = vld [vmem:[#allocation5 + $0x18] sm:$0xc] }
 0x92c   : > { %5531 = vmatprep.subr.bf16.mxu1 %v12906_v0  ;;  %v7055_v0 = vpop.eup %7054 }
 0x92e   : > { %5409 = vmatpush1.bf16.msra.mxu0 %v12912_v7  ;;  %v7057_v7 = vpop.eup %7056 }
 0x92f   : > { %v5176_v63 = vpop.f32.mrb[92].mxu0  ;;  %5410 = vmatprep.subr.bf16.mxu0 %v12918_v39  ;;  %5532 = vmatpush1.bf16.msra.mxu1 %v12924_v60  ;;  %v5239_v3 = vadd.f32 1.0, %v7057_v7 }
 0x930   : > { %v5246_v43 = vrot.slane %v5176_v63, 6  ;;  %v5178_v17 = vpop.f32.mrb[93].mxu0  ;;  %5533 = vmatprep.subr.bf16.mxu1 %v12930_v41  ;;  %v5238_v41 = vadd.f32 1.0, %v7055_v0  ;;  %v15155_v63 = vld [vmem:[#allocation12_spill] sm:$0xff] }
 0x931   : > { %v5247_v56 = vrot.slane %v5178_v17, 6  ;;  %v5180_v52 = vpop.f32.mrb[94].mxu0  ;;  %v15158_v17 = vld [vmem:[#allocation17_spill] sm:$0xff] }
 0x932   : > { %v5250_v12 = vadd.f32 %v5246_v43, %v5089_v2  ;;  %5411 = vmatpush1.bf16.msra.mxu0 %v12936_v40  ;;  %v5181_v54 = vpop.f32.mrb[95].mxu0  ;;  %v15145_v40 = vld [vmem:[#allocation131_spill] sm:$0xff] }
 0x933   : > { %v5251_v46 = vadd.f32 %v5247_v56, %v5090_v59  ;;  %5412 = vmatprep.subr.bf16.mxu0 %v12942_v8  ;;  %5534 = vmatpush1.bf16.msra.mxu1 %v12948_v49  ;;  %v15146_v8 = vld [vmem:[#allocation132_spill] sm:$0xff]  ;;  %v15147_v49 = vld [vmem:[#allocation133_spill] sm:$0xff]  ;;  %v15157_v43 = vld [vmem:[#allocation15_spill] sm:$0xff]  ;;  %v5285_v56 = vrot.slane %v13144_v61, 2 }
 0x934   : > { %v6333_v39 = vmul.f32 -1.442695, %v5250_v12  ;;  %5535 = vmatprep.subr.bf16.mxu1 %v12954_v10  ;;  %v15148_v10 = vld [vmem:[#allocation7_spill] sm:$0xff]  ;;  %v15159_v12 = vld [vmem:[#allocation16_spill] sm:$0xff]  ;;  %v15160_v54 = vld [vmem:[#allocation18_spill] sm:$0xff] }
 0x935   : > { %v6334_v60 = vmul.f32 -1.442695, %v5251_v46  ;;  %v15161_v46 = vld [vmem:[#allocation19_spill] sm:$0xff] }
 0x936   : > { %7058 = vpow2.f32 %v6333_v39  ;;  %5413 = vmatpush1.bf16.msra.mxu0 %v12960_v32 }
 0x937   : > { %7060 = vpow2.f32 %v6334_v60  ;;  %5414 = vmatprep.subr.bf16.mxu0 %v12966_v26  ;;  %5536 = vmatpush1.bf16.msra.mxu1 %v12972_v36 }
 0x938   : > { %5537 = vmatprep.subr.bf16.mxu1 %v12978_v48  ;;  %7062 = vrcp.f32 %v5238_v41 }
 0x939   : > { %7064 = vrcp.f32 %v5239_v3 }
 0x93a   : > { %5415 = vmatpush1.bf16.msra.mxu0 %v12984_v16 }
 0x93b   : > { %5416 = vmatprep.subr.bf16.mxu0 %v12990_v23  ;;  %5538 = vmatpush1.bf16.msra.mxu1 %v12996_v44 }
 0x93c   : > { %5539 = vmatprep.subr.bf16.mxu1 %v15145_v40 }
 0x93e   : > { %5417 = vmatpush1.bf16.msra.mxu0 %v15146_v8 }
 0x93f   : > { %5418 = vmatprep.subr.bf16.mxu0 %v15147_v49  ;;  %5540 = vmatpush1.bf16.msra.mxu1 %v15148_v10  ;;  %v15163_v49 = vld [vmem:[#allocation20_spill] sm:$0xff]  ;;  %v7771_v10 = vld [vmem:[%s13891_s3 + $0x374] ss:$24 sps:$4 sm:$0xff]  }
 0x940   : > { %v7059_v32 = vpop.eup %7058  ;;  %v5217_v26 = vpop.f32.mrb[92].mxu1  ;;  %5541 = vmatprep.subr.bf16.mxu1 %v13026_v15 }
 0x941   : > { %v7061_v36 = vpop.eup %7060  ;;  %v5258_v48 = vadd.f32 1.0, %v7059_v32  ;;  %v5264_v16 = vadd.f32 %v5217_v26, %v14961_v5  ;;  %v5219_v58 = vpop.f32.mrb[93].mxu1  ;;  %v7772_v32 = vld [vmem:[%s13891_s3 + $0x370] ss:$24 sps:$4 sm:$0xff]   ;;  %v15165_v26 = vld [vmem:[#allocation24_spill] sm:$0xff] }
 0x942   : > { %v5259_v23 = vadd.f32 1.0, %v7061_v36  ;;  %v5265_v44 = vadd.f32 %v5219_v58, %v9677_v14  ;;  %5419 = vmatpush1.bf16.msra.mxu0 %v15149_v30  ;;  %v5221_v24 = vpop.f32.mrb[94].mxu1  ;;  %v7063_v53 = vpop.eup %7062  ;;  %v15166_v36 = vld [vmem:[#allocation26_spill] sm:$0xff]  ;;  %v15169_v58 = vld [vmem:[#allocation25_spill] sm:$0xff]  ;;  %v15172_v30 = vld [vmem:[#allocation36_spill] sm:$0xff] }
 0x943   : > { %7066 = vrcp.f32 %v5258_v48  ;;  %v5268_v57 = vrot.slane %v5264_v16, 6  ;;  %v5222_v11 = vpop.f32.mrb[95].mxu1  ;;  %5420 = vmatprep.subr.bf16.mxu0 %v15150_v6  ;;  %5542 = vmatpush1.bf16.msra.mxu1 %v15151_v50  ;;  %v7065_v42 = vpop.eup %7064  ;;  %v15167_v48 = vld [vmem:[#allocation23_spill] sm:$0xff]  ;;  %v15168_v16 = vld [vmem:[#allocation28_spill] sm:$0xff]  ;;  %v15173_v24 = vld [vmem:[#allocation30_spill] sm:$0xff] }
 0x944   : > { %7068 = vrcp.f32 %v5259_v23  ;;  %v5269_v15 = vrot.slane %v5265_v44, 6  ;;  %5543 = vmatprep.subr.bf16.mxu1 %v13052_v37  ;;  %v15156_v37 = vld [vmem:[#allocation14_spill] sm:$0xff]  ;;  %v15170_v23 = vld [vmem:[#allocation32_spill] sm:$0xff]  ;;  %v15171_v44 = vld [vmem:[#allocation27_spill] sm:$0xff] }
 0x945   : > { %v5272_v29 = vmul.f32 %v7063_v53, %v5268_v57  ;;  %v15174_v57 = vld [vmem:[#allocation40_spill] sm:$0xff]  ;;  %v15175_v11 = vld [vmem:[#allocation34_spill] sm:$0xff] }
 0x946   : > { %v5273_v47 = vmul.f32 %v7065_v42, %v5269_v15  ;;  %5421 = vmatpush1.bf16.msra.mxu0 %v13058_v18  ;;  %v5284_v18 = vrot.slane %v13136_v25, 2  ;;  %v15176_v6 = vld [vmem:[#allocation44_spill] sm:$0xff]  ;;  %v15177_v50 = vld [vmem:[#allocation38_spill] sm:$0xff] }
 0x947   : > { %v5274_v34 = vadd.f32 %v5272_v29, %v5091_v33  ;;  %5422 = vmatprep.subr.bf16.mxu0 %v15152_v55  ;;  %5544 = vmatpush1.bf16.msra.mxu1 %v15153_v9  ;;  %v15178_v53 = vld [vmem:[#allocation46_spill] sm:$0xff]  ;;  %v15180_v42 = vld [vmem:[#allocation48_spill] sm:$0xff]  ;;  %v15181_v29 = vld [vmem:[#allocation29_spill] sm:$0xff] }
 0x948   : > { %v5275_v19 = vadd.f32 %v5273_v47, %v5092_v45  ;;  %5545 = vmatprep.subr.bf16.mxu1 %v15154_v13  ;;  %v15179_v15 = vld [vmem:[#allocation42_spill] sm:$0xff]  ;;  %v15183_v47 = vld [vmem:[#allocation31_spill] sm:$0xff]  ;;  %v15185_v45 = vld [vmem:[#allocation33_spill] sm:$0xff] }
 0x949   : > { %7070 = vtanh.f32 %v5274_v34  ;;  %v15182_v33 = vld [vmem:[#allocation50_spill] sm:$0xff]  ;;  %v15184_v34 = vld [vmem:[#allocation52_spill] sm:$0xff]  ;;  %v15187_v9 = vld [vmem:[#allocation35_spill] sm:$0xff] }
 0x94a   : > { %7072 = vtanh.f32 %v5275_v19  ;;  %5423 = vmatpush1.bf16.msra.mxu0 %v15155_v63  ;;  %v15186_v55 = vld [vmem:[#allocation54_spill] sm:$0xff]  ;;  %v15188_v19 = vld [vmem:[#allocation56_spill] sm:$0xff]  ;;  %v15189_v13 = vld [vmem:[#allocation37_spill] sm:$0xff] }
 0x94b   : > { %5556 = vmatprep.subr.bf16.mxu0 %v15156_v37  ;;  %5546 = vmatpush1.bf16.msra.mxu1 %v15157_v43  ;;  %v15190_v63 = vld [vmem:[#allocation58_spill] sm:$0xff]  ;;  %v15191_v37 = vld [vmem:[#allocation39_spill] sm:$0xff]  ;;  %v15192_v43 = vld [vmem:[#allocation60_spill] sm:$0xff] }
 0x94c   : > { %5597 = vmatprep.subr.bf16.mxu1 %v15158_v17  ;;  %v15193_v17 = vld [vmem:[#allocation41_spill] sm:$0xff] }
 0x94d   : > { %v7067_v2 = vpop.eup %7066  ;;  %5425 = vmatmul.mubr.bf16.vlgmr.msra.gmra.mrb[100].mxu0 %v13664_v51 }
 0x94e   : > { %v7069_v52 = vpop.eup %7068  ;;  %5557 = vmatpush1.bf16.msra.mxu0 %v15159_v12  ;;  %v5288_v59 = vmul.f32 %v7067_v2, %v5284_v18  ;;  %v5278_v7 = vsub.f32 1.0, %v7067_v2  ;;  %v15194_v18 = vld [vmem:[#allocation62_spill] sm:$0xff]  ;;  %v15195_v2 = vld [vmem:[#allocation43_spill] sm:$0xff] }
 0x94f   : > { %5558 = vmatprep.subr.bf16.mxu0 %v15160_v54  ;;  %v5289_v0 = vmul.f32 %v7069_v52, %v5285_v56  ;;  %v5279_v25 = vsub.f32 1.0, %v7069_v52  ;;  %v15196_v56 = vld [vmem:[#allocation64_spill] sm:$0xff]  ;;  %v15197_v52 = vld [vmem:[#allocation45_spill] sm:$0xff]  ;;  %v15198_v12 = vld [vmem:[#allocation66_spill] sm:$0xff] }
 0x950   : > { %v15200_v54 = vld [vmem:[#allocation68_spill] sm:$0xff] }
 0x952   : > { %5559 = vmatpush1.bf16.msra.mxu0 %v15161_v46  ;;  %v15202_v46 = vld [vmem:[#allocation55_spill] sm:$0xff] }
 0x953   : > { %v7071_v39 = vpop.eup %7070  ;;  %5560 = vmatprep.subr.bf16.mxu0 %v13127_v21 }
 0x954   : > { %v7073_v60 = vpop.eup %7072  ;;  %v5280_v51 = vmul.f32 %v7071_v39, %v5278_v7  ;;  %v15203_v7 = vld [vmem:[#allocation51_spill] sm:$0xff] }
 0x955   : > { %v5281_v41 = vmul.f32 %v7073_v60, %v5279_v25  ;;  %v15204_v39 = vld [vmem:[#allocation59_spill] sm:$0xff]  ;;  %v15205_v25 = vld [vmem:[#allocation53_spill] sm:$0xff] }
 0x956   : > { %5561 = vmatpush1.bf16.msra.mxu0 %v13133_v20  ;;  %v13788_v61 = vadd.f32 %v5288_v59, %v5280_v51  ;;  %v15199_v59 = vld [vmem:[#allocation47_spill] sm:$0xff]  ;;  %v15207_v51 = vld [vmem:[#allocation70_spill] sm:$0xff] }
 0x957   : > { %5562 = vmatprep.subr.bf16.mxu0 %v13141_v4  ;;  %v13791_v3 = vadd.f32 %v5289_v0, %v5281_v41  ;;  %v7768_v4 = vld [vmem:[%s13891_s3 + $0x310] ss:$24 sps:$4 sm:$0xff]   ;;  %v15201_v0 = vld [vmem:[#allocation49_spill] sm:$0xff] }
 0x958   : > { %5294 = vst [vmem:[%s7851_s21] sm:$0xc] %v13788_v61  ;;  %v5507_v40 = vpack.c.bf16 %v13788_v61, %v13788_v61  ;;  %v15206_v60 = vld [vmem:[#allocation63_spill] sm:$0xff] }
 0x959   : > { %5295 = vst [vmem:[%s7851_s21 + $0x8] sm:$0xc] %v13791_v3  ;;  %v5508_v21 = vpack.c.bf16 %v13791_v3, %v13791_v3  ;;  %v15208_v41 = vld [vmem:[#allocation67_spill] sm:$0xff] }
 0x95a   : > { %5563 = vmatpush1.bf16.msra.mxu0 %v13157_v62  ;;  %v13803_v8 = vrot.slane %v5507_v40, 1  ;;  %v7769_v62 = vld [vmem:[%s13891_s3 + $0x344] ss:$24 sps:$4 sm:$0xff]  }
 0x95b   : > { %5564 = vmatprep.subr.bf16.mxu0 %v13163_v22  ;;  %v5512_v20 = vrot.slane %v5508_v21, 1  ;;  %v15162_v22 = vld [vmem:[#allocation21_spill] sm:$0xff] }
 0x95d   : > { %5547 = vmatprep.mubr.bf16.mxu1 %v5512_v20  ;;  %5588 = vmatprep.mubr.bf16.mxu0 %v5512_v20 }
 0x95e   : > { %5565 = vmatpush1.bf16.msra.mxu0 %v13171_v1  ;;  %5548 = vmatmul.mubr.bf16.vlgmr.msra.gmra.mrb[100].mxu1 %v13803_v8  ;;  %v7770_v1 = vld [vmem:[%s13891_s3 + $0x340] ss:$24 sps:$4 sm:$0xff]  }
 0x95f   : > { %5598 = vmatpush1.bf16.msra.mxu1 %v7768_v4  ;;  %5629 = vmatprep.mubr.bf16.mxu1 %v5512_v20 }
 0x960   : > { %5566 = vmatprep.subr.bf16.mxu0 %v13179_v28  ;;  %5599 = vmatprep.subr.bf16.mxu1 %v7769_v62  ;;  %v15164_v28 = vld [vmem:[#allocation22_spill] sm:$0xff] }
 0x962   : > { %5567 = vmatpush1.bf16.msra.mxu0 %v15162_v22  ;;  %v5298_v22 = vld [vmem:[#allocation4 + $0x40] sm:$0xc0] }
 0x963   : > { %5600 = vmatpush1.bf16.msra.mxu1 %v7770_v1  ;;  %5568 = vmatprep.subr.bf16.mxu0 %v15163_v49 }
 0x964   : > { %5601 = vmatprep.subr.bf16.mxu1 %v7771_v10 }
 0x966   : > { %5569 = vmatpush1.bf16.msra.mxu0 %v15164_v28 }
 0x967   : > { %5602 = vmatpush1.bf16.msra.mxu1 %v7772_v32  ;;  %5570 = vmatprep.subr.bf16.mxu0 %v15165_v26  ;;  %v5299_v32 = vld [vmem:[#allocation4 + $0x48] sm:$0xc0] }
 0x968   : > { %5603 = vmatprep.subr.bf16.mxu1 %v15166_v36 }
 0x96a   : > { %5571 = vmatpush1.bf16.msra.mxu0 %v15167_v48 }
 0x96b   : > { %5604 = vmatpush1.bf16.msra.mxu1 %v15168_v16  ;;  %5572 = vmatprep.subr.bf16.mxu0 %v15169_v58 }
 0x96c   : > { %5605 = vmatprep.subr.bf16.mxu1 %v15170_v23 }
 0x96e   : > { %5573 = vmatpush1.bf16.msra.mxu0 %v15171_v44 }
 0x96f   : > { %5606 = vmatpush1.bf16.msra.mxu1 %v15172_v30  ;;  %5574 = vmatprep.subr.bf16.mxu0 %v15173_v24 }
 0x970   : > { %5607 = vmatprep.subr.bf16.mxu1 %v15174_v57  ;;  %v5493_v57 = vrot.slane %v13652_v35, 6 }
 0x972   : > { %5575 = vmatpush1.bf16.msra.mxu0 %v15175_v11 }
 0x973   : > { %5608 = vmatpush1.bf16.msra.mxu1 %v15176_v6  ;;  %5576 = vmatprep.subr.bf16.mxu0 %v15177_v50  ;;  %v5494_v50 = vrot.slane %v13654_v27, 6 }
 0x974   : > { %5609 = vmatprep.subr.bf16.mxu1 %v15178_v53  ;;  %v5296_v53 = vld [vmem:[#allocation4 + $0x30] sm:$0xc0] }
 0x976   : > { %5577 = vmatpush1.bf16.msra.mxu0 %v15179_v15 }
 0x977   : > { %5610 = vmatpush1.bf16.msra.mxu1 %v15180_v42  ;;  %5578 = vmatprep.subr.bf16.mxu0 %v15181_v29 }
 0x978   : > { %5611 = vmatprep.subr.bf16.mxu1 %v15182_v33  ;;  %v5297_v33 = vld [vmem:[#allocation4 + $0x38] sm:$0xc0] }
 0x97a   : > { %5579 = vmatpush1.bf16.msra.mxu0 %v15183_v47 }
 0x97b   : > { %5612 = vmatpush1.bf16.msra.mxu1 %v15184_v34  ;;  %5580 = vmatprep.subr.bf16.mxu0 %v15185_v45 }
 0x97c   : > { %5613 = vmatprep.subr.bf16.mxu1 %v15186_v55 }
 0x97e   : > { %5581 = vmatpush1.bf16.msra.mxu0 %v15187_v9 }
 0x97f   : > { %5614 = vmatpush1.bf16.msra.mxu1 %v15188_v19  ;;  %5582 = vmatprep.subr.bf16.mxu0 %v15189_v13 }
 0x980   : > { %5615 = vmatprep.subr.bf16.mxu1 %v15190_v63 }
 0x982   : > { %5583 = vmatpush1.bf16.msra.mxu0 %v15191_v37 }
 0x983   : > { %5616 = vmatpush1.bf16.msra.mxu1 %v15192_v43  ;;  %5584 = vmatprep.subr.bf16.mxu0 %v15193_v17 }
 0x984   : > { %5617 = vmatprep.subr.bf16.mxu1 %v15194_v18 }
 0x986   : > { %5585 = vmatpush1.bf16.msra.mxu0 %v15195_v2 }
 0x987   : > { %5618 = vmatpush1.bf16.msra.mxu1 %v15196_v56  ;;  %5586 = vmatprep.subr.bf16.mxu0 %v15197_v52 }
 0x988   : > { %5619 = vmatprep.subr.bf16.mxu1 %v15198_v12 }
 0x98a   : > { %5587 = vmatpush1.bf16.msra.mxu0 %v15199_v59 }
 0x98b   : > { %5620 = vmatpush1.bf16.msra.mxu1 %v15200_v54  ;;  %v5300_v54 = vld [vmem:[#allocation4 + $0x50] sm:$0xc0] }
 0x98c   : > { %5621 = vmatprep.subr.bf16.mxu1 %v15201_v0 }
 0x98d   : > { %5589 = vmatmul.mubr.bf16.vlgmr.msra.gmra.mrb[104].mxu0 %v13803_v8 }
 0x98f   : > { %5622 = vmatpush1.bf16.msra.mxu1 %v15202_v46 }
 0x990   : > { %5623 = vmatprep.subr.bf16.mxu1 %v15203_v7  ;;  %v5301_v7 = vld [vmem:[#allocation4 + $0x58] sm:$0xc0] }
 0x993   : > { %5624 = vmatpush1.bf16.msra.mxu1 %v15204_v39 }
 0x994   : > { %5625 = vmatprep.subr.bf16.mxu1 %v15205_v25 }
 0x997   : > { %5626 = vmatpush1.bf16.msra.mxu1 %v15206_v60 }
 0x998   : > { %5627 = vmatprep.subr.bf16.mxu1 %v15207_v51 }
 0x99b   : > { %5628 = vmatpush1.bf16.msra.mxu1 %v15208_v41 }
 0x99e   : > { %5630 = vmatmul.mubr.bf16.vlgmr.msra.gmra.mrb[104].mxu1 %v13803_v8 }
 0x9e0   : > { %v5344_v40 = vpop.f32.mrb[96].mxu0  ;;  %v5385_v21 = vpop.f32.mrb[96].mxu1 }
 0x9e1   : > { %v5455_v20 = vrot.slane %v5385_v21, 2  ;;  %v5346_v4 = vpop.f32.mrb[97].mxu0  ;;  %v5387_v62 = vpop.f32.mrb[97].mxu1  ;;  %v5435_v24 = vrot.slane %v5344_v40, 2 }
 0x9e2   : > { %v5456_v1 = vrot.slane %v5387_v62, 2  ;;  %v5348_v49 = vpop.f32.mrb[98].mxu0  ;;  %v5389_v10 = vpop.f32.mrb[98].mxu1  ;;  %v5436_v11 = vrot.slane %v5346_v4, 2 }
 0x9e3   : > { %v5459_v28 = vadd.f32 %v5455_v20, %v5298_v22  ;;  %v5349_v26 = vpop.f32.mrb[99].mxu0  ;;  %v5390_v36 = vpop.f32.mrb[99].mxu1  ;;  %v5439_v29 = vadd.f32 %v5435_v24, %v5296_v53  ;;  %v15209_v49 = vld [vmem:[#allocation6_spill] sm:$0xff] }
 0x9e4   : > { %v5460_v48 = vadd.f32 %v5456_v1, %v5299_v32  ;;  %v5440_v47 = vadd.f32 %v5436_v11, %v5297_v33  ;;  %v5501_v32 = vld [vmem:[#allocation5] sm:$0x3]  ;;  %v5502_v36 = vld [vmem:[#allocation5 + $0x8] sm:$0x3] }
 0x9e5   : > { %v6337_v16 = vmul.f32 -1.442695, %v5459_v28  ;;  %v6335_v45 = vmul.f32 -1.442695, %v5439_v29 }
 0x9e6   : > { %v6338_v58 = vmul.f32 -1.442695, %v5460_v48  ;;  %v6336_v55 = vmul.f32 -1.442695, %v5440_v47 }
 0x9e7   : > { %7074 = vpow2.f32 %v6337_v16 }
 0x9e8   : > { %7076 = vpow2.f32 %v6338_v58 }
 0x9f1   : > { %v7075_v23 = vpop.eup %7074 }
 0x9f2   : > { %v5467_v8 = vadd.f32 1.0, %v7075_v23  ;;  %v7077_v44 = vpop.eup %7076  ;;  %v5503_v23 = vld [vmem:[#allocation5 + $0x10] sm:$0x3] }
 0x9f3   : > { %v5468_v30 = vadd.f32 1.0, %v7077_v44 }
 0x9f4   : > { %7078 = vrcp.f32 %v5467_v8 }
 0x9f5   : > { %7080 = vrcp.f32 %v5468_v30  ;;  %v5504_v30 = vld [vmem:[#allocation5 + $0x18] sm:$0x3] }
 0x9f6   : > { %7082 = vpow2.f32 %v6335_v45 }
 0x9f7   : > { %7084 = vpow2.f32 %v6336_v55 }
 0x9fe   : > { %v7079_v6 = vpop.eup %7078 }
 0x9ff   : > { %v5497_v15 = vmul.f32 %v7079_v6, %v5493_v57  ;;  %v7081_v42 = vpop.eup %7080  ;;  %v5487_v25 = vsub.f32 1.0, %v7079_v6 }
 0xa00   : > { %v5498_v34 = vmul.f32 %v7081_v42, %v5494_v50  ;;  %v7083_v9 = vpop.eup %7082  ;;  %v5488_v51 = vsub.f32 1.0, %v7081_v42 }
 0xa01   : > { %v7085_v19 = vpop.eup %7084  ;;  %v5447_v13 = vadd.f32 1.0, %v7083_v9 }
 0xa02   : > { %v5448_v63 = vadd.f32 1.0, %v7085_v19 }
 0xa03   : > { %7086 = vrcp.f32 %v5447_v13 }
 0xa04   : > { %7088 = vrcp.f32 %v5448_v63 }
 0xa0d   : > { %v7087_v56 = vpop.eup %7086 }
 0xa0e   : > { %v7089_v12 = vpop.eup %7088 }
 0xa20   : > { %v5426_v35 = vpop.f32.mrb[100].mxu0 }
 0xa21   : > { %v5473_v27 = vadd.f32 %v5426_v35, %v15073_v31  ;;  %v5428_v37 = vpop.f32.mrb[101].mxu0 }
 0xa22   : > { %v5474_v43 = vadd.f32 %v5428_v37, %v15074_v38  ;;  %v5430_v17 = vpop.f32.mrb[102].mxu0 }
 0xa23   : > { %v5477_v18 = vrot.slane %v5473_v27, 2  ;;  %v5431_v2 = vpop.f32.mrb[103].mxu0 }
 0xa24   : > { %v5478_v52 = vrot.slane %v5474_v43, 2 }
 0xa25   : > { %v5481_v59 = vmul.f32 %v7087_v56, %v5477_v18  ;;  %v5505_v18 = vld [vmem:[#allocation5 + $0x20] sm:$0x3] }
 0xa26   : > { %v5482_v0 = vmul.f32 %v7089_v12, %v5478_v52  ;;  %v5506_v52 = vld [vmem:[#allocation5 + $0x28] sm:$0x3] }
 0xa27   : > { %v5483_v46 = vadd.f32 %v5481_v59, %v5300_v54  ;;  %v5681_v54 = vrot.slane %v13791_v3, 2 }
 0xa28   : > { %v5484_v39 = vadd.f32 %v5482_v0, %v5301_v7 }
 0xa29   : > { %7090 = vtanh.f32 %v5483_v46 }
 0xa2a   : > { %7092 = vtanh.f32 %v5484_v39 }
 0xa31   : > { %v5549_v31 = vpop.f32.mrb[100].mxu1 }
 0xa32   : > { %v5551_v60 = vpop.f32.mrb[101].mxu1  ;;  %v5638_v26 = vadd.f32 %v5549_v31, %v5501_v32 }
 0xa33   : > { %v7091_v38 = vpop.eup %7090  ;;  %v5553_v41 = vpop.f32.mrb[102].mxu1  ;;  %v5639_v48 = vadd.f32 %v5551_v60, %v5502_v36 }
 0xa34   : > { %v7093_v40 = vpop.eup %7092  ;;  %v5489_v21 = vmul.f32 %v7091_v38, %v5487_v25  ;;  %v5554_v20 = vpop.f32.mrb[103].mxu1  ;;  %v6339_v16 = vmul.f32 -1.442695, %v5638_v26 }
 0xa35   : > { %v5490_v4 = vmul.f32 %v7093_v40, %v5488_v51  ;;  %v6340_v58 = vmul.f32 -1.442695, %v5639_v48 }
 0xa36   : > { %v5499_v62 = vadd.f32 %v5497_v15, %v5489_v21  ;;  %7094 = vpow2.f32 %v6339_v16 }
 0xa37   : > { %v5500_v22 = vadd.f32 %v5498_v34, %v5490_v4  ;;  %7096 = vpow2.f32 %v6340_v58 }
 0xa38   : > { %5688 = vst [vmem:[%s7846_s17 + $0x10] sm:$0xc0] %v5499_v62 }
 0xa39   : > { %5689 = vst [vmem:[%s7846_s17 + $0x18] sm:$0xc0] %v5500_v22  ;;  %v5694_v1 = vcombine.high %v5499_v62, %v5500_v22 }
 0xa3b   : > { %v5701_v10 = vrot.slane %v5694_v1, %v15209_v49 }
 0xa3d   : > { %v5702_v28 = vcombine.high %v5701_v10, %v5701_v10 }
 0xa3f   : > { %5704 = vst [vmem:[#allocation2] sm:$0xf] %v5702_v28 }
 0xa40   : > { %v7095_v57 = vpop.eup %7094 }
 0xa41   : > { %v7097_v50 = vpop.eup %7096  ;;  %v5646_v29 = vadd.f32 1.0, %v7095_v57 }
 0xa42   : > { %v5647_v33 = vadd.f32 1.0, %v7097_v50 }
 0xa60   : > { %v5590_v8 = vpop.f32.mrb[104].mxu0 }
 0xa61   : > { %v5652_v44 = vadd.f32 %v5590_v8, %v5503_v23  ;;  %v5592_v24 = vpop.f32.mrb[105].mxu0 }
 0xa62   : > { %v5653_v11 = vadd.f32 %v5592_v24, %v5504_v30  ;;  %v5594_v6 = vpop.f32.mrb[106].mxu0 }
 0xa63   : > { %v6341_v53 = vmul.f32 -1.442695, %v5652_v44  ;;  %v5595_v15 = vpop.f32.mrb[107].mxu0 }
 0xa64   : > { %v6342_v42 = vmul.f32 -1.442695, %v5653_v11 }
 0xa65   : > { %7098 = vpow2.f32 %v6341_v53 }
 0xa66   : > { %7100 = vpow2.f32 %v6342_v42 }
 0xa67   : > { %7102 = vrcp.f32 %v5646_v29 }
 0xa68   : > { %7104 = vrcp.f32 %v5647_v33 }
 0xa6f   : > { %v7099_v47 = vpop.eup %7098 }
 0xa70   : > { %v7101_v34 = vpop.eup %7100  ;;  %v5660_v45 = vadd.f32 1.0, %v7099_v47 }
 0xa71   : > { %v5661_v55 = vadd.f32 1.0, %v7101_v34  ;;  %v5631_v9 = vpop.f32.mrb[104].mxu1  ;;  %v7103_v63 = vpop.eup %7102 }
 0xa72   : > { %7106 = vrcp.f32 %v5660_v45  ;;  %v5666_v19 = vadd.f32 %v5631_v9, %v14961_v5  ;;  %v5633_v13 = vpop.f32.mrb[105].mxu1  ;;  %v7105_v37 = vpop.eup %7104  ;;  %v5680_v5 = vrot.slane %v13788_v61, 2 }
 0xa73   : > { %7108 = vrcp.f32 %v5661_v55  ;;  %v5667_v35 = vadd.f32 %v5633_v13, %v9677_v14  ;;  %v5635_v27 = vpop.f32.mrb[106].mxu1 }
 0xa74   : > { %v5668_v43 = vmul.f32 %v7103_v63, %v5666_v19  ;;  %v5636_v17 = vpop.f32.mrb[107].mxu1 }
 0xa75   : > { %v5669_v2 = vmul.f32 %v7105_v37, %v5667_v35 }
 0xa76   : > { %v5670_v56 = vadd.f32 %v5668_v43, %v5505_v18 }
 0xa77   : > { %v5671_v12 = vadd.f32 %v5669_v2, %v5506_v52 }
 0xa78   : > { %7110 = vtanh.f32 %v5670_v56 }
 0xa79   : > { %7112 = vtanh.f32 %v5671_v12 }
 0xa7c   : > { %v7107_v59 = vpop.eup %7106 }
 0xa7d   : > { %v7109_v0 = vpop.eup %7108  ;;  %v5684_v14 = vmul.f32 %v7107_v59, %v5680_v5  ;;  %v5674_v7 = vsub.f32 1.0, %v7107_v59 }
 0xa7e   : > { %v5685_v46 = vmul.f32 %v7109_v0, %v5681_v54  ;;  %v5675_v31 = vsub.f32 1.0, %v7109_v0 }
 0xa82   : > { %v7111_v39 = vpop.eup %7110 }
 0xa83   : > { %v7113_v25 = vpop.eup %7112  ;;  %v5676_v60 = vmul.f32 %v7111_v39, %v5674_v7 }
 0xa84   : > { %v5677_v38 = vmul.f32 %v7113_v25, %v5675_v31 }
 0xa85   : > { %v5686_v51 = vadd.f32 %v5684_v14, %v5676_v60 }
 0xa86   : > { %v5687_v41 = vadd.f32 %v5685_v46, %v5677_v38 }
 0xa87   : > { %5690 = vst [vmem:[%s7851_s21] sm:$0x3] %v5686_v51 }
 0xa88   : > { %5691 = vst [vmem:[%s7851_s21 + $0x8] sm:$0x3] %v5687_v41  ;;  %v5707_v40 = vcombine.low %v5686_v51, %v5687_v41 }
 0xa8a   : > { %6343 = vst.sshfl [vmem:[#allocation3] sm:$0x33 pattern:$0x76325410] %v5707_v40 }
 0xa8b PF: > { %s18_s24 = sadd.s32 1, %s7780_s24  }
 0xa8c   : > { %p15_p6 = scmp.ge.s32.totalorder %s18_s24, 6  }
 0xa8e   :  { %17 = sbr.rel (!%p15_p6) target bundleno = 1 (0x1), region = 97 }

</bundles_post_ra>
